<compile_context>
chip_gen: v7x
topology: tpu7x:2x2x1
jax: 0.10.0
libtpu: 0.0.40
codegen_flags: <defaults>
</compile_context>

<pallas_src>
import jax
import jax.numpy as jnp
import numpy as np
from jax.experimental import pallas as pl
from jax.experimental.pallas import tpu as pltpu


# --------------------- conv as a transposed (lane-dense) GEMM ---------------------

def _conv_gemm_kernel(w_ref, at_ref, b_ref, o_ref):
    # out[O, Mtile] = W[O, K] @ AT[K, Mtile] + b[O, 1], then ReLU.
    acc = jnp.dot(w_ref[...], at_ref[...], preferred_element_type=jnp.float32)
    o_ref[...] = jnp.maximum(acc + b_ref[...], 0.0).astype(o_ref.dtype)


def conv2d_relu(x, w, b, *, m_tile):
    """VALID stride-1 conv + bias + ReLU.  x: NCHW, w: OIHW (PyTorch).  NCHW out."""
    B, C, H, W = x.shape
    O, Ci, kh, kw = w.shape
    assert Ci == C
    Ho, Wo = H - kh + 1, W - kw + 1
    M = B * Ho * Wo
    K = C * kh * kw
    assert M % m_tile == 0 and m_tile % 128 == 0, (M, m_tile)

    # Transposed im2col: AT[K, M], K ordered (c, kh, kw) so the OIHW weight
    # flattens directly; M ordered (b, ho, wo).  Lane axis (M) is dense.
    # TODO(synk): AT is still materialized in HBM by XLA; could be removed with
    # an in-kernel tap loop (or allow_input_fusion) if it ever dominates.
    taps = [x[:, :, di:di + Ho, dj:dj + Wo]
            for di in range(kh) for dj in range(kw)]            # each [B, C, Ho, Wo]
    at = jnp.stack(taps, axis=0).reshape(kh, kw, B, C, Ho, Wo)
    at = jnp.transpose(at, (3, 0, 1, 2, 4, 5)).reshape(K, M)

    wm = w.reshape(O, K)
    b2 = b.reshape(O, 1)

    y = pl.pallas_call(
        _conv_gemm_kernel,
        out_shape=jax.ShapeDtypeStruct((O, M), jnp.float32),
        grid_spec=pltpu.PrefetchScalarGridSpec(
            num_scalar_prefetch=0,
            grid=(M // m_tile,),
            in_specs=[
                pl.BlockSpec((O, K), lambda i: (0, 0)),
                pl.BlockSpec((K, m_tile), lambda i: (0, i)),
                pl.BlockSpec((O, 1), lambda i: (0, 0)),
            ],
            out_specs=pl.BlockSpec((O, m_tile), lambda i: (0, i)),
        ),
        compiler_params=pltpu.CompilerParams(
            dimension_semantics=("parallel",),
            vmem_limit_bytes=32 * 1024 * 1024,
        ),
    )(wm, at, b2)

    return y.reshape(O, B, Ho, Wo).transpose(1, 0, 2, 3)        # back to NCHW


def maxpool2x2(x):
    """nn.MaxPool2d(2, 2): left to XLA as a cheap reshape+max (per perf review)."""
    B, C, H, W = x.shape
    return x.reshape(B, C, H // 2, 2, W // 2, 2).max(axis=(3, 5))


# --------------------- fused relation-network tail (one kernel) ---------------------

def _rn_tail_kernel(a_ref, gw1, gb1, gw2, gb2, gw3, gb3, gw4, gb4,
                    fw1, fb1, fw2, fb2, fw3, fb3, o_ref):
    cat = jnp.zeros((32, 256), jnp.float32)          # torch.zeros([32, 256])
    for br in range(3):                              # row / col / other branches
        h = a_ref[br]                                # [2*32, 288]: the 2 pairs stacked
        for w_ref, b_ref in ((gw1, gb1), (gw2, gb2), (gw3, gb3), (gw4, gb4)):
            h = jnp.maximum(
                jnp.dot(h, w_ref[br], preferred_element_type=jnp.float32)
                + b_ref[br], 0.0)
        cat = cat + h[:32, :] + h[32:, :]            # sum over the branch's 2 pairs
    h = jnp.maximum(jnp.dot(cat, fw1[...], preferred_element_type=jnp.float32)
                    + fb1[...], 0.0)
    # TODO(synk): nn.Dropout(p=0.5) applied as identity (inference/eval mode).
    h = jnp.maximum(jnp.dot(h, fw2[...], preferred_element_type=jnp.float32)
                    + fb2[...], 0.0)
    o_ref[...] = (jnp.dot(h, fw3[...], preferred_element_type=jnp.float32)
                  + fb3[...]).astype(o_ref.dtype)


def rn_tail(branch_in, g_branches, f_layers):
    """branch_in: [3, 64, 288].  One fused pallas_call for the whole MLP tail."""
    gws = [jnp.stack([g_branches[b][l][0] for b in range(3)]) for l in range(4)]
    gbs = [jnp.stack([g_branches[b][l][1].reshape(1, 256) for b in range(3)])
           for l in range(4)]
    (fw1, fb1), (fw2, fb2), (fw3, fb3) = f_layers
    n3 = fw3.shape[1]
    fw3p = jnp.pad(fw3, ((0, 0), (0, 128 - n3)))     # lane-dense final store
    fb3p = jnp.pad(fb3, (0, 128 - n3)).reshape(1, 128)

    out = pl.pallas_call(
        _rn_tail_kernel,
        out_shape=jax.ShapeDtypeStruct((32, 128), jnp.float32),
        compiler_params=pltpu.CompilerParams(
            vmem_limit_bytes=32 * 1024 * 1024),
    )(branch_in, gws[0], gbs[0], gws[1], gbs[1], gws[2], gbs[2], gws[3], gbs[3],
      fw1, fb1.reshape(1, 256), fw2, fb2.reshape(1, 256), fw3p, fb3p)
    return out[:, :n3]


# ------------------------------ parameters ------------------------------

def _linear_params(key, fan_in, fan_out):
    k1, k2 = jax.random.split(key)
    bound = 1.0 / np.sqrt(fan_in)
    w = jax.random.uniform(k1, (fan_in, fan_out), jnp.float32, -bound, bound)
    b = jax.random.uniform(k2, (fan_out,), jnp.float32, -bound, bound)
    return w, b


def _conv_params(key, cin, cout, k):
    k1, k2 = jax.random.split(key)
    bound = 1.0 / np.sqrt(cin * k * k)
    w = jax.random.uniform(k1, (cout, cin, k, k), jnp.float32, -bound, bound)
    b = jax.random.uniform(k2, (cout,), jnp.float32, -bound, bound)
    return w, b


def init_params(key):
    keys = jax.random.split(key, 17)
    g_dims = [(16 * 3 * 3 * 2, 256), (256, 256), (256, 256), (256, 256)]

    def mlp(ks, dims):
        return [_linear_params(k, din, dout) for k, (din, dout) in zip(ks, dims)]

    return {
        "conv1": _conv_params(keys[0], 3, 6, 5),
        "conv2": _conv_params(keys[1], 6, 16, 5),
        "g_row": mlp(keys[2:6], g_dims),
        "g_col": mlp(keys[6:10], g_dims),
        "g_other": mlp(keys[10:14], g_dims),
        "f_pi": mlp(keys[14:17], [(256, 256), (256, 256), (256, 10)]),
    }


# ------------------------------ forward pass ------------------------------

def basic_rn_forward(params, x):
    # x: [32, 3, 32, 32] -- the module hardcodes cat_tensor = torch.zeros([32, 256]).
    assert x.shape[0] == 32, "BasicRN hardcodes batch size 32"
    x = maxpool2x2(conv2d_relu(x, *params["conv1"], m_tile=6272))   # [32, 6, 14, 14]
    x = maxpool2x2(conv2d_relu(x, *params["conv2"], m_tile=640))    # [32, 16, 5, 5]
    B = x.shape[0]

    xl = [
        x[:, :, 0:3, 0:3].reshape(B, 144),
        x[:, :, 2:5, 0:3].reshape(B, 144),
        x[:, :, 0:3, 2:5].reshape(B, 144),
        x[:, :, 2:5, 2:5].reshape(B, 144),
    ]
    branch_pairs = [[(0, 1), (2, 3)],      # row
                    [(0, 2), (1, 3)],      # col
                    [(0, 3), (1, 2)]]      # other
    branch_in = jnp.stack([
        jnp.concatenate(
            [jnp.concatenate([xl[i], xl[j]], axis=1) for (i, j) in pairs], axis=0)
        for pairs in branch_pairs])                                 # [3, 64, 288]

    g_branches = [params["g_row"], params["g_col"], params["g_other"]]
    return rn_tail(branch_in, g_branches, params["f_pi"])           # [32, 10]


# ------------------------------ pure-JAX reference ------------------------------

def reference_forward(params, x):
    def conv(x, w, b):
        y = jax.lax.conv_general_dilated(
            x, w, (1, 1), "VALID",
            dimension_numbers=("NCHW", "OIHW", "NCHW"))
        return jax.nn.relu(y + b[None, :, None, None])

    def pool(x):
        B, C, H, W = x.shape
        return x.reshape(B, C, H // 2, 2, W // 2, 2).max(axis=(3, 5))

    x = pool(conv(x, *params["conv1"]))
    x = pool(conv(x, *params["conv2"]))
    B = x.shape[0]
    xl = [x[:, :, 0:3, 0:3].reshape(B, 144), x[:, :, 2:5, 0:3].reshape(B, 144),
          x[:, :, 0:3, 2:5].reshape(B, 144), x[:, :, 2:5, 2:5].reshape(B, 144)]

    def g(layers, pairs):
        acc = jnp.zeros((B, 256), jnp.float32)
        for (i, j) in pairs:
            a = jnp.concatenate([xl[i], xl[j]], axis=1)
            for (w, b) in layers:
                a = jax.nn.relu(a @ w + b)
            acc = acc + a
        return acc

    cat = jnp.zeros((32, 256), jnp.float32)
    cat = cat + g(params["g_row"], [(0, 1), (2, 3)])
    cat = cat + g(params["g_col"], [(0, 2), (1, 3)])
    cat = cat + g(params["g_other"], [(0, 3), (1, 2)])
    (w1, b1), (w2, b2), (w3, b3) = params["f_pi"]
    h = jax.nn.relu(cat @ w1 + b1)
    h = jax.nn.relu(h @ w2 + b2)
    return h @ w3 + b3


if __name__ == "__main__":
    key = jax.random.PRNGKey(0)
    pkey, xkey = jax.random.split(key)
    params = init_params(pkey)
    # Batch is 32 because the module hardcodes cat_tensor = torch.zeros([32, 256]).
    x = jax.random.normal(xkey, (32, 3, 32, 32), jnp.float32)

    out = jax.jit(basic_rn_forward)(params, x)
    out = jax.block_until_ready(out)

    ref = reference_forward(params, x)
    np.testing.assert_allclose(np.asarray(out), np.asarray(ref),
                               rtol=5e-2, atol=5e-2)
    assert out.shape == (32, 10) and out.dtype == jnp.float32
    print("KERNEL_OK")
</pallas_src>

<mosaic_0001>
module attributes {stable_mosaic.version = 11 : i64} {
  func.func @_conv_gemm_kernel(%arg0: i32, %arg1: memref<6x75xf32, #tpu.memory_space<vmem>>, %arg2: memref<75x6272xf32, #tpu.memory_space<vmem>>, %arg3: memref<6x1xf32, #tpu.memory_space<vmem>>, %arg4: memref<6x6272xf32, #tpu.memory_space<vmem>>) attributes {dimension_semantics = [#tpu.dimension_semantics<parallel>], iteration_bounds = array<i64: 4>, scalar_prefetch = 0 : i64, scratch_operands = 0 : i64, tpu.core_type = #tpu.core_type<tc>, window_params = [{pipeline_mode = #tpu.pipeline_mode<synchronous>, transform_indices = @transform_0, window_bounds = array<i64: 6, 75>}, {transform_indices = @transform_1, window_bounds = array<i64: 75, 6272>}, {pipeline_mode = #tpu.pipeline_mode<synchronous>, transform_indices = @transform_2, window_bounds = array<i64: 6, 1>}, {transform_indices = @transform_3, window_bounds = array<i64: 6, 6272>}]} {
    %c0 = arith.constant 0 : index
    %c0_0 = arith.constant 0 : index
    %0 = vector.load %arg1[%c0, %c0_0] : memref<6x75xf32, #tpu.memory_space<vmem>>, vector<6x75xf32>
    %c0_1 = arith.constant 0 : index
    %c0_2 = arith.constant 0 : index
    %1 = vector.load %arg2[%c0_1, %c0_2] : memref<75x6272xf32, #tpu.memory_space<vmem>>, vector<75x6272xf32>
    %cst = arith.constant dense<0.000000e+00> : vector<6x6272xf32>
    %2 = tpu.matmul %0, %1, %cst {dimension_numbers = #tpu.dot_dimension_numbers<[1], [0], [0], [1], [0, 0, 1, 1], [], []>} : vector<6x75xf32>, vector<75x6272xf32>, vector<6x6272xf32> -> vector<6x6272xf32>
    %c0_3 = arith.constant 0 : index
    %c0_4 = arith.constant 0 : index
    %3 = vector.load %arg3[%c0_3, %c0_4] : memref<6x1xf32, #tpu.memory_space<vmem>>, vector<6x1xf32>
    %4 = vector.broadcast %3 : vector<6x1xf32> to vector<6x6272xf32>
    %5 = arith.addf %2, %4 : vector<6x6272xf32>
    %cst_5 = arith.constant 0.000000e+00 : f32
    %6 = vector.broadcast %cst_5 : f32 to vector<6x6272xf32>
    %7 = arith.maximumf %5, %6 : vector<6x6272xf32>
    %c0_6 = arith.constant 0 : index
    %c0_7 = arith.constant 0 : index
    %8 = vector.load %arg4[%c0_6, %c0_7] : memref<6x6272xf32, #tpu.memory_space<vmem>>, vector<6x6272xf32>
    tpu.vector_store %arg4[%c0_6, %c0_7], %7 {strides = array<i32>} : memref<6x6272xf32, #tpu.memory_space<vmem>>, vector<6x6272xf32>,
    return
  }
  func.func @transform_0(%arg0: i32) -> (i32, i32) {
    %c0_i32 = arith.constant 0 : i32
    %c0_i32_0 = arith.constant 0 : i32
    %c0_i32_1 = arith.constant 0 : i32
    return %c0_i32, %c0_i32_0 : i32, i32
  }
  func.func @transform_1(%arg0: i32) -> (i32, i32) {
    %c0_i32 = arith.constant 0 : i32
    %c0_i32_0 = arith.constant 0 : i32
    return %c0_i32, %arg0 : i32, i32
  }
  func.func @transform_2(%arg0: i32) -> (i32, i32) {
    %c0_i32 = arith.constant 0 : i32
    %c0_i32_0 = arith.constant 0 : i32
    %c0_i32_1 = arith.constant 0 : i32
    return %c0_i32, %c0_i32_0 : i32, i32
  }
  func.func @transform_3(%arg0: i32) -> (i32, i32) {
    %c0_i32 = arith.constant 0 : i32
    %c0_i32_0 = arith.constant 0 : i32
    return %c0_i32, %arg0 : i32, i32
  }
}

module attributes {stable_mosaic.version = 11 : i64} {
  func.func @_conv_gemm_kernel(%arg0: i32, %arg1: memref<16x150xf32, #tpu.memory_space<vmem>>, %arg2: memref<150x640xf32, #tpu.memory_space<vmem>>, %arg3: memref<16x1xf32, #tpu.memory_space<vmem>>, %arg4: memref<16x640xf32, #tpu.memory_space<vmem>>) attributes {dimension_semantics = [#tpu.dimension_semantics<parallel>], iteration_bounds = array<i64: 5>, scalar_prefetch = 0 : i64, scratch_operands = 0 : i64, tpu.core_type = #tpu.core_type<tc>, window_params = [{pipeline_mode = #tpu.pipeline_mode<synchronous>, transform_indices = @transform_0, window_bounds = array<i64: 16, 150>}, {transform_indices = @transform_1, window_bounds = array<i64: 150, 640>}, {pipeline_mode = #tpu.pipeline_mode<synchronous>, transform_indices = @transform_2, window_bounds = array<i64: 16, 1>}, {transform_indices = @transform_3, window_bounds = array<i64: 16, 640>}]} {
    %c0 = arith.constant 0 : index
    %c0_0 = arith.constant 0 : index
    %0 = vector.load %arg1[%c0, %c0_0] : memref<16x150xf32, #tpu.memory_space<vmem>>, vector<16x150xf32>
    %c0_1 = arith.constant 0 : index
    %c0_2 = arith.constant 0 : index
    %1 = vector.load %arg2[%c0_1, %c0_2] : memref<150x640xf32, #tpu.memory_space<vmem>>, vector<150x640xf32>
    %cst = arith.constant dense<0.000000e+00> : vector<16x640xf32>
    %2 = tpu.matmul %0, %1, %cst {dimension_numbers = #tpu.dot_dimension_numbers<[1], [0], [0], [1], [0, 0, 1, 1], [], []>} : vector<16x150xf32>, vector<150x640xf32>, vector<16x640xf32> -> vector<16x640xf32>
    %c0_3 = arith.constant 0 : index
    %c0_4 = arith.constant 0 : index
    %3 = vector.load %arg3[%c0_3, %c0_4] : memref<16x1xf32, #tpu.memory_space<vmem>>, vector<16x1xf32>
    %4 = vector.broadcast %3 : vector<16x1xf32> to vector<16x640xf32>
    %5 = arith.addf %2, %4 : vector<16x640xf32>
    %cst_5 = arith.constant 0.000000e+00 : f32
    %6 = vector.broadcast %cst_5 : f32 to vector<16x640xf32>
    %7 = arith.maximumf %5, %6 : vector<16x640xf32>
    %c0_6 = arith.constant 0 : index
    %c0_7 = arith.constant 0 : index
    %8 = vector.load %arg4[%c0_6, %c0_7] : memref<16x640xf32, #tpu.memory_space<vmem>>, vector<16x640xf32>
    tpu.vector_store %arg4[%c0_6, %c0_7], %7 {strides = array<i32>} : memref<16x640xf32, #tpu.memory_space<vmem>>, vector<16x640xf32>,
    return
  }
  func.func @transform_0(%arg0: i32) -> (i32, i32) {
    %c0_i32 = arith.constant 0 : i32
    %c0_i32_0 = arith.constant 0 : i32
    %c0_i32_1 = arith.constant 0 : i32
    return %c0_i32, %c0_i32_0 : i32, i32
  }
  func.func @transform_1(%arg0: i32) -> (i32, i32) {
    %c0_i32 = arith.constant 0 : i32
    %c0_i32_0 = arith.constant 0 : i32
    return %c0_i32, %arg0 : i32, i32
  }
  func.func @transform_2(%arg0: i32) -> (i32, i32) {
    %c0_i32 = arith.constant 0 : i32
    %c0_i32_0 = arith.constant 0 : i32
    %c0_i32_1 = arith.constant 0 : i32
    return %c0_i32, %c0_i32_0 : i32, i32
  }
  func.func @transform_3(%arg0: i32) -> (i32, i32) {
    %c0_i32 = arith.constant 0 : i32
    %c0_i32_0 = arith.constant 0 : i32
    return %c0_i32, %arg0 : i32, i32
  }
}

module attributes {stable_mosaic.version = 11 : i64} {
  func.func @_rn_tail_kernel(%arg0: memref<3x64x288xf32, #tpu.memory_space<vmem>>, %arg1: memref<3x288x256xf32, #tpu.memory_space<vmem>>, %arg2: memref<3x1x256xf32, #tpu.memory_space<vmem>>, %arg3: memref<3x256x256xf32, #tpu.memory_space<vmem>>, %arg4: memref<3x1x256xf32, #tpu.memory_space<vmem>>, %arg5: memref<3x256x256xf32, #tpu.memory_space<vmem>>, %arg6: memref<3x1x256xf32, #tpu.memory_space<vmem>>, %arg7: memref<3x256x256xf32, #tpu.memory_space<vmem>>, %arg8: memref<3x1x256xf32, #tpu.memory_space<vmem>>, %arg9: memref<256x256xf32, #tpu.memory_space<vmem>>, %arg10: memref<1x256xf32, #tpu.memory_space<vmem>>, %arg11: memref<256x256xf32, #tpu.memory_space<vmem>>, %arg12: memref<1x256xf32, #tpu.memory_space<vmem>>, %arg13: memref<256x128xf32, #tpu.memory_space<vmem>>, %arg14: memref<1x128xf32, #tpu.memory_space<vmem>>, %arg15: memref<32x128xf32, #tpu.memory_space<vmem>>) attributes {dimension_semantics = [], scalar_prefetch = 0 : i64, scratch_operands = 0 : i64, tpu.core_type = #tpu.core_type<tc>} {
    %cst = arith.constant 0.000000e+00 : f32
    %0 = vector.broadcast %cst : f32 to vector<32x256xf32>
    %c0 = arith.constant 0 : index
    %c0_0 = arith.constant 0 : index
    %c0_1 = arith.constant 0 : index
    %1 = vector.load %arg0[%c0, %c0_0, %c0_1] : memref<3x64x288xf32, #tpu.memory_space<vmem>>, vector<1x64x288xf32>
    %2 = vector.shape_cast %1 : vector<1x64x288xf32> to vector<64x288xf32>
    %c0_2 = arith.constant 0 : index
    %c0_3 = arith.constant 0 : index
    %c0_4 = arith.constant 0 : index
    %3 = vector.load %arg1[%c0_2, %c0_3, %c0_4] : memref<3x288x256xf32, #tpu.memory_space<vmem>>, vector<1x288x256xf32>
    %4 = vector.shape_cast %3 : vector<1x288x256xf32> to vector<288x256xf32>
    %cst_5 = arith.constant dense<0.000000e+00> : vector<64x256xf32>
    %5 = tpu.matmul %2, %4, %cst_5 {dimension_numbers = #tpu.dot_dimension_numbers<[1], [0], [0], [1], [0, 0, 1, 1], [], []>} : vector<64x288xf32>, vector<288x256xf32>, vector<64x256xf32> -> vector<64x256xf32>
    %c0_6 = arith.constant 0 : index
    %c0_7 = arith.constant 0 : index
    %c0_8 = arith.constant 0 : index
    %6 = vector.load %arg2[%c0_6, %c0_7, %c0_8] : memref<3x1x256xf32, #tpu.memory_space<vmem>>, vector<1x1x256xf32>
    %7 = vector.shape_cast %6 : vector<1x1x256xf32> to vector<1x256xf32>
    %8 = vector.broadcast %7 : vector<1x256xf32> to vector<64x256xf32>
    %9 = arith.addf %5, %8 : vector<64x256xf32>
    %cst_9 = arith.constant 0.000000e+00 : f32
    %10 = vector.broadcast %cst_9 : f32 to vector<64x256xf32>
    %11 = arith.maximumf %9, %10 : vector<64x256xf32>
    %c0_10 = arith.constant 0 : index
    %c0_11 = arith.constant 0 : index
    %c0_12 = arith.constant 0 : index
    %12 = vector.load %arg3[%c0_10, %c0_11, %c0_12] : memref<3x256x256xf32, #tpu.memory_space<vmem>>, vector<1x256x256xf32>
    %13 = vector.shape_cast %12 : vector<1x256x256xf32> to vector<256x256xf32>
    %cst_13 = arith.constant dense<0.000000e+00> : vector<64x256xf32>
    %14 = tpu.matmul %11, %13, %cst_13 {dimension_numbers = #tpu.dot_dimension_numbers<[1], [0], [0], [1], [0, 0, 1, 1], [], []>} : vector<64x256xf32>, vector<256x256xf32>, vector<64x256xf32> -> vector<64x256xf32>
    %c0_14 = arith.constant 0 : index
    %c0_15 = arith.constant 0 : index
    %c0_16 = arith.constant 0 : index
    %15 = vector.load %arg4[%c0_14, %c0_15, %c0_16] : memref<3x1x256xf32, #tpu.memory_space<vmem>>, vector<1x1x256xf32>
    %16 = vector.shape_cast %15 : vector<1x1x256xf32> to vector<1x256xf32>
    %17 = vector.broadcast %16 : vector<1x256xf32> to vector<64x256xf32>
    %18 = arith.addf %14, %17 : vector<64x256xf32>
    %cst_17 = arith.constant 0.000000e+00 : f32
    %19 = vector.broadcast %cst_17 : f32 to vector<64x256xf32>
    %20 = arith.maximumf %18, %19 : vector<64x256xf32>
    %c0_18 = arith.constant 0 : index
    %c0_19 = arith.constant 0 : index
    %c0_20 = arith.constant 0 : index
    %21 = vector.load %arg5[%c0_18, %c0_19, %c0_20] : memref<3x256x256xf32, #tpu.memory_space<vmem>>, vector<1x256x256xf32>
    %22 = vector.shape_cast %21 : vector<1x256x256xf32> to vector<256x256xf32>
    %cst_21 = arith.constant dense<0.000000e+00> : vector<64x256xf32>
    %23 = tpu.matmul %20, %22, %cst_21 {dimension_numbers = #tpu.dot_dimension_numbers<[1], [0], [0], [1], [0, 0, 1, 1], [], []>} : vector<64x256xf32>, vector<256x256xf32>, vector<64x256xf32> -> vector<64x256xf32>
    %c0_22 = arith.constant 0 : index
    %c0_23 = arith.constant 0 : index
    %c0_24 = arith.constant 0 : index
    %24 = vector.load %arg6[%c0_22, %c0_23, %c0_24] : memref<3x1x256xf32, #tpu.memory_space<vmem>>, vector<1x1x256xf32>
    %25 = vector.shape_cast %24 : vector<1x1x256xf32> to vector<1x256xf32>
    %26 = vector.broadcast %25 : vector<1x256xf32> to vector<64x256xf32>
    %27 = arith.addf %23, %26 : vector<64x256xf32>
    %cst_25 = arith.constant 0.000000e+00 : f32
    %28 = vector.broadcast %cst_25 : f32 to vector<64x256xf32>
    %29 = arith.maximumf %27, %28 : vector<64x256xf32>
    %c0_26 = arith.constant 0 : index
    %c0_27 = arith.constant 0 : index
    %c0_28 = arith.constant 0 : index
    %30 = vector.load %arg7[%c0_26, %c0_27, %c0_28] : memref<3x256x256xf32, #tpu.memory_space<vmem>>, vector<1x256x256xf32>
    %31 = vector.shape_cast %30 : vector<1x256x256xf32> to vector<256x256xf32>
    %cst_29 = arith.constant dense<0.000000e+00> : vector<64x256xf32>
    %32 = tpu.matmul %29, %31, %cst_29 {dimension_numbers = #tpu.dot_dimension_numbers<[1], [0], [0], [1], [0, 0, 1, 1], [], []>} : vector<64x256xf32>, vector<256x256xf32>, vector<64x256xf32> -> vector<64x256xf32>
    %c0_30 = arith.constant 0 : index
    %c0_31 = arith.constant 0 : index
    %c0_32 = arith.constant 0 : index
    %33 = vector.load %arg8[%c0_30, %c0_31, %c0_32] : memref<3x1x256xf32, #tpu.memory_space<vmem>>, vector<1x1x256xf32>
    %34 = vector.shape_cast %33 : vector<1x1x256xf32> to vector<1x256xf32>
    %35 = vector.broadcast %34 : vector<1x256xf32> to vector<64x256xf32>
    %36 = arith.addf %32, %35 : vector<64x256xf32>
    %cst_33 = arith.constant 0.000000e+00 : f32
    %37 = vector.broadcast %cst_33 : f32 to vector<64x256xf32>
    %38 = arith.maximumf %36, %37 : vector<64x256xf32>
    %39 = vector.extract_strided_slice %38 {offsets = [0, 0], sizes = [32, 256], strides = [1, 1]} : vector<64x256xf32> to vector<32x256xf32>
    %40 = arith.addf %0, %39 : vector<32x256xf32>
    %41 = vector.extract_strided_slice %38 {offsets = [32, 0], sizes = [32, 256], strides = [1, 1]} : vector<64x256xf32> to vector<32x256xf32>
    %42 = arith.addf %40, %41 : vector<32x256xf32>
    %c1 = arith.constant 1 : index
    %c0_34 = arith.constant 0 : index
    %c0_35 = arith.constant 0 : index
    %43 = vector.load %arg0[%c1, %c0_34, %c0_35] : memref<3x64x288xf32, #tpu.memory_space<vmem>>, vector<1x64x288xf32>
    %44 = vector.shape_cast %43 : vector<1x64x288xf32> to vector<64x288xf32>
    %c1_36 = arith.constant 1 : index
    %c0_37 = arith.constant 0 : index
    %c0_38 = arith.constant 0 : index
    %45 = vector.load %arg1[%c1_36, %c0_37, %c0_38] : memref<3x288x256xf32, #tpu.memory_space<vmem>>, vector<1x288x256xf32>
    %46 = vector.shape_cast %45 : vector<1x288x256xf32> to vector<288x256xf32>
    %cst_39 = arith.constant dense<0.000000e+00> : vector<64x256xf32>
    %47 = tpu.matmul %44, %46, %cst_39 {dimension_numbers = #tpu.dot_dimension_numbers<[1], [0], [0], [1], [0, 0, 1, 1], [], []>} : vector<64x288xf32>, vector<288x256xf32>, vector<64x256xf32> -> vector<64x256xf32>
    %c1_40 = arith.constant 1 : index
    %c0_41 = arith.constant 0 : index
    %c0_42 = arith.constant 0 : index
    %48 = vector.load %arg2[%c1_40, %c0_41, %c0_42] : memref<3x1x256xf32, #tpu.memory_space<vmem>>, vector<1x1x256xf32>
    %49 = vector.shape_cast %48 : vector<1x1x256xf32> to vector<1x256xf32>
    %50 = vector.broadcast %49 : vector<1x256xf32> to vector<64x256xf32>
    %51 = arith.addf %47, %50 : vector<64x256xf32>
    %cst_43 = arith.constant 0.000000e+00 : f32
    %52 = vector.broadcast %cst_43 : f32 to vector<64x256xf32>
    %53 = arith.maximumf %51, %52 : vector<64x256xf32>
    %c1_44 = arith.constant 1 : index
    %c0_45 = arith.constant 0 : index
    %c0_46 = arith.constant 0 : index
    %54 = vector.load %arg3[%c1_44, %c0_45, %c0_46] : memref<3x256x256xf32, #tpu.memory_space<vmem>>, vector<1x256x256xf32>
    %55 = vector.shape_cast %54 : vector<1x256x256xf32> to vector<256x256xf32>
    %cst_47 = arith.constant dense<0.000000e+00> : vector<64x256xf32>
    %56 = tpu.matmul %53, %55, %cst_47 {dimension_numbers = #tpu.dot_dimension_numbers<[1], [0], [0], [1], [0, 0, 1, 1], [], []>} : vector<64x256xf32>, vector<256x256xf32>, vector<64x256xf32> -> vector<64x256xf32>
    %c1_48 = arith.constant 1 : index
    %c0_49 = arith.constant 0 : index
    %c0_50 = arith.constant 0 : index
    %57 = vector.load %arg4[%c1_48, %c0_49, %c0_50] : memref<3x1x256xf32, #tpu.memory_space<vmem>>, vector<1x1x256xf32>
    %58 = vector.shape_cast %57 : vector<1x1x256xf32> to vector<1x256xf32>
    %59 = vector.broadcast %58 : vector<1x256xf32> to vector<64x256xf32>
    %60 = arith.addf %56, %59 : vector<64x256xf32>
    %cst_51 = arith.constant 0.000000e+00 : f32
    %61 = vector.broadcast %cst_51 : f32 to vector<64x256xf32>
    %62 = arith.maximumf %60, %61 : vector<64x256xf32>
    %c1_52 = arith.constant 1 : index
    %c0_53 = arith.constant 0 : index
    %c0_54 = arith.constant 0 : index
    %63 = vector.load %arg5[%c1_52, %c0_53, %c0_54] : memref<3x256x256xf32, #tpu.memory_space<vmem>>, vector<1x256x256xf32>
    %64 = vector.shape_cast %63 : vector<1x256x256xf32> to vector<256x256xf32>
    %cst_55 = arith.constant dense<0.000000e+00> : vector<64x256xf32>
    %65 = tpu.matmul %62, %64, %cst_55 {dimension_numbers = #tpu.dot_dimension_numbers<[1], [0], [0], [1], [0, 0, 1, 1], [], []>} : vector<64x256xf32>, vector<256x256xf32>, vector<64x256xf32> -> vector<64x256xf32>
    %c1_56 = arith.constant 1 : index
    %c0_57 = arith.constant 0 : index
    %c0_58 = arith.constant 0 : index
    %66 = vector.load %arg6[%c1_56, %c0_57, %c0_58] : memref<3x1x256xf32, #tpu.memory_space<vmem>>, vector<1x1x256xf32>
    %67 = vector.shape_cast %66 : vector<1x1x256xf32> to vector<1x256xf32>
    %68 = vector.broadcast %67 : vector<1x256xf32> to vector<64x256xf32>
    %69 = arith.addf %65, %68 : vector<64x256xf32>
    %cst_59 = arith.constant 0.000000e+00 : f32
    %70 = vector.broadcast %cst_59 : f32 to vector<64x256xf32>
    %71 = arith.maximumf %69, %70 : vector<64x256xf32>
    %c1_60 = arith.constant 1 : index
    %c0_61 = arith.constant 0 : index
    %c0_62 = arith.constant 0 : index
    %72 = vector.load %arg7[%c1_60, %c0_61, %c0_62] : memref<3x256x256xf32, #tpu.memory_space<vmem>>, vector<1x256x256xf32>
    %73 = vector.shape_cast %72 : vector<1x256x256xf32> to vector<256x256xf32>
    %cst_63 = arith.constant dense<0.000000e+00> : vector<64x256xf32>
    %74 = tpu.matmul %71, %73, %cst_63 {dimension_numbers = #tpu.dot_dimension_numbers<[1], [0], [0], [1], [0, 0, 1, 1], [], []>} : vector<64x256xf32>, vector<256x256xf32>, vector<64x256xf32> -> vector<64x256xf32>
    %c1_64 = arith.constant 1 : index
    %c0_65 = arith.constant 0 : index
    %c0_66 = arith.constant 0 : index
    %75 = vector.load %arg8[%c1_64, %c0_65, %c0_66] : memref<3x1x256xf32, #tpu.memory_space<vmem>>, vector<1x1x256xf32>
    %76 = vector.shape_cast %75 : vector<1x1x256xf32> to vector<1x256xf32>
    %77 = vector.broadcast %76 : vector<1x256xf32> to vector<64x256xf32>
    %78 = arith.addf %74, %77 : vector<64x256xf32>
    %cst_67 = arith.constant 0.000000e+00 : f32
    %79 = vector.broadcast %cst_67 : f32 to vector<64x256xf32>
    %80 = arith.maximumf %78, %79 : vector<64x256xf32>
    %81 = vector.extract_strided_slice %80 {offsets = [0, 0], sizes = [32, 256], strides = [1, 1]} : vector<64x256xf32> to vector<32x256xf32>
    %82 = arith.addf %42, %81 : vector<32x256xf32>
    %83 = vector.extract_strided_slice %80 {offsets = [32, 0], sizes = [32, 256], strides = [1, 1]} : vector<64x256xf32> to vector<32x256xf32>
    %84 = arith.addf %82, %83 : vector<32x256xf32>
    %c2 = arith.constant 2 : index
    %c0_68 = arith.constant 0 : index
    %c0_69 = arith.constant 0 : index
    %85 = vector.load %arg0[%c2, %c0_68, %c0_69] : memref<3x64x288xf32, #tpu.memory_space<vmem>>, vector<1x64x288xf32>
    %86 = vector.shape_cast %85 : vector<1x64x288xf32> to vector<64x288xf32>
    %c2_70 = arith.constant 2 : index
    %c0_71 = arith.constant 0 : index
    %c0_72 = arith.constant 0 : index
    %87 = vector.load %arg1[%c2_70, %c0_71, %c0_72] : memref<3x288x256xf32, #tpu.memory_space<vmem>>, vector<1x288x256xf32>
    %88 = vector.shape_cast %87 : vector<1x288x256xf32> to vector<288x256xf32>
    %cst_73 = arith.constant dense<0.000000e+00> : vector<64x256xf32>
    %89 = tpu.matmul %86, %88, %cst_73 {dimension_numbers = #tpu.dot_dimension_numbers<[1], [0], [0], [1], [0, 0, 1, 1], [], []>} : vector<64x288xf32>, vector<288x256xf32>, vector<64x256xf32> -> vector<64x256xf32>
    %c2_74 = arith.constant 2 : index
    %c0_75 = arith.constant 0 : index
    %c0_76 = arith.constant 0 : index
    %90 = vector.load %arg2[%c2_74, %c0_75, %c0_76] : memref<3x1x256xf32, #tpu.memory_space<vmem>>, vector<1x1x256xf32>
    %91 = vector.shape_cast %90 : vector<1x1x256xf32> to vector<1x256xf32>
    %92 = vector.broadcast %91 : vector<1x256xf32> to vector<64x256xf32>
    %93 = arith.addf %89, %92 : vector<64x256xf32>
    %cst_77 = arith.constant 0.000000e+00 : f32
    %94 = vector.broadcast %cst_77 : f32 to vector<64x256xf32>
    %95 = arith.maximumf %93, %94 : vector<64x256xf32>
    %c2_78 = arith.constant 2 : index
    %c0_79 = arith.constant 0 : index
    %c0_80 = arith.constant 0 : index
    %96 = vector.load %arg3[%c2_78, %c0_79, %c0_80] : memref<3x256x256xf32, #tpu.memory_space<vmem>>, vector<1x256x256xf32>
    %97 = vector.shape_cast %96 : vector<1x256x256xf32> to vector<256x256xf32>
    %cst_81 = arith.constant dense<0.000000e+00> : vector<64x256xf32>
    %98 = tpu.matmul %95, %97, %cst_81 {dimension_numbers = #tpu.dot_dimension_numbers<[1], [0], [0], [1], [0, 0, 1, 1], [], []>} : vector<64x256xf32>, vector<256x256xf32>, vector<64x256xf32> -> vector<64x256xf32>
    %c2_82 = arith.constant 2 : index
    %c0_83 = arith.constant 0 : index
    %c0_84 = arith.constant 0 : index
    %99 = vector.load %arg4[%c2_82, %c0_83, %c0_84] : memref<3x1x256xf32, #tpu.memory_space<vmem>>, vector<1x1x256xf32>
    %100 = vector.shape_cast %99 : vector<1x1x256xf32> to vector<1x256xf32>
    %101 = vector.broadcast %100 : vector<1x256xf32> to vector<64x256xf32>
    %102 = arith.addf %98, %101 : vector<64x256xf32>
    %cst_85 = arith.constant 0.000000e+00 : f32
    %103 = vector.broadcast %cst_85 : f32 to vector<64x256xf32>
    %104 = arith.maximumf %102, %103 : vector<64x256xf32>
    %c2_86 = arith.constant 2 : index
    %c0_87 = arith.constant 0 : index
    %c0_88 = arith.constant 0 : index
    %105 = vector.load %arg5[%c2_86, %c0_87, %c0_88] : memref<3x256x256xf32, #tpu.memory_space<vmem>>, vector<1x256x256xf32>
    %106 = vector.shape_cast %105 : vector<1x256x256xf32> to vector<256x256xf32>
    %cst_89 = arith.constant dense<0.000000e+00> : vector<64x256xf32>
    %107 = tpu.matmul %104, %106, %cst_89 {dimension_numbers = #tpu.dot_dimension_numbers<[1], [0], [0], [1], [0, 0, 1, 1], [], []>} : vector<64x256xf32>, vector<256x256xf32>, vector<64x256xf32> -> vector<64x256xf32>
    %c2_90 = arith.constant 2 : index
    %c0_91 = arith.constant 0 : index
    %c0_92 = arith.constant 0 : index
    %108 = vector.load %arg6[%c2_90, %c0_91, %c0_92] : memref<3x1x256xf32, #tpu.memory_space<vmem>>, vector<1x1x256xf32>
    %109 = vector.shape_cast %108 : vector<1x1x256xf32> to vector<1x256xf32>
    %110 = vector.broadcast %109 : vector<1x256xf32> to vector<64x256xf32>
    %111 = arith.addf %107, %110 : vector<64x256xf32>
    %cst_93 = arith.constant 0.000000e+00 : f32
    %112 = vector.broadcast %cst_93 : f32 to vector<64x256xf32>
    %113 = arith.maximumf %111, %112 : vector<64x256xf32>
    %c2_94 = arith.constant 2 : index
    %c0_95 = arith.constant 0 : index
    %c0_96 = arith.constant 0 : index
    %114 = vector.load %arg7[%c2_94, %c0_95, %c0_96] : memref<3x256x256xf32, #tpu.memory_space<vmem>>, vector<1x256x256xf32>
    %115 = vector.shape_cast %114 : vector<1x256x256xf32> to vector<256x256xf32>
    %cst_97 = arith.constant dense<0.000000e+00> : vector<64x256xf32>
    %116 = tpu.matmul %113, %115, %cst_97 {dimension_numbers = #tpu.dot_dimension_numbers<[1], [0], [0], [1], [0, 0, 1, 1], [], []>} : vector<64x256xf32>, vector<256x256xf32>, vector<64x256xf32> -> vector<64x256xf32>
    %c2_98 = arith.constant 2 : index
    %c0_99 = arith.constant 0 : index
    %c0_100 = arith.constant 0 : index
    %117 = vector.load %arg8[%c2_98, %c0_99, %c0_100] : memref<3x1x256xf32, #tpu.memory_space<vmem>>, vector<1x1x256xf32>
    %118 = vector.shape_cast %117 : vector<1x1x256xf32> to vector<1x256xf32>
    %119 = vector.broadcast %118 : vector<1x256xf32> to vector<64x256xf32>
    %120 = arith.addf %116, %119 : vector<64x256xf32>
    %cst_101 = arith.constant 0.000000e+00 : f32
    %121 = vector.broadcast %cst_101 : f32 to vector<64x256xf32>
    %122 = arith.maximumf %120, %121 : vector<64x256xf32>
    %123 = vector.extract_strided_slice %122 {offsets = [0, 0], sizes = [32, 256], strides = [1, 1]} : vector<64x256xf32> to vector<32x256xf32>
    %124 = arith.addf %84, %123 : vector<32x256xf32>
    %125 = vector.extract_strided_slice %122 {offsets = [32, 0], sizes = [32, 256], strides = [1, 1]} : vector<64x256xf32> to vector<32x256xf32>
    %126 = arith.addf %124, %125 : vector<32x256xf32>
    %c0_102 = arith.constant 0 : index
    %c0_103 = arith.constant 0 : index
    %127 = vector.load %arg9[%c0_102, %c0_103] : memref<256x256xf32, #tpu.memory_space<vmem>>, vector<256x256xf32>
    %cst_104 = arith.constant dense<0.000000e+00> : vector<32x256xf32>
    %128 = tpu.matmul %126, %127, %cst_104 {dimension_numbers = #tpu.dot_dimension_numbers<[1], [0], [0], [1], [0, 0, 1, 1], [], []>} : vector<32x256xf32>, vector<256x256xf32>, vector<32x256xf32> -> vector<32x256xf32>
    %c0_105 = arith.constant 0 : index
    %c0_106 = arith.constant 0 : index
    %129 = vector.load %arg10[%c0_105, %c0_106] : memref<1x256xf32, #tpu.memory_space<vmem>>, vector<1x256xf32>
    %130 = vector.broadcast %129 : vector<1x256xf32> to vector<32x256xf32>
    %131 = arith.addf %128, %130 : vector<32x256xf32>
    %cst_107 = arith.constant 0.000000e+00 : f32
    %132 = vector.broadcast %cst_107 : f32 to vector<32x256xf32>
    %133 = arith.maximumf %131, %132 : vector<32x256xf32>
    %c0_108 = arith.constant 0 : index
    %c0_109 = arith.constant 0 : index
    %134 = vector.load %arg11[%c0_108, %c0_109] : memref<256x256xf32, #tpu.memory_space<vmem>>, vector<256x256xf32>
    %cst_110 = arith.constant dense<0.000000e+00> : vector<32x256xf32>
    %135 = tpu.matmul %133, %134, %cst_110 {dimension_numbers = #tpu.dot_dimension_numbers<[1], [0], [0], [1], [0, 0, 1, 1], [], []>} : vector<32x256xf32>, vector<256x256xf32>, vector<32x256xf32> -> vector<32x256xf32>
    %c0_111 = arith.constant 0 : index
    %c0_112 = arith.constant 0 : index
    %136 = vector.load %arg12[%c0_111, %c0_112] : memref<1x256xf32, #tpu.memory_space<vmem>>, vector<1x256xf32>
    %137 = vector.broadcast %136 : vector<1x256xf32> to vector<32x256xf32>
    %138 = arith.addf %135, %137 : vector<32x256xf32>
    %cst_113 = arith.constant 0.000000e+00 : f32
    %139 = vector.broadcast %cst_113 : f32 to vector<32x256xf32>
    %140 = arith.maximumf %138, %139 : vector<32x256xf32>
    %c0_114 = arith.constant 0 : index
    %c0_115 = arith.constant 0 : index
    %141 = vector.load %arg13[%c0_114, %c0_115] : memref<256x128xf32, #tpu.memory_space<vmem>>, vector<256x128xf32>
    %cst_116 = arith.constant dense<0.000000e+00> : vector<32x128xf32>
    %142 = tpu.matmul %140, %141, %cst_116 {dimension_numbers = #tpu.dot_dimension_numbers<[1], [0], [0], [1], [0, 0, 1, 1], [], []>} : vector<32x256xf32>, vector<256x128xf32>, vector<32x128xf32> -> vector<32x128xf32>
    %c0_117 = arith.constant 0 : index
    %c0_118 = arith.constant 0 : index
    %143 = vector.load %arg14[%c0_117, %c0_118] : memref<1x128xf32, #tpu.memory_space<vmem>>, vector<1x128xf32>
    %144 = vector.broadcast %143 : vector<1x128xf32> to vector<32x128xf32>
    %145 = arith.addf %142, %144 : vector<32x128xf32>
    %c0_119 = arith.constant 0 : index
    %c0_120 = arith.constant 0 : index
    %146 = vector.load %arg15[%c0_119, %c0_120] : memref<32x128xf32, #tpu.memory_space<vmem>>, vector<32x128xf32>
    tpu.vector_store %arg15[%c0_119, %c0_120], %145 {strides = array<i32>} : memref<32x128xf32, #tpu.memory_space<vmem>>, vector<32x128xf32>,
    return
  }
}

</mosaic_0001>

<bundles_post_ra>
// kernel: basic_rn_forward.3
= control target key start
LH: loop header
LB: loop body
LE: loop exit
PB: predicated region body
PF: predicated region fallthrough
CT: control target
= control target key end

     0   :  { %s4498_s12 = smov 0   ;;  %s4500_s13 = smov 0   ;;  %s6328_s0 = inlined_call_operand.vmem [shape: f32[6,75], index: 0, kind: input, shape index: {}]   ;;  %s6329_s1 = inlined_call_operand.vmem [shape: f32[75,25088], index: 1, kind: input, shape index: {}]   ;;  %s6330_s2 = inlined_call_operand.vmem [shape: f32[6,1], index: 2, kind: input, shape index: {}]   ;;  %s6331_s3 = inlined_call_operand.vmem [shape: f32[6,25088], index: 3, kind: output, shape index: {}]  }
   0x1   :  { %s4502_s14 = smov 0  }
   0x2 LB: > { %s3754_s15 = sadd.s32 4294967295, %s4471_s14   ;;  %s4515_s16 = sadd.s32 1, %s4471_s14   ;;  %s4471_s14 = sphi %s4502_s14, %s6336_s14   ;;  %s4467_s13 = sphi %s4500_s13, %s6335_s13   ;;  %s4463_s12 = sphi %s4498_s12, %s6334_s12  }
   0x3   : > { %s38_s17 = ssub.s32 %s4471_s14, %s4515_s16  ;;  %s41_s18 = sadd.s32 1, %s4467_s13 }
   0x4   : > { %p39_p0 = scmp.eq.s32.totalorder %s38_s17, 0  ;;  %p48_p1 = scmp.ne.s32.totalorder %s4467_s13, %s4463_s12 }
   0x5   : > { %p49_p2 = scmp.eq.s32.totalorder %s4471_s14, 0  ;;  %p3757_p4 = scmp.ge.s32.totalorder %s4471_s14, 4 }
   0x6   : > { %s4524_s19 = scalar_select %p39_p0, %s4467_s13, %s41_s18  }
   0x7   : > { %p50_p3 = por %p49_p2, %p48_p1  ;;  %127 = sbr.rel (%p3757_p4) target bundleno = 264 (0x108), region = 24 }
   0xe   : > { %130 = sbr.rel (!%p50_p3) target bundleno = 264 (0x108), region = 28  ;;  %s132_s20 = sand.u32 (%p50_p3), 1, %s4467_s13  }
   0xf   : > { %s3837_s21 = smul.u32 (%p50_p3), 392, %s4471_s14 }
  0x10   : > { %s4416_s22 = smul.u32 (%p50_p3), 3920, %s132_s20 }
  0x11   : > { %s4532_s25 = scalar_lea.vmem (%p50_p3), %s6329_s1, %s3837_s21 }
  0x12   : > { %v150_v0 = vld [vmem:[%s4532_s25] sm:$0xff] (%p50_p3)  ;;  %v152_v1 = vld [vmem:[%s4532_s25 + $0x8] sm:$0xff] (%p50_p3)  ;;  %v154_v2 = vld [vmem:[%s4532_s25 + $0x10] sm:$0xff] (%p50_p3)  ;;  %s4537_s26 = scalar_lea.vmem (%p50_p3), [#allocation2], %s4416_s22 }
  0x13   : > { %151 = vst [vmem:[%s4537_s26] sm:$0xff] (%p50_p3), %v150_v0  ;;  %153 = vst [vmem:[%s4537_s26 + $0x8] sm:$0xff] (%p50_p3), %v152_v1  ;;  %v156_v3 = vld [vmem:[%s4532_s25 + $0x18] sm:$0xff] (%p50_p3)  ;;  %v158_v4 = vld [vmem:[%s4532_s25 + $0x20] sm:$0xff] (%p50_p3) }
  0x14   : > { %155 = vst [vmem:[%s4537_s26 + $0x10] sm:$0xff] (%p50_p3), %v154_v2  ;;  %v160_v5 = vld [vmem:[%s4532_s25 + $0x28] sm:$0xff] (%p50_p3)  ;;  %157 = vst [vmem:[%s4537_s26 + $0x18] sm:$0xff] (%p50_p3), %v156_v3  ;;  %v162_v6 = vld [vmem:[%s4532_s25 + $0x30] sm:$0xff] (%p50_p3) }
  0x15   : > { %159 = vst [vmem:[%s4537_s26 + $0x20] sm:$0xff] %v158_v4  ;;  %161 = vst [vmem:[%s4537_s26 + $0x28] sm:$0xff] %v160_v5  ;;  %v164_v7 = vld [vmem:[%s4532_s25 + $0x38] sm:$0xff]  ;;  %v166_v8 = vld [vmem:[%s4532_s25 + $0x40] sm:$0xff] }
  0x16   : > { %163 = vst [vmem:[%s4537_s26 + $0x30] sm:$0xff] %v162_v6  ;;  %165 = vst [vmem:[%s4537_s26 + $0x38] sm:$0xff] %v164_v7  ;;  %v168_v9 = vld [vmem:[%s4532_s25 + $0x48] sm:$0xff]  ;;  %v170_v10 = vld [vmem:[%s4532_s25 + $0x50] sm:$0xff] }
  0x17   : > { %167 = vst [vmem:[%s4537_s26 + $0x40] sm:$0xff] %v166_v8  ;;  %v172_v11 = vld [vmem:[%s4532_s25 + $0x58] sm:$0xff]  ;;  %169 = vst [vmem:[%s4537_s26 + $0x48] sm:$0xff] %v168_v9  ;;  %v174_v12 = vld [vmem:[%s4532_s25 + $0x60] sm:$0xff] }
  0x18   : > { %171 = vst [vmem:[%s4537_s26 + $0x50] sm:$0xff] %v170_v10  ;;  %173 = vst [vmem:[%s4537_s26 + $0x58] sm:$0xff] %v172_v11  ;;  %v176_v13 = vld [vmem:[%s4532_s25 + $0x68] sm:$0xff]  ;;  %v178_v14 = vld [vmem:[%s4532_s25 + $0x70] sm:$0xff] }
  0x19   : > { %175 = vst [vmem:[%s4537_s26 + $0x60] sm:$0xff] %v174_v12  ;;  %177 = vst [vmem:[%s4537_s26 + $0x68] sm:$0xff] %v176_v13  ;;  %v180_v15 = vld [vmem:[%s4532_s25 + $0x78] sm:$0xff]  ;;  %v182_v16 = vld [vmem:[%s4532_s25 + $0x80] sm:$0xff] }
  0x1a   : > { %179 = vst [vmem:[%s4537_s26 + $0x70] sm:$0xff] %v178_v14  ;;  %v184_v17 = vld [vmem:[%s4532_s25 + $0x88] sm:$0xff]  ;;  %181 = vst [vmem:[%s4537_s26 + $0x78] sm:$0xff] %v180_v15  ;;  %v186_v18 = vld [vmem:[%s4532_s25 + $0x90] sm:$0xff] }
  0x1b   : > { %183 = vst [vmem:[%s4537_s26 + $0x80] sm:$0xff] %v182_v16  ;;  %185 = vst [vmem:[%s4537_s26 + $0x88] sm:$0xff] %v184_v17  ;;  %v188_v19 = vld [vmem:[%s4532_s25 + $0x98] sm:$0xff]  ;;  %v190_v20 = vld [vmem:[%s4532_s25 + $0xa0] sm:$0xff] }
  0x1c   : > { %187 = vst [vmem:[%s4537_s26 + $0x90] sm:$0xff] %v186_v18  ;;  %189 = vst [vmem:[%s4537_s26 + $0x98] sm:$0xff] %v188_v19  ;;  %v192_v21 = vld [vmem:[%s4532_s25 + $0xa8] sm:$0xff]  ;;  %v194_v22 = vld [vmem:[%s4532_s25 + $0xb0] sm:$0xff] }
  0x1d   : > { %191 = vst [vmem:[%s4537_s26 + $0xa0] sm:$0xff] %v190_v20  ;;  %v196_v23 = vld [vmem:[%s4532_s25 + $0xb8] sm:$0xff]  ;;  %193 = vst [vmem:[%s4537_s26 + $0xa8] sm:$0xff] %v192_v21  ;;  %v198_v24 = vld [vmem:[%s4532_s25 + $0xc0] sm:$0xff] }
  0x1e   : > { %195 = vst [vmem:[%s4537_s26 + $0xb0] sm:$0xff] %v194_v22  ;;  %197 = vst [vmem:[%s4537_s26 + $0xb8] sm:$0xff] %v196_v23  ;;  %v200_v25 = vld [vmem:[%s4532_s25 + $0xc8] sm:$0xff]  ;;  %v202_v26 = vld [vmem:[%s4532_s25 + $0xd0] sm:$0xff] }
  0x1f   : > { %199 = vst [vmem:[%s4537_s26 + $0xc0] sm:$0xff] %v198_v24  ;;  %201 = vst [vmem:[%s4537_s26 + $0xc8] sm:$0xff] %v200_v25  ;;  %v204_v27 = vld [vmem:[%s4532_s25 + $0xd8] sm:$0xff]  ;;  %v206_v28 = vld [vmem:[%s4532_s25 + $0xe0] sm:$0xff] }
  0x20   : > { %203 = vst [vmem:[%s4537_s26 + $0xd0] sm:$0xff] %v202_v26  ;;  %v208_v29 = vld [vmem:[%s4532_s25 + $0xe8] sm:$0xff]  ;;  %205 = vst [vmem:[%s4537_s26 + $0xd8] sm:$0xff] %v204_v27  ;;  %v210_v30 = vld [vmem:[%s4532_s25 + $0xf0] sm:$0xff] }
  0x21   : > { %207 = vst [vmem:[%s4537_s26 + $0xe0] sm:$0xff] %v206_v28  ;;  %209 = vst [vmem:[%s4537_s26 + $0xe8] sm:$0xff] %v208_v29  ;;  %v212_v31 = vld [vmem:[%s4532_s25 + $0xf8] sm:$0xff]  ;;  %v214_v32 = vld [vmem:[%s4532_s25 + $0x100] sm:$0xff] }
  0x22   : > { %211 = vst [vmem:[%s4537_s26 + $0xf0] sm:$0xff] %v210_v30  ;;  %213 = vst [vmem:[%s4537_s26 + $0xf8] sm:$0xff] %v212_v31  ;;  %v216_v33 = vld [vmem:[%s4532_s25 + $0x108] sm:$0xff]  ;;  %v218_v34 = vld [vmem:[%s4532_s25 + $0x110] sm:$0xff] }
  0x23   : > { %215 = vst [vmem:[%s4537_s26 + $0x100] sm:$0xff] %v214_v32  ;;  %v220_v35 = vld [vmem:[%s4532_s25 + $0x118] sm:$0xff]  ;;  %217 = vst [vmem:[%s4537_s26 + $0x108] sm:$0xff] %v216_v33  ;;  %v222_v36 = vld [vmem:[%s4532_s25 + $0x120] sm:$0xff] }
  0x24   : > { %219 = vst [vmem:[%s4537_s26 + $0x110] sm:$0xff] %v218_v34  ;;  %221 = vst [vmem:[%s4537_s26 + $0x118] sm:$0xff] %v220_v35  ;;  %v224_v37 = vld [vmem:[%s4532_s25 + $0x128] sm:$0xff]  ;;  %v226_v38 = vld [vmem:[%s4532_s25 + $0x130] sm:$0xff] }
  0x25   : > { %223 = vst [vmem:[%s4537_s26 + $0x120] sm:$0xff] %v222_v36  ;;  %225 = vst [vmem:[%s4537_s26 + $0x128] sm:$0xff] %v224_v37  ;;  %v228_v39 = vld [vmem:[%s4532_s25 + $0x138] sm:$0xff]  ;;  %v230_v40 = vld [vmem:[%s4532_s25 + $0x140] sm:$0xff] }
  0x26   : > { %227 = vst [vmem:[%s4537_s26 + $0x130] sm:$0xff] %v226_v38  ;;  %v232_v41 = vld [vmem:[%s4532_s25 + $0x148] sm:$0xff]  ;;  %229 = vst [vmem:[%s4537_s26 + $0x138] sm:$0xff] %v228_v39  ;;  %v234_v42 = vld [vmem:[%s4532_s25 + $0x150] sm:$0xff] }
  0x27   : > { %231 = vst [vmem:[%s4537_s26 + $0x140] sm:$0xff] %v230_v40  ;;  %233 = vst [vmem:[%s4537_s26 + $0x148] sm:$0xff] %v232_v41  ;;  %v236_v43 = vld [vmem:[%s4532_s25 + $0x158] sm:$0xff]  ;;  %v238_v44 = vld [vmem:[%s4532_s25 + $0x160] sm:$0xff] }
  0x28   : > { %235 = vst [vmem:[%s4537_s26 + $0x150] sm:$0xff] %v234_v42  ;;  %237 = vst [vmem:[%s4537_s26 + $0x158] sm:$0xff] %v236_v43  ;;  %v240_v45 = vld [vmem:[%s4532_s25 + $0x168] sm:$0xff]  ;;  %v242_v46 = vld [vmem:[%s4532_s25 + $0x170] sm:$0xff] }
  0x29   : > { %239 = vst [vmem:[%s4537_s26 + $0x160] sm:$0xff] %v238_v44  ;;  %v244_v47 = vld [vmem:[%s4532_s25 + $0x178] sm:$0xff]  ;;  %241 = vst [vmem:[%s4537_s26 + $0x168] sm:$0xff] %v240_v45  ;;  %v246_v48 = vld [vmem:[%s4532_s25 + $0x180] sm:$0xff] }
  0x2a   : > { %243 = vst [vmem:[%s4537_s26 + $0x170] sm:$0xff] %v242_v46  ;;  %245 = vst [vmem:[%s4537_s26 + $0x178] sm:$0xff] %v244_v47  ;;  %v248_v49 = vld [vmem:[%s4532_s25 + $0x620] sm:$0xff]  ;;  %v250_v50 = vld [vmem:[%s4532_s25 + $0x628] sm:$0xff] }
  0x2b   : > { %247 = vst [vmem:[%s4537_s26 + $0x180] sm:$0xff] %v246_v48  ;;  %249 = vst [vmem:[%s4537_s26 + $0x188] sm:$0xff] %v248_v49  ;;  %v252_v51 = vld [vmem:[%s4532_s25 + $0x630] sm:$0xff]  ;;  %v254_v52 = vld [vmem:[%s4532_s25 + $0x638] sm:$0xff] }
  0x2c   : > { %251 = vst [vmem:[%s4537_s26 + $0x190] sm:$0xff] %v250_v50  ;;  %v256_v53 = vld [vmem:[%s4532_s25 + $0x640] sm:$0xff]  ;;  %253 = vst [vmem:[%s4537_s26 + $0x198] sm:$0xff] %v252_v51  ;;  %v258_v54 = vld [vmem:[%s4532_s25 + $0x648] sm:$0xff] }
  0x2d   : > { %255 = vst [vmem:[%s4537_s26 + $0x1a0] sm:$0xff] %v254_v52  ;;  %257 = vst [vmem:[%s4537_s26 + $0x1a8] sm:$0xff] %v256_v53  ;;  %v260_v55 = vld [vmem:[%s4532_s25 + $0x650] sm:$0xff]  ;;  %v262_v56 = vld [vmem:[%s4532_s25 + $0x658] sm:$0xff] }
  0x2e   : > { %259 = vst [vmem:[%s4537_s26 + $0x1b0] sm:$0xff] %v258_v54  ;;  %261 = vst [vmem:[%s4537_s26 + $0x1b8] sm:$0xff] %v260_v55  ;;  %v264_v57 = vld [vmem:[%s4532_s25 + $0x660] sm:$0xff]  ;;  %v266_v58 = vld [vmem:[%s4532_s25 + $0x668] sm:$0xff] }
  0x2f   : > { %263 = vst [vmem:[%s4537_s26 + $0x1c0] sm:$0xff] %v262_v56  ;;  %v268_v59 = vld [vmem:[%s4532_s25 + $0x670] sm:$0xff]  ;;  %265 = vst [vmem:[%s4537_s26 + $0x1c8] sm:$0xff] %v264_v57  ;;  %v270_v60 = vld [vmem:[%s4532_s25 + $0x678] sm:$0xff] }
  0x30   : > { %267 = vst [vmem:[%s4537_s26 + $0x1d0] sm:$0xff] %v266_v58  ;;  %269 = vst [vmem:[%s4537_s26 + $0x1d8] sm:$0xff] %v268_v59  ;;  %v272_v61 = vld [vmem:[%s4532_s25 + $0x680] sm:$0xff]  ;;  %v274_v62 = vld [vmem:[%s4532_s25 + $0x688] sm:$0xff] }
  0x31   : > { %271 = vst [vmem:[%s4537_s26 + $0x1e0] sm:$0xff] %v270_v60  ;;  %273 = vst [vmem:[%s4537_s26 + $0x1e8] sm:$0xff] %v272_v61  ;;  %v276_v63 = vld [vmem:[%s4532_s25 + $0x690] sm:$0xff]  ;;  %v278_v0 = vld [vmem:[%s4532_s25 + $0x698] sm:$0xff] }
  0x32   : > { %275 = vst [vmem:[%s4537_s26 + $0x1f0] sm:$0xff] %v274_v62  ;;  %v280_v1 = vld [vmem:[%s4532_s25 + $0x6a0] sm:$0xff]  ;;  %277 = vst [vmem:[%s4537_s26 + $0x1f8] sm:$0xff] %v276_v63  ;;  %v282_v2 = vld [vmem:[%s4532_s25 + $0x6a8] sm:$0xff] }
  0x33   : > { %279 = vst [vmem:[%s4537_s26 + $0x200] sm:$0xff] %v278_v0  ;;  %281 = vst [vmem:[%s4537_s26 + $0x208] sm:$0xff] %v280_v1  ;;  %v284_v3 = vld [vmem:[%s4532_s25 + $0x6b0] sm:$0xff]  ;;  %v286_v4 = vld [vmem:[%s4532_s25 + $0x6b8] sm:$0xff] }
  0x34   : > { %283 = vst [vmem:[%s4537_s26 + $0x210] sm:$0xff] %v282_v2  ;;  %285 = vst [vmem:[%s4537_s26 + $0x218] sm:$0xff] %v284_v3  ;;  %v288_v5 = vld [vmem:[%s4532_s25 + $0x6c0] sm:$0xff]  ;;  %v290_v6 = vld [vmem:[%s4532_s25 + $0x6c8] sm:$0xff] }
  0x35   : > { %287 = vst [vmem:[%s4537_s26 + $0x220] sm:$0xff] %v286_v4  ;;  %v292_v7 = vld [vmem:[%s4532_s25 + $0x6d0] sm:$0xff]  ;;  %289 = vst [vmem:[%s4537_s26 + $0x228] sm:$0xff] %v288_v5  ;;  %v294_v8 = vld [vmem:[%s4532_s25 + $0x6d8] sm:$0xff] }
  0x36   : > { %291 = vst [vmem:[%s4537_s26 + $0x230] sm:$0xff] %v290_v6  ;;  %293 = vst [vmem:[%s4537_s26 + $0x238] sm:$0xff] %v292_v7  ;;  %v296_v9 = vld [vmem:[%s4532_s25 + $0x6e0] sm:$0xff]  ;;  %v298_v10 = vld [vmem:[%s4532_s25 + $0x6e8] sm:$0xff] }
  0x37   : > { %295 = vst [vmem:[%s4537_s26 + $0x240] sm:$0xff] %v294_v8  ;;  %297 = vst [vmem:[%s4537_s26 + $0x248] sm:$0xff] %v296_v9  ;;  %v300_v11 = vld [vmem:[%s4532_s25 + $0x6f0] sm:$0xff]  ;;  %v302_v12 = vld [vmem:[%s4532_s25 + $0x6f8] sm:$0xff] }
  0x38   : > { %299 = vst [vmem:[%s4537_s26 + $0x250] sm:$0xff] %v298_v10  ;;  %v304_v13 = vld [vmem:[%s4532_s25 + $0x700] sm:$0xff]  ;;  %301 = vst [vmem:[%s4537_s26 + $0x258] sm:$0xff] %v300_v11  ;;  %v306_v14 = vld [vmem:[%s4532_s25 + $0x708] sm:$0xff] }
  0x39   : > { %303 = vst [vmem:[%s4537_s26 + $0x260] sm:$0xff] %v302_v12  ;;  %305 = vst [vmem:[%s4537_s26 + $0x268] sm:$0xff] %v304_v13  ;;  %v308_v15 = vld [vmem:[%s4532_s25 + $0x710] sm:$0xff]  ;;  %v310_v16 = vld [vmem:[%s4532_s25 + $0x718] sm:$0xff] }
  0x3a   : > { %307 = vst [vmem:[%s4537_s26 + $0x270] sm:$0xff] %v306_v14  ;;  %309 = vst [vmem:[%s4537_s26 + $0x278] sm:$0xff] %v308_v15  ;;  %v312_v17 = vld [vmem:[%s4532_s25 + $0x720] sm:$0xff]  ;;  %v314_v18 = vld [vmem:[%s4532_s25 + $0x728] sm:$0xff] }
  0x3b   : > { %311 = vst [vmem:[%s4537_s26 + $0x280] sm:$0xff] %v310_v16  ;;  %v316_v19 = vld [vmem:[%s4532_s25 + $0x730] sm:$0xff]  ;;  %313 = vst [vmem:[%s4537_s26 + $0x288] sm:$0xff] %v312_v17  ;;  %v318_v20 = vld [vmem:[%s4532_s25 + $0x738] sm:$0xff] }
  0x3c   : > { %315 = vst [vmem:[%s4537_s26 + $0x290] sm:$0xff] %v314_v18  ;;  %317 = vst [vmem:[%s4537_s26 + $0x298] sm:$0xff] %v316_v19  ;;  %v320_v21 = vld [vmem:[%s4532_s25 + $0x740] sm:$0xff]  ;;  %v322_v22 = vld [vmem:[%s4532_s25 + $0x748] sm:$0xff] }
  0x3d   : > { %319 = vst [vmem:[%s4537_s26 + $0x2a0] sm:$0xff] %v318_v20  ;;  %321 = vst [vmem:[%s4537_s26 + $0x2a8] sm:$0xff] %v320_v21  ;;  %v324_v23 = vld [vmem:[%s4532_s25 + $0x750] sm:$0xff]  ;;  %v326_v24 = vld [vmem:[%s4532_s25 + $0x758] sm:$0xff] }
  0x3e   : > { %323 = vst [vmem:[%s4537_s26 + $0x2b0] sm:$0xff] %v322_v22  ;;  %v328_v25 = vld [vmem:[%s4532_s25 + $0x760] sm:$0xff]  ;;  %325 = vst [vmem:[%s4537_s26 + $0x2b8] sm:$0xff] %v324_v23  ;;  %v330_v26 = vld [vmem:[%s4532_s25 + $0x768] sm:$0xff] }
  0x3f   : > { %327 = vst [vmem:[%s4537_s26 + $0x2c0] sm:$0xff] %v326_v24  ;;  %329 = vst [vmem:[%s4537_s26 + $0x2c8] sm:$0xff] %v328_v25  ;;  %v332_v27 = vld [vmem:[%s4532_s25 + $0x770] sm:$0xff]  ;;  %v334_v28 = vld [vmem:[%s4532_s25 + $0x778] sm:$0xff] }
  0x40   : > { %331 = vst [vmem:[%s4537_s26 + $0x2d0] sm:$0xff] %v330_v26  ;;  %333 = vst [vmem:[%s4537_s26 + $0x2d8] sm:$0xff] %v332_v27  ;;  %v336_v29 = vld [vmem:[%s4532_s25 + $0x780] sm:$0xff]  ;;  %v338_v30 = vld [vmem:[%s4532_s25 + $0x788] sm:$0xff] }
  0x41   : > { %335 = vst [vmem:[%s4537_s26 + $0x2e0] sm:$0xff] %v334_v28  ;;  %v340_v31 = vld [vmem:[%s4532_s25 + $0x790] sm:$0xff]  ;;  %337 = vst [vmem:[%s4537_s26 + $0x2e8] sm:$0xff] %v336_v29  ;;  %v342_v32 = vld [vmem:[%s4532_s25 + $0x798] sm:$0xff] }
  0x42   : > { %339 = vst [vmem:[%s4537_s26 + $0x2f0] sm:$0xff] %v338_v30  ;;  %341 = vst [vmem:[%s4537_s26 + $0x2f8] sm:$0xff] %v340_v31  ;;  %v344_v33 = vld [vmem:[%s4532_s25 + $0x7a0] sm:$0xff]  ;;  %v348_v35 = vld [vmem:[%s4532_s25 + $0xc48] sm:$0xff] }
  0x43   : > { %v346_v34 = vld [vmem:[%s4532_s25 + $0xc40] sm:$0xff]  ;;  %343 = vst [vmem:[%s4537_s26 + $0x300] sm:$0xff] %v342_v32  ;;  %345 = vst [vmem:[%s4537_s26 + $0x308] sm:$0xff] %v344_v33  ;;  %v350_v36 = vld [vmem:[%s4532_s25 + $0xc50] sm:$0xff] }
  0x44   : > { %347 = vst [vmem:[%s4537_s26 + $0x310] sm:$0xff] %v346_v34  ;;  %v352_v37 = vld [vmem:[%s4532_s25 + $0xc58] sm:$0xff]  ;;  %349 = vst [vmem:[%s4537_s26 + $0x318] sm:$0xff] %v348_v35  ;;  %v354_v38 = vld [vmem:[%s4532_s25 + $0xc60] sm:$0xff] }
  0x45   : > { %351 = vst [vmem:[%s4537_s26 + $0x320] sm:$0xff] %v350_v36  ;;  %353 = vst [vmem:[%s4537_s26 + $0x328] sm:$0xff] %v352_v37  ;;  %v356_v39 = vld [vmem:[%s4532_s25 + $0xc68] sm:$0xff]  ;;  %v358_v40 = vld [vmem:[%s4532_s25 + $0xc70] sm:$0xff] }
  0x46   : > { %355 = vst [vmem:[%s4537_s26 + $0x330] sm:$0xff] %v354_v38  ;;  %357 = vst [vmem:[%s4537_s26 + $0x338] sm:$0xff] %v356_v39  ;;  %v360_v41 = vld [vmem:[%s4532_s25 + $0xc78] sm:$0xff]  ;;  %v362_v42 = vld [vmem:[%s4532_s25 + $0xc80] sm:$0xff] }
  0x47   : > { %359 = vst [vmem:[%s4537_s26 + $0x340] sm:$0xff] %v358_v40  ;;  %v364_v43 = vld [vmem:[%s4532_s25 + $0xc88] sm:$0xff]  ;;  %361 = vst [vmem:[%s4537_s26 + $0x348] sm:$0xff] %v360_v41  ;;  %v366_v44 = vld [vmem:[%s4532_s25 + $0xc90] sm:$0xff] }
  0x48   : > { %363 = vst [vmem:[%s4537_s26 + $0x350] sm:$0xff] %v362_v42  ;;  %365 = vst [vmem:[%s4537_s26 + $0x358] sm:$0xff] %v364_v43  ;;  %v368_v45 = vld [vmem:[%s4532_s25 + $0xc98] sm:$0xff]  ;;  %v370_v46 = vld [vmem:[%s4532_s25 + $0xca0] sm:$0xff] }
  0x49   : > { %367 = vst [vmem:[%s4537_s26 + $0x360] sm:$0xff] %v366_v44  ;;  %369 = vst [vmem:[%s4537_s26 + $0x368] sm:$0xff] %v368_v45  ;;  %v372_v47 = vld [vmem:[%s4532_s25 + $0xca8] sm:$0xff]  ;;  %v374_v48 = vld [vmem:[%s4532_s25 + $0xcb0] sm:$0xff] }
  0x4a   : > { %371 = vst [vmem:[%s4537_s26 + $0x370] sm:$0xff] %v370_v46  ;;  %v376_v49 = vld [vmem:[%s4532_s25 + $0xcb8] sm:$0xff]  ;;  %373 = vst [vmem:[%s4537_s26 + $0x378] sm:$0xff] %v372_v47  ;;  %v378_v50 = vld [vmem:[%s4532_s25 + $0xcc0] sm:$0xff] }
  0x4b   : > { %375 = vst [vmem:[%s4537_s26 + $0x380] sm:$0xff] %v374_v48  ;;  %377 = vst [vmem:[%s4537_s26 + $0x388] sm:$0xff] %v376_v49  ;;  %v380_v51 = vld [vmem:[%s4532_s25 + $0xcc8] sm:$0xff]  ;;  %v382_v52 = vld [vmem:[%s4532_s25 + $0xcd0] sm:$0xff] }
  0x4c   : > { %379 = vst [vmem:[%s4537_s26 + $0x390] sm:$0xff] %v378_v50  ;;  %381 = vst [vmem:[%s4537_s26 + $0x398] sm:$0xff] %v380_v51  ;;  %v384_v53 = vld [vmem:[%s4532_s25 + $0xcd8] sm:$0xff]  ;;  %v386_v54 = vld [vmem:[%s4532_s25 + $0xce0] sm:$0xff] }
  0x4d   : > { %383 = vst [vmem:[%s4537_s26 + $0x3a0] sm:$0xff] %v382_v52  ;;  %v388_v55 = vld [vmem:[%s4532_s25 + $0xce8] sm:$0xff]  ;;  %385 = vst [vmem:[%s4537_s26 + $0x3a8] sm:$0xff] %v384_v53  ;;  %v390_v56 = vld [vmem:[%s4532_s25 + $0xcf0] sm:$0xff] }
  0x4e   : > { %387 = vst [vmem:[%s4537_s26 + $0x3b0] sm:$0xff] %v386_v54  ;;  %389 = vst [vmem:[%s4537_s26 + $0x3b8] sm:$0xff] %v388_v55  ;;  %v392_v57 = vld [vmem:[%s4532_s25 + $0xcf8] sm:$0xff]  ;;  %v394_v58 = vld [vmem:[%s4532_s25 + $0xd00] sm:$0xff] }
  0x4f   : > { %391 = vst [vmem:[%s4537_s26 + $0x3c0] sm:$0xff] %v390_v56  ;;  %393 = vst [vmem:[%s4537_s26 + $0x3c8] sm:$0xff] %v392_v57  ;;  %v396_v59 = vld [vmem:[%s4532_s25 + $0xd08] sm:$0xff]  ;;  %v398_v60 = vld [vmem:[%s4532_s25 + $0xd10] sm:$0xff] }
  0x50   : > { %395 = vst [vmem:[%s4537_s26 + $0x3d0] sm:$0xff] %v394_v58  ;;  %v400_v61 = vld [vmem:[%s4532_s25 + $0xd18] sm:$0xff]  ;;  %397 = vst [vmem:[%s4537_s26 + $0x3d8] sm:$0xff] %v396_v59  ;;  %v402_v62 = vld [vmem:[%s4532_s25 + $0xd20] sm:$0xff] }
  0x51   : > { %399 = vst [vmem:[%s4537_s26 + $0x3e0] sm:$0xff] %v398_v60  ;;  %401 = vst [vmem:[%s4537_s26 + $0x3e8] sm:$0xff] %v400_v61  ;;  %v404_v63 = vld [vmem:[%s4532_s25 + $0xd28] sm:$0xff]  ;;  %v406_v0 = vld [vmem:[%s4532_s25 + $0xd30] sm:$0xff] }
  0x52   : > { %403 = vst [vmem:[%s4537_s26 + $0x3f0] sm:$0xff] %v402_v62  ;;  %405 = vst [vmem:[%s4537_s26 + $0x3f8] sm:$0xff] %v404_v63  ;;  %v408_v1 = vld [vmem:[%s4532_s25 + $0xd38] sm:$0xff]  ;;  %v410_v2 = vld [vmem:[%s4532_s25 + $0xd40] sm:$0xff] }
  0x53   : > { %407 = vst [vmem:[%s4537_s26 + $0x400] sm:$0xff] %v406_v0  ;;  %v412_v3 = vld [vmem:[%s4532_s25 + $0xd48] sm:$0xff]  ;;  %409 = vst [vmem:[%s4537_s26 + $0x408] sm:$0xff] %v408_v1  ;;  %v414_v4 = vld [vmem:[%s4532_s25 + $0xd50] sm:$0xff] }
  0x54   : > { %411 = vst [vmem:[%s4537_s26 + $0x410] sm:$0xff] %v410_v2  ;;  %413 = vst [vmem:[%s4537_s26 + $0x418] sm:$0xff] %v412_v3  ;;  %v416_v5 = vld [vmem:[%s4532_s25 + $0xd58] sm:$0xff]  ;;  %v418_v6 = vld [vmem:[%s4532_s25 + $0xd60] sm:$0xff] }
  0x55   : > { %415 = vst [vmem:[%s4537_s26 + $0x420] sm:$0xff] %v414_v4  ;;  %417 = vst [vmem:[%s4537_s26 + $0x428] sm:$0xff] %v416_v5  ;;  %v420_v7 = vld [vmem:[%s4532_s25 + $0xd68] sm:$0xff]  ;;  %v422_v8 = vld [vmem:[%s4532_s25 + $0xd70] sm:$0xff] }
  0x56   : > { %419 = vst [vmem:[%s4537_s26 + $0x430] sm:$0xff] %v418_v6  ;;  %v424_v9 = vld [vmem:[%s4532_s25 + $0xd78] sm:$0xff]  ;;  %421 = vst [vmem:[%s4537_s26 + $0x438] sm:$0xff] %v420_v7  ;;  %v426_v10 = vld [vmem:[%s4532_s25 + $0xd80] sm:$0xff] }
  0x57   : > { %423 = vst [vmem:[%s4537_s26 + $0x440] sm:$0xff] %v422_v8  ;;  %425 = vst [vmem:[%s4537_s26 + $0x448] sm:$0xff] %v424_v9  ;;  %v428_v11 = vld [vmem:[%s4532_s25 + $0xd88] sm:$0xff]  ;;  %v430_v12 = vld [vmem:[%s4532_s25 + $0xd90] sm:$0xff] }
  0x58   : > { %427 = vst [vmem:[%s4537_s26 + $0x450] sm:$0xff] %v426_v10  ;;  %429 = vst [vmem:[%s4537_s26 + $0x458] sm:$0xff] %v428_v11  ;;  %v432_v13 = vld [vmem:[%s4532_s25 + $0xd98] sm:$0xff]  ;;  %v434_v14 = vld [vmem:[%s4532_s25 + $0xda0] sm:$0xff] }
  0x59   : > { %431 = vst [vmem:[%s4537_s26 + $0x460] sm:$0xff] %v430_v12  ;;  %v436_v15 = vld [vmem:[%s4532_s25 + $0xda8] sm:$0xff]  ;;  %433 = vst [vmem:[%s4537_s26 + $0x468] sm:$0xff] %v432_v13  ;;  %v438_v16 = vld [vmem:[%s4532_s25 + $0xdb0] sm:$0xff] }
  0x5a   : > { %435 = vst [vmem:[%s4537_s26 + $0x470] sm:$0xff] %v434_v14  ;;  %437 = vst [vmem:[%s4537_s26 + $0x478] sm:$0xff] %v436_v15  ;;  %v440_v17 = vld [vmem:[%s4532_s25 + $0xdb8] sm:$0xff]  ;;  %v442_v18 = vld [vmem:[%s4532_s25 + $0xdc0] sm:$0xff] }
  0x5b   : > { %439 = vst [vmem:[%s4537_s26 + $0x480] sm:$0xff] %v438_v16  ;;  %441 = vst [vmem:[%s4537_s26 + $0x488] sm:$0xff] %v440_v17  ;;  %v444_v19 = vld [vmem:[%s4532_s25 + $0x1260] sm:$0xff]  ;;  %v446_v20 = vld [vmem:[%s4532_s25 + $0x1268] sm:$0xff] }
  0x5c   : > { %443 = vst [vmem:[%s4537_s26 + $0x490] sm:$0xff] %v442_v18  ;;  %v448_v21 = vld [vmem:[%s4532_s25 + $0x1270] sm:$0xff]  ;;  %445 = vst [vmem:[%s4537_s26 + $0x498] sm:$0xff] %v444_v19  ;;  %v450_v22 = vld [vmem:[%s4532_s25 + $0x1278] sm:$0xff] }
  0x5d   : > { %447 = vst [vmem:[%s4537_s26 + $0x4a0] sm:$0xff] %v446_v20  ;;  %449 = vst [vmem:[%s4537_s26 + $0x4a8] sm:$0xff] %v448_v21  ;;  %v452_v23 = vld [vmem:[%s4532_s25 + $0x1280] sm:$0xff]  ;;  %v454_v24 = vld [vmem:[%s4532_s25 + $0x1288] sm:$0xff] }
  0x5e   : > { %451 = vst [vmem:[%s4537_s26 + $0x4b0] sm:$0xff] %v450_v22  ;;  %453 = vst [vmem:[%s4537_s26 + $0x4b8] sm:$0xff] %v452_v23  ;;  %v456_v25 = vld [vmem:[%s4532_s25 + $0x1290] sm:$0xff]  ;;  %v458_v26 = vld [vmem:[%s4532_s25 + $0x1298] sm:$0xff] }
  0x5f   : > { %455 = vst [vmem:[%s4537_s26 + $0x4c0] sm:$0xff] %v454_v24  ;;  %v460_v27 = vld [vmem:[%s4532_s25 + $0x12a0] sm:$0xff]  ;;  %457 = vst [vmem:[%s4537_s26 + $0x4c8] sm:$0xff] %v456_v25  ;;  %v462_v28 = vld [vmem:[%s4532_s25 + $0x12a8] sm:$0xff] }
  0x60   : > { %459 = vst [vmem:[%s4537_s26 + $0x4d0] sm:$0xff] %v458_v26  ;;  %461 = vst [vmem:[%s4537_s26 + $0x4d8] sm:$0xff] %v460_v27  ;;  %v464_v29 = vld [vmem:[%s4532_s25 + $0x12b0] sm:$0xff]  ;;  %v466_v30 = vld [vmem:[%s4532_s25 + $0x12b8] sm:$0xff] }
  0x61   : > { %463 = vst [vmem:[%s4537_s26 + $0x4e0] sm:$0xff] %v462_v28  ;;  %465 = vst [vmem:[%s4537_s26 + $0x4e8] sm:$0xff] %v464_v29  ;;  %v468_v31 = vld [vmem:[%s4532_s25 + $0x12c0] sm:$0xff]  ;;  %v470_v32 = vld [vmem:[%s4532_s25 + $0x12c8] sm:$0xff] }
  0x62   : > { %467 = vst [vmem:[%s4537_s26 + $0x4f0] sm:$0xff] %v466_v30  ;;  %v472_v33 = vld [vmem:[%s4532_s25 + $0x12d0] sm:$0xff]  ;;  %469 = vst [vmem:[%s4537_s26 + $0x4f8] sm:$0xff] %v468_v31  ;;  %v474_v34 = vld [vmem:[%s4532_s25 + $0x12d8] sm:$0xff] }
  0x63   : > { %471 = vst [vmem:[%s4537_s26 + $0x500] sm:$0xff] %v470_v32  ;;  %473 = vst [vmem:[%s4537_s26 + $0x508] sm:$0xff] %v472_v33  ;;  %v476_v35 = vld [vmem:[%s4532_s25 + $0x12e0] sm:$0xff]  ;;  %v478_v36 = vld [vmem:[%s4532_s25 + $0x12e8] sm:$0xff] }
  0x64   : > { %475 = vst [vmem:[%s4537_s26 + $0x510] sm:$0xff] %v474_v34  ;;  %477 = vst [vmem:[%s4537_s26 + $0x518] sm:$0xff] %v476_v35  ;;  %v480_v37 = vld [vmem:[%s4532_s25 + $0x12f0] sm:$0xff]  ;;  %v482_v38 = vld [vmem:[%s4532_s25 + $0x12f8] sm:$0xff] }
  0x65   : > { %479 = vst [vmem:[%s4537_s26 + $0x520] sm:$0xff] %v478_v36  ;;  %v484_v39 = vld [vmem:[%s4532_s25 + $0x1300] sm:$0xff]  ;;  %481 = vst [vmem:[%s4537_s26 + $0x528] sm:$0xff] %v480_v37  ;;  %v486_v40 = vld [vmem:[%s4532_s25 + $0x1308] sm:$0xff] }
  0x66   : > { %483 = vst [vmem:[%s4537_s26 + $0x530] sm:$0xff] %v482_v38  ;;  %485 = vst [vmem:[%s4537_s26 + $0x538] sm:$0xff] %v484_v39  ;;  %v488_v41 = vld [vmem:[%s4532_s25 + $0x1310] sm:$0xff]  ;;  %v490_v42 = vld [vmem:[%s4532_s25 + $0x1318] sm:$0xff] }
  0x67   : > { %487 = vst [vmem:[%s4537_s26 + $0x540] sm:$0xff] %v486_v40  ;;  %489 = vst [vmem:[%s4537_s26 + $0x548] sm:$0xff] %v488_v41  ;;  %v492_v43 = vld [vmem:[%s4532_s25 + $0x1320] sm:$0xff]  ;;  %v494_v44 = vld [vmem:[%s4532_s25 + $0x1328] sm:$0xff] }
  0x68   : > { %491 = vst [vmem:[%s4537_s26 + $0x550] sm:$0xff] %v490_v42  ;;  %v496_v45 = vld [vmem:[%s4532_s25 + $0x1330] sm:$0xff]  ;;  %493 = vst [vmem:[%s4537_s26 + $0x558] sm:$0xff] %v492_v43  ;;  %v498_v46 = vld [vmem:[%s4532_s25 + $0x1338] sm:$0xff] }
  0x69   : > { %495 = vst [vmem:[%s4537_s26 + $0x560] sm:$0xff] %v494_v44  ;;  %497 = vst [vmem:[%s4537_s26 + $0x568] sm:$0xff] %v496_v45  ;;  %v500_v47 = vld [vmem:[%s4532_s25 + $0x1340] sm:$0xff]  ;;  %v502_v48 = vld [vmem:[%s4532_s25 + $0x1348] sm:$0xff] }
  0x6a   : > { %499 = vst [vmem:[%s4537_s26 + $0x570] sm:$0xff] %v498_v46  ;;  %501 = vst [vmem:[%s4537_s26 + $0x578] sm:$0xff] %v500_v47  ;;  %v504_v49 = vld [vmem:[%s4532_s25 + $0x1350] sm:$0xff]  ;;  %v506_v50 = vld [vmem:[%s4532_s25 + $0x1358] sm:$0xff] }
  0x6b   : > { %503 = vst [vmem:[%s4537_s26 + $0x580] sm:$0xff] %v502_v48  ;;  %v508_v51 = vld [vmem:[%s4532_s25 + $0x1360] sm:$0xff]  ;;  %505 = vst [vmem:[%s4537_s26 + $0x588] sm:$0xff] %v504_v49  ;;  %v510_v52 = vld [vmem:[%s4532_s25 + $0x1368] sm:$0xff] }
  0x6c   : > { %507 = vst [vmem:[%s4537_s26 + $0x590] sm:$0xff] %v506_v50  ;;  %509 = vst [vmem:[%s4537_s26 + $0x598] sm:$0xff] %v508_v51  ;;  %v512_v53 = vld [vmem:[%s4532_s25 + $0x1370] sm:$0xff]  ;;  %v514_v54 = vld [vmem:[%s4532_s25 + $0x1378] sm:$0xff] }
  0x6d   : > { %511 = vst [vmem:[%s4537_s26 + $0x5a0] sm:$0xff] %v510_v52  ;;  %513 = vst [vmem:[%s4537_s26 + $0x5a8] sm:$0xff] %v512_v53  ;;  %v516_v55 = vld [vmem:[%s4532_s25 + $0x1380] sm:$0xff]  ;;  %v518_v56 = vld [vmem:[%s4532_s25 + $0x1388] sm:$0xff] }
  0x6e   : > { %515 = vst [vmem:[%s4537_s26 + $0x5b0] sm:$0xff] %v514_v54  ;;  %v520_v57 = vld [vmem:[%s4532_s25 + $0x1390] sm:$0xff]  ;;  %517 = vst [vmem:[%s4537_s26 + $0x5b8] sm:$0xff] %v516_v55  ;;  %v522_v58 = vld [vmem:[%s4532_s25 + $0x1398] sm:$0xff] }
  0x6f   : > { %519 = vst [vmem:[%s4537_s26 + $0x5c0] sm:$0xff] %v518_v56  ;;  %521 = vst [vmem:[%s4537_s26 + $0x5c8] sm:$0xff] %v520_v57  ;;  %v524_v59 = vld [vmem:[%s4532_s25 + $0x13a0] sm:$0xff]  ;;  %v526_v60 = vld [vmem:[%s4532_s25 + $0x13a8] sm:$0xff] }
  0x70   : > { %523 = vst [vmem:[%s4537_s26 + $0x5d0] sm:$0xff] %v522_v58  ;;  %525 = vst [vmem:[%s4537_s26 + $0x5d8] sm:$0xff] %v524_v59  ;;  %v528_v61 = vld [vmem:[%s4532_s25 + $0x13b0] sm:$0xff]  ;;  %v530_v62 = vld [vmem:[%s4532_s25 + $0x13b8] sm:$0xff] }
  0x71   : > { %527 = vst [vmem:[%s4537_s26 + $0x5e0] sm:$0xff] %v526_v60  ;;  %v532_v63 = vld [vmem:[%s4532_s25 + $0x13c0] sm:$0xff]  ;;  %529 = vst [vmem:[%s4537_s26 + $0x5e8] sm:$0xff] %v528_v61  ;;  %v534_v0 = vld [vmem:[%s4532_s25 + $0x13c8] sm:$0xff] }
  0x72   : > { %531 = vst [vmem:[%s4537_s26 + $0x5f0] sm:$0xff] %v530_v62  ;;  %533 = vst [vmem:[%s4537_s26 + $0x5f8] sm:$0xff] %v532_v63  ;;  %v536_v1 = vld [vmem:[%s4532_s25 + $0x13d0] sm:$0xff]  ;;  %v538_v2 = vld [vmem:[%s4532_s25 + $0x13d8] sm:$0xff] }
  0x73   : > { %535 = vst [vmem:[%s4537_s26 + $0x600] sm:$0xff] %v534_v0  ;;  %537 = vst [vmem:[%s4537_s26 + $0x608] sm:$0xff] %v536_v1  ;;  %v540_v3 = vld [vmem:[%s4532_s25 + $0x13e0] sm:$0xff]  ;;  %v544_v5 = vld [vmem:[%s4532_s25 + $0x1888] sm:$0xff] }
  0x74   : > { %539 = vst [vmem:[%s4537_s26 + $0x610] sm:$0xff] %v538_v2  ;;  %v542_v4 = vld [vmem:[%s4532_s25 + $0x1880] sm:$0xff]  ;;  %541 = vst [vmem:[%s4537_s26 + $0x618] sm:$0xff] %v540_v3  ;;  %v546_v6 = vld [vmem:[%s4532_s25 + $0x1890] sm:$0xff] }
  0x75   : > { %543 = vst [vmem:[%s4537_s26 + $0x620] sm:$0xff] %v542_v4  ;;  %545 = vst [vmem:[%s4537_s26 + $0x628] sm:$0xff] %v544_v5  ;;  %v548_v7 = vld [vmem:[%s4532_s25 + $0x1898] sm:$0xff]  ;;  %v550_v8 = vld [vmem:[%s4532_s25 + $0x18a0] sm:$0xff] }
  0x76   : > { %547 = vst [vmem:[%s4537_s26 + $0x630] sm:$0xff] %v546_v6  ;;  %549 = vst [vmem:[%s4537_s26 + $0x638] sm:$0xff] %v548_v7  ;;  %v552_v9 = vld [vmem:[%s4532_s25 + $0x18a8] sm:$0xff]  ;;  %v554_v10 = vld [vmem:[%s4532_s25 + $0x18b0] sm:$0xff] }
  0x77   : > { %551 = vst [vmem:[%s4537_s26 + $0x640] sm:$0xff] %v550_v8  ;;  %v556_v11 = vld [vmem:[%s4532_s25 + $0x18b8] sm:$0xff]  ;;  %553 = vst [vmem:[%s4537_s26 + $0x648] sm:$0xff] %v552_v9  ;;  %v558_v12 = vld [vmem:[%s4532_s25 + $0x18c0] sm:$0xff] }
  0x78   : > { %555 = vst [vmem:[%s4537_s26 + $0x650] sm:$0xff] %v554_v10  ;;  %557 = vst [vmem:[%s4537_s26 + $0x658] sm:$0xff] %v556_v11  ;;  %v560_v13 = vld [vmem:[%s4532_s25 + $0x18c8] sm:$0xff]  ;;  %v562_v14 = vld [vmem:[%s4532_s25 + $0x18d0] sm:$0xff] }
  0x79   : > { %559 = vst [vmem:[%s4537_s26 + $0x660] sm:$0xff] %v558_v12  ;;  %561 = vst [vmem:[%s4537_s26 + $0x668] sm:$0xff] %v560_v13  ;;  %v564_v15 = vld [vmem:[%s4532_s25 + $0x18d8] sm:$0xff]  ;;  %v566_v16 = vld [vmem:[%s4532_s25 + $0x18e0] sm:$0xff] }
  0x7a   : > { %563 = vst [vmem:[%s4537_s26 + $0x670] sm:$0xff] %v562_v14  ;;  %v568_v17 = vld [vmem:[%s4532_s25 + $0x18e8] sm:$0xff]  ;;  %565 = vst [vmem:[%s4537_s26 + $0x678] sm:$0xff] %v564_v15  ;;  %v570_v18 = vld [vmem:[%s4532_s25 + $0x18f0] sm:$0xff] }
  0x7b   : > { %567 = vst [vmem:[%s4537_s26 + $0x680] sm:$0xff] %v566_v16  ;;  %569 = vst [vmem:[%s4537_s26 + $0x688] sm:$0xff] %v568_v17  ;;  %v572_v19 = vld [vmem:[%s4532_s25 + $0x18f8] sm:$0xff]  ;;  %v574_v20 = vld [vmem:[%s4532_s25 + $0x1900] sm:$0xff] }
  0x7c   : > { %571 = vst [vmem:[%s4537_s26 + $0x690] sm:$0xff] %v570_v18  ;;  %573 = vst [vmem:[%s4537_s26 + $0x698] sm:$0xff] %v572_v19  ;;  %v576_v21 = vld [vmem:[%s4532_s25 + $0x1908] sm:$0xff]  ;;  %v578_v22 = vld [vmem:[%s4532_s25 + $0x1910] sm:$0xff] }
  0x7d   : > { %575 = vst [vmem:[%s4537_s26 + $0x6a0] sm:$0xff] %v574_v20  ;;  %v580_v23 = vld [vmem:[%s4532_s25 + $0x1918] sm:$0xff]  ;;  %577 = vst [vmem:[%s4537_s26 + $0x6a8] sm:$0xff] %v576_v21  ;;  %v582_v24 = vld [vmem:[%s4532_s25 + $0x1920] sm:$0xff] }
  0x7e   : > { %579 = vst [vmem:[%s4537_s26 + $0x6b0] sm:$0xff] %v578_v22  ;;  %581 = vst [vmem:[%s4537_s26 + $0x6b8] sm:$0xff] %v580_v23  ;;  %v584_v25 = vld [vmem:[%s4532_s25 + $0x1928] sm:$0xff]  ;;  %v586_v26 = vld [vmem:[%s4532_s25 + $0x1930] sm:$0xff] }
  0x7f   : > { %583 = vst [vmem:[%s4537_s26 + $0x6c0] sm:$0xff] %v582_v24  ;;  %585 = vst [vmem:[%s4537_s26 + $0x6c8] sm:$0xff] %v584_v25  ;;  %v588_v27 = vld [vmem:[%s4532_s25 + $0x1938] sm:$0xff]  ;;  %v590_v28 = vld [vmem:[%s4532_s25 + $0x1940] sm:$0xff] }
  0x80   : > { %587 = vst [vmem:[%s4537_s26 + $0x6d0] sm:$0xff] %v586_v26  ;;  %v592_v29 = vld [vmem:[%s4532_s25 + $0x1948] sm:$0xff]  ;;  %589 = vst [vmem:[%s4537_s26 + $0x6d8] sm:$0xff] %v588_v27  ;;  %v594_v30 = vld [vmem:[%s4532_s25 + $0x1950] sm:$0xff] }
  0x81   : > { %591 = vst [vmem:[%s4537_s26 + $0x6e0] sm:$0xff] %v590_v28  ;;  %593 = vst [vmem:[%s4537_s26 + $0x6e8] sm:$0xff] %v592_v29  ;;  %v596_v31 = vld [vmem:[%s4532_s25 + $0x1958] sm:$0xff]  ;;  %v598_v32 = vld [vmem:[%s4532_s25 + $0x1960] sm:$0xff] }
  0x82   : > { %595 = vst [vmem:[%s4537_s26 + $0x6f0] sm:$0xff] %v594_v30  ;;  %597 = vst [vmem:[%s4537_s26 + $0x6f8] sm:$0xff] %v596_v31  ;;  %v600_v33 = vld [vmem:[%s4532_s25 + $0x1968] sm:$0xff]  ;;  %v602_v34 = vld [vmem:[%s4532_s25 + $0x1970] sm:$0xff] }
  0x83   : > { %599 = vst [vmem:[%s4537_s26 + $0x700] sm:$0xff] %v598_v32  ;;  %v604_v35 = vld [vmem:[%s4532_s25 + $0x1978] sm:$0xff]  ;;  %601 = vst [vmem:[%s4537_s26 + $0x708] sm:$0xff] %v600_v33  ;;  %v606_v36 = vld [vmem:[%s4532_s25 + $0x1980] sm:$0xff] }
  0x84   : > { %603 = vst [vmem:[%s4537_s26 + $0x710] sm:$0xff] %v602_v34  ;;  %605 = vst [vmem:[%s4537_s26 + $0x718] sm:$0xff] %v604_v35  ;;  %v608_v37 = vld [vmem:[%s4532_s25 + $0x1988] sm:$0xff]  ;;  %v610_v38 = vld [vmem:[%s4532_s25 + $0x1990] sm:$0xff] }
  0x85   : > { %607 = vst [vmem:[%s4537_s26 + $0x720] sm:$0xff] %v606_v36  ;;  %609 = vst [vmem:[%s4537_s26 + $0x728] sm:$0xff] %v608_v37  ;;  %v612_v39 = vld [vmem:[%s4532_s25 + $0x1998] sm:$0xff]  ;;  %v614_v40 = vld [vmem:[%s4532_s25 + $0x19a0] sm:$0xff] }
  0x86   : > { %611 = vst [vmem:[%s4537_s26 + $0x730] sm:$0xff] %v610_v38  ;;  %v616_v41 = vld [vmem:[%s4532_s25 + $0x19a8] sm:$0xff]  ;;  %613 = vst [vmem:[%s4537_s26 + $0x738] sm:$0xff] %v612_v39  ;;  %v618_v42 = vld [vmem:[%s4532_s25 + $0x19b0] sm:$0xff] }
  0x87   : > { %615 = vst [vmem:[%s4537_s26 + $0x740] sm:$0xff] %v614_v40  ;;  %617 = vst [vmem:[%s4537_s26 + $0x748] sm:$0xff] %v616_v41  ;;  %v620_v43 = vld [vmem:[%s4532_s25 + $0x19b8] sm:$0xff]  ;;  %v622_v44 = vld [vmem:[%s4532_s25 + $0x19c0] sm:$0xff] }
  0x88   : > { %619 = vst [vmem:[%s4537_s26 + $0x750] sm:$0xff] %v618_v42  ;;  %621 = vst [vmem:[%s4537_s26 + $0x758] sm:$0xff] %v620_v43  ;;  %v624_v45 = vld [vmem:[%s4532_s25 + $0x19c8] sm:$0xff]  ;;  %v626_v46 = vld [vmem:[%s4532_s25 + $0x19d0] sm:$0xff] }
  0x89   : > { %623 = vst [vmem:[%s4537_s26 + $0x760] sm:$0xff] %v622_v44  ;;  %v628_v47 = vld [vmem:[%s4532_s25 + $0x19d8] sm:$0xff]  ;;  %625 = vst [vmem:[%s4537_s26 + $0x768] sm:$0xff] %v624_v45  ;;  %v630_v48 = vld [vmem:[%s4532_s25 + $0x19e0] sm:$0xff] }
  0x8a   : > { %627 = vst [vmem:[%s4537_s26 + $0x770] sm:$0xff] %v626_v46  ;;  %629 = vst [vmem:[%s4537_s26 + $0x778] sm:$0xff] %v628_v47  ;;  %v632_v49 = vld [vmem:[%s4532_s25 + $0x19e8] sm:$0xff]  ;;  %v634_v50 = vld [vmem:[%s4532_s25 + $0x19f0] sm:$0xff] }
  0x8b   : > { %631 = vst [vmem:[%s4537_s26 + $0x780] sm:$0xff] %v630_v48  ;;  %633 = vst [vmem:[%s4537_s26 + $0x788] sm:$0xff] %v632_v49  ;;  %v636_v51 = vld [vmem:[%s4532_s25 + $0x19f8] sm:$0xff]  ;;  %v638_v52 = vld [vmem:[%s4532_s25 + $0x1a00] sm:$0xff] }
  0x8c   : > { %635 = vst [vmem:[%s4537_s26 + $0x790] sm:$0xff] %v634_v50  ;;  %v640_v53 = vld [vmem:[%s4532_s25 + $0x1ea0] sm:$0xff]  ;;  %637 = vst [vmem:[%s4537_s26 + $0x798] sm:$0xff] %v636_v51  ;;  %v642_v54 = vld [vmem:[%s4532_s25 + $0x1ea8] sm:$0xff] }
  0x8d   : > { %639 = vst [vmem:[%s4537_s26 + $0x7a0] sm:$0xff] %v638_v52  ;;  %641 = vst [vmem:[%s4537_s26 + $0x7a8] sm:$0xff] %v640_v53  ;;  %v644_v55 = vld [vmem:[%s4532_s25 + $0x1eb0] sm:$0xff]  ;;  %v646_v56 = vld [vmem:[%s4532_s25 + $0x1eb8] sm:$0xff] }
  0x8e   : > { %643 = vst [vmem:[%s4537_s26 + $0x7b0] sm:$0xff] %v642_v54  ;;  %645 = vst [vmem:[%s4537_s26 + $0x7b8] sm:$0xff] %v644_v55  ;;  %v648_v57 = vld [vmem:[%s4532_s25 + $0x1ec0] sm:$0xff]  ;;  %v650_v58 = vld [vmem:[%s4532_s25 + $0x1ec8] sm:$0xff] }
  0x8f   : > { %647 = vst [vmem:[%s4537_s26 + $0x7c0] sm:$0xff] %v646_v56  ;;  %v652_v59 = vld [vmem:[%s4532_s25 + $0x1ed0] sm:$0xff]  ;;  %649 = vst [vmem:[%s4537_s26 + $0x7c8] sm:$0xff] %v648_v57  ;;  %v654_v60 = vld [vmem:[%s4532_s25 + $0x1ed8] sm:$0xff] }
  0x90   : > { %651 = vst [vmem:[%s4537_s26 + $0x7d0] sm:$0xff] %v650_v58  ;;  %653 = vst [vmem:[%s4537_s26 + $0x7d8] sm:$0xff] %v652_v59  ;;  %v656_v61 = vld [vmem:[%s4532_s25 + $0x1ee0] sm:$0xff]  ;;  %v658_v62 = vld [vmem:[%s4532_s25 + $0x1ee8] sm:$0xff] }
  0x91   : > { %655 = vst [vmem:[%s4537_s26 + $0x7e0] sm:$0xff] %v654_v60  ;;  %657 = vst [vmem:[%s4537_s26 + $0x7e8] sm:$0xff] %v656_v61  ;;  %v660_v63 = vld [vmem:[%s4532_s25 + $0x1ef0] sm:$0xff]  ;;  %v662_v0 = vld [vmem:[%s4532_s25 + $0x1ef8] sm:$0xff] }
  0x92   : > { %659 = vst [vmem:[%s4537_s26 + $0x7f0] sm:$0xff] %v658_v62  ;;  %v664_v1 = vld [vmem:[%s4532_s25 + $0x1f00] sm:$0xff]  ;;  %661 = vst [vmem:[%s4537_s26 + $0x7f8] sm:$0xff] %v660_v63  ;;  %v666_v2 = vld [vmem:[%s4532_s25 + $0x1f08] sm:$0xff] }
  0x93   : > { %663 = vst [vmem:[%s4537_s26 + $0x800] sm:$0xff] %v662_v0  ;;  %665 = vst [vmem:[%s4537_s26 + $0x808] sm:$0xff] %v664_v1  ;;  %v668_v3 = vld [vmem:[%s4532_s25 + $0x1f10] sm:$0xff]  ;;  %v670_v4 = vld [vmem:[%s4532_s25 + $0x1f18] sm:$0xff] }
  0x94   : > { %667 = vst [vmem:[%s4537_s26 + $0x810] sm:$0xff] %v666_v2  ;;  %669 = vst [vmem:[%s4537_s26 + $0x818] sm:$0xff] %v668_v3  ;;  %v672_v5 = vld [vmem:[%s4532_s25 + $0x1f20] sm:$0xff]  ;;  %v674_v6 = vld [vmem:[%s4532_s25 + $0x1f28] sm:$0xff] }
  0x95   : > { %671 = vst [vmem:[%s4537_s26 + $0x820] sm:$0xff] %v670_v4  ;;  %v676_v7 = vld [vmem:[%s4532_s25 + $0x1f30] sm:$0xff]  ;;  %673 = vst [vmem:[%s4537_s26 + $0x828] sm:$0xff] %v672_v5  ;;  %v678_v8 = vld [vmem:[%s4532_s25 + $0x1f38] sm:$0xff] }
  0x96   : > { %675 = vst [vmem:[%s4537_s26 + $0x830] sm:$0xff] %v674_v6  ;;  %677 = vst [vmem:[%s4537_s26 + $0x838] sm:$0xff] %v676_v7  ;;  %v680_v9 = vld [vmem:[%s4532_s25 + $0x1f40] sm:$0xff]  ;;  %v682_v10 = vld [vmem:[%s4532_s25 + $0x1f48] sm:$0xff] }
  0x97   : > { %679 = vst [vmem:[%s4537_s26 + $0x840] sm:$0xff] %v678_v8  ;;  %681 = vst [vmem:[%s4537_s26 + $0x848] sm:$0xff] %v680_v9  ;;  %v684_v11 = vld [vmem:[%s4532_s25 + $0x1f50] sm:$0xff]  ;;  %v686_v12 = vld [vmem:[%s4532_s25 + $0x1f58] sm:$0xff] }
  0x98   : > { %683 = vst [vmem:[%s4537_s26 + $0x850] sm:$0xff] %v682_v10  ;;  %v688_v13 = vld [vmem:[%s4532_s25 + $0x1f60] sm:$0xff]  ;;  %685 = vst [vmem:[%s4537_s26 + $0x858] sm:$0xff] %v684_v11  ;;  %v690_v14 = vld [vmem:[%s4532_s25 + $0x1f68] sm:$0xff] }
  0x99   : > { %687 = vst [vmem:[%s4537_s26 + $0x860] sm:$0xff] %v686_v12  ;;  %689 = vst [vmem:[%s4537_s26 + $0x868] sm:$0xff] %v688_v13  ;;  %v692_v15 = vld [vmem:[%s4532_s25 + $0x1f70] sm:$0xff]  ;;  %v694_v16 = vld [vmem:[%s4532_s25 + $0x1f78] sm:$0xff] }
  0x9a   : > { %691 = vst [vmem:[%s4537_s26 + $0x870] sm:$0xff] %v690_v14  ;;  %693 = vst [vmem:[%s4537_s26 + $0x878] sm:$0xff] %v692_v15  ;;  %v696_v17 = vld [vmem:[%s4532_s25 + $0x1f80] sm:$0xff]  ;;  %v698_v18 = vld [vmem:[%s4532_s25 + $0x1f88] sm:$0xff] }
  0x9b   : > { %695 = vst [vmem:[%s4537_s26 + $0x880] sm:$0xff] %v694_v16  ;;  %v700_v19 = vld [vmem:[%s4532_s25 + $0x1f90] sm:$0xff]  ;;  %697 = vst [vmem:[%s4537_s26 + $0x888] sm:$0xff] %v696_v17  ;;  %v702_v20 = vld [vmem:[%s4532_s25 + $0x1f98] sm:$0xff] }
  0x9c   : > { %699 = vst [vmem:[%s4537_s26 + $0x890] sm:$0xff] %v698_v18  ;;  %701 = vst [vmem:[%s4537_s26 + $0x898] sm:$0xff] %v700_v19  ;;  %v704_v21 = vld [vmem:[%s4532_s25 + $0x1fa0] sm:$0xff]  ;;  %v706_v22 = vld [vmem:[%s4532_s25 + $0x1fa8] sm:$0xff] }
  0x9d   : > { %703 = vst [vmem:[%s4537_s26 + $0x8a0] sm:$0xff] %v702_v20  ;;  %705 = vst [vmem:[%s4537_s26 + $0x8a8] sm:$0xff] %v704_v21  ;;  %v708_v23 = vld [vmem:[%s4532_s25 + $0x1fb0] sm:$0xff]  ;;  %v710_v24 = vld [vmem:[%s4532_s25 + $0x1fb8] sm:$0xff] }
  0x9e   : > { %707 = vst [vmem:[%s4537_s26 + $0x8b0] sm:$0xff] %v706_v22  ;;  %v712_v25 = vld [vmem:[%s4532_s25 + $0x1fc0] sm:$0xff]  ;;  %709 = vst [vmem:[%s4537_s26 + $0x8b8] sm:$0xff] %v708_v23  ;;  %v714_v26 = vld [vmem:[%s4532_s25 + $0x1fc8] sm:$0xff] }
  0x9f   : > { %711 = vst [vmem:[%s4537_s26 + $0x8c0] sm:$0xff] %v710_v24  ;;  %713 = vst [vmem:[%s4537_s26 + $0x8c8] sm:$0xff] %v712_v25  ;;  %v716_v27 = vld [vmem:[%s4532_s25 + $0x1fd0] sm:$0xff]  ;;  %v718_v28 = vld [vmem:[%s4532_s25 + $0x1fd8] sm:$0xff] }
  0xa0   : > { %715 = vst [vmem:[%s4537_s26 + $0x8d0] sm:$0xff] %v714_v26  ;;  %717 = vst [vmem:[%s4537_s26 + $0x8d8] sm:$0xff] %v716_v27  ;;  %v720_v29 = vld [vmem:[%s4532_s25 + $0x1fe0] sm:$0xff]  ;;  %v722_v30 = vld [vmem:[%s4532_s25 + $0x1fe8] sm:$0xff] }
  0xa1   : > { %719 = vst [vmem:[%s4537_s26 + $0x8e0] sm:$0xff] %v718_v28  ;;  %v724_v31 = vld [vmem:[%s4532_s25 + $0x1ff0] sm:$0xff]  ;;  %721 = vst [vmem:[%s4537_s26 + $0x8e8] sm:$0xff] %v720_v29  ;;  %v726_v32 = vld [vmem:[%s4532_s25 + $0x1ff8] sm:$0xff] }
  0xa2   : > { %723 = vst [vmem:[%s4537_s26 + $0x8f0] sm:$0xff] %v722_v30  ;;  %725 = vst [vmem:[%s4537_s26 + $0x8f8] sm:$0xff] %v724_v31  ;;  %v728_v33 = vld [vmem:[%s4532_s25 + $0x2000] sm:$0xff]  ;;  %v730_v34 = vld [vmem:[%s4532_s25 + $0x2008] sm:$0xff] }
  0xa3   : > { %727 = vst [vmem:[%s4537_s26 + $0x900] sm:$0xff] %v726_v32  ;;  %729 = vst [vmem:[%s4537_s26 + $0x908] sm:$0xff] %v728_v33  ;;  %v732_v35 = vld [vmem:[%s4532_s25 + $0x2010] sm:$0xff]  ;;  %v734_v36 = vld [vmem:[%s4532_s25 + $0x2018] sm:$0xff] }
  0xa4   : > { %731 = vst [vmem:[%s4537_s26 + $0x910] sm:$0xff] %v730_v34  ;;  %v736_v37 = vld [vmem:[%s4532_s25 + $0x2020] sm:$0xff]  ;;  %733 = vst [vmem:[%s4537_s26 + $0x918] sm:$0xff] %v732_v35  ;;  %v740_v39 = vld [vmem:[%s4532_s25 + $0x24c8] sm:$0xff] }
  0xa5   : > { %735 = vst [vmem:[%s4537_s26 + $0x920] sm:$0xff] %v734_v36  ;;  %737 = vst [vmem:[%s4537_s26 + $0x928] sm:$0xff] %v736_v37  ;;  %v738_v38 = vld [vmem:[%s4532_s25 + $0x24c0] sm:$0xff]  ;;  %v742_v40 = vld [vmem:[%s4532_s25 + $0x24d0] sm:$0xff] }
  0xa6   : > { %739 = vst [vmem:[%s4537_s26 + $0x930] sm:$0xff] %v738_v38  ;;  %741 = vst [vmem:[%s4537_s26 + $0x938] sm:$0xff] %v740_v39  ;;  %v744_v41 = vld [vmem:[%s4532_s25 + $0x24d8] sm:$0xff]  ;;  %v746_v42 = vld [vmem:[%s4532_s25 + $0x24e0] sm:$0xff] }
  0xa7   : > { %743 = vst [vmem:[%s4537_s26 + $0x940] sm:$0xff] %v742_v40  ;;  %v748_v43 = vld [vmem:[%s4532_s25 + $0x24e8] sm:$0xff]  ;;  %745 = vst [vmem:[%s4537_s26 + $0x948] sm:$0xff] %v744_v41  ;;  %v750_v44 = vld [vmem:[%s4532_s25 + $0x24f0] sm:$0xff] }
  0xa8   : > { %747 = vst [vmem:[%s4537_s26 + $0x950] sm:$0xff] %v746_v42  ;;  %749 = vst [vmem:[%s4537_s26 + $0x958] sm:$0xff] %v748_v43  ;;  %v752_v45 = vld [vmem:[%s4532_s25 + $0x24f8] sm:$0xff]  ;;  %v754_v46 = vld [vmem:[%s4532_s25 + $0x2500] sm:$0xff] }
  0xa9   : > { %751 = vst [vmem:[%s4537_s26 + $0x960] sm:$0xff] %v750_v44  ;;  %753 = vst [vmem:[%s4537_s26 + $0x968] sm:$0xff] %v752_v45  ;;  %v756_v47 = vld [vmem:[%s4532_s25 + $0x2508] sm:$0xff]  ;;  %v758_v48 = vld [vmem:[%s4532_s25 + $0x2510] sm:$0xff] }
  0xaa   : > { %755 = vst [vmem:[%s4537_s26 + $0x970] sm:$0xff] %v754_v46  ;;  %v760_v49 = vld [vmem:[%s4532_s25 + $0x2518] sm:$0xff]  ;;  %757 = vst [vmem:[%s4537_s26 + $0x978] sm:$0xff] %v756_v47  ;;  %v762_v50 = vld [vmem:[%s4532_s25 + $0x2520] sm:$0xff] }
  0xab   : > { %759 = vst [vmem:[%s4537_s26 + $0x980] sm:$0xff] %v758_v48  ;;  %761 = vst [vmem:[%s4537_s26 + $0x988] sm:$0xff] %v760_v49  ;;  %v764_v51 = vld [vmem:[%s4532_s25 + $0x2528] sm:$0xff]  ;;  %v766_v52 = vld [vmem:[%s4532_s25 + $0x2530] sm:$0xff] }
  0xac   : > { %763 = vst [vmem:[%s4537_s26 + $0x990] sm:$0xff] %v762_v50  ;;  %765 = vst [vmem:[%s4537_s26 + $0x998] sm:$0xff] %v764_v51  ;;  %v768_v53 = vld [vmem:[%s4532_s25 + $0x2538] sm:$0xff]  ;;  %v770_v54 = vld [vmem:[%s4532_s25 + $0x2540] sm:$0xff] }
  0xad   : > { %767 = vst [vmem:[%s4537_s26 + $0x9a0] sm:$0xff] %v766_v52  ;;  %v772_v55 = vld [vmem:[%s4532_s25 + $0x2548] sm:$0xff]  ;;  %769 = vst [vmem:[%s4537_s26 + $0x9a8] sm:$0xff] %v768_v53  ;;  %v774_v56 = vld [vmem:[%s4532_s25 + $0x2550] sm:$0xff] }
  0xae   : > { %771 = vst [vmem:[%s4537_s26 + $0x9b0] sm:$0xff] %v770_v54  ;;  %773 = vst [vmem:[%s4537_s26 + $0x9b8] sm:$0xff] %v772_v55  ;;  %v776_v57 = vld [vmem:[%s4532_s25 + $0x2558] sm:$0xff]  ;;  %v778_v58 = vld [vmem:[%s4532_s25 + $0x2560] sm:$0xff] }
  0xaf   : > { %775 = vst [vmem:[%s4537_s26 + $0x9c0] sm:$0xff] %v774_v56  ;;  %777 = vst [vmem:[%s4537_s26 + $0x9c8] sm:$0xff] %v776_v57  ;;  %v780_v59 = vld [vmem:[%s4532_s25 + $0x2568] sm:$0xff]  ;;  %v782_v60 = vld [vmem:[%s4532_s25 + $0x2570] sm:$0xff] }
  0xb0   : > { %779 = vst [vmem:[%s4537_s26 + $0x9d0] sm:$0xff] %v778_v58  ;;  %v784_v61 = vld [vmem:[%s4532_s25 + $0x2578] sm:$0xff]  ;;  %781 = vst [vmem:[%s4537_s26 + $0x9d8] sm:$0xff] %v780_v59  ;;  %v786_v62 = vld [vmem:[%s4532_s25 + $0x2580] sm:$0xff] }
  0xb1   : > { %783 = vst [vmem:[%s4537_s26 + $0x9e0] sm:$0xff] %v782_v60  ;;  %785 = vst [vmem:[%s4537_s26 + $0x9e8] sm:$0xff] %v784_v61  ;;  %v788_v63 = vld [vmem:[%s4532_s25 + $0x2588] sm:$0xff]  ;;  %v790_v0 = vld [vmem:[%s4532_s25 + $0x2590] sm:$0xff] }
  0xb2   : > { %787 = vst [vmem:[%s4537_s26 + $0x9f0] sm:$0xff] %v786_v62  ;;  %789 = vst [vmem:[%s4537_s26 + $0x9f8] sm:$0xff] %v788_v63  ;;  %v792_v1 = vld [vmem:[%s4532_s25 + $0x2598] sm:$0xff]  ;;  %v794_v2 = vld [vmem:[%s4532_s25 + $0x25a0] sm:$0xff] }
  0xb3   : > { %791 = vst [vmem:[%s4537_s26 + $0xa00] sm:$0xff] %v790_v0  ;;  %v796_v3 = vld [vmem:[%s4532_s25 + $0x25a8] sm:$0xff]  ;;  %793 = vst [vmem:[%s4537_s26 + $0xa08] sm:$0xff] %v792_v1  ;;  %v798_v4 = vld [vmem:[%s4532_s25 + $0x25b0] sm:$0xff] }
  0xb4   : > { %795 = vst [vmem:[%s4537_s26 + $0xa10] sm:$0xff] %v794_v2  ;;  %797 = vst [vmem:[%s4537_s26 + $0xa18] sm:$0xff] %v796_v3  ;;  %v800_v5 = vld [vmem:[%s4532_s25 + $0x25b8] sm:$0xff]  ;;  %v802_v6 = vld [vmem:[%s4532_s25 + $0x25c0] sm:$0xff] }
  0xb5   : > { %799 = vst [vmem:[%s4537_s26 + $0xa20] sm:$0xff] %v798_v4  ;;  %801 = vst [vmem:[%s4537_s26 + $0xa28] sm:$0xff] %v800_v5  ;;  %v804_v7 = vld [vmem:[%s4532_s25 + $0x25c8] sm:$0xff]  ;;  %v806_v8 = vld [vmem:[%s4532_s25 + $0x25d0] sm:$0xff] }
  0xb6   : > { %803 = vst [vmem:[%s4537_s26 + $0xa30] sm:$0xff] %v802_v6  ;;  %v808_v9 = vld [vmem:[%s4532_s25 + $0x25d8] sm:$0xff]  ;;  %805 = vst [vmem:[%s4537_s26 + $0xa38] sm:$0xff] %v804_v7  ;;  %v810_v10 = vld [vmem:[%s4532_s25 + $0x25e0] sm:$0xff] }
  0xb7   : > { %807 = vst [vmem:[%s4537_s26 + $0xa40] sm:$0xff] %v806_v8  ;;  %809 = vst [vmem:[%s4537_s26 + $0xa48] sm:$0xff] %v808_v9  ;;  %v812_v11 = vld [vmem:[%s4532_s25 + $0x25e8] sm:$0xff]  ;;  %v814_v12 = vld [vmem:[%s4532_s25 + $0x25f0] sm:$0xff] }
  0xb8   : > { %811 = vst [vmem:[%s4537_s26 + $0xa50] sm:$0xff] %v810_v10  ;;  %813 = vst [vmem:[%s4537_s26 + $0xa58] sm:$0xff] %v812_v11  ;;  %v816_v13 = vld [vmem:[%s4532_s25 + $0x25f8] sm:$0xff]  ;;  %v818_v14 = vld [vmem:[%s4532_s25 + $0x2600] sm:$0xff] }
  0xb9   : > { %815 = vst [vmem:[%s4537_s26 + $0xa60] sm:$0xff] %v814_v12  ;;  %v820_v15 = vld [vmem:[%s4532_s25 + $0x2608] sm:$0xff]  ;;  %817 = vst [vmem:[%s4537_s26 + $0xa68] sm:$0xff] %v816_v13  ;;  %v822_v16 = vld [vmem:[%s4532_s25 + $0x2610] sm:$0xff] }
  0xba   : > { %819 = vst [vmem:[%s4537_s26 + $0xa70] sm:$0xff] %v818_v14  ;;  %821 = vst [vmem:[%s4537_s26 + $0xa78] sm:$0xff] %v820_v15  ;;  %v824_v17 = vld [vmem:[%s4532_s25 + $0x2618] sm:$0xff]  ;;  %v826_v18 = vld [vmem:[%s4532_s25 + $0x2620] sm:$0xff] }
  0xbb   : > { %823 = vst [vmem:[%s4537_s26 + $0xa80] sm:$0xff] %v822_v16  ;;  %825 = vst [vmem:[%s4537_s26 + $0xa88] sm:$0xff] %v824_v17  ;;  %v828_v19 = vld [vmem:[%s4532_s25 + $0x2628] sm:$0xff]  ;;  %v830_v20 = vld [vmem:[%s4532_s25 + $0x2630] sm:$0xff] }
  0xbc   : > { %827 = vst [vmem:[%s4537_s26 + $0xa90] sm:$0xff] %v826_v18  ;;  %v832_v21 = vld [vmem:[%s4532_s25 + $0x2638] sm:$0xff]  ;;  %829 = vst [vmem:[%s4537_s26 + $0xa98] sm:$0xff] %v828_v19  ;;  %v834_v22 = vld [vmem:[%s4532_s25 + $0x2640] sm:$0xff] }
  0xbd   : > { %831 = vst [vmem:[%s4537_s26 + $0xaa0] sm:$0xff] %v830_v20  ;;  %833 = vst [vmem:[%s4537_s26 + $0xaa8] sm:$0xff] %v832_v21  ;;  %v836_v23 = vld [vmem:[%s4532_s25 + $0x2ae0] sm:$0xff]  ;;  %v838_v24 = vld [vmem:[%s4532_s25 + $0x2ae8] sm:$0xff] }
  0xbe   : > { %835 = vst [vmem:[%s4537_s26 + $0xab0] sm:$0xff] %v834_v22  ;;  %837 = vst [vmem:[%s4537_s26 + $0xab8] sm:$0xff] %v836_v23  ;;  %v840_v25 = vld [vmem:[%s4532_s25 + $0x2af0] sm:$0xff]  ;;  %v842_v26 = vld [vmem:[%s4532_s25 + $0x2af8] sm:$0xff] }
  0xbf   : > { %839 = vst [vmem:[%s4537_s26 + $0xac0] sm:$0xff] %v838_v24  ;;  %v844_v27 = vld [vmem:[%s4532_s25 + $0x2b00] sm:$0xff]  ;;  %841 = vst [vmem:[%s4537_s26 + $0xac8] sm:$0xff] %v840_v25  ;;  %v846_v28 = vld [vmem:[%s4532_s25 + $0x2b08] sm:$0xff] }
  0xc0   : > { %843 = vst [vmem:[%s4537_s26 + $0xad0] sm:$0xff] %v842_v26  ;;  %845 = vst [vmem:[%s4537_s26 + $0xad8] sm:$0xff] %v844_v27  ;;  %v848_v29 = vld [vmem:[%s4532_s25 + $0x2b10] sm:$0xff]  ;;  %v850_v30 = vld [vmem:[%s4532_s25 + $0x2b18] sm:$0xff] }
  0xc1   : > { %847 = vst [vmem:[%s4537_s26 + $0xae0] sm:$0xff] %v846_v28  ;;  %849 = vst [vmem:[%s4537_s26 + $0xae8] sm:$0xff] %v848_v29  ;;  %v852_v31 = vld [vmem:[%s4532_s25 + $0x2b20] sm:$0xff]  ;;  %v854_v32 = vld [vmem:[%s4532_s25 + $0x2b28] sm:$0xff] }
  0xc2   : > { %851 = vst [vmem:[%s4537_s26 + $0xaf0] sm:$0xff] %v850_v30  ;;  %v856_v33 = vld [vmem:[%s4532_s25 + $0x2b30] sm:$0xff]  ;;  %853 = vst [vmem:[%s4537_s26 + $0xaf8] sm:$0xff] %v852_v31  ;;  %v858_v34 = vld [vmem:[%s4532_s25 + $0x2b38] sm:$0xff] }
  0xc3   : > { %855 = vst [vmem:[%s4537_s26 + $0xb00] sm:$0xff] %v854_v32  ;;  %857 = vst [vmem:[%s4537_s26 + $0xb08] sm:$0xff] %v856_v33  ;;  %v860_v35 = vld [vmem:[%s4532_s25 + $0x2b40] sm:$0xff]  ;;  %v862_v36 = vld [vmem:[%s4532_s25 + $0x2b48] sm:$0xff] }
  0xc4   : > { %859 = vst [vmem:[%s4537_s26 + $0xb10] sm:$0xff] %v858_v34  ;;  %861 = vst [vmem:[%s4537_s26 + $0xb18] sm:$0xff] %v860_v35  ;;  %v864_v37 = vld [vmem:[%s4532_s25 + $0x2b50] sm:$0xff]  ;;  %v866_v38 = vld [vmem:[%s4532_s25 + $0x2b58] sm:$0xff] }
  0xc5   : > { %863 = vst [vmem:[%s4537_s26 + $0xb20] sm:$0xff] %v862_v36  ;;  %v868_v39 = vld [vmem:[%s4532_s25 + $0x2b60] sm:$0xff]  ;;  %865 = vst [vmem:[%s4537_s26 + $0xb28] sm:$0xff] %v864_v37  ;;  %v870_v40 = vld [vmem:[%s4532_s25 + $0x2b68] sm:$0xff] }
  0xc6   : > { %867 = vst [vmem:[%s4537_s26 + $0xb30] sm:$0xff] %v866_v38  ;;  %869 = vst [vmem:[%s4537_s26 + $0xb38] sm:$0xff] %v868_v39  ;;  %v872_v41 = vld [vmem:[%s4532_s25 + $0x2b70] sm:$0xff]  ;;  %v874_v42 = vld [vmem:[%s4532_s25 + $0x2b78] sm:$0xff] }
  0xc7   : > { %871 = vst [vmem:[%s4537_s26 + $0xb40] sm:$0xff] %v870_v40  ;;  %873 = vst [vmem:[%s4537_s26 + $0xb48] sm:$0xff] %v872_v41  ;;  %v876_v43 = vld [vmem:[%s4532_s25 + $0x2b80] sm:$0xff]  ;;  %v878_v44 = vld [vmem:[%s4532_s25 + $0x2b88] sm:$0xff] }
  0xc8   : > { %875 = vst [vmem:[%s4537_s26 + $0xb50] sm:$0xff] %v874_v42  ;;  %v880_v45 = vld [vmem:[%s4532_s25 + $0x2b90] sm:$0xff]  ;;  %877 = vst [vmem:[%s4537_s26 + $0xb58] sm:$0xff] %v876_v43  ;;  %v882_v46 = vld [vmem:[%s4532_s25 + $0x2b98] sm:$0xff] }
  0xc9   : > { %879 = vst [vmem:[%s4537_s26 + $0xb60] sm:$0xff] %v878_v44  ;;  %881 = vst [vmem:[%s4537_s26 + $0xb68] sm:$0xff] %v880_v45  ;;  %v884_v47 = vld [vmem:[%s4532_s25 + $0x2ba0] sm:$0xff]  ;;  %v886_v48 = vld [vmem:[%s4532_s25 + $0x2ba8] sm:$0xff] }
  0xca   : > { %883 = vst [vmem:[%s4537_s26 + $0xb70] sm:$0xff] %v882_v46  ;;  %885 = vst [vmem:[%s4537_s26 + $0xb78] sm:$0xff] %v884_v47  ;;  %v888_v49 = vld [vmem:[%s4532_s25 + $0x2bb0] sm:$0xff]  ;;  %v890_v50 = vld [vmem:[%s4532_s25 + $0x2bb8] sm:$0xff] }
  0xcb   : > { %887 = vst [vmem:[%s4537_s26 + $0xb80] sm:$0xff] %v886_v48  ;;  %v892_v51 = vld [vmem:[%s4532_s25 + $0x2bc0] sm:$0xff]  ;;  %889 = vst [vmem:[%s4537_s26 + $0xb88] sm:$0xff] %v888_v49  ;;  %v894_v52 = vld [vmem:[%s4532_s25 + $0x2bc8] sm:$0xff] }
  0xcc   : > { %891 = vst [vmem:[%s4537_s26 + $0xb90] sm:$0xff] %v890_v50  ;;  %893 = vst [vmem:[%s4537_s26 + $0xb98] sm:$0xff] %v892_v51  ;;  %v896_v53 = vld [vmem:[%s4532_s25 + $0x2bd0] sm:$0xff]  ;;  %v898_v54 = vld [vmem:[%s4532_s25 + $0x2bd8] sm:$0xff] }
  0xcd   : > { %895 = vst [vmem:[%s4537_s26 + $0xba0] sm:$0xff] %v894_v52  ;;  %897 = vst [vmem:[%s4537_s26 + $0xba8] sm:$0xff] %v896_v53  ;;  %v900_v55 = vld [vmem:[%s4532_s25 + $0x2be0] sm:$0xff]  ;;  %v902_v56 = vld [vmem:[%s4532_s25 + $0x2be8] sm:$0xff] }
  0xce   : > { %899 = vst [vmem:[%s4537_s26 + $0xbb0] sm:$0xff] %v898_v54  ;;  %v904_v57 = vld [vmem:[%s4532_s25 + $0x2bf0] sm:$0xff]  ;;  %901 = vst [vmem:[%s4537_s26 + $0xbb8] sm:$0xff] %v900_v55  ;;  %v906_v58 = vld [vmem:[%s4532_s25 + $0x2bf8] sm:$0xff] }
  0xcf   : > { %903 = vst [vmem:[%s4537_s26 + $0xbc0] sm:$0xff] %v902_v56  ;;  %905 = vst [vmem:[%s4537_s26 + $0xbc8] sm:$0xff] %v904_v57  ;;  %v908_v59 = vld [vmem:[%s4532_s25 + $0x2c00] sm:$0xff]  ;;  %v910_v60 = vld [vmem:[%s4532_s25 + $0x2c08] sm:$0xff] }
  0xd0   : > { %907 = vst [vmem:[%s4537_s26 + $0xbd0] sm:$0xff] %v906_v58  ;;  %909 = vst [vmem:[%s4537_s26 + $0xbd8] sm:$0xff] %v908_v59  ;;  %v912_v61 = vld [vmem:[%s4532_s25 + $0x2c10] sm:$0xff]  ;;  %v914_v62 = vld [vmem:[%s4532_s25 + $0x2c18] sm:$0xff] }
  0xd1   : > { %911 = vst [vmem:[%s4537_s26 + $0xbe0] sm:$0xff] %v910_v60  ;;  %v916_v63 = vld [vmem:[%s4532_s25 + $0x2c20] sm:$0xff]  ;;  %913 = vst [vmem:[%s4537_s26 + $0xbe8] sm:$0xff] %v912_v61  ;;  %v918_v0 = vld [vmem:[%s4532_s25 + $0x2c28] sm:$0xff] }
  0xd2   : > { %915 = vst [vmem:[%s4537_s26 + $0xbf0] sm:$0xff] %v914_v62  ;;  %917 = vst [vmem:[%s4537_s26 + $0xbf8] sm:$0xff] %v916_v63  ;;  %v920_v1 = vld [vmem:[%s4532_s25 + $0x2c30] sm:$0xff]  ;;  %v922_v2 = vld [vmem:[%s4532_s25 + $0x2c38] sm:$0xff] }
  0xd3   : > { %919 = vst [vmem:[%s4537_s26 + $0xc00] sm:$0xff] %v918_v0  ;;  %921 = vst [vmem:[%s4537_s26 + $0xc08] sm:$0xff] %v920_v1  ;;  %v924_v3 = vld [vmem:[%s4532_s25 + $0x2c40] sm:$0xff]  ;;  %v926_v4 = vld [vmem:[%s4532_s25 + $0x2c48] sm:$0xff] }
  0xd4   : > { %923 = vst [vmem:[%s4537_s26 + $0xc10] sm:$0xff] %v922_v2  ;;  %v928_v5 = vld [vmem:[%s4532_s25 + $0x2c50] sm:$0xff]  ;;  %925 = vst [vmem:[%s4537_s26 + $0xc18] sm:$0xff] %v924_v3  ;;  %v930_v6 = vld [vmem:[%s4532_s25 + $0x2c58] sm:$0xff] }
  0xd5   : > { %927 = vst [vmem:[%s4537_s26 + $0xc20] sm:$0xff] %v926_v4  ;;  %929 = vst [vmem:[%s4537_s26 + $0xc28] sm:$0xff] %v928_v5  ;;  %v932_v7 = vld [vmem:[%s4532_s25 + $0x2c60] sm:$0xff]  ;;  %v936_v9 = vld [vmem:[%s4532_s25 + $0x3108] sm:$0xff] }
  0xd6   : > { %v934_v8 = vld [vmem:[%s4532_s25 + $0x3100] sm:$0xff]  ;;  %931 = vst [vmem:[%s4537_s26 + $0xc30] sm:$0xff] %v930_v6  ;;  %933 = vst [vmem:[%s4537_s26 + $0xc38] sm:$0xff] %v932_v7  ;;  %v938_v10 = vld [vmem:[%s4532_s25 + $0x3110] sm:$0xff] }
  0xd7   : > { %935 = vst [vmem:[%s4537_s26 + $0xc40] sm:$0xff] %v934_v8  ;;  %v940_v11 = vld [vmem:[%s4532_s25 + $0x3118] sm:$0xff]  ;;  %937 = vst [vmem:[%s4537_s26 + $0xc48] sm:$0xff] %v936_v9  ;;  %v942_v12 = vld [vmem:[%s4532_s25 + $0x3120] sm:$0xff] }
  0xd8   : > { %939 = vst [vmem:[%s4537_s26 + $0xc50] sm:$0xff] %v938_v10  ;;  %941 = vst [vmem:[%s4537_s26 + $0xc58] sm:$0xff] %v940_v11  ;;  %v944_v13 = vld [vmem:[%s4532_s25 + $0x3128] sm:$0xff]  ;;  %v946_v14 = vld [vmem:[%s4532_s25 + $0x3130] sm:$0xff] }
  0xd9   : > { %943 = vst [vmem:[%s4537_s26 + $0xc60] sm:$0xff] %v942_v12  ;;  %945 = vst [vmem:[%s4537_s26 + $0xc68] sm:$0xff] %v944_v13  ;;  %v948_v15 = vld [vmem:[%s4532_s25 + $0x3138] sm:$0xff]  ;;  %v950_v16 = vld [vmem:[%s4532_s25 + $0x3140] sm:$0xff] }
  0xda   : > { %947 = vst [vmem:[%s4537_s26 + $0xc70] sm:$0xff] %v946_v14  ;;  %v952_v17 = vld [vmem:[%s4532_s25 + $0x3148] sm:$0xff]  ;;  %949 = vst [vmem:[%s4537_s26 + $0xc78] sm:$0xff] %v948_v15  ;;  %v954_v18 = vld [vmem:[%s4532_s25 + $0x3150] sm:$0xff] }
  0xdb   : > { %951 = vst [vmem:[%s4537_s26 + $0xc80] sm:$0xff] %v950_v16  ;;  %953 = vst [vmem:[%s4537_s26 + $0xc88] sm:$0xff] %v952_v17  ;;  %v956_v19 = vld [vmem:[%s4532_s25 + $0x3158] sm:$0xff]  ;;  %v958_v20 = vld [vmem:[%s4532_s25 + $0x3160] sm:$0xff] }
  0xdc   : > { %955 = vst [vmem:[%s4537_s26 + $0xc90] sm:$0xff] %v954_v18  ;;  %957 = vst [vmem:[%s4537_s26 + $0xc98] sm:$0xff] %v956_v19  ;;  %v960_v21 = vld [vmem:[%s4532_s25 + $0x3168] sm:$0xff]  ;;  %v962_v22 = vld [vmem:[%s4532_s25 + $0x3170] sm:$0xff] }
  0xdd   : > { %959 = vst [vmem:[%s4537_s26 + $0xca0] sm:$0xff] %v958_v20  ;;  %v964_v23 = vld [vmem:[%s4532_s25 + $0x3178] sm:$0xff]  ;;  %961 = vst [vmem:[%s4537_s26 + $0xca8] sm:$0xff] %v960_v21  ;;  %v966_v24 = vld [vmem:[%s4532_s25 + $0x3180] sm:$0xff] }
  0xde   : > { %963 = vst [vmem:[%s4537_s26 + $0xcb0] sm:$0xff] %v962_v22  ;;  %965 = vst [vmem:[%s4537_s26 + $0xcb8] sm:$0xff] %v964_v23  ;;  %v968_v25 = vld [vmem:[%s4532_s25 + $0x3188] sm:$0xff]  ;;  %v970_v26 = vld [vmem:[%s4532_s25 + $0x3190] sm:$0xff] }
  0xdf   : > { %967 = vst [vmem:[%s4537_s26 + $0xcc0] sm:$0xff] %v966_v24  ;;  %969 = vst [vmem:[%s4537_s26 + $0xcc8] sm:$0xff] %v968_v25  ;;  %v972_v27 = vld [vmem:[%s4532_s25 + $0x3198] sm:$0xff]  ;;  %v974_v28 = vld [vmem:[%s4532_s25 + $0x31a0] sm:$0xff] }
  0xe0   : > { %971 = vst [vmem:[%s4537_s26 + $0xcd0] sm:$0xff] %v970_v26  ;;  %v976_v29 = vld [vmem:[%s4532_s25 + $0x31a8] sm:$0xff]  ;;  %973 = vst [vmem:[%s4537_s26 + $0xcd8] sm:$0xff] %v972_v27  ;;  %v978_v30 = vld [vmem:[%s4532_s25 + $0x31b0] sm:$0xff] }
  0xe1   : > { %975 = vst [vmem:[%s4537_s26 + $0xce0] sm:$0xff] %v974_v28  ;;  %977 = vst [vmem:[%s4537_s26 + $0xce8] sm:$0xff] %v976_v29  ;;  %v980_v31 = vld [vmem:[%s4532_s25 + $0x31b8] sm:$0xff]  ;;  %v982_v32 = vld [vmem:[%s4532_s25 + $0x31c0] sm:$0xff] }
  0xe2   : > { %979 = vst [vmem:[%s4537_s26 + $0xcf0] sm:$0xff] %v978_v30  ;;  %981 = vst [vmem:[%s4537_s26 + $0xcf8] sm:$0xff] %v980_v31  ;;  %v984_v33 = vld [vmem:[%s4532_s25 + $0x31c8] sm:$0xff]  ;;  %v986_v34 = vld [vmem:[%s4532_s25 + $0x31d0] sm:$0xff] }
  0xe3   : > { %983 = vst [vmem:[%s4537_s26 + $0xd00] sm:$0xff] %v982_v32  ;;  %v988_v35 = vld [vmem:[%s4532_s25 + $0x31d8] sm:$0xff]  ;;  %985 = vst [vmem:[%s4537_s26 + $0xd08] sm:$0xff] %v984_v33  ;;  %v990_v36 = vld [vmem:[%s4532_s25 + $0x31e0] sm:$0xff] }
  0xe4   : > { %987 = vst [vmem:[%s4537_s26 + $0xd10] sm:$0xff] %v986_v34  ;;  %989 = vst [vmem:[%s4537_s26 + $0xd18] sm:$0xff] %v988_v35  ;;  %v992_v37 = vld [vmem:[%s4532_s25 + $0x31e8] sm:$0xff]  ;;  %v994_v38 = vld [vmem:[%s4532_s25 + $0x31f0] sm:$0xff] }
  0xe5   : > { %991 = vst [vmem:[%s4537_s26 + $0xd20] sm:$0xff] %v990_v36  ;;  %993 = vst [vmem:[%s4537_s26 + $0xd28] sm:$0xff] %v992_v37  ;;  %v996_v39 = vld [vmem:[%s4532_s25 + $0x31f8] sm:$0xff]  ;;  %v998_v40 = vld [vmem:[%s4532_s25 + $0x3200] sm:$0xff] }
  0xe6   : > { %995 = vst [vmem:[%s4537_s26 + $0xd30] sm:$0xff] %v994_v38  ;;  %v1000_v41 = vld [vmem:[%s4532_s25 + $0x3208] sm:$0xff]  ;;  %997 = vst [vmem:[%s4537_s26 + $0xd38] sm:$0xff] %v996_v39  ;;  %v1002_v42 = vld [vmem:[%s4532_s25 + $0x3210] sm:$0xff] }
  0xe7   : > { %999 = vst [vmem:[%s4537_s26 + $0xd40] sm:$0xff] %v998_v40  ;;  %1001 = vst [vmem:[%s4537_s26 + $0xd48] sm:$0xff] %v1000_v41  ;;  %v1004_v43 = vld [vmem:[%s4532_s25 + $0x3218] sm:$0xff]  ;;  %v1006_v44 = vld [vmem:[%s4532_s25 + $0x3220] sm:$0xff] }
  0xe8   : > { %1003 = vst [vmem:[%s4537_s26 + $0xd50] sm:$0xff] %v1002_v42  ;;  %1005 = vst [vmem:[%s4537_s26 + $0xd58] sm:$0xff] %v1004_v43  ;;  %v1008_v45 = vld [vmem:[%s4532_s25 + $0x3228] sm:$0xff]  ;;  %v1010_v46 = vld [vmem:[%s4532_s25 + $0x3230] sm:$0xff] }
  0xe9   : > { %1007 = vst [vmem:[%s4537_s26 + $0xd60] sm:$0xff] %v1006_v44  ;;  %v1012_v47 = vld [vmem:[%s4532_s25 + $0x3238] sm:$0xff]  ;;  %1009 = vst [vmem:[%s4537_s26 + $0xd68] sm:$0xff] %v1008_v45  ;;  %v1014_v48 = vld [vmem:[%s4532_s25 + $0x3240] sm:$0xff] }
  0xea   : > { %1011 = vst [vmem:[%s4537_s26 + $0xd70] sm:$0xff] %v1010_v46  ;;  %1013 = vst [vmem:[%s4537_s26 + $0xd78] sm:$0xff] %v1012_v47  ;;  %v1016_v49 = vld [vmem:[%s4532_s25 + $0x3248] sm:$0xff]  ;;  %v1018_v50 = vld [vmem:[%s4532_s25 + $0x3250] sm:$0xff] }
  0xeb   : > { %1015 = vst [vmem:[%s4537_s26 + $0xd80] sm:$0xff] %v1014_v48  ;;  %1017 = vst [vmem:[%s4537_s26 + $0xd88] sm:$0xff] %v1016_v49  ;;  %v1020_v51 = vld [vmem:[%s4532_s25 + $0x3258] sm:$0xff]  ;;  %v1022_v52 = vld [vmem:[%s4532_s25 + $0x3260] sm:$0xff] }
  0xec   : > { %1019 = vst [vmem:[%s4537_s26 + $0xd90] sm:$0xff] %v1018_v50  ;;  %v1024_v53 = vld [vmem:[%s4532_s25 + $0x3268] sm:$0xff]  ;;  %1021 = vst [vmem:[%s4537_s26 + $0xd98] sm:$0xff] %v1020_v51  ;;  %v1026_v54 = vld [vmem:[%s4532_s25 + $0x3270] sm:$0xff] }
  0xed   : > { %1023 = vst [vmem:[%s4537_s26 + $0xda0] sm:$0xff] %v1022_v52  ;;  %1025 = vst [vmem:[%s4537_s26 + $0xda8] sm:$0xff] %v1024_v53  ;;  %v1028_v55 = vld [vmem:[%s4532_s25 + $0x3278] sm:$0xff]  ;;  %v1030_v56 = vld [vmem:[%s4532_s25 + $0x3280] sm:$0xff] }
  0xee   : > { %1027 = vst [vmem:[%s4537_s26 + $0xdb0] sm:$0xff] %v1026_v54  ;;  %1029 = vst [vmem:[%s4537_s26 + $0xdb8] sm:$0xff] %v1028_v55  ;;  %v1032_v57 = vld [vmem:[%s4532_s25 + $0x3720] sm:$0xff]  ;;  %v1034_v58 = vld [vmem:[%s4532_s25 + $0x3728] sm:$0xff] }
  0xef   : > { %1031 = vst [vmem:[%s4537_s26 + $0xdc0] sm:$0xff] %v1030_v56  ;;  %v1036_v59 = vld [vmem:[%s4532_s25 + $0x3730] sm:$0xff]  ;;  %1033 = vst [vmem:[%s4537_s26 + $0xdc8] sm:$0xff] %v1032_v57  ;;  %v1038_v60 = vld [vmem:[%s4532_s25 + $0x3738] sm:$0xff] }
  0xf0   : > { %1035 = vst [vmem:[%s4537_s26 + $0xdd0] sm:$0xff] %v1034_v58  ;;  %1037 = vst [vmem:[%s4537_s26 + $0xdd8] sm:$0xff] %v1036_v59  ;;  %v1040_v61 = vld [vmem:[%s4532_s25 + $0x3740] sm:$0xff]  ;;  %v1042_v62 = vld [vmem:[%s4532_s25 + $0x3748] sm:$0xff] }
  0xf1   : > { %1039 = vst [vmem:[%s4537_s26 + $0xde0] sm:$0xff] %v1038_v60  ;;  %1041 = vst [vmem:[%s4537_s26 + $0xde8] sm:$0xff] %v1040_v61  ;;  %v1044_v63 = vld [vmem:[%s4532_s25 + $0x3750] sm:$0xff]  ;;  %v1046_v0 = vld [vmem:[%s4532_s25 + $0x3758] sm:$0xff] }
  0xf2   : > { %1043 = vst [vmem:[%s4537_s26 + $0xdf0] sm:$0xff] %v1042_v62  ;;  %v1048_v1 = vld [vmem:[%s4532_s25 + $0x3760] sm:$0xff]  ;;  %1045 = vst [vmem:[%s4537_s26 + $0xdf8] sm:$0xff] %v1044_v63  ;;  %v1050_v2 = vld [vmem:[%s4532_s25 + $0x3768] sm:$0xff] }
  0xf3   : > { %1047 = vst [vmem:[%s4537_s26 + $0xe00] sm:$0xff] %v1046_v0  ;;  %1049 = vst [vmem:[%s4537_s26 + $0xe08] sm:$0xff] %v1048_v1  ;;  %v1052_v3 = vld [vmem:[%s4532_s25 + $0x3770] sm:$0xff]  ;;  %v1054_v4 = vld [vmem:[%s4532_s25 + $0x3778] sm:$0xff] }
  0xf4   : > { %1051 = vst [vmem:[%s4537_s26 + $0xe10] sm:$0xff] %v1050_v2  ;;  %1053 = vst [vmem:[%s4537_s26 + $0xe18] sm:$0xff] %v1052_v3  ;;  %v1056_v5 = vld [vmem:[%s4532_s25 + $0x3780] sm:$0xff]  ;;  %v1058_v6 = vld [vmem:[%s4532_s25 + $0x3788] sm:$0xff] }
  0xf5   : > { %1055 = vst [vmem:[%s4537_s26 + $0xe20] sm:$0xff] %v1054_v4  ;;  %v1060_v7 = vld [vmem:[%s4532_s25 + $0x3790] sm:$0xff]  ;;  %1057 = vst [vmem:[%s4537_s26 + $0xe28] sm:$0xff] %v1056_v5  ;;  %v1062_v8 = vld [vmem:[%s4532_s25 + $0x3798] sm:$0xff] }
  0xf6   : > { %1059 = vst [vmem:[%s4537_s26 + $0xe30] sm:$0xff] %v1058_v6  ;;  %1061 = vst [vmem:[%s4537_s26 + $0xe38] sm:$0xff] %v1060_v7  ;;  %v1064_v9 = vld [vmem:[%s4532_s25 + $0x37a0] sm:$0xff]  ;;  %v1066_v10 = vld [vmem:[%s4532_s25 + $0x37a8] sm:$0xff] }
  0xf7   : > { %1063 = vst [vmem:[%s4537_s26 + $0xe40] sm:$0xff] %v1062_v8  ;;  %1065 = vst [vmem:[%s4537_s26 + $0xe48] sm:$0xff] %v1064_v9  ;;  %v1068_v11 = vld [vmem:[%s4532_s25 + $0x37b0] sm:$0xff]  ;;  %v1070_v12 = vld [vmem:[%s4532_s25 + $0x37b8] sm:$0xff] }
  0xf8   : > { %1067 = vst [vmem:[%s4537_s26 + $0xe50] sm:$0xff] %v1066_v10  ;;  %v1072_v13 = vld [vmem:[%s4532_s25 + $0x37c0] sm:$0xff]  ;;  %1069 = vst [vmem:[%s4537_s26 + $0xe58] sm:$0xff] %v1068_v11  ;;  %v1074_v14 = vld [vmem:[%s4532_s25 + $0x37c8] sm:$0xff] }
  0xf9   : > { %1071 = vst [vmem:[%s4537_s26 + $0xe60] sm:$0xff] %v1070_v12  ;;  %1073 = vst [vmem:[%s4537_s26 + $0xe68] sm:$0xff] %v1072_v13  ;;  %v1076_v15 = vld [vmem:[%s4532_s25 + $0x37d0] sm:$0xff]  ;;  %v1078_v16 = vld [vmem:[%s4532_s25 + $0x37d8] sm:$0xff] }
  0xfa   : > { %1075 = vst [vmem:[%s4537_s26 + $0xe70] sm:$0xff] %v1074_v14  ;;  %1077 = vst [vmem:[%s4537_s26 + $0xe78] sm:$0xff] %v1076_v15  ;;  %v1080_v17 = vld [vmem:[%s4532_s25 + $0x37e0] sm:$0xff]  ;;  %v1082_v18 = vld [vmem:[%s4532_s25 + $0x37e8] sm:$0xff] }
  0xfb   : > { %1079 = vst [vmem:[%s4537_s26 + $0xe80] sm:$0xff] %v1078_v16  ;;  %v1084_v19 = vld [vmem:[%s4532_s25 + $0x37f0] sm:$0xff]  ;;  %1081 = vst [vmem:[%s4537_s26 + $0xe88] sm:$0xff] %v1080_v17  ;;  %v1086_v20 = vld [vmem:[%s4532_s25 + $0x37f8] sm:$0xff] }
  0xfc   : > { %1083 = vst [vmem:[%s4537_s26 + $0xe90] sm:$0xff] %v1082_v18  ;;  %1085 = vst [vmem:[%s4537_s26 + $0xe98] sm:$0xff] %v1084_v19  ;;  %v1088_v21 = vld [vmem:[%s4532_s25 + $0x3800] sm:$0xff]  ;;  %v1090_v22 = vld [vmem:[%s4532_s25 + $0x3808] sm:$0xff] }
  0xfd   : > { %1087 = vst [vmem:[%s4537_s26 + $0xea0] sm:$0xff] %v1086_v20  ;;  %1089 = vst [vmem:[%s4537_s26 + $0xea8] sm:$0xff] %v1088_v21  ;;  %v1092_v23 = vld [vmem:[%s4532_s25 + $0x3810] sm:$0xff]  ;;  %v1094_v24 = vld [vmem:[%s4532_s25 + $0x3818] sm:$0xff] }
  0xfe   : > { %1091 = vst [vmem:[%s4537_s26 + $0xeb0] sm:$0xff] %v1090_v22  ;;  %v1096_v25 = vld [vmem:[%s4532_s25 + $0x3820] sm:$0xff]  ;;  %1093 = vst [vmem:[%s4537_s26 + $0xeb8] sm:$0xff] %v1092_v23  ;;  %v1098_v26 = vld [vmem:[%s4532_s25 + $0x3828] sm:$0xff] }
  0xff   : > { %1095 = vst [vmem:[%s4537_s26 + $0xec0] sm:$0xff] %v1094_v24  ;;  %1097 = vst [vmem:[%s4537_s26 + $0xec8] sm:$0xff] %v1096_v25  ;;  %v1100_v27 = vld [vmem:[%s4532_s25 + $0x3830] sm:$0xff]  ;;  %v1102_v28 = vld [vmem:[%s4532_s25 + $0x3838] sm:$0xff] }
 0x100   : > { %1099 = vst [vmem:[%s4537_s26 + $0xed0] sm:$0xff] %v1098_v26  ;;  %1101 = vst [vmem:[%s4537_s26 + $0xed8] sm:$0xff] %v1100_v27  ;;  %v1104_v29 = vld [vmem:[%s4532_s25 + $0x3840] sm:$0xff]  ;;  %v1106_v30 = vld [vmem:[%s4532_s25 + $0x3848] sm:$0xff] }
 0x101   : > { %1103 = vst [vmem:[%s4537_s26 + $0xee0] sm:$0xff] %v1102_v28  ;;  %v1108_v31 = vld [vmem:[%s4532_s25 + $0x3850] sm:$0xff]  ;;  %1105 = vst [vmem:[%s4537_s26 + $0xee8] sm:$0xff] %v1104_v29  ;;  %v1110_v32 = vld [vmem:[%s4532_s25 + $0x3858] sm:$0xff] }
 0x102   : > { %1107 = vst [vmem:[%s4537_s26 + $0xef0] sm:$0xff] %v1106_v30  ;;  %1109 = vst [vmem:[%s4537_s26 + $0xef8] sm:$0xff] %v1108_v31  ;;  %v1112_v33 = vld [vmem:[%s4532_s25 + $0x3860] sm:$0xff]  ;;  %v1114_v34 = vld [vmem:[%s4532_s25 + $0x3868] sm:$0xff] }
 0x103   : > { %1111 = vst [vmem:[%s4537_s26 + $0xf00] sm:$0xff] %v1110_v32  ;;  %1113 = vst [vmem:[%s4537_s26 + $0xf08] sm:$0xff] %v1112_v33  ;;  %v1116_v35 = vld [vmem:[%s4532_s25 + $0x3870] sm:$0xff]  ;;  %v1118_v36 = vld [vmem:[%s4532_s25 + $0x3878] sm:$0xff] }
 0x104   : > { %1115 = vst [vmem:[%s4537_s26 + $0xf10] sm:$0xff] %v1114_v34  ;;  %v1120_v37 = vld [vmem:[%s4532_s25 + $0x3880] sm:$0xff]  ;;  %1117 = vst [vmem:[%s4537_s26 + $0xf18] sm:$0xff] %v1116_v35  ;;  %v1122_v38 = vld [vmem:[%s4532_s25 + $0x3888] sm:$0xff] }
 0x105   : > { %1119 = vst [vmem:[%s4537_s26 + $0xf20] sm:$0xff] %v1118_v36  ;;  %1121 = vst [vmem:[%s4537_s26 + $0xf28] sm:$0xff] %v1120_v37  ;;  %v1124_v39 = vld [vmem:[%s4532_s25 + $0x3890] sm:$0xff]  ;;  %v1126_v40 = vld [vmem:[%s4532_s25 + $0x3898] sm:$0xff] }
 0x106   : > { %1123 = vst [vmem:[%s4537_s26 + $0xf30] sm:$0xff] %v1122_v38  ;;  %1125 = vst [vmem:[%s4537_s26 + $0xf38] sm:$0xff] %v1124_v39  ;;  %v1128_v41 = vld [vmem:[%s4532_s25 + $0x38a0] sm:$0xff] }
 0x107   : > { %1127 = vst [vmem:[%s4537_s26 + $0xf40] sm:$0xff] %v1126_v40  ;;  %1129 = vst [vmem:[%s4537_s26 + $0xf48] sm:$0xff] %v1128_v41 }
 0x108 PF: > { %p3759_p5 = scmp.ge.s32.totalorder %s4471_s14, 1  ;;  %p1134_p6 = scmp.lt.s32.totalorder %s4471_s14, 5 }
 0x10a   : > { %p1135_p7 = pnand %p3759_p5, %p1134_p6 }
 0x10b   : > { %s1141_s27 = sand.u32 (!%p1135_p7), 1, %s4463_s12   ;;  %v4473_v42 = vmov (!%p1135_p7), 0.0   ;;  %v1662_v43 = vld [vmem:[%s6330_s2] sm:$0x3f] (!%p1135_p7)  ;;  %v4474_v44 = vmov (!%p1135_p7), 0   ;;  %vm1672_vm0 = vcmask (!%p1135_p7), 1042432  }
 0x10c   : > { %1138 = sbr.rel (%p1135_p7) target bundleno = 752 (0x2f0), region = 51  ;;  %1884 = vmatprep.mubr.f32.mxu0 (!%p1135_p7), %v4473_v42  ;;  %1955 = vmatprep.mubr.f32.mxu1 (!%p1135_p7), %v4473_v42  ;;  %vm4475_vm1 = vmmov (!%p1135_p7), 1   ;;  %vm1668_vm3 = vcmask (!%p1135_p7), 613376   ;;  %vm4477_vm4 = vmmov (!%p1135_p7), 0  }
 0x10d   : > { %s4417_s28 = smul.u32 (!%p1135_p7), 3920, %s1141_s27  ;;  %4447 = vset.pattern.permute.xlu0 (!%p1135_p7), %v4474_v44  ;;  %vm5553_vm2 = vmpackc.low (!%p1135_p7), %vm1672_vm0, %vm4475_vm1 }
 0x10e   : > { %1665 = vperm.xlu0 (!%p1135_p7), %4447, %v1662_v43   ;;  %s6135_s9 = smul.u32 (!%p1135_p7), 49, %s3754_s15 }
 0x10f   : > { %s5524_s4 = scalar_lea.vmem (!%p1135_p7), [#allocation2], %s4417_s28 }
 0x110   : > { %v1173_v45 = vld [vmem:[%s5524_s4 + $0x8] sm:$0xff] (!%p1135_p7)  ;;  %v1222_v46 = vld [vmem:[%s5524_s4 + $0x190] sm:$0xff] (!%p1135_p7)  ;;  %v1172_v47 = vld [vmem:[%s5524_s4] sm:$0xff] (!%p1135_p7)  ;;  %p1166_p8 = scmp.lt.s32.totalorder (!%p1135_p7), %s6135_s9, 195 }
 0x111   : > { %v3872_v48 = vpack.c.bf16 (!%p1135_p7), %v1222_v46, %v1173_v45  ;;  %v1221_v49 = vld [vmem:[%s5524_s4 + $0x188] sm:$0xff] (!%p1135_p7)  ;;  %v1271_v50 = vld [vmem:[%s5524_s4 + $0x318] sm:$0xff] (!%p1135_p7)  ;;  %v1320_v51 = vld [vmem:[%s5524_s4 + $0x4a0] sm:$0xff] (!%p1135_p7) }
 0x112   : > { %v3874_v52 = vpack.c.bf16 (!%p1135_p7), %v1221_v49, %v1172_v47  ;;  %v3876_v53 = vpack.c.bf16 (!%p1135_p7), %v1320_v51, %v1271_v50  ;;  %v1270_v54 = vld [vmem:[%s5524_s4 + $0x310] sm:$0xff] (!%p1135_p7)  ;;  %v1319_v55 = vld [vmem:[%s5524_s4 + $0x498] sm:$0xff] (!%p1135_p7)  ;;  %v1369_v56 = vld [vmem:[%s5524_s4 + $0x628] sm:$0xff] (!%p1135_p7) }
 0x113   : > { %3873 = vmatprep.subr.bf16.mxu0 %v3872_v48  ;;  %v1418_v57 = vld [vmem:[%s5524_s4 + $0x7b0] sm:$0xff]  ;;  %v3878_v58 = vpack.c.bf16 %v1319_v55, %v1270_v54  ;;  %v1368_v60 = vld [vmem:[%s5524_s4 + $0x620] sm:$0xff]  ;;  %v1417_v61 = vld [vmem:[%s5524_s4 + $0x7a8] sm:$0xff]  ;;  %s6338_s9 = smov (!%p1166_p8, %s6135_s9), 195 }
 0x114   : > { %3875 = vmatpush1.bf16.msra.mxu0 %v3874_v52  ;;  %v3880_v59 = vpack.c.bf16 %v1418_v57, %v1369_v56  ;;  %v1467_v62 = vld [vmem:[%s5524_s4 + $0x938] sm:$0xff]  ;;  %v1516_v63 = vld [vmem:[%s5524_s4 + $0xac0] sm:$0xff]  ;;  %v1174_v2 = vld [vmem:[%s5524_s4 + $0x10] sm:$0xff]  ;;  %v3882_v4 = vpack.c.bf16 %v1417_v61, %v1368_v60  ;;  %s3760_s10 = sshll.u32 %s6338_s9, 3 }
 0x115   : > { %3877 = vmatprep.subr.bf16.mxu0 %v3876_v53  ;;  %v1175_v0 = vld [vmem:[%s5524_s4 + $0x18] sm:$0xff]  ;;  %v1224_v1 = vld [vmem:[%s5524_s4 + $0x1a0] sm:$0xff]  ;;  %v1466_v5 = vld [vmem:[%s5524_s4 + $0x930] sm:$0xff]  ;;  %v3884_v9 = vpack.c.bf16 %v1516_v63, %v1467_v62  ;;  %s6186_s14 = scalar_lea.vmem %s6331_s3, %s3760_s10 }
 0x116   : > { %v1223_v3 = vld [vmem:[%s5524_s4 + $0x198] sm:$0xff]  ;;  %v3894_v7 = vpack.c.bf16 %v1224_v1, %v1175_v0  ;;  %v1565_v10 = vld [vmem:[%s5524_s4 + $0xc48] sm:$0xff]  ;;  %v1322_v12 = vld [vmem:[%s5524_s4 + $0x4b0] sm:$0xff] }
 0x117   : > { %v1515_v6 = vld [vmem:[%s5524_s4 + $0xab8] sm:$0xff]  ;;  %v3896_v8 = vpack.c.bf16 %v1223_v3, %v1174_v2  ;;  %v1273_v11 = vld [vmem:[%s5524_s4 + $0x328] sm:$0xff]  ;;  %v1614_v13 = vld [vmem:[%s5524_s4 + $0xdd0] sm:$0x7] }
 0x118   : > { %3879 = vmatpush1.bf16.msra.mxu0 %v3878_v58  ;;  %3895 = vmatprep.subr.bf16.mxu1 %v3894_v7  ;;  %v3898_v14 = vpack.c.bf16 %v1322_v12, %v1273_v11  ;;  %v1272_v15 = vld [vmem:[%s5524_s4 + $0x320] sm:$0xff]  ;;  %v1321_v16 = vld [vmem:[%s5524_s4 + $0x4a8] sm:$0xff]  ;;  %v3886_v19 = vpack.c.bf16 %v1515_v6, %v1466_v5  ;;  %v1371_v20 = vld [vmem:[%s5524_s4 + $0x638] sm:$0xff]  ;;  %v3888_v23 = vpack.c.bf16 %v1614_v13, %v1565_v10 }
 0x119   : > { %3881 = vmatprep.subr.bf16.mxu0 %v3880_v59  ;;  %3897 = vmatpush1.bf16.msra.mxu1 %v3896_v8  ;;  %v3900_v18 = vpack.c.bf16 %v1321_v16, %v1272_v15  ;;  %v1420_v21 = vld [vmem:[%s5524_s4 + $0x7c0] sm:$0xff]  ;;  %v1370_v22 = vld [vmem:[%s5524_s4 + $0x630] sm:$0xff]  ;;  %v1613_v25 = vld [vmem:[%s5524_s4 + $0xdc8] sm:$0x7] }
 0x11a   : > { %3899 = vmatprep.subr.bf16.mxu1 %v3898_v14  ;;  %v1564_v24 = vld [vmem:[%s5524_s4 + $0xc40] sm:$0xff]  ;;  %v3902_v26 = vpack.c.bf16 %v1420_v21, %v1371_v20  ;;  %v1419_v27 = vld [vmem:[%s5524_s4 + $0x7b8] sm:$0xff]  ;;  %v1177_v28 = vld [vmem:[%s5524_s4 + $0x28] sm:$0xff] }
 0x11b   : > { %v1226_v29 = vld [vmem:[%s5524_s4 + $0x1b0] sm:$0xff]  ;;  %v1469_v30 = vld [vmem:[%s5524_s4 + $0x948] sm:$0xff]  ;;  %v3904_v31 = vpack.c.bf16 %v1419_v27, %v1370_v22  ;;  %v3891_v33 = vpack.c.bf16 %v1613_v25, %v1564_v24  ;;  %v1176_v34 = vld [vmem:[%s5524_s4 + $0x20] sm:$0xff] }
 0x11c   : > { %3883 = vmatpush1.bf16.msra.mxu0 %v3882_v4  ;;  %v1518_v32 = vld [vmem:[%s5524_s4 + $0xad0] sm:$0xff]  ;;  %v1468_v36 = vld [vmem:[%s5524_s4 + $0x940] sm:$0xff]  ;;  %v1517_v37 = vld [vmem:[%s5524_s4 + $0xac8] sm:$0xff]  ;;  %v3916_v38 = vpack.c.bf16 %v1226_v29, %v1177_v28 }
 0x11d   : > { %3885 = vmatprep.subr.bf16.mxu0 %v3884_v9  ;;  %3901 = vmatpush1.bf16.msra.mxu1 %v3900_v18  ;;  %v3906_v35 = vpack.c.bf16 %v1518_v32, %v1469_v30  ;;  %v1225_v39 = vld [vmem:[%s5524_s4 + $0x1a8] sm:$0xff]  ;;  %v1567_v40 = vld [vmem:[%s5524_s4 + $0xc58] sm:$0xff]  ;;  %v1616_v41 = vld [vmem:[%s5524_s4 + $0xde0] sm:$0x7]  ;;  %v3908_v46 = vpack.c.bf16 %v1517_v37, %v1468_v36 }
 0x11e   : > { %3903 = vmatprep.subr.bf16.mxu1 %v3902_v26  ;;  %v1275_v43 = vld [vmem:[%s5524_s4 + $0x338] sm:$0xff]  ;;  %v1324_v44 = vld [vmem:[%s5524_s4 + $0x4c0] sm:$0xff]  ;;  %v3918_v47 = vpack.c.bf16 %v1225_v39, %v1176_v34  ;;  %v1274_v48 = vld [vmem:[%s5524_s4 + $0x330] sm:$0xff]  ;;  %v3910_v49 = vpack.c.bf16 %v1616_v41, %v1567_v40 }
 0x11f   : > { %v5580_v45 = vld [vmem:[%s6328_s0] sm:$0x3f]  ;;  %v1615_v51 = vld [vmem:[%s5524_s4 + $0xdd8] sm:$0x7]  ;;  %v3920_v52 = vpack.c.bf16 %v1324_v44, %v1275_v43  ;;  %v1373_v56 = vld [vmem:[%s5524_s4 + $0x648] sm:$0xff] }
 0x120   : > { %3887 = vmatpush1.bf16.msra.mxu0 %v3886_v19  ;;  %v1566_v50 = vld [vmem:[%s5524_s4 + $0xc50] sm:$0xff]  ;;  %v1323_v53 = vld [vmem:[%s5524_s4 + $0x4b8] sm:$0xff]  ;;  %v1228_v55 = vld [vmem:[%s5524_s4 + $0x1c0] sm:$0xff] }
 0x121   : > { %3890 = vmatprep.subr.msk.bf16.mxu0 %vm5553_vm2, %v3888_v23  ;;  %3905 = vmatpush1.bf16.msra.mxu1 %v3904_v31  ;;  %v1179_v54 = vld [vmem:[%s5524_s4 + $0x38] sm:$0xff]  ;;  %v1422_v57 = vld [vmem:[%s5524_s4 + $0x7d0] sm:$0xff]  ;;  %v3913_v58 = vpack.c.bf16 %v1615_v51, %v1566_v50  ;;  %v3922_v59 = vpack.c.bf16 %v1323_v53, %v1274_v48  ;;  %v1372_v60 = vld [vmem:[%s5524_s4 + $0x640] sm:$0xff] }
 0x122   : > { %3907 = vmatprep.subr.bf16.mxu1 %v3906_v35  ;;  %v3938_v61 = vpack.c.bf16 %v1228_v55, %v1179_v54  ;;  %v1178_v62 = vld [vmem:[%s5524_s4 + $0x30] sm:$0xff]  ;;  %v1227_v63 = vld [vmem:[%s5524_s4 + $0x1b8] sm:$0xff]  ;;  %v3924_v0 = vpack.c.bf16 %v1422_v57, %v1373_v56  ;;  %v1421_v1 = vld [vmem:[%s5524_s4 + $0x7c8] sm:$0xff] }
 0x123   : > { %v1277_v2 = vld [vmem:[%s5524_s4 + $0x348] sm:$0xff]  ;;  %v1326_v3 = vld [vmem:[%s5524_s4 + $0x4d0] sm:$0xff]  ;;  %v1471_v4 = vld [vmem:[%s5524_s4 + $0x958] sm:$0xff]  ;;  %v3940_v6 = vpack.c.bf16 %v1227_v63, %v1178_v62  ;;  %v3926_v7 = vpack.c.bf16 %v1421_v1, %v1372_v60 }
 0x124   : > { %3893 = vmatpush1.bf16.msk.msra.mxu0 %vm5553_vm2, %v3891_v33  ;;  %v1520_v5 = vld [vmem:[%s5524_s4 + $0xae0] sm:$0xff]  ;;  %v1470_v8 = vld [vmem:[%s5524_s4 + $0x950] sm:$0xff]  ;;  %v3942_v9 = vpack.c.bf16 %v1326_v3, %v1277_v2  ;;  %v1325_v11 = vld [vmem:[%s5524_s4 + $0x4c8] sm:$0xff] }
 0x125   : > { %3917 = vmatprep.subr.bf16.mxu0 %v3916_v38  ;;  %3909 = vmatpush1.bf16.msra.mxu1 %v3908_v46  ;;  %v1276_v10 = vld [vmem:[%s5524_s4 + $0x340] sm:$0xff]  ;;  %v3928_v12 = vpack.c.bf16 %v1520_v5, %v1471_v4  ;;  %v1519_v13 = vld [vmem:[%s5524_s4 + $0xad8] sm:$0xff]  ;;  %v1569_v16 = vld [vmem:[%s5524_s4 + $0xc68] sm:$0xff] }
 0x126   : > { %3912 = vmatprep.subr.msk.bf16.mxu1 %vm5553_vm2, %v3910_v49  ;;  %v1375_v14 = vld [vmem:[%s5524_s4 + $0x658] sm:$0xff]  ;;  %v1424_v15 = vld [vmem:[%s5524_s4 + $0x7e0] sm:$0xff]  ;;  %v1618_v18 = vld [vmem:[%s5524_s4 + $0xdf0] sm:$0x7]  ;;  %v3944_v19 = vpack.c.bf16 %v1325_v11, %v1276_v10  ;;  %v3930_v20 = vpack.c.bf16 %v1519_v13, %v1470_v8 }
 0x127   : > { %3763 = vmatmul.mubr.msk.f32.vlgmr.msra.gmra.mrb[0].mxu0 %vm1668_vm3, %v5580_v45  ;;  %v1568_v21 = vld [vmem:[%s5524_s4 + $0xc60] sm:$0xff]  ;;  %v3946_v22 = vpack.c.bf16 %v1424_v15, %v1375_v14  ;;  %v1374_v23 = vld [vmem:[%s5524_s4 + $0x650] sm:$0xff]  ;;  %v1423_v24 = vld [vmem:[%s5524_s4 + $0x7d8] sm:$0xff]  ;;  %v3932_v25 = vpack.c.bf16 %v1618_v18, %v1569_v16 }
 0x128   : > { %3919 = vmatpush1.bf16.msra.mxu0 %v3918_v47  ;;  %2026 = vmatprep.mubr.f32.mxu0 %v4473_v42  ;;  %v1617_v26 = vld [vmem:[%s5524_s4 + $0xde8] sm:$0x7]  ;;  %v1522_v28 = vld [vmem:[%s5524_s4 + $0xaf0] sm:$0xff]  ;;  %v3948_v31 = vpack.c.bf16 %v1423_v24, %v1374_v23  ;;  %v1180_v33 = vld [vmem:[%s5524_s4 + $0x40] sm:$0xff] }
 0x129   : > { %3921 = vmatprep.subr.bf16.mxu0 %v3920_v52  ;;  %3915 = vmatpush1.bf16.msk.msra.mxu1 %vm5553_vm2, %v3913_v58  ;;  %v1473_v27 = vld [vmem:[%s5524_s4 + $0x968] sm:$0xff]  ;;  %v1230_v30 = vld [vmem:[%s5524_s4 + $0x1d0] sm:$0xff]  ;;  %v3935_v32 = vpack.c.bf16 %v1617_v26, %v1568_v21  ;;  %v1472_v35 = vld [vmem:[%s5524_s4 + $0x960] sm:$0xff] }
 0x12a   : > { %3939 = vmatprep.subr.bf16.mxu1 %v3938_v61  ;;  %v1181_v29 = vld [vmem:[%s5524_s4 + $0x48] sm:$0xff]  ;;  %v3950_v34 = vpack.c.bf16 %v1522_v28, %v1473_v27  ;;  %v1571_v39 = vld [vmem:[%s5524_s4 + $0xc78] sm:$0xff]  ;;  %v1620_v40 = vld [vmem:[%s5524_s4 + $0xe00] sm:$0x7] }
 0x12b   : > { %v1521_v36 = vld [vmem:[%s5524_s4 + $0xae8] sm:$0xff]  ;;  %v3960_v37 = vpack.c.bf16 %v1230_v30, %v1181_v29  ;;  %v1279_v41 = vld [vmem:[%s5524_s4 + $0x358] sm:$0xff]  ;;  %v1328_v43 = vld [vmem:[%s5524_s4 + $0x4e0] sm:$0xff]  ;;  %v3954_v48 = vpack.c.bf16 %v1620_v40, %v1571_v39 }
 0x12c   : > { %3923 = vmatpush1.bf16.msra.mxu0 %v3922_v59  ;;  %3766 = vmatmul.mubr.msk.f32.vlgmr.msra.gmra.mrb[0].mxu1 %vm1668_vm3, %v5580_v45  ;;  %v1229_v38 = vld [vmem:[%s5524_s4 + $0x1c8] sm:$0xff]  ;;  %v3952_v44 = vpack.c.bf16 %v1521_v36, %v1472_v35  ;;  %v1278_v47 = vld [vmem:[%s5524_s4 + $0x350] sm:$0xff]  ;;  %v1619_v50 = vld [vmem:[%s5524_s4 + $0xdf8] sm:$0x7]  ;;  %v3964_v51 = vpack.c.bf16 %v1328_v43, %v1279_v41 }
 0x12d   : > { %3925 = vmatprep.subr.bf16.mxu0 %v3924_v0  ;;  %3941 = vmatpush1.bf16.msra.mxu1 %v3940_v6  ;;  %v3962_v46 = vpack.c.bf16 %v1229_v38, %v1180_v33  ;;  %v1570_v49 = vld [vmem:[%s5524_s4 + $0xc70] sm:$0xff]  ;;  %v1327_v52 = vld [vmem:[%s5524_s4 + $0x4d8] sm:$0xff]  ;;  %v1232_v54 = vld [vmem:[%s5524_s4 + $0x1e0] sm:$0xff] }
 0x12e   : > { %2097 = vmatprep.mubr.f32.mxu1 %v4473_v42  ;;  %3943 = vmatprep.subr.bf16.mxu1 %v3942_v9  ;;  %v1183_v53 = vld [vmem:[%s5524_s4 + $0x58] sm:$0xff]  ;;  %v1377_v55 = vld [vmem:[%s5524_s4 + $0x668] sm:$0xff]  ;;  %v1426_v56 = vld [vmem:[%s5524_s4 + $0x7f0] sm:$0xff]  ;;  %v3957_v57 = vpack.c.bf16 %v1619_v50, %v1570_v49  ;;  %v3966_v58 = vpack.c.bf16 %v1327_v52, %v1278_v47 }
 0x12f   : > { %v1376_v59 = vld [vmem:[%s5524_s4 + $0x660] sm:$0xff]  ;;  %v3982_v60 = vpack.c.bf16 %v1232_v54, %v1183_v53  ;;  %v1182_v61 = vld [vmem:[%s5524_s4 + $0x50] sm:$0xff]  ;;  %v1231_v62 = vld [vmem:[%s5524_s4 + $0x1d8] sm:$0xff]  ;;  %v3968_v63 = vpack.c.bf16 %v1426_v56, %v1377_v55 }
 0x130   : > { %3927 = vmatpush1.bf16.msra.mxu0 %v3926_v7  ;;  %v1425_v0 = vld [vmem:[%s5524_s4 + $0x7e8] sm:$0xff]  ;;  %v1330_v2 = vld [vmem:[%s5524_s4 + $0x4f0] sm:$0xff]  ;;  %v1475_v3 = vld [vmem:[%s5524_s4 + $0x978] sm:$0xff]  ;;  %v3984_v5 = vpack.c.bf16 %v1231_v62, %v1182_v61 }
 0x131   : > { %3929 = vmatprep.subr.bf16.mxu0 %v3928_v12  ;;  %3945 = vmatpush1.bf16.msra.mxu1 %v3944_v19  ;;  %v1281_v1 = vld [vmem:[%s5524_s4 + $0x368] sm:$0xff]  ;;  %v1524_v4 = vld [vmem:[%s5524_s4 + $0xb00] sm:$0xff]  ;;  %v3970_v6 = vpack.c.bf16 %v1425_v0, %v1376_v59  ;;  %v1474_v7 = vld [vmem:[%s5524_s4 + $0x970] sm:$0xff] }
 0x132   : > { %3947 = vmatprep.subr.bf16.mxu1 %v3946_v22  ;;  %v3986_v8 = vpack.c.bf16 %v1330_v2, %v1281_v1  ;;  %v1280_v9 = vld [vmem:[%s5524_s4 + $0x360] sm:$0xff]  ;;  %v1329_v10 = vld [vmem:[%s5524_s4 + $0x4e8] sm:$0xff]  ;;  %v3972_v11 = vpack.c.bf16 %v1524_v4, %v1475_v3  ;;  %v1523_v12 = vld [vmem:[%s5524_s4 + $0xaf8] sm:$0xff] }
 0x133   : > { %v1379_v13 = vld [vmem:[%s5524_s4 + $0x678] sm:$0xff]  ;;  %v1428_v14 = vld [vmem:[%s5524_s4 + $0x800] sm:$0xff]  ;;  %v1573_v15 = vld [vmem:[%s5524_s4 + $0xc88] sm:$0xff]  ;;  %v3988_v18 = vpack.c.bf16 %v1329_v10, %v1280_v9  ;;  %v3974_v19 = vpack.c.bf16 %v1523_v12, %v1474_v7 }
 0x134   : > { %3931 = vmatpush1.bf16.msra.mxu0 %v3930_v20  ;;  %v1622_v16 = vld [vmem:[%s5524_s4 + $0xe10] sm:$0x7]  ;;  %v1572_v20 = vld [vmem:[%s5524_s4 + $0xc80] sm:$0xff]  ;;  %v3990_v21 = vpack.c.bf16 %v1428_v14, %v1379_v13  ;;  %v1427_v23 = vld [vmem:[%s5524_s4 + $0x7f8] sm:$0xff] }
 0x135   : > { %3934 = vmatprep.subr.msk.bf16.mxu0 %vm5553_vm2, %v3932_v25  ;;  %3949 = vmatpush1.bf16.msra.mxu1 %v3948_v31  ;;  %v1378_v22 = vld [vmem:[%s5524_s4 + $0x670] sm:$0xff]  ;;  %v3976_v24 = vpack.c.bf16 %v1622_v16, %v1573_v15  ;;  %v1621_v25 = vld [vmem:[%s5524_s4 + $0xe08] sm:$0x7]  ;;  %v1575_v38 = vld [vmem:[%s5524_s4 + $0xc98] sm:$0xff] }
 0x136   : > { %3951 = vmatprep.subr.bf16.mxu1 %v3950_v34  ;;  %v1477_v26 = vld [vmem:[%s5524_s4 + $0x988] sm:$0xff]  ;;  %v1526_v27 = vld [vmem:[%s5524_s4 + $0xb10] sm:$0xff]  ;;  %v3992_v30 = vpack.c.bf16 %v1427_v23, %v1378_v22  ;;  %v3979_v31 = vpack.c.bf16 %v1621_v25, %v1572_v20  ;;  %v1476_v34 = vld [vmem:[%s5524_s4 + $0x980] sm:$0xff] }
 0x137   : > { %v1185_v28 = vld [vmem:[%s5524_s4 + $0x68] sm:$0xff]  ;;  %v1234_v29 = vld [vmem:[%s5524_s4 + $0x1f0] sm:$0xff]  ;;  %v3994_v33 = vpack.c.bf16 %v1526_v27, %v1477_v26  ;;  %v1624_v39 = vld [vmem:[%s5524_s4 + $0xe20] sm:$0x7] }
 0x138   : > { %3937 = vmatpush1.bf16.msk.msra.mxu0 %vm5553_vm2, %v3935_v32  ;;  %v1184_v32 = vld [vmem:[%s5524_s4 + $0x60] sm:$0xff]  ;;  %v1525_v35 = vld [vmem:[%s5524_s4 + $0xb08] sm:$0xff]  ;;  %v4004_v36 = vpack.c.bf16 %v1234_v29, %v1185_v28  ;;  %v1283_v40 = vld [vmem:[%s5524_s4 + $0x378] sm:$0xff]  ;;  %v3998_v47 = vpack.c.bf16 %v1624_v39, %v1575_v38 }
 0x139   : > { %3961 = vmatprep.subr.bf16.mxu0 %v3960_v37  ;;  %3953 = vmatpush1.bf16.msra.mxu1 %v3952_v44  ;;  %v1233_v37 = vld [vmem:[%s5524_s4 + $0x1e8] sm:$0xff]  ;;  %v1332_v41 = vld [vmem:[%s5524_s4 + $0x500] sm:$0xff]  ;;  %v3996_v43 = vpack.c.bf16 %v1525_v35, %v1476_v34  ;;  %v1623_v49 = vld [vmem:[%s5524_s4 + $0xe18] sm:$0x7] }
 0x13a   : > { %3956 = vmatprep.subr.msk.bf16.mxu1 %vm5553_vm2, %v3954_v48  ;;  %v4006_v44 = vpack.c.bf16 %v1233_v37, %v1184_v32  ;;  %v1574_v48 = vld [vmem:[%s5524_s4 + $0xc90] sm:$0xff]  ;;  %v4008_v50 = vpack.c.bf16 %v1332_v41, %v1283_v40  ;;  %v1187_v52 = vld [vmem:[%s5524_s4 + $0x78] sm:$0xff]  ;;  %v1236_v53 = vld [vmem:[%s5524_s4 + $0x200] sm:$0xff] }
 0x13b   : > { %3769 = vmatmul.mubr.msk.f32.vlgmr.msra.gmra.mrb[2].mxu0 %vm1668_vm3, %v5580_v45  ;;  %v1381_v54 = vld [vmem:[%s5524_s4 + $0x688] sm:$0xff]  ;;  %v1430_v55 = vld [vmem:[%s5524_s4 + $0x810] sm:$0xff]  ;;  %v4001_v56 = vpack.c.bf16 %v1623_v49, %v1574_v48  ;;  %v4026_v59 = vpack.c.bf16 %v1236_v53, %v1187_v52  ;;  %v1235_v61 = vld [vmem:[%s5524_s4 + $0x1f8] sm:$0xff] }
 0x13c   : > { %3963 = vmatpush1.bf16.msra.mxu0 %v3962_v46  ;;  %2168 = vmatprep.mubr.f32.mxu0 %v4473_v42  ;;  %v1282_v46 = vld [vmem:[%s5524_s4 + $0x370] sm:$0xff]  ;;  %v4012_v62 = vpack.c.bf16 %v1430_v55, %v1381_v54  ;;  %v1285_v0 = vld [vmem:[%s5524_s4 + $0x388] sm:$0xff]  ;;  %v1479_v2 = vld [vmem:[%s5524_s4 + $0x998] sm:$0xff] }
 0x13d   : > { %3965 = vmatprep.subr.bf16.mxu0 %v3964_v51  ;;  %3959 = vmatpush1.bf16.msk.msra.mxu1 %vm5553_vm2, %v3957_v57  ;;  %v1331_v51 = vld [vmem:[%s5524_s4 + $0x4f8] sm:$0xff]  ;;  %v1334_v1 = vld [vmem:[%s5524_s4 + $0x510] sm:$0xff]  ;;  %v1528_v3 = vld [vmem:[%s5524_s4 + $0xb20] sm:$0xff] }
 0x13e   : > { %3983 = vmatprep.subr.bf16.mxu1 %v3982_v60  ;;  %v4010_v57 = vpack.c.bf16 %v1331_v51, %v1282_v46  ;;  %v1186_v60 = vld [vmem:[%s5524_s4 + $0x70] sm:$0xff]  ;;  %v4030_v7 = vpack.c.bf16 %v1334_v1, %v1285_v0  ;;  %v1333_v9 = vld [vmem:[%s5524_s4 + $0x508] sm:$0xff]  ;;  %v4016_v10 = vpack.c.bf16 %v1528_v3, %v1479_v2  ;;  %v1383_v12 = vld [vmem:[%s5524_s4 + $0x698] sm:$0xff] }
 0x13f   : > { %v4028_v4 = vpack.c.bf16 %v1235_v61, %v1186_v60  ;;  %v1432_v13 = vld [vmem:[%s5524_s4 + $0x820] sm:$0xff]  ;;  %v1577_v14 = vld [vmem:[%s5524_s4 + $0xca8] sm:$0xff]  ;;  %v1626_v15 = vld [vmem:[%s5524_s4 + $0xe30] sm:$0x7] }
 0x140   : > { %3967 = vmatpush1.bf16.msra.mxu0 %v3966_v58  ;;  %3772 = vmatmul.mubr.msk.f32.vlgmr.msra.gmra.mrb[2].mxu1 %vm1668_vm3, %v5580_v45  ;;  %v1380_v58 = vld [vmem:[%s5524_s4 + $0x680] sm:$0xff]  ;;  %v4034_v20 = vpack.c.bf16 %v1432_v13, %v1383_v12  ;;  %v1431_v22 = vld [vmem:[%s5524_s4 + $0x818] sm:$0xff]  ;;  %v4020_v23 = vpack.c.bf16 %v1626_v15, %v1577_v14  ;;  %v1481_v25 = vld [vmem:[%s5524_s4 + $0x9a8] sm:$0xff] }
 0x141   : > { %3969 = vmatprep.subr.bf16.mxu0 %v3968_v63  ;;  %3985 = vmatpush1.bf16.msra.mxu1 %v3984_v5  ;;  %v1429_v63 = vld [vmem:[%s5524_s4 + $0x808] sm:$0xff]  ;;  %v1530_v26 = vld [vmem:[%s5524_s4 + $0xb30] sm:$0xff]  ;;  %v1579_v37 = vld [vmem:[%s5524_s4 + $0xcb8] sm:$0xff] }
 0x142   : > { %2239 = vmatprep.mubr.f32.mxu1 %v4473_v42  ;;  %3987 = vmatprep.subr.bf16.mxu1 %v3986_v8  ;;  %v4014_v5 = vpack.c.bf16 %v1429_v63, %v1380_v58  ;;  %v1284_v8 = vld [vmem:[%s5524_s4 + $0x380] sm:$0xff]  ;;  %v1189_v27 = vld [vmem:[%s5524_s4 + $0x88] sm:$0xff]  ;;  %v1238_v28 = vld [vmem:[%s5524_s4 + $0x210] sm:$0xff]  ;;  %v4038_v32 = vpack.c.bf16 %v1530_v26, %v1481_v25 }
 0x143   : > { %v4032_v16 = vpack.c.bf16 %v1333_v9, %v1284_v8  ;;  %v1529_v34 = vld [vmem:[%s5524_s4 + $0xb28] sm:$0xff]  ;;  %v4048_v35 = vpack.c.bf16 %v1238_v28, %v1189_v27  ;;  %v1628_v38 = vld [vmem:[%s5524_s4 + $0xe40] sm:$0x7]  ;;  %v1287_v39 = vld [vmem:[%s5524_s4 + $0x398] sm:$0xff] }
 0x144   : > { %3971 = vmatpush1.bf16.msra.mxu0 %v3970_v6  ;;  %v1478_v6 = vld [vmem:[%s5524_s4 + $0x990] sm:$0xff]  ;;  %v1336_v40 = vld [vmem:[%s5524_s4 + $0x520] sm:$0xff]  ;;  %v4042_v46 = vpack.c.bf16 %v1628_v38, %v1579_v37  ;;  %v1627_v48 = vld [vmem:[%s5524_s4 + $0xe38] sm:$0x7] }
 0x145   : > { %3973 = vmatprep.subr.bf16.mxu0 %v3972_v11  ;;  %3989 = vmatpush1.bf16.msra.mxu1 %v3988_v18  ;;  %v1527_v11 = vld [vmem:[%s5524_s4 + $0xb18] sm:$0xff]  ;;  %v4052_v49 = vpack.c.bf16 %v1336_v40, %v1287_v39  ;;  %v1240_v52 = vld [vmem:[%s5524_s4 + $0x220] sm:$0xff]  ;;  %v1385_v53 = vld [vmem:[%s5524_s4 + $0x6a8] sm:$0xff] }
 0x146   : > { %3991 = vmatprep.subr.bf16.mxu1 %v3990_v21  ;;  %v4018_v18 = vpack.c.bf16 %v1527_v11, %v1478_v6  ;;  %v1382_v21 = vld [vmem:[%s5524_s4 + $0x690] sm:$0xff]  ;;  %v1191_v51 = vld [vmem:[%s5524_s4 + $0x98] sm:$0xff]  ;;  %v1289_v63 = vld [vmem:[%s5524_s4 + $0x3a8] sm:$0xff] }
 0x147   : > { %v4036_v29 = vpack.c.bf16 %v1431_v22, %v1382_v21  ;;  %v1434_v54 = vld [vmem:[%s5524_s4 + $0x830] sm:$0xff]  ;;  %v4070_v58 = vpack.c.bf16 %v1240_v52, %v1191_v51  ;;  %v1239_v60 = vld [vmem:[%s5524_s4 + $0x218] sm:$0xff]  ;;  %v1532_v2 = vld [vmem:[%s5524_s4 + $0xb40] sm:$0xff] }
 0x148   : > { %3975 = vmatpush1.bf16.msra.mxu0 %v3974_v19  ;;  %v1576_v19 = vld [vmem:[%s5524_s4 + $0xca0] sm:$0xff]  ;;  %v4056_v61 = vpack.c.bf16 %v1434_v54, %v1385_v53  ;;  %v1338_v0 = vld [vmem:[%s5524_s4 + $0x530] sm:$0xff]  ;;  %v1483_v1 = vld [vmem:[%s5524_s4 + $0x9b8] sm:$0xff] }
 0x149   : > { %3978 = vmatprep.subr.msk.bf16.mxu0 %vm5553_vm2, %v3976_v24  ;;  %3993 = vmatpush1.bf16.msra.mxu1 %v3992_v30  ;;  %v1625_v24 = vld [vmem:[%s5524_s4 + $0xe28] sm:$0x7]  ;;  %v4074_v6 = vpack.c.bf16 %v1338_v0, %v1289_v63  ;;  %v4060_v9 = vpack.c.bf16 %v1532_v2, %v1483_v1  ;;  %v1387_v11 = vld [vmem:[%s5524_s4 + $0x6b8] sm:$0xff]  ;;  %v1436_v12 = vld [vmem:[%s5524_s4 + $0x840] sm:$0xff] }
 0x14a   : > { %3995 = vmatprep.subr.bf16.mxu1 %v3994_v33  ;;  %v4023_v30 = vpack.c.bf16 %v1625_v24, %v1576_v19  ;;  %v1480_v33 = vld [vmem:[%s5524_s4 + $0x9a0] sm:$0xff]  ;;  %v1337_v8 = vld [vmem:[%s5524_s4 + $0x528] sm:$0xff]  ;;  %v1630_v14 = vld [vmem:[%s5524_s4 + $0xe50] sm:$0x7]  ;;  %v4078_v19 = vpack.c.bf16 %v1436_v12, %v1387_v11 }
 0x14b   : > { %v4040_v41 = vpack.c.bf16 %v1529_v34, %v1480_v33  ;;  %v1581_v13 = vld [vmem:[%s5524_s4 + $0xcc8] sm:$0xff]  ;;  %v1435_v21 = vld [vmem:[%s5524_s4 + $0x838] sm:$0xff]  ;;  %v1534_v25 = vld [vmem:[%s5524_s4 + $0xb50] sm:$0xff] }
 0x14c   : > { %3981 = vmatpush1.bf16.msk.msra.mxu0 %vm5553_vm2, %v3979_v31  ;;  %v1188_v31 = vld [vmem:[%s5524_s4 + $0x80] sm:$0xff]  ;;  %v4064_v22 = vpack.c.bf16 %v1630_v14, %v1581_v13  ;;  %v1485_v24 = vld [vmem:[%s5524_s4 + $0x9c8] sm:$0xff]  ;;  %v1242_v27 = vld [vmem:[%s5524_s4 + $0x230] sm:$0xff] }
 0x14d   : > { %4005 = vmatprep.subr.bf16.mxu0 %v4004_v36  ;;  %3997 = vmatpush1.bf16.msra.mxu1 %v3996_v43  ;;  %v1237_v36 = vld [vmem:[%s5524_s4 + $0x208] sm:$0xff]  ;;  %v1632_v37 = vld [vmem:[%s5524_s4 + $0xe60] sm:$0x7]  ;;  %v1291_v38 = vld [vmem:[%s5524_s4 + $0x3b8] sm:$0xff] }
 0x14e   : > { %4000 = vmatprep.subr.msk.bf16.mxu1 %vm5553_vm2, %v3998_v47  ;;  %v4050_v43 = vpack.c.bf16 %v1237_v36, %v1188_v31  ;;  %v1578_v47 = vld [vmem:[%s5524_s4 + $0xcb0] sm:$0xff]  ;;  %v1193_v26 = vld [vmem:[%s5524_s4 + $0xa8] sm:$0xff]  ;;  %v4082_v31 = vpack.c.bf16 %v1534_v25, %v1485_v24  ;;  %v1583_v36 = vld [vmem:[%s5524_s4 + $0xcd8] sm:$0xff] }
 0x14f   : > { %3775 = vmatmul.mubr.msk.f32.vlgmr.msra.gmra.mrb[4].mxu0 %vm1668_vm3, %v5580_v45  ;;  %v4045_v55 = vpack.c.bf16 %v1627_v48, %v1578_v47  ;;  %v1533_v33 = vld [vmem:[%s5524_s4 + $0xb48] sm:$0xff]  ;;  %v4092_v34 = vpack.c.bf16 %v1242_v27, %v1193_v26  ;;  %v1340_v39 = vld [vmem:[%s5524_s4 + $0x540] sm:$0xff]  ;;  %v1631_v47 = vld [vmem:[%s5524_s4 + $0xe58] sm:$0x7] }
 0x150   : > { %4007 = vmatpush1.bf16.msra.mxu0 %v4006_v44  ;;  %2310 = vmatprep.mubr.f32.mxu0 %v4473_v42  ;;  %v1286_v44 = vld [vmem:[%s5524_s4 + $0x390] sm:$0xff]  ;;  %v4096_v48 = vpack.c.bf16 %v1340_v39, %v1291_v38  ;;  %v1244_v51 = vld [vmem:[%s5524_s4 + $0x240] sm:$0xff]  ;;  %v1389_v52 = vld [vmem:[%s5524_s4 + $0x6c8] sm:$0xff] }
 0x151   : > { %4009 = vmatprep.subr.bf16.mxu0 %v4008_v50  ;;  %4003 = vmatpush1.bf16.msk.msra.mxu1 %vm5553_vm2, %v4001_v56  ;;  %v1335_v50 = vld [vmem:[%s5524_s4 + $0x518] sm:$0xff]  ;;  %v1438_v53 = vld [vmem:[%s5524_s4 + $0x850] sm:$0xff]  ;;  %v1536_v1 = vld [vmem:[%s5524_s4 + $0xb60] sm:$0xff] }
 0x152   : > { %4027 = vmatprep.subr.bf16.mxu1 %v4026_v59  ;;  %v4054_v56 = vpack.c.bf16 %v1335_v50, %v1286_v44  ;;  %v1190_v59 = vld [vmem:[%s5524_s4 + $0x90] sm:$0xff]  ;;  %v4086_v44 = vpack.c.bf16 %v1632_v37, %v1583_v36  ;;  %v1195_v50 = vld [vmem:[%s5524_s4 + $0xb8] sm:$0xff]  ;;  %v1440_v11 = vld [vmem:[%s5524_s4 + $0x860] sm:$0xff] }
 0x153   : > { %v4072_v3 = vpack.c.bf16 %v1239_v60, %v1190_v59  ;;  %v1243_v59 = vld [vmem:[%s5524_s4 + $0x238] sm:$0xff]  ;;  %v4100_v60 = vpack.c.bf16 %v1438_v53, %v1389_v52  ;;  %v1342_v63 = vld [vmem:[%s5524_s4 + $0x550] sm:$0xff]  ;;  %v1585_v12 = vld [vmem:[%s5524_s4 + $0xce8] sm:$0xff] }
 0x154   : > { %4011 = vmatpush1.bf16.msra.mxu0 %v4010_v57  ;;  %3778 = vmatmul.mubr.msk.f32.vlgmr.msra.gmra.mrb[4].mxu1 %vm1668_vm3, %v5580_v45  ;;  %v1384_v57 = vld [vmem:[%s5524_s4 + $0x6a0] sm:$0xff]  ;;  %v1487_v0 = vld [vmem:[%s5524_s4 + $0x9d8] sm:$0xff]  ;;  %v1634_v13 = vld [vmem:[%s5524_s4 + $0xe70] sm:$0x7] }
 0x155   : > { %4013 = vmatprep.subr.bf16.mxu0 %v4012_v62  ;;  %4029 = vmatpush1.bf16.msra.mxu1 %v4028_v4  ;;  %v1433_v62 = vld [vmem:[%s5524_s4 + $0x828] sm:$0xff]  ;;  %v1538_v24 = vld [vmem:[%s5524_s4 + $0xb70] sm:$0xff]  ;;  %v1636_v36 = vld [vmem:[%s5524_s4 + $0xe80] sm:$0x7] }
 0x156   : > { %2381 = vmatprep.mubr.f32.mxu1 %v4473_v42  ;;  %4031 = vmatprep.subr.bf16.mxu1 %v4030_v7  ;;  %v4058_v4 = vpack.c.bf16 %v1433_v62, %v1384_v57  ;;  %v1288_v7 = vld [vmem:[%s5524_s4 + $0x3a0] sm:$0xff]  ;;  %v4114_v57 = vpack.c.bf16 %v1244_v51, %v1195_v50  ;;  %v1293_v62 = vld [vmem:[%s5524_s4 + $0x3c8] sm:$0xff]  ;;  %v1246_v26 = vld [vmem:[%s5524_s4 + $0x250] sm:$0xff] }
 0x157   : > { %v4076_v15 = vpack.c.bf16 %v1337_v8, %v1288_v7  ;;  %v1341_v7 = vld [vmem:[%s5524_s4 + $0x548] sm:$0xff]  ;;  %v4104_v8 = vpack.c.bf16 %v1536_v1, %v1487_v0  ;;  %v1295_v37 = vld [vmem:[%s5524_s4 + $0x3d8] sm:$0xff]  ;;  %v1344_v38 = vld [vmem:[%s5524_s4 + $0x560] sm:$0xff] }
 0x158   : > { %4015 = vmatpush1.bf16.msra.mxu0 %v4014_v5  ;;  %v1482_v5 = vld [vmem:[%s5524_s4 + $0x9b0] sm:$0xff]  ;;  %v1197_v25 = vld [vmem:[%s5524_s4 + $0xc8] sm:$0xff]  ;;  %v1248_v50 = vld [vmem:[%s5524_s4 + $0x260] sm:$0xff] }
 0x159   : > { %4017 = vmatprep.subr.bf16.mxu0 %v4016_v10  ;;  %4033 = vmatpush1.bf16.msra.mxu1 %v4032_v16  ;;  %v1531_v10 = vld [vmem:[%s5524_s4 + $0xb38] sm:$0xff]  ;;  %v1393_v51 = vld [vmem:[%s5524_s4 + $0x6e8] sm:$0xff]  ;;  %v1442_v52 = vld [vmem:[%s5524_s4 + $0x870] sm:$0xff] }
 0x15a   : > { %4035 = vmatprep.subr.bf16.mxu1 %v4034_v20  ;;  %v4062_v16 = vpack.c.bf16 %v1531_v10, %v1482_v5  ;;  %v1386_v20 = vld [vmem:[%s5524_s4 + $0x6b0] sm:$0xff]  ;;  %v4118_v5 = vpack.c.bf16 %v1342_v63, %v1293_v62  ;;  %v1391_v10 = vld [vmem:[%s5524_s4 + $0x6d8] sm:$0xff]  ;;  %v1540_v0 = vld [vmem:[%s5524_s4 + $0xb80] sm:$0xff] }
 0x15b   : > { %v4080_v28 = vpack.c.bf16 %v1435_v21, %v1386_v20  ;;  %v1439_v20 = vld [vmem:[%s5524_s4 + $0x858] sm:$0xff]  ;;  %v4108_v21 = vpack.c.bf16 %v1634_v13, %v1585_v12  ;;  %v1346_v62 = vld [vmem:[%s5524_s4 + $0x570] sm:$0xff] }
 0x15c   : > { %4019 = vmatpush1.bf16.msra.mxu0 %v4018_v18  ;;  %v1580_v18 = vld [vmem:[%s5524_s4 + $0xcc0] sm:$0xff]  ;;  %v1491_v63 = vld [vmem:[%s5524_s4 + $0x9f8] sm:$0xff]  ;;  %v1638_v12 = vld [vmem:[%s5524_s4 + $0xe90] sm:$0x7] }
 0x15d   : > { %4022 = vmatprep.subr.msk.bf16.mxu0 %vm5553_vm2, %v4020_v23  ;;  %4037 = vmatpush1.bf16.msra.mxu1 %v4036_v29  ;;  %v1629_v23 = vld [vmem:[%s5524_s4 + $0xe48] sm:$0x7] }
 0x15e   : > { %4039 = vmatprep.subr.bf16.mxu1 %v4038_v32  ;;  %v4067_v29 = vpack.c.bf16 %v1629_v23, %v1580_v18  ;;  %v1484_v32 = vld [vmem:[%s5524_s4 + $0x9c0] sm:$0xff]  ;;  %v4122_v18 = vpack.c.bf16 %v1440_v11, %v1391_v10  ;;  %v1489_v23 = vld [vmem:[%s5524_s4 + $0x9e8] sm:$0xff] }
 0x15f   : > { %v4084_v40 = vpack.c.bf16 %v1533_v33, %v1484_v32  ;;  %v1537_v32 = vld [vmem:[%s5524_s4 + $0xb68] sm:$0xff]  ;;  %v4136_v33 = vpack.c.bf16 %v1246_v26, %v1197_v25  ;;  %v1444_v10 = vld [vmem:[%s5524_s4 + $0x880] sm:$0xff] }
 0x160   : > { %4025 = vmatpush1.bf16.msk.msra.mxu0 %vm5553_vm2, %v4023_v30  ;;  %v1192_v30 = vld [vmem:[%s5524_s4 + $0xa0] sm:$0xff]  ;;  %v1589_v11 = vld [vmem:[%s5524_s4 + $0xd08] sm:$0xff] }
 0x161   : > { %4049 = vmatprep.subr.bf16.mxu0 %v4048_v35  ;;  %4041 = vmatpush1.bf16.msra.mxu1 %v4040_v41  ;;  %v1241_v35 = vld [vmem:[%s5524_s4 + $0x228] sm:$0xff] }
 0x162   : > { %4044 = vmatprep.subr.msk.bf16.mxu1 %vm5553_vm2, %v4042_v46  ;;  %v4094_v41 = vpack.c.bf16 %v1241_v35, %v1192_v30  ;;  %v1582_v46 = vld [vmem:[%s5524_s4 + $0xcd0] sm:$0xff]  ;;  %v4126_v30 = vpack.c.bf16 %v1538_v24, %v1489_v23  ;;  %v1587_v35 = vld [vmem:[%s5524_s4 + $0xcf8] sm:$0xff]  ;;  %v1201_v23 = vld [vmem:[%s5524_s4 + $0xe8] sm:$0xff] }
 0x163   : > { %3781 = vmatmul.mubr.msk.f32.vlgmr.msra.gmra.mrb[6].mxu0 %vm1668_vm3, %v5580_v45  ;;  %v4089_v54 = vpack.c.bf16 %v1631_v47, %v1582_v46  ;;  %v1635_v46 = vld [vmem:[%s5524_s4 + $0xe78] sm:$0x7]  ;;  %v4140_v47 = vpack.c.bf16 %v1344_v38, %v1295_v37  ;;  %v1250_v24 = vld [vmem:[%s5524_s4 + $0x270] sm:$0xff] }
 0x164   : > { %4051 = vmatpush1.bf16.msra.mxu0 %v4050_v43  ;;  %2452 = vmatprep.mubr.f32.mxu0 %v4473_v42  ;;  %v1290_v43 = vld [vmem:[%s5524_s4 + $0x3b0] sm:$0xff] }
 0x165   : > { %4053 = vmatprep.subr.bf16.mxu0 %v4052_v49  ;;  %4047 = vmatpush1.bf16.msk.msra.mxu1 %vm5553_vm2, %v4045_v55  ;;  %v1339_v49 = vld [vmem:[%s5524_s4 + $0x538] sm:$0xff] }
 0x166   : > { %4071 = vmatprep.subr.bf16.mxu1 %v4070_v58  ;;  %v4098_v55 = vpack.c.bf16 %v1339_v49, %v1290_v43  ;;  %v1194_v58 = vld [vmem:[%s5524_s4 + $0xb0] sm:$0xff]  ;;  %v4130_v43 = vpack.c.bf16 %v1636_v36, %v1587_v35  ;;  %v1199_v49 = vld [vmem:[%s5524_s4 + $0xd8] sm:$0xff]  ;;  %v1348_v36 = vld [vmem:[%s5524_s4 + $0x580] sm:$0xff] }
 0x167   : > { %v4116_v2 = vpack.c.bf16 %v1243_v59, %v1194_v58  ;;  %v1247_v58 = vld [vmem:[%s5524_s4 + $0x258] sm:$0xff]  ;;  %v4144_v59 = vpack.c.bf16 %v1442_v52, %v1393_v51  ;;  %v5919_v51 = vld [vmem:[%s6328_s0] sm:$0x3f] }
 0x168   : > { %4055 = vmatpush1.bf16.msra.mxu0 %v4054_v56  ;;  %3784 = vmatmul.mubr.msk.f32.vlgmr.msra.gmra.mrb[6].mxu1 %vm1668_vm3, %v5580_v45  ;;  %v1388_v56 = vld [vmem:[%s5524_s4 + $0x6c0] sm:$0xff]  ;;  %v1299_v35 = vld [vmem:[%s5524_s4 + $0x3f8] sm:$0xff] }
 0x169   : > { %4057 = vmatprep.subr.bf16.mxu0 %v4056_v61  ;;  %4073 = vmatpush1.bf16.msra.mxu1 %v4072_v3  ;;  %v1437_v61 = vld [vmem:[%s5524_s4 + $0x848] sm:$0xff] }
 0x16a   : > { %2523 = vmatprep.mubr.f32.mxu1 %v4473_v42  ;;  %4075 = vmatprep.subr.bf16.mxu1 %v4074_v6  ;;  %v4102_v3 = vpack.c.bf16 %v1437_v61, %v1388_v56  ;;  %v1292_v6 = vld [vmem:[%s5524_s4 + $0x3c0] sm:$0xff]  ;;  %v4158_v56 = vpack.c.bf16 %v1248_v50, %v1199_v49  ;;  %v1297_v61 = vld [vmem:[%s5524_s4 + $0x3e8] sm:$0xff]  ;;  %v1446_v50 = vld [vmem:[%s5524_s4 + $0x890] sm:$0xff] }
 0x16b   : > { %v4120_v14 = vpack.c.bf16 %v1341_v7, %v1292_v6  ;;  %v1345_v6 = vld [vmem:[%s5524_s4 + $0x568] sm:$0xff]  ;;  %v4148_v7 = vpack.c.bf16 %v1540_v0, %v1491_v63  ;;  %v1544_v63 = vld [vmem:[%s5524_s4 + $0xba0] sm:$0xff] }
 0x16c   : > { %4059 = vmatpush1.bf16.msra.mxu0 %v4058_v4  ;;  %v1486_v4 = vld [vmem:[%s5524_s4 + $0x9d0] sm:$0xff]  ;;  %v1397_v49 = vld [vmem:[%s5524_s4 + $0x708] sm:$0xff] }
 0x16d   : > { %4061 = vmatprep.subr.bf16.mxu0 %v4060_v9  ;;  %4077 = vmatpush1.bf16.msra.mxu1 %v4076_v15  ;;  %v1535_v9 = vld [vmem:[%s5524_s4 + $0xb58] sm:$0xff] }
 0x16e   : > { %4079 = vmatprep.subr.bf16.mxu1 %v4078_v19  ;;  %v4106_v15 = vpack.c.bf16 %v1535_v9, %v1486_v4  ;;  %v1390_v19 = vld [vmem:[%s5524_s4 + $0x6d0] sm:$0xff]  ;;  %v4162_v4 = vpack.c.bf16 %v1346_v62, %v1297_v61  ;;  %v1395_v9 = vld [vmem:[%s5524_s4 + $0x6f8] sm:$0xff] }
 0x16f   : > { %v4124_v27 = vpack.c.bf16 %v1439_v20, %v1390_v19  ;;  %v1443_v19 = vld [vmem:[%s5524_s4 + $0x878] sm:$0xff]  ;;  %v4152_v20 = vpack.c.bf16 %v1638_v12, %v1589_v11  ;;  %v1350_v61 = vld [vmem:[%s5524_s4 + $0x590] sm:$0xff] }
 0x170   : > { %4063 = vmatpush1.bf16.msra.mxu0 %v4062_v16  ;;  %v1584_v16 = vld [vmem:[%s5524_s4 + $0xce0] sm:$0xff]  ;;  %v1495_v62 = vld [vmem:[%s5524_s4 + $0xa18] sm:$0xff]  ;;  %v1642_v11 = vld [vmem:[%s5524_s4 + $0xeb0] sm:$0x7] }
 0x171   : > { %4066 = vmatprep.subr.msk.bf16.mxu0 %vm5553_vm2, %v4064_v22  ;;  %4081 = vmatpush1.bf16.msra.mxu1 %v4080_v28  ;;  %v1633_v22 = vld [vmem:[%s5524_s4 + $0xe68] sm:$0x7] }
 0x172   : > { %4083 = vmatprep.subr.bf16.mxu1 %v4082_v31  ;;  %v4111_v28 = vpack.c.bf16 %v1633_v22, %v1584_v16  ;;  %v1488_v31 = vld [vmem:[%s5524_s4 + $0x9e0] sm:$0xff]  ;;  %v4166_v16 = vpack.c.bf16 %v1444_v10, %v1395_v9  ;;  %v1542_v22 = vld [vmem:[%s5524_s4 + $0xb90] sm:$0xff]  ;;  %v1593_v10 = vld [vmem:[%s5524_s4 + $0xd28] sm:$0xff] }
 0x173   : > { %v4128_v39 = vpack.c.bf16 %v1537_v32, %v1488_v31  ;;  %v4180_v31 = vpack.c.bf16 %v1250_v24, %v1201_v23  ;;  %v1249_v32 = vld [vmem:[%s5524_s4 + $0x268] sm:$0xff]  ;;  %v1448_v9 = vld [vmem:[%s5524_s4 + $0x8a0] sm:$0xff]  ;;  %v1254_v23 = vld [vmem:[%s5524_s4 + $0x290] sm:$0xff] }
 0x174   : > { %4069 = vmatpush1.bf16.msk.msra.mxu0 %vm5553_vm2, %v4067_v29  ;;  %v1196_v29 = vld [vmem:[%s5524_s4 + $0xc0] sm:$0xff] }
 0x175   : > { %4093 = vmatprep.subr.bf16.mxu0 %v4092_v34  ;;  %4085 = vmatpush1.bf16.msra.mxu1 %v4084_v40  ;;  %v1245_v34 = vld [vmem:[%s5524_s4 + $0x248] sm:$0xff] }
 0x176   : > { %4088 = vmatprep.subr.msk.bf16.mxu1 %vm5553_vm2, %v4086_v44  ;;  %v4138_v40 = vpack.c.bf16 %v1245_v34, %v1196_v29  ;;  %v1586_v44 = vld [vmem:[%s5524_s4 + $0xcf0] sm:$0xff]  ;;  %v1492_v29 = vld [vmem:[%s5524_s4 + $0xa00] sm:$0xff] }
 0x177   : > { %3787 = vmatmul.mubr.msk.f32.vlgmr.msra.gmra.mrb[8].mxu0 %vm1668_vm3, %v5580_v45  ;;  %v4133_v53 = vpack.c.bf16 %v1635_v46, %v1586_v44  ;;  %v1640_v34 = vld [vmem:[%s5524_s4 + $0xea0] sm:$0x7]  ;;  %v4184_v44 = vpack.c.bf16 %v1348_v36, %v1299_v35  ;;  %v1347_v46 = vld [vmem:[%s5524_s4 + $0x578] sm:$0xff] }
 0x178   : > { %4095 = vmatpush1.bf16.msra.mxu0 %v4094_v41  ;;  %2594 = vmatprep.mubr.f32.mxu0 %v4473_v42  ;;  %v1294_v41 = vld [vmem:[%s5524_s4 + $0x3d0] sm:$0xff]  ;;  %v1352_v35 = vld [vmem:[%s5524_s4 + $0x5a0] sm:$0xff] }
 0x179   : > { %4097 = vmatprep.subr.bf16.mxu0 %v4096_v48  ;;  %4091 = vmatpush1.bf16.msk.msra.mxu1 %vm5553_vm2, %v4089_v54  ;;  %v1343_v48 = vld [vmem:[%s5524_s4 + $0x558] sm:$0xff] }
 0x17a   : > { %4115 = vmatprep.subr.bf16.mxu1 %v4114_v57  ;;  %v4142_v54 = vpack.c.bf16 %v1343_v48, %v1294_v41  ;;  %v1198_v57 = vld [vmem:[%s5524_s4 + $0xd0] sm:$0xff]  ;;  %v1252_v48 = vld [vmem:[%s5524_s4 + $0x280] sm:$0xff] }
 0x17b   : > { %v4160_v1 = vpack.c.bf16 %v1247_v58, %v1198_v57  ;;  %v1590_v41 = vld [vmem:[%s5524_s4 + $0xd10] sm:$0xff]  ;;  %v1251_v57 = vld [vmem:[%s5524_s4 + $0x278] sm:$0xff]  ;;  %v4188_v58 = vpack.c.bf16 %v1446_v50, %v1397_v49 }
 0x17c   : > { %4099 = vmatpush1.bf16.msra.mxu0 %v4098_v55  ;;  %3790 = vmatmul.mubr.msk.f32.vlgmr.msra.gmra.mrb[8].mxu1 %vm1668_vm3, %v5580_v45  ;;  %v1392_v55 = vld [vmem:[%s5524_s4 + $0x6e0] sm:$0xff]  ;;  %v1450_v49 = vld [vmem:[%s5524_s4 + $0x8b0] sm:$0xff] }
 0x17d   : > { %4101 = vmatprep.subr.bf16.mxu0 %v4100_v60  ;;  %4117 = vmatpush1.bf16.msra.mxu1 %v4116_v2  ;;  %v1441_v60 = vld [vmem:[%s5524_s4 + $0x868] sm:$0xff] }
 0x17e   : > { %2665 = vmatprep.mubr.f32.mxu1 %v4473_v42  ;;  %4119 = vmatprep.subr.bf16.mxu1 %v4118_v5  ;;  %v4146_v2 = vpack.c.bf16 %v1441_v60, %v1392_v55  ;;  %v1296_v5 = vld [vmem:[%s5524_s4 + $0x3e0] sm:$0xff]  ;;  %v1301_v60 = vld [vmem:[%s5524_s4 + $0x408] sm:$0xff] }
 0x17f   : > { %v4164_v13 = vpack.c.bf16 %v1345_v6, %v1296_v5  ;;  %v1349_v5 = vld [vmem:[%s5524_s4 + $0x588] sm:$0xff]  ;;  %v4192_v6 = vpack.c.bf16 %v1544_v63, %v1495_v62  ;;  %v1548_v62 = vld [vmem:[%s5524_s4 + $0xbc0] sm:$0xff] }
 0x180   : > { %4103 = vmatpush1.bf16.msra.mxu0 %v4102_v3  ;;  %v1490_v3 = vld [vmem:[%s5524_s4 + $0x9f0] sm:$0xff] }
 0x181   : > { %4105 = vmatprep.subr.bf16.mxu0 %v4104_v8  ;;  %4121 = vmatpush1.bf16.msra.mxu1 %v4120_v14  ;;  %v1539_v8 = vld [vmem:[%s5524_s4 + $0xb78] sm:$0xff] }
 0x182   : > { %4123 = vmatprep.subr.bf16.mxu1 %v4122_v18  ;;  %v4150_v14 = vpack.c.bf16 %v1539_v8, %v1490_v3  ;;  %v1394_v18 = vld [vmem:[%s5524_s4 + $0x6f0] sm:$0xff]  ;;  %v4206_v3 = vpack.c.bf16 %v1350_v61, %v1301_v60  ;;  %v1399_v8 = vld [vmem:[%s5524_s4 + $0x718] sm:$0xff] }
 0x183   : > { %v4168_v25 = vpack.c.bf16 %v1443_v19, %v1394_v18  ;;  %v1447_v18 = vld [vmem:[%s5524_s4 + $0x898] sm:$0xff]  ;;  %v4196_v19 = vpack.c.bf16 %v1642_v11, %v1593_v10  ;;  %v1354_v60 = vld [vmem:[%s5524_s4 + $0x5b0] sm:$0xff] }
 0x184   : > { %4107 = vmatpush1.bf16.msra.mxu0 %v4106_v15  ;;  %v1588_v15 = vld [vmem:[%s5524_s4 + $0xd00] sm:$0xff]  ;;  %v1499_v61 = vld [vmem:[%s5524_s4 + $0xa38] sm:$0xff]  ;;  %v1646_v10 = vld [vmem:[%s5524_s4 + $0xed0] sm:$0x7] }
 0x185   : > { %4110 = vmatprep.subr.msk.bf16.mxu0 %vm5553_vm2, %v4108_v21  ;;  %4125 = vmatpush1.bf16.msra.mxu1 %v4124_v27  ;;  %v1637_v21 = vld [vmem:[%s5524_s4 + $0xe88] sm:$0x7]  ;;  %v1200_v27 = vld [vmem:[%s5524_s4 + $0xe0] sm:$0xff] }
 0x186   : > { %4127 = vmatprep.subr.bf16.mxu1 %v4126_v30  ;;  %v4155_v26 = vpack.c.bf16 %v1637_v21, %v1588_v15  ;;  %v1541_v30 = vld [vmem:[%s5524_s4 + $0xb88] sm:$0xff]  ;;  %v4182_v38 = vpack.c.bf16 %v1249_v32, %v1200_v27  ;;  %v4210_v15 = vpack.c.bf16 %v1448_v9, %v1399_v8  ;;  %v1595_v32 = vld [vmem:[%s5524_s4 + $0xd38] sm:$0xff]  ;;  %v1452_v8 = vld [vmem:[%s5524_s4 + $0x8c0] sm:$0xff] }
 0x187   : > { %v4172_v37 = vpack.c.bf16 %v1541_v30, %v1492_v29  ;;  %v1497_v21 = vld [vmem:[%s5524_s4 + $0xa28] sm:$0xff] }
 0x188   : > { %4113 = vmatpush1.bf16.msk.msra.mxu0 %vm5553_vm2, %v4111_v28  ;;  %v1545_v29 = vld [vmem:[%s5524_s4 + $0xba8] sm:$0xff] }
 0x189   : > { %4137 = vmatprep.subr.bf16.mxu0 %v4136_v33  ;;  %4129 = vmatpush1.bf16.msra.mxu1 %v4128_v39  ;;  %v1591_v33 = vld [vmem:[%s5524_s4 + $0xd18] sm:$0xff]  ;;  %v1298_v39 = vld [vmem:[%s5524_s4 + $0x3f0] sm:$0xff]  ;;  %v1597_v9 = vld [vmem:[%s5524_s4 + $0xd48] sm:$0xff] }
 0x18a   : > { %4132 = vmatprep.subr.msk.bf16.mxu1 %vm5553_vm2, %v4130_v43  ;;  %v1639_v43 = vld [vmem:[%s5524_s4 + $0xe98] sm:$0x7] }
 0x18b   : > { %3793 = vmatmul.mubr.msk.f32.vlgmr.msra.gmra.mrb[10].mxu0 %vm1668_vm3, %v5580_v45  ;;  %v4177_v52 = vpack.c.bf16 %v1639_v43, %v1590_v41  ;;  %v1643_v41 = vld [vmem:[%s5524_s4 + $0xeb8] sm:$0x7] }
 0x18c   : > { %4139 = vmatpush1.bf16.msra.mxu0 %v4138_v40  ;;  %2736 = vmatprep.mubr.f32.mxu0 %v4473_v42  ;;  %v4174_v40 = vpack.c.bf16 %v1640_v34, %v1591_v33  ;;  %v1644_v33 = vld [vmem:[%s5524_s4 + $0xec0] sm:$0x7]  ;;  %v1303_v34 = vld [vmem:[%s5524_s4 + $0x418] sm:$0xff] }
 0x18d   : > { %4141 = vmatprep.subr.bf16.mxu0 %v4140_v47  ;;  %4135 = vmatpush1.bf16.msk.msra.mxu1 %vm5553_vm2, %v4133_v53  ;;  %v1203_v47 = vld [vmem:[%s5524_s4 + $0xf8] sm:$0xff]  ;;  %v4186_v53 = vpack.c.bf16 %v1347_v46, %v1298_v39  ;;  %v4218_v39 = vpack.c.bf16 %v1644_v33, %v1595_v32  ;;  %v4228_v43 = vpack.c.bf16 %v1352_v35, %v1303_v34  ;;  %v1648_v32 = vld [vmem:[%s5524_s4 + $0xee0] sm:$0x7] }
 0x18e   : > { %4159 = vmatprep.subr.bf16.mxu1 %v4158_v56  ;;  %v4202_v55 = vpack.c.bf16 %v1252_v48, %v1203_v47  ;;  %v1202_v56 = vld [vmem:[%s5524_s4 + $0xf0] sm:$0xff]  ;;  %v1207_v46 = vld [vmem:[%s5524_s4 + $0x118] sm:$0xff]  ;;  %v1256_v47 = vld [vmem:[%s5524_s4 + $0x2a0] sm:$0xff] }
 0x18f   : > { %v4204_v0 = vpack.c.bf16 %v1251_v57, %v1202_v56  ;;  %v1401_v48 = vld [vmem:[%s5524_s4 + $0x728] sm:$0xff]  ;;  %v1255_v56 = vld [vmem:[%s5524_s4 + $0x298] sm:$0xff]  ;;  %v1356_v34 = vld [vmem:[%s5524_s4 + $0x5c0] sm:$0xff] }
 0x190   : > { %4143 = vmatpush1.bf16.msra.mxu0 %v4142_v54  ;;  %3796 = vmatmul.mubr.msk.f32.vlgmr.msra.gmra.mrb[10].mxu1 %vm1668_vm3, %v5580_v45  ;;  %v1493_v45 = vld [vmem:[%s5524_s4 + $0xa08] sm:$0xff]  ;;  %v1396_v54 = vld [vmem:[%s5524_s4 + $0x700] sm:$0xff]  ;;  %v4232_v57 = vpack.c.bf16 %v1450_v49, %v1401_v48  ;;  %v1307_v33 = vld [vmem:[%s5524_s4 + $0x438] sm:$0xff] }
 0x191   : > { %4145 = vmatprep.subr.bf16.mxu0 %v4144_v59  ;;  %4161 = vmatpush1.bf16.msra.mxu1 %v4160_v1  ;;  %v4170_v28 = vpack.c.bf16 %v1542_v22, %v1493_v45  ;;  %v1445_v59 = vld [vmem:[%s5524_s4 + $0x888] sm:$0xff]  ;;  %v1546_v45 = vld [vmem:[%s5524_s4 + $0xbb0] sm:$0xff] }
 0x192   : > { %2807 = vmatprep.mubr.f32.mxu1 %v4473_v42  ;;  %4163 = vmatprep.subr.bf16.mxu1 %v4162_v4  ;;  %v4190_v1 = vpack.c.bf16 %v1445_v59, %v1396_v54  ;;  %v1300_v4 = vld [vmem:[%s5524_s4 + $0x400] sm:$0xff]  ;;  %v1205_v22 = vld [vmem:[%s5524_s4 + $0x108] sm:$0xff]  ;;  %v4214_v27 = vpack.c.bf16 %v1546_v45, %v1497_v21  ;;  %v4246_v54 = vpack.c.bf16 %v1256_v47, %v1207_v46  ;;  %v1550_v21 = vld [vmem:[%s5524_s4 + $0xbd0] sm:$0xff] }
 0x193   : > { %v4208_v12 = vpack.c.bf16 %v1349_v5, %v1300_v4  ;;  %v4224_v30 = vpack.c.bf16 %v1254_v23, %v1205_v22  ;;  %v1305_v59 = vld [vmem:[%s5524_s4 + $0x428] sm:$0xff]  ;;  %v4236_v5 = vpack.c.bf16 %v1548_v62, %v1499_v61  ;;  %v1258_v22 = vld [vmem:[%s5524_s4 + $0x2b0] sm:$0xff]  ;;  %v1260_v46 = vld [vmem:[%s5524_s4 + $0x2c0] sm:$0xff] }
 0x194   : > { %4147 = vmatpush1.bf16.msra.mxu0 %v4146_v2  ;;  %v1494_v2 = vld [vmem:[%s5524_s4 + $0xa10] sm:$0xff]  ;;  %v1353_v4 = vld [vmem:[%s5524_s4 + $0x5a8] sm:$0xff]  ;;  %v1552_v61 = vld [vmem:[%s5524_s4 + $0xbe0] sm:$0xff] }
 0x195   : > { %4149 = vmatprep.subr.bf16.mxu0 %v4148_v7  ;;  %4165 = vmatpush1.bf16.msra.mxu1 %v4164_v13  ;;  %v1543_v7 = vld [vmem:[%s5524_s4 + $0xb98] sm:$0xff]  ;;  %v1209_v45 = vld [vmem:[%s5524_s4 + $0x128] sm:$0xff]  ;;  %v1454_v48 = vld [vmem:[%s5524_s4 + $0x8d0] sm:$0xff] }
 0x196   : > { %4167 = vmatprep.subr.bf16.mxu1 %v4166_v16  ;;  %v4194_v13 = vpack.c.bf16 %v1543_v7, %v1494_v2  ;;  %v1398_v16 = vld [vmem:[%s5524_s4 + $0x710] sm:$0xff]  ;;  %v4250_v2 = vpack.c.bf16 %v1354_v60, %v1305_v59  ;;  %v1403_v7 = vld [vmem:[%s5524_s4 + $0x738] sm:$0xff]  ;;  %v1405_v47 = vld [vmem:[%s5524_s4 + $0x748] sm:$0xff] }
 0x197   : > { %v4212_v24 = vpack.c.bf16 %v1447_v18, %v1398_v16  ;;  %v1451_v16 = vld [vmem:[%s5524_s4 + $0x8b8] sm:$0xff]  ;;  %v4240_v18 = vpack.c.bf16 %v1646_v10, %v1597_v9  ;;  %v1358_v59 = vld [vmem:[%s5524_s4 + $0x5d0] sm:$0xff] }
 0x198   : > { %4151 = vmatpush1.bf16.msra.mxu0 %v4150_v14  ;;  %v1592_v14 = vld [vmem:[%s5524_s4 + $0xd20] sm:$0xff]  ;;  %v1503_v60 = vld [vmem:[%s5524_s4 + $0xa58] sm:$0xff]  ;;  %v1650_v9 = vld [vmem:[%s5524_s4 + $0xef0] sm:$0x7] }
 0x199   : > { %4154 = vmatprep.subr.msk.bf16.mxu0 %vm5553_vm2, %v4152_v20  ;;  %4169 = vmatpush1.bf16.msra.mxu1 %v4168_v25  ;;  %v1641_v20 = vld [vmem:[%s5524_s4 + $0xea8] sm:$0x7] }
 0x19a   : > { %4171 = vmatprep.subr.bf16.mxu1 %v4170_v28  ;;  %v4199_v25 = vpack.c.bf16 %v1641_v20, %v1592_v14  ;;  %v1496_v28 = vld [vmem:[%s5524_s4 + $0xa20] sm:$0xff]  ;;  %v4254_v14 = vpack.c.bf16 %v1452_v8, %v1403_v7  ;;  %v1501_v20 = vld [vmem:[%s5524_s4 + $0xa48] sm:$0xff] }
 0x19b   : > { %v4216_v36 = vpack.c.bf16 %v1545_v29, %v1496_v28  ;;  %v1549_v28 = vld [vmem:[%s5524_s4 + $0xbc8] sm:$0xff]  ;;  %v4268_v29 = vpack.c.bf16 %v1258_v22, %v1209_v45  ;;  %v1456_v7 = vld [vmem:[%s5524_s4 + $0x8e0] sm:$0xff]  ;;  %v1262_v45 = vld [vmem:[%s5524_s4 + $0x2d0] sm:$0xff] }
 0x19c   : > { %4157 = vmatpush1.bf16.msk.msra.mxu0 %vm5553_vm2, %v4155_v26  ;;  %v1204_v26 = vld [vmem:[%s5524_s4 + $0x100] sm:$0xff]  ;;  %v1601_v8 = vld [vmem:[%s5524_s4 + $0xd68] sm:$0xff] }
 0x19d   : > { %4181 = vmatprep.subr.bf16.mxu0 %v4180_v31  ;;  %4173 = vmatpush1.bf16.msra.mxu1 %v4172_v37  ;;  %v1253_v31 = vld [vmem:[%s5524_s4 + $0x288] sm:$0xff] }
 0x19e   : > { %4176 = vmatprep.subr.msk.bf16.mxu1 %vm5553_vm2, %v4174_v40  ;;  %v4226_v37 = vpack.c.bf16 %v1253_v31, %v1204_v26  ;;  %v1594_v40 = vld [vmem:[%s5524_s4 + $0xd30] sm:$0xff]  ;;  %v4258_v26 = vpack.c.bf16 %v1550_v21, %v1501_v20  ;;  %v1599_v31 = vld [vmem:[%s5524_s4 + $0xd58] sm:$0xff]  ;;  %v1213_v21 = vld [vmem:[%s5524_s4 + $0x148] sm:$0xff] }
 0x19f   : > { %3799 = vmatmul.mubr.msk.f32.vlgmr.msra.gmra.mrb[12].mxu0 %vm1668_vm3, %v5919_v51  ;;  %v4221_v50 = vpack.c.bf16 %v1643_v41, %v1594_v40  ;;  %v1647_v40 = vld [vmem:[%s5524_s4 + $0xed8] sm:$0x7]  ;;  %v4272_v41 = vpack.c.bf16 %v1356_v34, %v1307_v33  ;;  %v1554_v20 = vld [vmem:[%s5524_s4 + $0xbf0] sm:$0xff]  ;;  %v1360_v33 = vld [vmem:[%s5524_s4 + $0x5e0] sm:$0xff] }
 0x1a0   : > { %4183 = vmatpush1.bf16.msra.mxu0 %v4182_v38  ;;  %2878 = vmatprep.mubr.f32.mxu0 %v4473_v42  ;;  %v1302_v38 = vld [vmem:[%s5524_s4 + $0x410] sm:$0xff] }
 0x1a1   : > { %4185 = vmatprep.subr.bf16.mxu0 %v4184_v44  ;;  %4179 = vmatpush1.bf16.msk.msra.mxu1 %vm5553_vm2, %v4177_v52  ;;  %v1351_v44 = vld [vmem:[%s5524_s4 + $0x598] sm:$0xff] }
 0x1a2   : > { %4203 = vmatprep.subr.bf16.mxu1 %v4202_v55  ;;  %v4230_v52 = vpack.c.bf16 %v1351_v44, %v1302_v38  ;;  %v1206_v55 = vld [vmem:[%s5524_s4 + $0x110] sm:$0xff]  ;;  %v4262_v38 = vpack.c.bf16 %v1648_v32, %v1599_v31  ;;  %v1211_v44 = vld [vmem:[%s5524_s4 + $0x138] sm:$0xff]  ;;  %v1652_v31 = vld [vmem:[%s5524_s4 + $0xf00] sm:$0x7] }
 0x1a3   : > { %v4248_v63 = vpack.c.bf16 %v1255_v56, %v1206_v55  ;;  %v1259_v55 = vld [vmem:[%s5524_s4 + $0x2b8] sm:$0xff]  ;;  %v4276_v56 = vpack.c.bf16 %v1454_v48, %v1405_v47  ;;  %v1458_v47 = vld [vmem:[%s5524_s4 + $0x8f0] sm:$0xff] }
 0x1a4   : > { %4187 = vmatpush1.bf16.msra.mxu0 %v4186_v53  ;;  %3802 = vmatmul.mubr.msk.f32.vlgmr.msra.gmra.mrb[12].mxu1 %vm1668_vm3, %v5919_v51  ;;  %v1400_v53 = vld [vmem:[%s5524_s4 + $0x720] sm:$0xff]  ;;  %v1311_v32 = vld [vmem:[%s5524_s4 + $0x458] sm:$0xff] }
 0x1a5   : > { %4189 = vmatprep.subr.bf16.mxu0 %v4188_v58  ;;  %4205 = vmatpush1.bf16.msra.mxu1 %v4204_v0  ;;  %v1449_v58 = vld [vmem:[%s5524_s4 + $0x8a8] sm:$0xff] }
 0x1a6   : > { %2949 = vmatprep.mubr.f32.mxu1 %v4473_v42  ;;  %4207 = vmatprep.subr.bf16.mxu1 %v4206_v3  ;;  %v4234_v0 = vpack.c.bf16 %v1449_v58, %v1400_v53  ;;  %v1304_v3 = vld [vmem:[%s5524_s4 + $0x420] sm:$0xff]  ;;  %v4290_v53 = vpack.c.bf16 %v1260_v46, %v1211_v44  ;;  %v1309_v58 = vld [vmem:[%s5524_s4 + $0x448] sm:$0xff] }
 0x1a7   : > { %v4252_v11 = vpack.c.bf16 %v1353_v4, %v1304_v3  ;;  %v1357_v3 = vld [vmem:[%s5524_s4 + $0x5c8] sm:$0xff]  ;;  %v4280_v4 = vpack.c.bf16 %v1552_v61, %v1503_v60  ;;  %v1264_v44 = vld [vmem:[%s5524_s4 + $0x2e0] sm:$0xff] }
 0x1a8   : > { %4191 = vmatpush1.bf16.msra.mxu0 %v4190_v1  ;;  %v1498_v1 = vld [vmem:[%s5524_s4 + $0xa30] sm:$0xff]  ;;  %v1409_v46 = vld [vmem:[%s5524_s4 + $0x768] sm:$0xff]  ;;  %v1556_v60 = vld [vmem:[%s5524_s4 + $0xc00] sm:$0xff] }
 0x1a9   : > { %4193 = vmatprep.subr.bf16.mxu0 %v4192_v6  ;;  %4209 = vmatpush1.bf16.msra.mxu1 %v4208_v12  ;;  %v1547_v6 = vld [vmem:[%s5524_s4 + $0xbb8] sm:$0xff] }
 0x1aa   : > { %4211 = vmatprep.subr.bf16.mxu1 %v4210_v15  ;;  %v4238_v12 = vpack.c.bf16 %v1547_v6, %v1498_v1  ;;  %v1402_v15 = vld [vmem:[%s5524_s4 + $0x730] sm:$0xff]  ;;  %v4294_v1 = vpack.c.bf16 %v1358_v59, %v1309_v58  ;;  %v1407_v6 = vld [vmem:[%s5524_s4 + $0x758] sm:$0xff] }
 0x1ab   : > { %v4256_v23 = vpack.c.bf16 %v1451_v16, %v1402_v15  ;;  %v1455_v15 = vld [vmem:[%s5524_s4 + $0x8d8] sm:$0xff]  ;;  %v4284_v16 = vpack.c.bf16 %v1650_v9, %v1601_v8  ;;  %v1362_v58 = vld [vmem:[%s5524_s4 + $0x5f0] sm:$0xff] }
 0x1ac   : > { %4195 = vmatpush1.bf16.msra.mxu0 %v4194_v13  ;;  %v1596_v13 = vld [vmem:[%s5524_s4 + $0xd40] sm:$0xff]  ;;  %v1507_v59 = vld [vmem:[%s5524_s4 + $0xa78] sm:$0xff]  ;;  %v1654_v8 = vld [vmem:[%s5524_s4 + $0xf10] sm:$0x7] }
 0x1ad   : > { %4198 = vmatprep.subr.msk.bf16.mxu0 %vm5553_vm2, %v4196_v19  ;;  %4213 = vmatpush1.bf16.msra.mxu1 %v4212_v24  ;;  %v1645_v19 = vld [vmem:[%s5524_s4 + $0xec8] sm:$0x7] }
 0x1ae   : > { %4215 = vmatprep.subr.bf16.mxu1 %v4214_v27  ;;  %v4243_v24 = vpack.c.bf16 %v1645_v19, %v1596_v13  ;;  %v1500_v27 = vld [vmem:[%s5524_s4 + $0xa40] sm:$0xff]  ;;  %v4298_v13 = vpack.c.bf16 %v1456_v7, %v1407_v6  ;;  %v1505_v19 = vld [vmem:[%s5524_s4 + $0xa68] sm:$0xff] }
 0x1af   : > { %v4260_v35 = vpack.c.bf16 %v1549_v28, %v1500_v27  ;;  %v1553_v27 = vld [vmem:[%s5524_s4 + $0xbe8] sm:$0xff]  ;;  %v4312_v28 = vpack.c.bf16 %v1262_v45, %v1213_v21  ;;  %v1460_v6 = vld [vmem:[%s5524_s4 + $0x900] sm:$0xff]  ;;  %v1266_v21 = vld [vmem:[%s5524_s4 + $0x2f0] sm:$0xff] }
 0x1b0   : > { %4201 = vmatpush1.bf16.msk.msra.mxu0 %vm5553_vm2, %v4199_v25  ;;  %v1208_v25 = vld [vmem:[%s5524_s4 + $0x120] sm:$0xff]  ;;  %v1605_v7 = vld [vmem:[%s5524_s4 + $0xd88] sm:$0xff] }
 0x1b1   : > { %4225 = vmatprep.subr.bf16.mxu0 %v4224_v30  ;;  %4217 = vmatpush1.bf16.msra.mxu1 %v4216_v36  ;;  %v1257_v30 = vld [vmem:[%s5524_s4 + $0x2a8] sm:$0xff] }
 0x1b2   : > { %4220 = vmatprep.subr.msk.bf16.mxu1 %vm5553_vm2, %v4218_v39  ;;  %v4270_v36 = vpack.c.bf16 %v1257_v30, %v1208_v25  ;;  %v1598_v39 = vld [vmem:[%s5524_s4 + $0xd50] sm:$0xff]  ;;  %v4302_v25 = vpack.c.bf16 %v1554_v20, %v1505_v19  ;;  %v1603_v30 = vld [vmem:[%s5524_s4 + $0xd78] sm:$0xff]  ;;  %v1217_v20 = vld [vmem:[%s5524_s4 + $0x168] sm:$0xff] }
 0x1b3   : > { %3805 = vmatmul.mubr.msk.f32.vlgmr.msra.gmra.mrb[14].mxu0 %vm1668_vm3, %v5919_v51  ;;  %v4265_v49 = vpack.c.bf16 %v1647_v40, %v1598_v39  ;;  %v1651_v39 = vld [vmem:[%s5524_s4 + $0xef8] sm:$0x7]  ;;  %v4316_v40 = vpack.c.bf16 %v1360_v33, %v1311_v32  ;;  %v1558_v19 = vld [vmem:[%s5524_s4 + $0xc10] sm:$0xff]  ;;  %v1364_v32 = vld [vmem:[%s5524_s4 + $0x600] sm:$0xff] }
 0x1b4   : > { %4227 = vmatpush1.bf16.msra.mxu0 %v4226_v37  ;;  %3020 = vmatprep.mubr.f32.mxu0 %v4473_v42  ;;  %v1306_v37 = vld [vmem:[%s5524_s4 + $0x430] sm:$0xff] }
 0x1b5   : > { %4229 = vmatprep.subr.bf16.mxu0 %v4228_v43  ;;  %4223 = vmatpush1.bf16.msk.msra.mxu1 %vm5553_vm2, %v4221_v50  ;;  %v1355_v43 = vld [vmem:[%s5524_s4 + $0x5b8] sm:$0xff] }
 0x1b6   : > { %4247 = vmatprep.subr.bf16.mxu1 %v4246_v54  ;;  %v4274_v50 = vpack.c.bf16 %v1355_v43, %v1306_v37  ;;  %v1210_v54 = vld [vmem:[%s5524_s4 + $0x130] sm:$0xff]  ;;  %v4306_v37 = vpack.c.bf16 %v1652_v31, %v1603_v30  ;;  %v1215_v43 = vld [vmem:[%s5524_s4 + $0x158] sm:$0xff]  ;;  %v1656_v30 = vld [vmem:[%s5524_s4 + $0xf20] sm:$0x7] }
 0x1b7   : > { %v4292_v62 = vpack.c.bf16 %v1259_v55, %v1210_v54  ;;  %v1263_v54 = vld [vmem:[%s5524_s4 + $0x2d8] sm:$0xff]  ;;  %v4320_v55 = vpack.c.bf16 %v1458_v47, %v1409_v46  ;;  %v1462_v46 = vld [vmem:[%s5524_s4 + $0x910] sm:$0xff] }
 0x1b8   : > { %4231 = vmatpush1.bf16.msra.mxu0 %v4230_v52  ;;  %3808 = vmatmul.mubr.msk.f32.vlgmr.msra.gmra.mrb[14].mxu1 %vm1668_vm3, %v5919_v51  ;;  %v1404_v52 = vld [vmem:[%s5524_s4 + $0x740] sm:$0xff]  ;;  %v1315_v31 = vld [vmem:[%s5524_s4 + $0x478] sm:$0xff] }
 0x1b9   : > { %4233 = vmatprep.subr.bf16.mxu0 %v4232_v57  ;;  %4249 = vmatpush1.bf16.msra.mxu1 %v4248_v63  ;;  %v1453_v57 = vld [vmem:[%s5524_s4 + $0x8c8] sm:$0xff] }
 0x1ba   : > { %3091 = vmatprep.mubr.f32.mxu1 %v4473_v42  ;;  %4251 = vmatprep.subr.bf16.mxu1 %v4250_v2  ;;  %v4278_v63 = vpack.c.bf16 %v1453_v57, %v1404_v52  ;;  %v1308_v2 = vld [vmem:[%s5524_s4 + $0x440] sm:$0xff]  ;;  %v4334_v52 = vpack.c.bf16 %v1264_v44, %v1215_v43  ;;  %v1313_v57 = vld [vmem:[%s5524_s4 + $0x468] sm:$0xff] }
 0x1bb   : > { %v4296_v10 = vpack.c.bf16 %v1357_v3, %v1308_v2  ;;  %v1361_v2 = vld [vmem:[%s5524_s4 + $0x5e8] sm:$0xff]  ;;  %v4324_v3 = vpack.c.bf16 %v1556_v60, %v1507_v59  ;;  %v1268_v43 = vld [vmem:[%s5524_s4 + $0x300] sm:$0xff] }
 0x1bc   : > { %4235 = vmatpush1.bf16.msra.mxu0 %v4234_v0  ;;  %v1502_v0 = vld [vmem:[%s5524_s4 + $0xa50] sm:$0xff]  ;;  %v1413_v44 = vld [vmem:[%s5524_s4 + $0x788] sm:$0xff]  ;;  %v1560_v59 = vld [vmem:[%s5524_s4 + $0xc20] sm:$0xff] }
 0x1bd   : > { %4237 = vmatprep.subr.bf16.mxu0 %v4236_v5  ;;  %4253 = vmatpush1.bf16.msra.mxu1 %v4252_v11  ;;  %v1551_v5 = vld [vmem:[%s5524_s4 + $0xbd8] sm:$0xff] }
 0x1be   : > { %4255 = vmatprep.subr.bf16.mxu1 %v4254_v14  ;;  %v4282_v11 = vpack.c.bf16 %v1551_v5, %v1502_v0  ;;  %v1406_v14 = vld [vmem:[%s5524_s4 + $0x750] sm:$0xff]  ;;  %v4338_v0 = vpack.c.bf16 %v1362_v58, %v1313_v57  ;;  %v1411_v5 = vld [vmem:[%s5524_s4 + $0x778] sm:$0xff] }
 0x1bf   : > { %v4300_v22 = vpack.c.bf16 %v1455_v15, %v1406_v14  ;;  %v1459_v14 = vld [vmem:[%s5524_s4 + $0x8f8] sm:$0xff]  ;;  %v4328_v15 = vpack.c.bf16 %v1654_v8, %v1605_v7  ;;  %v1366_v57 = vld [vmem:[%s5524_s4 + $0x610] sm:$0xff] }
 0x1c0   : > { %4239 = vmatpush1.bf16.msra.mxu0 %v4238_v12  ;;  %v1600_v12 = vld [vmem:[%s5524_s4 + $0xd60] sm:$0xff]  ;;  %v1511_v58 = vld [vmem:[%s5524_s4 + $0xa98] sm:$0xff]  ;;  %v1658_v7 = vld [vmem:[%s5524_s4 + $0xf30] sm:$0x7] }
 0x1c1   : > { %4242 = vmatprep.subr.msk.bf16.mxu0 %vm5553_vm2, %v4240_v18  ;;  %4257 = vmatpush1.bf16.msra.mxu1 %v4256_v23  ;;  %v1649_v18 = vld [vmem:[%s5524_s4 + $0xee8] sm:$0x7] }
 0x1c2   : > { %4259 = vmatprep.subr.bf16.mxu1 %v4258_v26  ;;  %v4287_v23 = vpack.c.bf16 %v1649_v18, %v1600_v12  ;;  %v1504_v26 = vld [vmem:[%s5524_s4 + $0xa60] sm:$0xff]  ;;  %v4342_v12 = vpack.c.bf16 %v1460_v6, %v1411_v5  ;;  %v1509_v18 = vld [vmem:[%s5524_s4 + $0xa88] sm:$0xff] }
 0x1c3   : > { %v4304_v34 = vpack.c.bf16 %v1553_v27, %v1504_v26  ;;  %v1557_v26 = vld [vmem:[%s5524_s4 + $0xc08] sm:$0xff]  ;;  %v4356_v27 = vpack.c.bf16 %v1266_v21, %v1217_v20  ;;  %v1464_v5 = vld [vmem:[%s5524_s4 + $0x920] sm:$0xff] }
 0x1c4   : > { %4245 = vmatpush1.bf16.msk.msra.mxu0 %vm5553_vm2, %v4243_v24  ;;  %v1212_v24 = vld [vmem:[%s5524_s4 + $0x140] sm:$0xff]  ;;  %v1609_v6 = vld [vmem:[%s5524_s4 + $0xda8] sm:$0xff] }
 0x1c5   : > { %4269 = vmatprep.subr.bf16.mxu0 %v4268_v29  ;;  %4261 = vmatpush1.bf16.msra.mxu1 %v4260_v35  ;;  %v1261_v29 = vld [vmem:[%s5524_s4 + $0x2c8] sm:$0xff] }
 0x1c6   : > { %4264 = vmatprep.subr.msk.bf16.mxu1 %vm5553_vm2, %v4262_v38  ;;  %v4314_v35 = vpack.c.bf16 %v1261_v29, %v1212_v24  ;;  %v1602_v38 = vld [vmem:[%s5524_s4 + $0xd70] sm:$0xff]  ;;  %v4346_v24 = vpack.c.bf16 %v1558_v19, %v1509_v18  ;;  %v1607_v29 = vld [vmem:[%s5524_s4 + $0xd98] sm:$0xff]  ;;  %v1513_v18 = vld [vmem:[%s5524_s4 + $0xaa8] sm:$0xff] }
 0x1c7   : > { %3811 = vmatmul.mubr.msk.f32.vlgmr.msra.gmra.mrb[16].mxu0 %vm1668_vm3, %v5919_v51  ;;  %v4309_v48 = vpack.c.bf16 %v1651_v39, %v1602_v38  ;;  %v1655_v38 = vld [vmem:[%s5524_s4 + $0xf18] sm:$0x7]  ;;  %v4360_v39 = vpack.c.bf16 %v1364_v32, %v1315_v31  ;;  %v1562_v19 = vld [vmem:[%s5524_s4 + $0xc30] sm:$0xff]  ;;  %v1660_v32 = vld [vmem:[%s5524_s4 + $0xf40] sm:$0x7] }
 0x1c8   : > { %4271 = vmatpush1.bf16.msra.mxu0 %v4270_v36  ;;  %3162 = vmatprep.mubr.f32.mxu0 %v4473_v42  ;;  %v1310_v36 = vld [vmem:[%s5524_s4 + $0x450] sm:$0xff]  ;;  %v1611_v31 = vld [vmem:[%s5524_s4 + $0xdb8] sm:$0xff] }
 0x1c9   : > { %4273 = vmatprep.subr.bf16.mxu0 %v4272_v41  ;;  %4267 = vmatpush1.bf16.msk.msra.mxu1 %vm5553_vm2, %v4265_v49  ;;  %v1359_v41 = vld [vmem:[%s5524_s4 + $0x5d8] sm:$0xff] }
 0x1ca   : > { %4291 = vmatprep.subr.bf16.mxu1 %v4290_v53  ;;  %v4318_v49 = vpack.c.bf16 %v1359_v41, %v1310_v36  ;;  %v1214_v53 = vld [vmem:[%s5524_s4 + $0x150] sm:$0xff]  ;;  %v4350_v36 = vpack.c.bf16 %v1656_v30, %v1607_v29  ;;  %v1219_v41 = vld [vmem:[%s5524_s4 + $0x178] sm:$0xff]  ;;  %v1269_v30 = vld [vmem:[%s5524_s4 + $0x308] sm:$0xff] }
 0x1cb   : > { %v4336_v61 = vpack.c.bf16 %v1263_v54, %v1214_v53  ;;  %v1267_v53 = vld [vmem:[%s5524_s4 + $0x2f8] sm:$0xff]  ;;  %v4364_v54 = vpack.c.bf16 %v1462_v46, %v1413_v44 }
 0x1cc   : > { %4275 = vmatpush1.bf16.msra.mxu0 %v4274_v50  ;;  %3814 = vmatmul.mubr.msk.f32.vlgmr.msra.gmra.mrb[16].mxu1 %vm1668_vm3, %v5919_v51  ;;  %v1408_v50 = vld [vmem:[%s5524_s4 + $0x760] sm:$0xff] }
 0x1cd   : > { %4277 = vmatprep.subr.bf16.mxu0 %v4276_v56  ;;  %4293 = vmatpush1.bf16.msra.mxu1 %v4292_v62  ;;  %v1457_v56 = vld [vmem:[%s5524_s4 + $0x8e8] sm:$0xff] }
 0x1ce   : > { %3233 = vmatprep.mubr.f32.mxu1 %v4473_v42  ;;  %4295 = vmatprep.subr.bf16.mxu1 %v4294_v1  ;;  %v4322_v62 = vpack.c.bf16 %v1457_v56, %v1408_v50  ;;  %v1312_v1 = vld [vmem:[%s5524_s4 + $0x460] sm:$0xff]  ;;  %v4378_v50 = vpack.c.bf16 %v1268_v43, %v1219_v41  ;;  %v1317_v56 = vld [vmem:[%s5524_s4 + $0x488] sm:$0xff]  ;;  %v1367_v41 = vld [vmem:[%s5524_s4 + $0x618] sm:$0xff] }
 0x1cf   : > { %v4340_v9 = vpack.c.bf16 %v1361_v2, %v1312_v1  ;;  %v1365_v1 = vld [vmem:[%s5524_s4 + $0x608] sm:$0xff]  ;;  %v4368_v2 = vpack.c.bf16 %v1560_v59, %v1511_v58  ;;  %v1612_v59 = vld [vmem:[%s5524_s4 + $0xdc0] sm:$0xff] }
 0x1d0   : > { %4279 = vmatpush1.bf16.msra.mxu0 %v4278_v63  ;;  %v1506_v63 = vld [vmem:[%s5524_s4 + $0xa70] sm:$0xff] }
 0x1d1   : > { %4281 = vmatprep.subr.bf16.mxu0 %v4280_v4  ;;  %4297 = vmatpush1.bf16.msra.mxu1 %v4296_v10  ;;  %v1555_v4 = vld [vmem:[%s5524_s4 + $0xbf8] sm:$0xff] }
 0x1d2   : > { %4299 = vmatprep.subr.bf16.mxu1 %v4298_v13  ;;  %v4326_v10 = vpack.c.bf16 %v1555_v4, %v1506_v63  ;;  %v1410_v13 = vld [vmem:[%s5524_s4 + $0x770] sm:$0xff]  ;;  %v4382_v63 = vpack.c.bf16 %v1366_v57, %v1317_v56  ;;  %v1415_v4 = vld [vmem:[%s5524_s4 + $0x798] sm:$0xff] }
 0x1d3   : > { %v4344_v45 = vpack.c.bf16 %v1459_v14, %v1410_v13  ;;  %v1414_v13 = vld [vmem:[%s5524_s4 + $0x790] sm:$0xff]  ;;  %v1463_v14 = vld [vmem:[%s5524_s4 + $0x918] sm:$0xff] }
 0x1d4   : > { %4283 = vmatpush1.bf16.msra.mxu0 %v4282_v11  ;;  %v1604_v11 = vld [vmem:[%s5524_s4 + $0xd80] sm:$0xff]  ;;  %v1514_v56 = vld [vmem:[%s5524_s4 + $0xab0] sm:$0xff]  ;;  %v1563_v57 = vld [vmem:[%s5524_s4 + $0xc38] sm:$0xff] }
 0x1d5   : > { %4286 = vmatprep.subr.msk.bf16.mxu0 %vm5553_vm2, %v4284_v16  ;;  %4301 = vmatpush1.bf16.msra.mxu1 %v4300_v22  ;;  %v1653_v16 = vld [vmem:[%s5524_s4 + $0xf08] sm:$0x7]  ;;  %v4410_v58 = vpack.c.bf16 %v1563_v57, %v1514_v56 }
 0x1d6   : > { %4303 = vmatprep.subr.bf16.mxu1 %v4302_v25  ;;  %v4331_v22 = vpack.c.bf16 %v1653_v16, %v1604_v11  ;;  %v1508_v25 = vld [vmem:[%s5524_s4 + $0xa80] sm:$0xff]  ;;  %v1657_v16 = vld [vmem:[%s5524_s4 + $0xf28] sm:$0x7] }
 0x1d7   : > { %v4348_v33 = vpack.c.bf16 %v1557_v26, %v1508_v25  ;;  %v1608_v11 = vld [vmem:[%s5524_s4 + $0xda0] sm:$0xff]  ;;  %v4390_v26 = vpack.c.bf16 %v1562_v19, %v1513_v18 }
 0x1d8   : > { %4289 = vmatpush1.bf16.msk.msra.mxu0 %vm5553_vm2, %v4287_v23  ;;  %v1216_v23 = vld [vmem:[%s5524_s4 + $0x160] sm:$0xff] }
 0x1d9   : > { %4313 = vmatprep.subr.bf16.mxu0 %v4312_v28  ;;  %4305 = vmatpush1.bf16.msra.mxu1 %v4304_v34  ;;  %v1265_v28 = vld [vmem:[%s5524_s4 + $0x2e8] sm:$0xff]  ;;  %v1220_v25 = vld [vmem:[%s5524_s4 + $0x180] sm:$0xff] }
 0x1da   : > { %4308 = vmatprep.subr.msk.bf16.mxu1 %vm5553_vm2, %v4306_v37  ;;  %v4358_v34 = vpack.c.bf16 %v1265_v28, %v1216_v23  ;;  %v1606_v37 = vld [vmem:[%s5524_s4 + $0xd90] sm:$0xff]  ;;  %v1561_v28 = vld [vmem:[%s5524_s4 + $0xc28] sm:$0xff] }
 0x1db   : > { %3817 = vmatmul.mubr.msk.f32.vlgmr.msra.gmra.mrb[18].mxu0 %vm1668_vm3, %v5919_v51  ;;  %v4353_v47 = vpack.c.bf16 %v1655_v38, %v1606_v37  ;;  %v1610_v37 = vld [vmem:[%s5524_s4 + $0xdb0] sm:$0xff]  ;;  %v1659_v38 = vld [vmem:[%s5524_s4 + $0xf38] sm:$0x7] }
 0x1dc   : > { %4315 = vmatpush1.bf16.msra.mxu0 %v4314_v35  ;;  %3304 = vmatprep.mubr.f32.mxu0 %v4473_v42  ;;  %v1314_v35 = vld [vmem:[%s5524_s4 + $0x470] sm:$0xff] }
 0x1dd   : > { %4317 = vmatprep.subr.bf16.mxu0 %v4316_v40  ;;  %4311 = vmatpush1.bf16.msk.msra.mxu1 %vm5553_vm2, %v4309_v48  ;;  %v1363_v40 = vld [vmem:[%s5524_s4 + $0x5f8] sm:$0xff] }
 0x1de   : > { %4335 = vmatprep.subr.bf16.mxu1 %v4334_v52  ;;  %v4362_v48 = vpack.c.bf16 %v1363_v40, %v1314_v35  ;;  %v1218_v52 = vld [vmem:[%s5524_s4 + $0x170] sm:$0xff]  ;;  %v4401_v35 = vpack.c.bf16 %v1269_v30, %v1220_v25 }
 0x1df   : > { %v4380_v60 = vpack.c.bf16 %v1267_v53, %v1218_v52  ;;  %v1318_v40 = vld [vmem:[%s5524_s4 + $0x490] sm:$0xff]  ;;  %v1416_v52 = vld [vmem:[%s5524_s4 + $0x7a0] sm:$0xff]  ;;  %v1465_v53 = vld [vmem:[%s5524_s4 + $0x928] sm:$0xff] }
 0x1e0   : > { %4319 = vmatpush1.bf16.msra.mxu0 %v4318_v49  ;;  %3820 = vmatmul.mubr.msk.f32.vlgmr.msra.gmra.mrb[18].mxu1 %vm1668_vm3, %v5919_v51  ;;  %v1412_v49 = vld [vmem:[%s5524_s4 + $0x780] sm:$0xff] }
 0x1e1   : > { %4321 = vmatprep.subr.bf16.mxu0 %v4320_v55  ;;  %4337 = vmatpush1.bf16.msra.mxu1 %v4336_v61  ;;  %v1461_v55 = vld [vmem:[%s5524_s4 + $0x908] sm:$0xff] }
 0x1e2   : > { %3375 = vmatprep.mubr.f32.mxu1 %v4473_v42  ;;  %4339 = vmatprep.subr.bf16.mxu1 %v4338_v0  ;;  %v4366_v61 = vpack.c.bf16 %v1461_v55, %v1412_v49  ;;  %v1316_v0 = vld [vmem:[%s5524_s4 + $0x480] sm:$0xff]  ;;  %v4404_v49 = vpack.c.bf16 %v1367_v41, %v1318_v40  ;;  %v4407_v55 = vpack.c.bf16 %v1465_v53, %v1416_v52 }
 0x1e3   : > { %v4384_v8 = vpack.c.bf16 %v1365_v1, %v1316_v0 }
 0x1e4   : > { %4323 = vmatpush1.bf16.msra.mxu0 %v4322_v62  ;;  %v1510_v62 = vld [vmem:[%s5524_s4 + $0xa90] sm:$0xff] }
 0x1e5   : > { %4325 = vmatprep.subr.bf16.mxu0 %v4324_v3  ;;  %4341 = vmatpush1.bf16.msra.mxu1 %v4340_v9  ;;  %v1559_v3 = vld [vmem:[%s5524_s4 + $0xc18] sm:$0xff]  ;;  %v6173_v9 = vpop.permute.xlu0 %1665 }
 0x1e6   : > { %4343 = vmatprep.subr.bf16.mxu1 %v4342_v12  ;;  %v4386_v12 = vpack.c.bf16 %v1464_v5, %v1415_v4 }
 0x1e8   : > { %4327 = vmatpush1.bf16.msra.mxu0 %v4326_v10  ;;  %v4370_v10 = vpack.c.bf16 %v1559_v3, %v1510_v62 }
 0x1e9   : > { %4330 = vmatprep.subr.msk.bf16.mxu0 %vm5553_vm2, %v4328_v15  ;;  %4345 = vmatpush1.bf16.msra.mxu1 %v4344_v45  ;;  %v4372_v15 = vpack.c.bf16 %v1658_v7, %v1609_v6 }
 0x1ea   : > { %4347 = vmatprep.subr.bf16.mxu1 %v4346_v24  ;;  %v4375_v24 = vpack.c.bf16 %v1657_v16, %v1608_v11 }
 0x1ec   : > { %4333 = vmatpush1.bf16.msk.msra.mxu0 %vm5553_vm2, %v4331_v22  ;;  %v4388_v22 = vpack.c.bf16 %v1463_v14, %v1414_v13 }
 0x1ed   : > { %4357 = vmatprep.subr.bf16.mxu0 %v4356_v27  ;;  %4349 = vmatpush1.bf16.msra.mxu1 %v4348_v33  ;;  %v1512_v27 = vld [vmem:[%s5524_s4 + $0xaa0] sm:$0xff] }
 0x1ee   : > { %4352 = vmatprep.subr.msk.bf16.mxu1 %vm5553_vm2, %v4350_v36  ;;  %v4394_v36 = vpack.c.bf16 %v1660_v32, %v1611_v31 }
 0x1ef   : > { %3823 = vmatmul.mubr.msk.f32.vlgmr.msra.gmra.mrb[20].mxu0 %vm1668_vm3, %v5919_v51 }
 0x1f0   : > { %4359 = vmatpush1.bf16.msra.mxu0 %v4358_v34  ;;  %3446 = vmatprep.mubr.f32.mxu0 %v4473_v42  ;;  %v4392_v34 = vpack.c.bf16 %v1561_v28, %v1512_v27 }
 0x1f1   : > { %4361 = vmatprep.subr.bf16.mxu0 %v4360_v39  ;;  %4355 = vmatpush1.bf16.msk.msra.mxu1 %vm5553_vm2, %v4353_v47  ;;  %v4476_v39 = vmov 0.0|0.0  }
 0x1f2   : > { %4379 = vmatprep.subr.bf16.mxu1 %v4378_v50 }
 0x1f4   : > { %4363 = vmatpush1.bf16.msra.mxu0 %v4362_v48  ;;  %3826 = vmatmul.mubr.msk.f32.vlgmr.msra.gmra.mrb[20].mxu1 %vm1668_vm3, %v5919_v51  ;;  %v4397_v48 = vpack.c.bf16 %v1659_v38, %v1610_v37 }
 0x1f5   : > { %4365 = vmatprep.subr.bf16.mxu0 %v4364_v54  ;;  %4381 = vmatpush1.bf16.msra.mxu1 %v4380_v60 }
 0x1f6   : > { %3517 = vmatprep.mubr.f32.mxu1 %v4473_v42  ;;  %4383 = vmatprep.subr.bf16.mxu1 %v4382_v63 }
 0x1f8   : > { %4367 = vmatpush1.bf16.msra.mxu0 %v4366_v61 }
 0x1f9   : > { %4369 = vmatprep.subr.bf16.mxu0 %v4368_v2  ;;  %4385 = vmatpush1.bf16.msra.mxu1 %v4384_v8 }
 0x1fa   : > { %v1886_v20 = vpop.f32.mrb[0].mxu0  ;;  %4387 = vmatprep.subr.bf16.mxu1 %v4386_v12 }
 0x1fb   : > { %v1887_v21 = vadd.f32 %v1886_v20, %v6173_v9  ;;  %v1888_v45 = vpop.f32.mrb[1].mxu0 }
 0x1fc   : > { %v1889_v23 = vadd.f32 %v1888_v45, %v6173_v9  ;;  %4371 = vmatpush1.bf16.msra.mxu0 %v4370_v10 }
 0x1fd   : > { %v3594_v29 = vmax.f32 %v1887_v21, 0.0  ;;  %4374 = vmatprep.subr.msk.bf16.mxu0 %vm5553_vm2, %v4372_v15  ;;  %4389 = vmatpush1.bf16.msra.mxu1 %v4388_v22 }
 0x1fe   : > { %v3595_v33 = vmax.f32 %v1889_v23, 0.0  ;;  %4391 = vmatprep.subr.bf16.mxu1 %v4390_v26 }
 0x1ff   : > { %3643 = vst [vmem:[%s6186_s14] sm:$0x3f] %v3594_v29  ;;  %v1957_v43 = vpop.f32.mrb[0].mxu1 }
 0x200   : > { %3644 = vst [vmem:[%s6186_s14 + $0x8] sm:$0x3f] %v3595_v33  ;;  %4377 = vmatpush1.bf16.msk.msra.mxu0 %vm5553_vm2, %v4375_v24  ;;  %v1958_v44 = vadd.f32 %v1957_v43, %v6173_v9  ;;  %v1959_v46 = vpop.f32.mrb[1].mxu1 }
 0x201   : > { %4400 = vmatprep.subr.bf16.mxu0 %v4476_v39  ;;  %v1960_v47 = vadd.f32 %v1959_v46, %v6173_v9  ;;  %4393 = vmatpush1.bf16.msra.mxu1 %v4392_v34 }
 0x202   : > { %v3596_v50 = vmax.f32 %v1958_v44, 0.0  ;;  %4396 = vmatprep.subr.msk.bf16.mxu1 %vm5553_vm2, %v4394_v36 }
 0x203   : > { %3829 = vmatmul.mubr.msk.f32.vlgmr.msra.gmra.mrb[22].mxu0 %vm1668_vm3, %v5919_v51  ;;  %v3597_v54 = vmax.f32 %v1960_v47, 0.0 }
 0x204   : > { %4402 = vmatpush3.bf16.msra.mxu0 %v4401_v35  ;;  %3869 = vmatprep.mubr.msk.f32.mxu0 %vm4477_vm4, %v4473_v42  ;;  %3645 = vst [vmem:[%s6186_s14 + $0x10] sm:$0x3f] %v3596_v50  ;;  %v1661_v42 = vld [vmem:[%s5524_s4 + $0xf48] sm:$0x7] }
 0x205   : > { %4403 = vmatprep.subr.bf16.mxu0 %v4476_v39  ;;  %3646 = vst [vmem:[%s6186_s14 + $0x18] sm:$0x3f] %v3597_v54  ;;  %4399 = vmatpush1.bf16.msk.msra.mxu1 %vm5553_vm2, %v4397_v48  ;;  %v4413_v0 = vpack.c.bf16 %v1661_v42, %v1612_v59 }
 0x208   : > { %4405 = vmatpush3.bf16.msra.mxu0 %v4404_v49  ;;  %3832 = vmatmul.mubr.msk.f32.vlgmr.msra.gmra.mrb[22].mxu1 %vm1668_vm3, %v5919_v51 }
 0x209   : > { %4406 = vmatprep.subr.bf16.mxu0 %v4476_v39 }
 0x20c   : > { %4408 = vmatpush3.bf16.msra.mxu0 %v4407_v55 }
 0x20d   : > { %4409 = vmatprep.subr.bf16.mxu0 %v4476_v39 }
 0x20e   : > { %v2028_v60 = vpop.f32.mrb[2].mxu0 }
 0x20f   : > { %v2029_v61 = vadd.f32 %v2028_v60, %v6173_v9  ;;  %v2030_v62 = vpop.f32.mrb[3].mxu0 }
 0x210   : > { %v2031_v63 = vadd.f32 %v2030_v62, %v6173_v9  ;;  %4411 = vmatpush3.bf16.msra.mxu0 %v4410_v58 }
 0x211   : > { %v3598_v1 = vmax.f32 %v2029_v61, 0.0  ;;  %4412 = vmatprep.subr.bf16.mxu0 %v4476_v39 }
 0x212   : > { %v3599_v2 = vmax.f32 %v2031_v63, 0.0 }
 0x213   : > { %3647 = vst [vmem:[%s6186_s14 + $0x20] sm:$0x3f] %v3598_v1  ;;  %v2099_v3 = vpop.f32.mrb[2].mxu1 }
 0x214   : > { %3648 = vst [vmem:[%s6186_s14 + $0x28] sm:$0x3f] %v3599_v2  ;;  %4415 = vmatpush3.bf16.msk.msra.mxu0 %vm5553_vm2, %v4413_v0  ;;  %v2100_v4 = vadd.f32 %v2099_v3, %v6173_v9  ;;  %v2101_v5 = vpop.f32.mrb[3].mxu1 }
 0x215   : > { %v2102_v6 = vadd.f32 %v2101_v5, %v6173_v9 }
 0x216   : > { %v3600_v7 = vmax.f32 %v2100_v4, 0.0 }
 0x217   : > { %3870 = vmatmul.mubr.msk.f32.vlgmr.msra.gmra.mrb[24].mxu0 %vm1668_vm3, %v5919_v51  ;;  %v3601_v8 = vmax.f32 %v2102_v6, 0.0 }
 0x218   : > { %3649 = vst [vmem:[%s6186_s14 + $0x30] sm:$0x3f] %v3600_v7 }
 0x219   : > { %3650 = vst [vmem:[%s6186_s14 + $0x38] sm:$0x3f] %v3601_v8 }
 0x222   : > { %v2170_v10 = vpop.f32.mrb[4].mxu0 }
 0x223   : > { %v2171_v17 = vadd.f32 %v2170_v10, %v6173_v9  ;;  %v2172_v11 = vpop.f32.mrb[5].mxu0 }
 0x224   : > { %v2173_v12 = vadd.f32 %v2172_v11, %v6173_v9 }
 0x225   : > { %v3602_v13 = vmax.f32 %v2171_v17, 0.0 }
 0x226   : > { %v3603_v14 = vmax.f32 %v2173_v12, 0.0 }
 0x227   : > { %3651 = vst [vmem:[%s6186_s14 + $0x40] sm:$0x3f] %v3602_v13  ;;  %v2241_v51 = vpop.f32.mrb[4].mxu1 }
 0x228   : > { %3652 = vst [vmem:[%s6186_s14 + $0x48] sm:$0x3f] %v3603_v14  ;;  %v2242_v15 = vadd.f32 %v2241_v51, %v6173_v9  ;;  %v2243_v16 = vpop.f32.mrb[5].mxu1 }
 0x229   : > { %v2244_v18 = vadd.f32 %v2243_v16, %v6173_v9 }
 0x22a   : > { %v3604_v19 = vmax.f32 %v2242_v15, 0.0 }
 0x22b   : > { %v3605_v20 = vmax.f32 %v2244_v18, 0.0 }
 0x22c   : > { %3653 = vst [vmem:[%s6186_s14 + $0x50] sm:$0x3f] %v3604_v19 }
 0x22d   : > { %3654 = vst [vmem:[%s6186_s14 + $0x58] sm:$0x3f] %v3605_v20 }
 0x236   : > { %v2312_v21 = vpop.f32.mrb[6].mxu0 }
 0x237   : > { %v2313_v45 = vadd.f32 %v2312_v21, %v6173_v9  ;;  %v2314_v22 = vpop.f32.mrb[7].mxu0 }
 0x238   : > { %v2315_v23 = vadd.f32 %v2314_v22, %v6173_v9 }
 0x239   : > { %v3606_v24 = vmax.f32 %v2313_v45, 0.0 }
 0x23a   : > { %v3607_v25 = vmax.f32 %v2315_v23, 0.0 }
 0x23b   : > { %3655 = vst [vmem:[%s6186_s14 + $0x60] sm:$0x3f] %v3606_v24  ;;  %v2383_v26 = vpop.f32.mrb[6].mxu1 }
 0x23c   : > { %3656 = vst [vmem:[%s6186_s14 + $0x68] sm:$0x3f] %v3607_v25  ;;  %v2384_v27 = vadd.f32 %v2383_v26, %v6173_v9  ;;  %v2385_v28 = vpop.f32.mrb[7].mxu1 }
 0x23d   : > { %v2386_v29 = vadd.f32 %v2385_v28, %v6173_v9 }
 0x23e   : > { %v3608_v30 = vmax.f32 %v2384_v27, 0.0 }
 0x23f   : > { %v3609_v31 = vmax.f32 %v2386_v29, 0.0 }
 0x240   : > { %3657 = vst [vmem:[%s6186_s14 + $0x70] sm:$0x3f] %v3608_v30 }
 0x241   : > { %3658 = vst [vmem:[%s6186_s14 + $0x78] sm:$0x3f] %v3609_v31 }
 0x24a   : > { %v2454_v32 = vpop.f32.mrb[8].mxu0 }
 0x24b   : > { %v2455_v33 = vadd.f32 %v2454_v32, %v6173_v9  ;;  %v2456_v34 = vpop.f32.mrb[9].mxu0 }
 0x24c   : > { %v2457_v35 = vadd.f32 %v2456_v34, %v6173_v9 }
 0x24d   : > { %v3610_v36 = vmax.f32 %v2455_v33, 0.0 }
 0x24e   : > { %v3611_v37 = vmax.f32 %v2457_v35, 0.0 }
 0x24f   : > { %3659 = vst [vmem:[%s6186_s14 + $0x80] sm:$0x3f] %v3610_v36  ;;  %v2525_v38 = vpop.f32.mrb[8].mxu1 }
 0x250   : > { %3660 = vst [vmem:[%s6186_s14 + $0x88] sm:$0x3f] %v3611_v37  ;;  %v2526_v39 = vadd.f32 %v2525_v38, %v6173_v9  ;;  %v2527_v40 = vpop.f32.mrb[9].mxu1 }
 0x251   : > { %v2528_v41 = vadd.f32 %v2527_v40, %v6173_v9 }
 0x252   : > { %v3612_v43 = vmax.f32 %v2526_v39, 0.0 }
 0x253   : > { %v3613_v44 = vmax.f32 %v2528_v41, 0.0 }
 0x254   : > { %3661 = vst [vmem:[%s6186_s14 + $0x90] sm:$0x3f] %v3612_v43 }
 0x255   : > { %3662 = vst [vmem:[%s6186_s14 + $0x98] sm:$0x3f] %v3613_v44 }
 0x25e   : > { %v2596_v46 = vpop.f32.mrb[10].mxu0 }
 0x25f   : > { %v2597_v47 = vadd.f32 %v2596_v46, %v6173_v9  ;;  %v2598_v48 = vpop.f32.mrb[11].mxu0 }
 0x260   : > { %v2599_v49 = vadd.f32 %v2598_v48, %v6173_v9 }
 0x261   : > { %v3614_v50 = vmax.f32 %v2597_v47, 0.0 }
 0x262   : > { %v3615_v52 = vmax.f32 %v2599_v49, 0.0 }
 0x263   : > { %3663 = vst [vmem:[%s6186_s14 + $0xa0] sm:$0x3f] %v3614_v50  ;;  %v2667_v53 = vpop.f32.mrb[10].mxu1 }
 0x264   : > { %3664 = vst [vmem:[%s6186_s14 + $0xa8] sm:$0x3f] %v3615_v52  ;;  %v2668_v54 = vadd.f32 %v2667_v53, %v6173_v9  ;;  %v2669_v55 = vpop.f32.mrb[11].mxu1 }
 0x265   : > { %v2670_v56 = vadd.f32 %v2669_v55, %v6173_v9 }
 0x266   : > { %v3616_v57 = vmax.f32 %v2668_v54, 0.0 }
 0x267   : > { %v3617_v58 = vmax.f32 %v2670_v56, 0.0 }
 0x268   : > { %3665 = vst [vmem:[%s6186_s14 + $0xb0] sm:$0x3f] %v3616_v57 }
 0x269   : > { %3666 = vst [vmem:[%s6186_s14 + $0xb8] sm:$0x3f] %v3617_v58 }
 0x272   : > { %v2738_v59 = vpop.f32.mrb[12].mxu0 }
 0x273   : > { %v2739_v42 = vadd.f32 %v2738_v59, %v6173_v9  ;;  %v2740_v60 = vpop.f32.mrb[13].mxu0 }
 0x274   : > { %v2741_v61 = vadd.f32 %v2740_v60, %v6173_v9 }
 0x275   : > { %v3618_v62 = vmax.f32 %v2739_v42, 0.0 }
 0x276   : > { %v3619_v63 = vmax.f32 %v2741_v61, 0.0 }
 0x277   : > { %3667 = vst [vmem:[%s6186_s14 + $0xc0] sm:$0x3f] %v3618_v62  ;;  %v2809_v0 = vpop.f32.mrb[12].mxu1 }
 0x278   : > { %3668 = vst [vmem:[%s6186_s14 + $0xc8] sm:$0x3f] %v3619_v63  ;;  %v2810_v1 = vadd.f32 %v2809_v0, %v6173_v9  ;;  %v2811_v2 = vpop.f32.mrb[13].mxu1 }
 0x279   : > { %v2812_v3 = vadd.f32 %v2811_v2, %v6173_v9 }
 0x27a   : > { %v3620_v4 = vmax.f32 %v2810_v1, 0.0 }
 0x27b   : > { %v3621_v5 = vmax.f32 %v2812_v3, 0.0 }
 0x27c   : > { %3669 = vst [vmem:[%s6186_s14 + $0xd0] sm:$0x3f] %v3620_v4 }
 0x27d   : > { %3670 = vst [vmem:[%s6186_s14 + $0xd8] sm:$0x3f] %v3621_v5 }
 0x286   : > { %v2880_v6 = vpop.f32.mrb[14].mxu0 }
 0x287   : > { %v2881_v7 = vadd.f32 %v2880_v6, %v6173_v9  ;;  %v2882_v8 = vpop.f32.mrb[15].mxu0 }
 0x288   : > { %v2883_v10 = vadd.f32 %v2882_v8, %v6173_v9 }
 0x289   : > { %v3622_v17 = vmax.f32 %v2881_v7, 0.0 }
 0x28a   : > { %v3623_v11 = vmax.f32 %v2883_v10, 0.0 }
 0x28b   : > { %3671 = vst [vmem:[%s6186_s14 + $0xe0] sm:$0x3f] %v3622_v17  ;;  %v2951_v12 = vpop.f32.mrb[14].mxu1 }
 0x28c   : > { %3672 = vst [vmem:[%s6186_s14 + $0xe8] sm:$0x3f] %v3623_v11  ;;  %v2952_v13 = vadd.f32 %v2951_v12, %v6173_v9  ;;  %v2953_v14 = vpop.f32.mrb[15].mxu1 }
 0x28d   : > { %v2954_v51 = vadd.f32 %v2953_v14, %v6173_v9 }
 0x28e   : > { %v3624_v15 = vmax.f32 %v2952_v13, 0.0 }
 0x28f   : > { %v3625_v16 = vmax.f32 %v2954_v51, 0.0 }
 0x290   : > { %3673 = vst [vmem:[%s6186_s14 + $0xf0] sm:$0x3f] %v3624_v15 }
 0x291   : > { %3674 = vst [vmem:[%s6186_s14 + $0xf8] sm:$0x3f] %v3625_v16 }
 0x29a   : > { %v3022_v18 = vpop.f32.mrb[16].mxu0 }
 0x29b   : > { %v3023_v19 = vadd.f32 %v3022_v18, %v6173_v9  ;;  %v3024_v20 = vpop.f32.mrb[17].mxu0 }
 0x29c   : > { %v3025_v21 = vadd.f32 %v3024_v20, %v6173_v9 }
 0x29d   : > { %v3626_v45 = vmax.f32 %v3023_v19, 0.0 }
 0x29e   : > { %v3627_v22 = vmax.f32 %v3025_v21, 0.0 }
 0x29f   : > { %3675 = vst [vmem:[%s6186_s14 + $0x100] sm:$0x3f] %v3626_v45  ;;  %v3093_v23 = vpop.f32.mrb[16].mxu1 }
 0x2a0   : > { %3676 = vst [vmem:[%s6186_s14 + $0x108] sm:$0x3f] %v3627_v22  ;;  %v3094_v24 = vadd.f32 %v3093_v23, %v6173_v9  ;;  %v3095_v25 = vpop.f32.mrb[17].mxu1 }
 0x2a1   : > { %v3096_v26 = vadd.f32 %v3095_v25, %v6173_v9 }
 0x2a2   : > { %v3628_v27 = vmax.f32 %v3094_v24, 0.0 }
 0x2a3   : > { %v3629_v28 = vmax.f32 %v3096_v26, 0.0 }
 0x2a4   : > { %3677 = vst [vmem:[%s6186_s14 + $0x110] sm:$0x3f] %v3628_v27 }
 0x2a5   : > { %3678 = vst [vmem:[%s6186_s14 + $0x118] sm:$0x3f] %v3629_v28 }
 0x2ae   : > { %v3164_v29 = vpop.f32.mrb[18].mxu0 }
 0x2af   : > { %v3165_v30 = vadd.f32 %v3164_v29, %v6173_v9  ;;  %v3166_v31 = vpop.f32.mrb[19].mxu0 }
 0x2b0   : > { %v3167_v32 = vadd.f32 %v3166_v31, %v6173_v9 }
 0x2b1   : > { %v3630_v33 = vmax.f32 %v3165_v30, 0.0 }
 0x2b2   : > { %v3631_v34 = vmax.f32 %v3167_v32, 0.0 }
 0x2b3   : > { %3679 = vst [vmem:[%s6186_s14 + $0x120] sm:$0x3f] %v3630_v33  ;;  %v3235_v35 = vpop.f32.mrb[18].mxu1 }
 0x2b4   : > { %3680 = vst [vmem:[%s6186_s14 + $0x128] sm:$0x3f] %v3631_v34  ;;  %v3236_v36 = vadd.f32 %v3235_v35, %v6173_v9  ;;  %v3237_v37 = vpop.f32.mrb[19].mxu1 }
 0x2b5   : > { %v3238_v38 = vadd.f32 %v3237_v37, %v6173_v9 }
 0x2b6   : > { %v3632_v39 = vmax.f32 %v3236_v36, 0.0 }
 0x2b7   : > { %v3633_v40 = vmax.f32 %v3238_v38, 0.0 }
 0x2b8   : > { %3681 = vst [vmem:[%s6186_s14 + $0x130] sm:$0x3f] %v3632_v39 }
 0x2b9   : > { %3682 = vst [vmem:[%s6186_s14 + $0x138] sm:$0x3f] %v3633_v40 }
 0x2c2   : > { %v3306_v41 = vpop.f32.mrb[20].mxu0 }
 0x2c3   : > { %v3307_v43 = vadd.f32 %v3306_v41, %v6173_v9  ;;  %v3308_v44 = vpop.f32.mrb[21].mxu0 }
 0x2c4   : > { %v3309_v46 = vadd.f32 %v3308_v44, %v6173_v9 }
 0x2c5   : > { %v3634_v47 = vmax.f32 %v3307_v43, 0.0 }
 0x2c6   : > { %v3635_v48 = vmax.f32 %v3309_v46, 0.0 }
 0x2c7   : > { %3683 = vst [vmem:[%s6186_s14 + $0x140] sm:$0x3f] %v3634_v47  ;;  %v3377_v49 = vpop.f32.mrb[20].mxu1 }
 0x2c8   : > { %3684 = vst [vmem:[%s6186_s14 + $0x148] sm:$0x3f] %v3635_v48  ;;  %v3378_v50 = vadd.f32 %v3377_v49, %v6173_v9  ;;  %v3379_v52 = vpop.f32.mrb[21].mxu1 }
 0x2c9   : > { %v3380_v53 = vadd.f32 %v3379_v52, %v6173_v9 }
 0x2ca   : > { %v3636_v54 = vmax.f32 %v3378_v50, 0.0 }
 0x2cb   : > { %v3637_v55 = vmax.f32 %v3380_v53, 0.0 }
 0x2cc   : > { %3685 = vst [vmem:[%s6186_s14 + $0x150] sm:$0x3f] %v3636_v54 }
 0x2cd   : > { %3686 = vst [vmem:[%s6186_s14 + $0x158] sm:$0x3f] %v3637_v55 }
 0x2d6   : > { %v3448_v56 = vpop.f32.mrb[22].mxu0 }
 0x2d7   : > { %v3449_v57 = vadd.f32 %v3448_v56, %v6173_v9  ;;  %v3450_v58 = vpop.f32.mrb[23].mxu0 }
 0x2d8   : > { %v3451_v59 = vadd.f32 %v3450_v58, %v6173_v9 }
 0x2d9   : > { %v3638_v42 = vmax.f32 %v3449_v57, 0.0 }
 0x2da   : > { %v3639_v60 = vmax.f32 %v3451_v59, 0.0 }
 0x2db   : > { %3687 = vst [vmem:[%s6186_s14 + $0x160] sm:$0x3f] %v3638_v42  ;;  %v3519_v61 = vpop.f32.mrb[22].mxu1 }
 0x2dc   : > { %3688 = vst [vmem:[%s6186_s14 + $0x168] sm:$0x3f] %v3639_v60  ;;  %v3520_v62 = vadd.f32 %v3519_v61, %v6173_v9  ;;  %v3521_v63 = vpop.f32.mrb[23].mxu1 }
 0x2dd   : > { %v3522_v0 = vadd.f32 %v3521_v63, %v6173_v9 }
 0x2de   : > { %v3640_v1 = vmax.f32 %v3520_v62, 0.0 }
 0x2df   : > { %v3641_v2 = vmax.f32 %v3522_v0, 0.0 }
 0x2e0   : > { %3689 = vst [vmem:[%s6186_s14 + $0x170] sm:$0x3f] %v3640_v1 }
 0x2e1   : > { %3690 = vst [vmem:[%s6186_s14 + $0x178] sm:$0x3f] %v3641_v2 }
 0x2ea   : > { %v3590_v3 = vpop.f32.mrb[24].mxu0 }
 0x2eb   : > { %v3591_v4 = vadd.f32 %v3590_v3, %v6173_v9  ;;  %v3871_v5 = vpop.f32.mrb[25].mxu0 }
 0x2ed   : > { %v3642_v6 = vmax.f32 %v3591_v4, 0.0 }
 0x2ef   : > { %3691 = vst [vmem:[%s6186_s14 + $0x180] sm:$0x3f] %v3642_v6 }
 0x2f0 PF: > { %p10_p9 = scmp.ge.s32.totalorder %s4515_s16, 6   ;;  %s6334_s12 = smov %s4467_s13 }
 0x2f1   : > { %s6335_s13 = smov %s4524_s19  ;;  %s6336_s14 = smov %s4515_s16 }
 0x2f2   :  { %12 = sbr.rel (!%p10_p9) target bundleno = 2 (0x2), region = 90 }

// kernel: basic_rn_forward.4
= control target key start
LH: loop header
LB: loop body
LE: loop exit
PB: predicated region body
PF: predicated region fallthrough
CT: control target
= control target key end

     0   :  { %s1078_s12 = smov 0   ;;  %s1080_s13 = smov 0   ;;  %s1518_s0 = inlined_call_operand.vmem [shape: f32[16,150], index: 0, kind: input, shape index: {}]   ;;  %s1519_s1 = inlined_call_operand.vmem [shape: f32[150,3200], index: 1, kind: input, shape index: {}]   ;;  %s1520_s2 = inlined_call_operand.vmem [shape: f32[16,1], index: 2, kind: input, shape index: {}]   ;;  %s1521_s3 = inlined_call_operand.vmem [shape: f32[16,3200], index: 3, kind: output, shape index: {}]  }
   0x1   :  { %s1082_s14 = smov 0  }
   0x2 LB: > { %s859_s15 = sadd.s32 4294967295, %s1053_s14   ;;  %s1095_s16 = sadd.s32 1, %s1053_s14   ;;  %s1053_s14 = sphi %s1082_s14, %s1525_s14   ;;  %s1049_s13 = sphi %s1080_s13, %s1524_s13   ;;  %s1045_s12 = sphi %s1078_s12, %s1523_s12  }
   0x3   : > { %s38_s17 = ssub.s32 %s1053_s14, %s1095_s16  ;;  %s41_s18 = sadd.s32 1, %s1049_s13 }
   0x4   : > { %p39_p0 = scmp.eq.s32.totalorder %s38_s17, 0  ;;  %p48_p1 = scmp.ne.s32.totalorder %s1049_s13, %s1045_s12 }
   0x5   : > { %p49_p2 = scmp.eq.s32.totalorder %s1053_s14, 0  ;;  %p99_p3 = scmp.eq.s32.totalorder %s859_s15, 4 }
   0x6   : > { %s1106_s19 = scalar_select %p39_p0, %s1049_s13, %s41_s18  }
   0x7   : > { %p50_p4 = por %p49_p2, %p48_p1  ;;  %p1108_p5 = por %p99_p3, %p48_p1 }
   0x8   : > { %p862_p6 = scmp.ge.s32.totalorder %s1053_s14, 5 }
   0xa   : > { %127 = sbr.rel (%p862_p6) target bundleno = 70 (0x46), region = 24 }
  0x11   : > { %130 = sbr.rel (!%p50_p4) target bundleno = 70 (0x46), region = 28  ;;  %s132_s21 = sand.u32 (%p50_p4), 1, %s1049_s13  }
  0x12   : > { %s879_s22 = smul.u32 (%p50_p4), 40, %s1053_s14 }
  0x13   : > { %s1000_s23 = smul.u32 (%p50_p4), 760, %s132_s21 }
  0x14   : > { %s1118_s26 = scalar_lea.vmem (%p50_p4), %s1519_s1, %s879_s22 }
  0x15   : > { %v150_v0 = vld [vmem:[%s1118_s26] sm:$0xff] (%p50_p4)  ;;  %v152_v1 = vld [vmem:[%s1118_s26 + $0x8] sm:$0xff] (%p50_p4)  ;;  %v154_v2 = vld [vmem:[%s1118_s26 + $0x10] sm:$0xff] (%p50_p4)  ;;  %s1123_s27 = scalar_lea.vmem (%p50_p4), [#allocation2], %s1000_s23 }
  0x16   : > { %151 = vst [vmem:[%s1123_s27] sm:$0xff] (%p50_p4), %v150_v0  ;;  %153 = vst [vmem:[%s1123_s27 + $0x8] sm:$0xff] (%p50_p4), %v152_v1  ;;  %v156_v3 = vld [vmem:[%s1118_s26 + $0x18] sm:$0xff] (%p50_p4)  ;;  %v158_v4 = vld [vmem:[%s1118_s26 + $0x20] sm:$0xff] (%p50_p4) }
  0x17   : > { %155 = vst [vmem:[%s1123_s27 + $0x10] sm:$0xff] (%p50_p4), %v154_v2  ;;  %v160_v5 = vld [vmem:[%s1118_s26 + $0xc8] sm:$0xff] (%p50_p4)  ;;  %157 = vst [vmem:[%s1123_s27 + $0x18] sm:$0xff] (%p50_p4), %v156_v3  ;;  %v162_v6 = vld [vmem:[%s1118_s26 + $0xd0] sm:$0xff] (%p50_p4) }
  0x18   : > { %159 = vst [vmem:[%s1123_s27 + $0x20] sm:$0xff] %v158_v4  ;;  %161 = vst [vmem:[%s1123_s27 + $0x28] sm:$0xff] %v160_v5  ;;  %v164_v7 = vld [vmem:[%s1118_s26 + $0xd8] sm:$0xff]  ;;  %v166_v8 = vld [vmem:[%s1118_s26 + $0xe0] sm:$0xff] }
  0x19   : > { %163 = vst [vmem:[%s1123_s27 + $0x30] sm:$0xff] %v162_v6  ;;  %165 = vst [vmem:[%s1123_s27 + $0x38] sm:$0xff] %v164_v7  ;;  %v168_v9 = vld [vmem:[%s1118_s26 + $0xe8] sm:$0xff]  ;;  %v170_v10 = vld [vmem:[%s1118_s26 + $0x190] sm:$0xff] }
  0x1a   : > { %167 = vst [vmem:[%s1123_s27 + $0x40] sm:$0xff] %v166_v8  ;;  %v172_v11 = vld [vmem:[%s1118_s26 + $0x198] sm:$0xff]  ;;  %169 = vst [vmem:[%s1123_s27 + $0x48] sm:$0xff] %v168_v9  ;;  %v174_v12 = vld [vmem:[%s1118_s26 + $0x1a0] sm:$0xff] }
  0x1b   : > { %171 = vst [vmem:[%s1123_s27 + $0x50] sm:$0xff] %v170_v10  ;;  %173 = vst [vmem:[%s1123_s27 + $0x58] sm:$0xff] %v172_v11  ;;  %v176_v13 = vld [vmem:[%s1118_s26 + $0x1a8] sm:$0xff]  ;;  %v178_v14 = vld [vmem:[%s1118_s26 + $0x1b0] sm:$0xff] }
  0x1c   : > { %175 = vst [vmem:[%s1123_s27 + $0x60] sm:$0xff] %v174_v12  ;;  %177 = vst [vmem:[%s1123_s27 + $0x68] sm:$0xff] %v176_v13  ;;  %v180_v15 = vld [vmem:[%s1118_s26 + $0x258] sm:$0xff]  ;;  %v182_v16 = vld [vmem:[%s1118_s26 + $0x260] sm:$0xff] }
  0x1d   : > { %179 = vst [vmem:[%s1123_s27 + $0x70] sm:$0xff] %v178_v14  ;;  %v184_v17 = vld [vmem:[%s1118_s26 + $0x268] sm:$0xff]  ;;  %181 = vst [vmem:[%s1123_s27 + $0x78] sm:$0xff] %v180_v15  ;;  %v186_v18 = vld [vmem:[%s1118_s26 + $0x270] sm:$0xff] }
  0x1e   : > { %183 = vst [vmem:[%s1123_s27 + $0x80] sm:$0xff] %v182_v16  ;;  %185 = vst [vmem:[%s1123_s27 + $0x88] sm:$0xff] %v184_v17  ;;  %v188_v19 = vld [vmem:[%s1118_s26 + $0x278] sm:$0xff]  ;;  %v190_v20 = vld [vmem:[%s1118_s26 + $0x320] sm:$0xff] }
  0x1f   : > { %187 = vst [vmem:[%s1123_s27 + $0x90] sm:$0xff] %v186_v18  ;;  %189 = vst [vmem:[%s1123_s27 + $0x98] sm:$0xff] %v188_v19  ;;  %v192_v21 = vld [vmem:[%s1118_s26 + $0x328] sm:$0xff]  ;;  %v194_v22 = vld [vmem:[%s1118_s26 + $0x330] sm:$0xff] }
  0x20   : > { %191 = vst [vmem:[%s1123_s27 + $0xa0] sm:$0xff] %v190_v20  ;;  %v196_v23 = vld [vmem:[%s1118_s26 + $0x338] sm:$0xff]  ;;  %193 = vst [vmem:[%s1123_s27 + $0xa8] sm:$0xff] %v192_v21  ;;  %v198_v24 = vld [vmem:[%s1118_s26 + $0x340] sm:$0xff] }
  0x21   : > { %195 = vst [vmem:[%s1123_s27 + $0xb0] sm:$0xff] %v194_v22  ;;  %197 = vst [vmem:[%s1123_s27 + $0xb8] sm:$0xff] %v196_v23  ;;  %v200_v25 = vld [vmem:[%s1118_s26 + $0x3e8] sm:$0xff]  ;;  %v202_v26 = vld [vmem:[%s1118_s26 + $0x3f0] sm:$0xff] }
  0x22   : > { %199 = vst [vmem:[%s1123_s27 + $0xc0] sm:$0xff] %v198_v24  ;;  %201 = vst [vmem:[%s1123_s27 + $0xc8] sm:$0xff] %v200_v25  ;;  %v204_v27 = vld [vmem:[%s1118_s26 + $0x3f8] sm:$0xff]  ;;  %v206_v28 = vld [vmem:[%s1118_s26 + $0x400] sm:$0xff] }
  0x23   : > { %203 = vst [vmem:[%s1123_s27 + $0xd0] sm:$0xff] %v202_v26  ;;  %v208_v29 = vld [vmem:[%s1118_s26 + $0x408] sm:$0xff]  ;;  %205 = vst [vmem:[%s1123_s27 + $0xd8] sm:$0xff] %v204_v27  ;;  %v210_v30 = vld [vmem:[%s1118_s26 + $0x4b0] sm:$0xff] }
  0x24   : > { %207 = vst [vmem:[%s1123_s27 + $0xe0] sm:$0xff] %v206_v28  ;;  %209 = vst [vmem:[%s1123_s27 + $0xe8] sm:$0xff] %v208_v29  ;;  %v212_v31 = vld [vmem:[%s1118_s26 + $0x4b8] sm:$0xff]  ;;  %v214_v32 = vld [vmem:[%s1118_s26 + $0x4c0] sm:$0xff] }
  0x25   : > { %211 = vst [vmem:[%s1123_s27 + $0xf0] sm:$0xff] %v210_v30  ;;  %213 = vst [vmem:[%s1123_s27 + $0xf8] sm:$0xff] %v212_v31  ;;  %v216_v33 = vld [vmem:[%s1118_s26 + $0x4c8] sm:$0xff]  ;;  %v218_v34 = vld [vmem:[%s1118_s26 + $0x4d0] sm:$0xff] }
  0x26   : > { %215 = vst [vmem:[%s1123_s27 + $0x100] sm:$0xff] %v214_v32  ;;  %v220_v35 = vld [vmem:[%s1118_s26 + $0x578] sm:$0xff]  ;;  %217 = vst [vmem:[%s1123_s27 + $0x108] sm:$0xff] %v216_v33  ;;  %v222_v36 = vld [vmem:[%s1118_s26 + $0x580] sm:$0xff] }
  0x27   : > { %219 = vst [vmem:[%s1123_s27 + $0x110] sm:$0xff] %v218_v34  ;;  %221 = vst [vmem:[%s1123_s27 + $0x118] sm:$0xff] %v220_v35  ;;  %v224_v37 = vld [vmem:[%s1118_s26 + $0x588] sm:$0xff]  ;;  %v226_v38 = vld [vmem:[%s1118_s26 + $0x590] sm:$0xff] }
  0x28   : > { %223 = vst [vmem:[%s1123_s27 + $0x120] sm:$0xff] %v222_v36  ;;  %225 = vst [vmem:[%s1123_s27 + $0x128] sm:$0xff] %v224_v37  ;;  %v228_v39 = vld [vmem:[%s1118_s26 + $0x598] sm:$0xff]  ;;  %v230_v40 = vld [vmem:[%s1118_s26 + $0x640] sm:$0xff] }
  0x29   : > { %227 = vst [vmem:[%s1123_s27 + $0x130] sm:$0xff] %v226_v38  ;;  %v232_v41 = vld [vmem:[%s1118_s26 + $0x648] sm:$0xff]  ;;  %229 = vst [vmem:[%s1123_s27 + $0x138] sm:$0xff] %v228_v39  ;;  %v234_v42 = vld [vmem:[%s1118_s26 + $0x650] sm:$0xff] }
  0x2a   : > { %231 = vst [vmem:[%s1123_s27 + $0x140] sm:$0xff] %v230_v40  ;;  %233 = vst [vmem:[%s1123_s27 + $0x148] sm:$0xff] %v232_v41  ;;  %v236_v43 = vld [vmem:[%s1118_s26 + $0x658] sm:$0xff]  ;;  %v238_v44 = vld [vmem:[%s1118_s26 + $0x660] sm:$0xff] }
  0x2b   : > { %235 = vst [vmem:[%s1123_s27 + $0x150] sm:$0xff] %v234_v42  ;;  %237 = vst [vmem:[%s1123_s27 + $0x158] sm:$0xff] %v236_v43  ;;  %v240_v45 = vld [vmem:[%s1118_s26 + $0x708] sm:$0xff]  ;;  %v242_v46 = vld [vmem:[%s1118_s26 + $0x710] sm:$0xff] }
  0x2c   : > { %239 = vst [vmem:[%s1123_s27 + $0x160] sm:$0xff] %v238_v44  ;;  %v244_v47 = vld [vmem:[%s1118_s26 + $0x718] sm:$0xff]  ;;  %241 = vst [vmem:[%s1123_s27 + $0x168] sm:$0xff] %v240_v45  ;;  %v246_v48 = vld [vmem:[%s1118_s26 + $0x720] sm:$0xff] }
  0x2d   : > { %243 = vst [vmem:[%s1123_s27 + $0x170] sm:$0xff] %v242_v46  ;;  %245 = vst [vmem:[%s1123_s27 + $0x178] sm:$0xff] %v244_v47  ;;  %v248_v49 = vld [vmem:[%s1118_s26 + $0x728] sm:$0xff]  ;;  %v250_v50 = vld [vmem:[%s1118_s26 + $0x7d0] sm:$0xff] }
  0x2e   : > { %247 = vst [vmem:[%s1123_s27 + $0x180] sm:$0xff] %v246_v48  ;;  %249 = vst [vmem:[%s1123_s27 + $0x188] sm:$0xff] %v248_v49  ;;  %v252_v51 = vld [vmem:[%s1118_s26 + $0x7d8] sm:$0xff]  ;;  %v254_v52 = vld [vmem:[%s1118_s26 + $0x7e0] sm:$0xff] }
  0x2f   : > { %251 = vst [vmem:[%s1123_s27 + $0x190] sm:$0xff] %v250_v50  ;;  %v256_v53 = vld [vmem:[%s1118_s26 + $0x7e8] sm:$0xff]  ;;  %253 = vst [vmem:[%s1123_s27 + $0x198] sm:$0xff] %v252_v51  ;;  %v258_v54 = vld [vmem:[%s1118_s26 + $0x7f0] sm:$0xff] }
  0x30   : > { %255 = vst [vmem:[%s1123_s27 + $0x1a0] sm:$0xff] %v254_v52  ;;  %257 = vst [vmem:[%s1123_s27 + $0x1a8] sm:$0xff] %v256_v53  ;;  %v260_v55 = vld [vmem:[%s1118_s26 + $0x898] sm:$0xff]  ;;  %v262_v56 = vld [vmem:[%s1118_s26 + $0x8a0] sm:$0xff] }
  0x31   : > { %259 = vst [vmem:[%s1123_s27 + $0x1b0] sm:$0xff] %v258_v54  ;;  %261 = vst [vmem:[%s1123_s27 + $0x1b8] sm:$0xff] %v260_v55  ;;  %v264_v57 = vld [vmem:[%s1118_s26 + $0x8a8] sm:$0xff]  ;;  %v266_v58 = vld [vmem:[%s1118_s26 + $0x8b0] sm:$0xff] }
  0x32   : > { %263 = vst [vmem:[%s1123_s27 + $0x1c0] sm:$0xff] %v262_v56  ;;  %v268_v59 = vld [vmem:[%s1118_s26 + $0x8b8] sm:$0xff]  ;;  %265 = vst [vmem:[%s1123_s27 + $0x1c8] sm:$0xff] %v264_v57  ;;  %v270_v60 = vld [vmem:[%s1118_s26 + $0x960] sm:$0xff] }
  0x33   : > { %267 = vst [vmem:[%s1123_s27 + $0x1d0] sm:$0xff] %v266_v58  ;;  %269 = vst [vmem:[%s1123_s27 + $0x1d8] sm:$0xff] %v268_v59  ;;  %v272_v61 = vld [vmem:[%s1118_s26 + $0x968] sm:$0xff]  ;;  %v274_v62 = vld [vmem:[%s1118_s26 + $0x970] sm:$0xff] }
  0x34   : > { %271 = vst [vmem:[%s1123_s27 + $0x1e0] sm:$0xff] %v270_v60  ;;  %273 = vst [vmem:[%s1123_s27 + $0x1e8] sm:$0xff] %v272_v61  ;;  %v276_v63 = vld [vmem:[%s1118_s26 + $0x978] sm:$0xff]  ;;  %v278_v0 = vld [vmem:[%s1118_s26 + $0x980] sm:$0xff] }
  0x35   : > { %275 = vst [vmem:[%s1123_s27 + $0x1f0] sm:$0xff] %v274_v62  ;;  %v280_v1 = vld [vmem:[%s1118_s26 + $0xa28] sm:$0xff]  ;;  %277 = vst [vmem:[%s1123_s27 + $0x1f8] sm:$0xff] %v276_v63  ;;  %v282_v2 = vld [vmem:[%s1118_s26 + $0xa30] sm:$0xff] }
  0x36   : > { %279 = vst [vmem:[%s1123_s27 + $0x200] sm:$0xff] %v278_v0  ;;  %281 = vst [vmem:[%s1123_s27 + $0x208] sm:$0xff] %v280_v1  ;;  %v284_v3 = vld [vmem:[%s1118_s26 + $0xa38] sm:$0xff]  ;;  %v286_v4 = vld [vmem:[%s1118_s26 + $0xa40] sm:$0xff] }
  0x37   : > { %283 = vst [vmem:[%s1123_s27 + $0x210] sm:$0xff] %v282_v2  ;;  %285 = vst [vmem:[%s1123_s27 + $0x218] sm:$0xff] %v284_v3  ;;  %v288_v5 = vld [vmem:[%s1118_s26 + $0xa48] sm:$0xff]  ;;  %v290_v6 = vld [vmem:[%s1118_s26 + $0xaf0] sm:$0xff] }
  0x38   : > { %287 = vst [vmem:[%s1123_s27 + $0x220] sm:$0xff] %v286_v4  ;;  %v292_v7 = vld [vmem:[%s1118_s26 + $0xaf8] sm:$0xff]  ;;  %289 = vst [vmem:[%s1123_s27 + $0x228] sm:$0xff] %v288_v5  ;;  %v294_v8 = vld [vmem:[%s1118_s26 + $0xb00] sm:$0xff] }
  0x39   : > { %291 = vst [vmem:[%s1123_s27 + $0x230] sm:$0xff] %v290_v6  ;;  %293 = vst [vmem:[%s1123_s27 + $0x238] sm:$0xff] %v292_v7  ;;  %v296_v9 = vld [vmem:[%s1118_s26 + $0xb08] sm:$0xff]  ;;  %v298_v10 = vld [vmem:[%s1118_s26 + $0xb10] sm:$0xff] }
  0x3a   : > { %295 = vst [vmem:[%s1123_s27 + $0x240] sm:$0xff] %v294_v8  ;;  %297 = vst [vmem:[%s1123_s27 + $0x248] sm:$0xff] %v296_v9  ;;  %v300_v11 = vld [vmem:[%s1118_s26 + $0xbb8] sm:$0xff]  ;;  %v302_v12 = vld [vmem:[%s1118_s26 + $0xbc0] sm:$0xff] }
  0x3b   : > { %299 = vst [vmem:[%s1123_s27 + $0x250] sm:$0xff] %v298_v10  ;;  %v304_v13 = vld [vmem:[%s1118_s26 + $0xbc8] sm:$0xff]  ;;  %301 = vst [vmem:[%s1123_s27 + $0x258] sm:$0xff] %v300_v11  ;;  %v306_v14 = vld [vmem:[%s1118_s26 + $0xbd0] sm:$0xff] }
  0x3c   : > { %303 = vst [vmem:[%s1123_s27 + $0x260] sm:$0xff] %v302_v12  ;;  %305 = vst [vmem:[%s1123_s27 + $0x268] sm:$0xff] %v304_v13  ;;  %v308_v15 = vld [vmem:[%s1118_s26 + $0xbd8] sm:$0xff]  ;;  %v310_v16 = vld [vmem:[%s1118_s26 + $0xc80] sm:$0xff] }
  0x3d   : > { %307 = vst [vmem:[%s1123_s27 + $0x270] sm:$0xff] %v306_v14  ;;  %309 = vst [vmem:[%s1123_s27 + $0x278] sm:$0xff] %v308_v15  ;;  %v312_v17 = vld [vmem:[%s1118_s26 + $0xc88] sm:$0xff]  ;;  %v314_v18 = vld [vmem:[%s1118_s26 + $0xc90] sm:$0xff] }
  0x3e   : > { %311 = vst [vmem:[%s1123_s27 + $0x280] sm:$0xff] %v310_v16  ;;  %v316_v19 = vld [vmem:[%s1118_s26 + $0xc98] sm:$0xff]  ;;  %313 = vst [vmem:[%s1123_s27 + $0x288] sm:$0xff] %v312_v17  ;;  %v318_v20 = vld [vmem:[%s1118_s26 + $0xca0] sm:$0xff] }
  0x3f   : > { %315 = vst [vmem:[%s1123_s27 + $0x290] sm:$0xff] %v314_v18  ;;  %317 = vst [vmem:[%s1123_s27 + $0x298] sm:$0xff] %v316_v19  ;;  %v320_v21 = vld [vmem:[%s1118_s26 + $0xd48] sm:$0xff]  ;;  %v322_v22 = vld [vmem:[%s1118_s26 + $0xd50] sm:$0xff] }
  0x40   : > { %319 = vst [vmem:[%s1123_s27 + $0x2a0] sm:$0xff] %v318_v20  ;;  %321 = vst [vmem:[%s1123_s27 + $0x2a8] sm:$0xff] %v320_v21  ;;  %v324_v23 = vld [vmem:[%s1118_s26 + $0xd58] sm:$0xff]  ;;  %v326_v24 = vld [vmem:[%s1118_s26 + $0xd60] sm:$0xff] }
  0x41   : > { %323 = vst [vmem:[%s1123_s27 + $0x2b0] sm:$0xff] %v322_v22  ;;  %v328_v25 = vld [vmem:[%s1118_s26 + $0xd68] sm:$0xff]  ;;  %325 = vst [vmem:[%s1123_s27 + $0x2b8] sm:$0xff] %v324_v23  ;;  %v330_v26 = vld [vmem:[%s1118_s26 + $0xe10] sm:$0xff] }
  0x42   : > { %327 = vst [vmem:[%s1123_s27 + $0x2c0] sm:$0xff] %v326_v24  ;;  %329 = vst [vmem:[%s1123_s27 + $0x2c8] sm:$0xff] %v328_v25  ;;  %v332_v27 = vld [vmem:[%s1118_s26 + $0xe18] sm:$0xff]  ;;  %v334_v28 = vld [vmem:[%s1118_s26 + $0xe20] sm:$0xff] }
  0x43   : > { %331 = vst [vmem:[%s1123_s27 + $0x2d0] sm:$0xff] %v330_v26  ;;  %333 = vst [vmem:[%s1123_s27 + $0x2d8] sm:$0xff] %v332_v27  ;;  %v336_v29 = vld [vmem:[%s1118_s26 + $0xe28] sm:$0xff]  ;;  %v338_v30 = vld [vmem:[%s1118_s26 + $0xe30] sm:$0xff] }
  0x44   : > { %335 = vst [vmem:[%s1123_s27 + $0x2e0] sm:$0xff] %v334_v28  ;;  %337 = vst [vmem:[%s1123_s27 + $0x2e8] sm:$0xff] %v336_v29 }
  0x45   : > { %339 = vst [vmem:[%s1123_s27 + $0x2f0] sm:$0xff] %v338_v30 }
  0x46 PF: > { %p864_p7 = scmp.ge.s32.totalorder %s1053_s14, 1  ;;  %p344_p8 = scmp.lt.s32.totalorder %s1053_s14, 6 }
  0x48   : > { %p345_p9 = pnand %p864_p7, %p344_p8 }
  0x49   : > { %s351_s28 = sand.u32 (!%p345_p9), 1, %s1045_s12   ;;  %v1318_v31 = vld [vmem:[%s1518_s0 + $0x8] sm:$0xff] (!%p345_p9)  ;;  %vm486_vm0 = vcmask (!%p345_p9), 179200   ;;  %v474_v32 = vld [vmem:[%s1520_s2] sm:$0xff] (!%p345_p9)  ;;  %v1055_v33 = vmov (!%p345_p9), 0   ;;  %vm493_vm1 = vcmask (!%p345_p9), 1045504  }
  0x4a   : > { %348 = sbr.rel (%p345_p9) target bundleno = 384 (0x180), region = 51  ;;  %867 = vmatprep.mubr.msk.f32.mxu0 (!%p345_p9), %vm486_vm0, %v1318_v31  ;;  %871 = vmatprep.mubr.msk.f32.mxu1 (!%p345_p9), %vm486_vm0, %v1318_v31  ;;  %v475_v34 = vld [vmem:[%s1520_s2 + $0x8] sm:$0xff] (!%p345_p9) }
  0x4b   : > { %s1001_s4 = smul.u32 (!%p345_p9), 760, %s351_s28  ;;  %1030 = vset.pattern.permute.xlu0 (!%p345_p9), %v1055_v33 }
  0x4c   : > { %478 = vperm.xlu0 (!%p345_p9), %1030, %v474_v32   ;;  %s1002_s23 = smul.u32 (!%p345_p9), 80, %s351_s28 }
  0x4d   : > { %s1332_s9 = scalar_lea.vmem (!%p345_p9), [#allocation2], %s1001_s4 }
  0x4e   : > { %v380_v35 = vld [vmem:[%s1332_s9 + $0x8] sm:$0xff] (!%p345_p9)  ;;  %v385_v36 = vld [vmem:[%s1332_s9 + $0x30] sm:$0xff] (!%p345_p9)  ;;  %v382_v37 = vld [vmem:[%s1332_s9 + $0x18] sm:$0xff] (!%p345_p9)  ;;  %s1479_s24 = scalar_lea.vmem (!%p345_p9), [#allocation3], %s1002_s23 }
  0x4f   : > { %v881_v38 = vpack.c.bf16 (!%p345_p9), %v385_v36, %v380_v35  ;;  %v387_v39 = vld [vmem:[%s1332_s9 + $0x40] sm:$0xff] (!%p345_p9)  ;;  %v384_v41 = vld [vmem:[%s1332_s9 + $0x28] sm:$0xff] (!%p345_p9)  ;;  %v381_v44 = vld [vmem:[%s1332_s9 + $0x10] sm:$0xff] (!%p345_p9) }
  0x50   : > { %v379_v40 = vld [vmem:[%s1332_s9] sm:$0xff] (!%p345_p9)  ;;  %v917_v42 = vpack.c.bf16 (!%p345_p9), %v387_v39, %v382_v37  ;;  %v386_v45 = vld [vmem:[%s1332_s9 + $0x38] sm:$0xff] (!%p345_p9)  ;;  %v392_v49 = vld [vmem:[%s1332_s9 + $0x68] sm:$0xff] (!%p345_p9)  ;;  %483 = vperm.xlu0 (!%p345_p9), %1030, %v475_v34  }
  0x51   : > { %v883_v43 = vpack.c.bf16 %v384_v41, %v379_v40  ;;  %v390_v46 = vld [vmem:[%s1332_s9 + $0x58] sm:$0xff]  ;;  %882 = vmatprep.subr.bf16.mxu0 %v881_v38  ;;  %v919_v47 = vpack.c.bf16 %v386_v45, %v381_v44  ;;  %v395_v48 = vld [vmem:[%s1332_s9 + $0x80] sm:$0xff]  ;;  %v397_v50 = vld [vmem:[%s1332_s9 + $0x90] sm:$0xff]  ;;  %s880_s12 = smul.u32 (%p1108_p5), 40, %s859_s15 }
  0x52   : > { %918 = vmatprep.subr.bf16.mxu1 %v917_v42  ;;  %v885_v51 = vpack.c.bf16 %v395_v48, %v390_v46  ;;  %v921_v52 = vpack.c.bf16 %v397_v50, %v392_v49  ;;  %v389_v53 = vld [vmem:[%s1332_s9 + $0x50] sm:$0xff]  ;;  %v394_v54 = vld [vmem:[%s1332_s9 + $0x78] sm:$0xff]  ;;  %v391_v55 = vld [vmem:[%s1332_s9 + $0x60] sm:$0xff] }
  0x53   : > { %884 = vmatpush1.bf16.msra.mxu0 %v883_v43  ;;  %920 = vmatpush1.bf16.msra.mxu1 %v919_v47  ;;  %v887_v56 = vpack.c.bf16 %v394_v54, %v389_v53  ;;  %v396_v57 = vld [vmem:[%s1332_s9 + $0x88] sm:$0xff]  ;;  %v405_v59 = vld [vmem:[%s1332_s9 + $0xd0] sm:$0xff]  ;;  %v402_v62 = vld [vmem:[%s1332_s9 + $0xb8] sm:$0xff]  ;;  %s767_s14 = scalar_lea.vmem (%p1108_p5), %s1521_s3, %s880_s12 }
  0x54   : > { %v400_v58 = vld [vmem:[%s1332_s9 + $0xa8] sm:$0xff]  ;;  %886 = vmatprep.subr.bf16.mxu0 %v885_v51  ;;  %922 = vmatprep.subr.bf16.mxu1 %v921_v52  ;;  %v923_v60 = vpack.c.bf16 %v396_v57, %v391_v55  ;;  %v407_v63 = vld [vmem:[%s1332_s9 + $0xe0] sm:$0xff]  ;;  %v401_v3 = vld [vmem:[%s1332_s9 + $0xb0] sm:$0xff] }
  0x55   : > { %v889_v61 = vpack.c.bf16 %v405_v59, %v400_v58  ;;  %v399_v0 = vld [vmem:[%s1332_s9 + $0xa0] sm:$0xff]  ;;  %v925_v1 = vpack.c.bf16 %v407_v63, %v402_v62  ;;  %v404_v2 = vld [vmem:[%s1332_s9 + $0xc8] sm:$0xff]  ;;  %v406_v4 = vld [vmem:[%s1332_s9 + $0xd8] sm:$0xff] }
  0x56   : > { %v891_v5 = vpack.c.bf16 %v404_v2, %v399_v0  ;;  %v410_v6 = vld [vmem:[%s1332_s9 + $0xf8] sm:$0xff]  ;;  %v415_v7 = vld [vmem:[%s1332_s9 + $0x120] sm:$0xff]  ;;  %v412_v8 = vld [vmem:[%s1332_s9 + $0x108] sm:$0xff]  ;;  %v927_v9 = vpack.c.bf16 %v406_v4, %v401_v3 }
  0x57   : > { %888 = vmatpush1.bf16.msra.mxu0 %v887_v56  ;;  %924 = vmatpush1.bf16.msra.mxu1 %v923_v60  ;;  %v893_v10 = vpack.c.bf16 %v415_v7, %v410_v6  ;;  %v417_v11 = vld [vmem:[%s1332_s9 + $0x130] sm:$0xff]  ;;  %v414_v13 = vld [vmem:[%s1332_s9 + $0x118] sm:$0xff]  ;;  %v411_v15 = vld [vmem:[%s1332_s9 + $0x100] sm:$0xff] }
  0x58   : > { %890 = vmatprep.subr.bf16.mxu0 %v889_v61  ;;  %v409_v12 = vld [vmem:[%s1332_s9 + $0xf0] sm:$0xff]  ;;  %926 = vmatprep.subr.bf16.mxu1 %v925_v1  ;;  %v929_v14 = vpack.c.bf16 %v417_v11, %v412_v8  ;;  %v416_v16 = vld [vmem:[%s1332_s9 + $0x128] sm:$0xff]  ;;  %v422_v19 = vld [vmem:[%s1332_s9 + $0x158] sm:$0xff] }
  0x59   : > { %v420_v17 = vld [vmem:[%s1332_s9 + $0x148] sm:$0xff]  ;;  %v425_v18 = vld [vmem:[%s1332_s9 + $0x170] sm:$0xff]  ;;  %v427_v20 = vld [vmem:[%s1332_s9 + $0x180] sm:$0xff]  ;;  %v895_v21 = vpack.c.bf16 %v414_v13, %v409_v12  ;;  %v931_v22 = vpack.c.bf16 %v416_v16, %v411_v15 }
  0x5a   : > { %v897_v23 = vpack.c.bf16 %v425_v18, %v420_v17  ;;  %v419_v24 = vld [vmem:[%s1332_s9 + $0x140] sm:$0xff]  ;;  %v424_v25 = vld [vmem:[%s1332_s9 + $0x168] sm:$0xff]  ;;  %v421_v26 = vld [vmem:[%s1332_s9 + $0x150] sm:$0xff]  ;;  %v933_v27 = vpack.c.bf16 %v427_v20, %v422_v19 }
  0x5b   : > { %892 = vmatpush1.bf16.msra.mxu0 %v891_v5  ;;  %928 = vmatpush1.bf16.msra.mxu1 %v927_v9  ;;  %v426_v28 = vld [vmem:[%s1332_s9 + $0x178] sm:$0xff]  ;;  %v435_v30 = vld [vmem:[%s1332_s9 + $0x1c0] sm:$0xff]  ;;  %v432_v32 = vld [vmem:[%s1332_s9 + $0x1a8] sm:$0xff]  ;;  %v899_v34 = vpack.c.bf16 %v424_v25, %v419_v24 }
  0x5c   : > { %894 = vmatprep.subr.bf16.mxu0 %v893_v10  ;;  %930 = vmatprep.subr.bf16.mxu1 %v929_v14  ;;  %v430_v29 = vld [vmem:[%s1332_s9 + $0x198] sm:$0xff]  ;;  %v437_v33 = vld [vmem:[%s1332_s9 + $0x1d0] sm:$0xff]  ;;  %v935_v35 = vpack.c.bf16 %v426_v28, %v421_v26  ;;  %v431_v39 = vld [vmem:[%s1332_s9 + $0x1a0] sm:$0xff]  ;;  %v1056_v26 = vmov 0.0|0.0  }
  0x5d   : > { %v901_v36 = vpack.c.bf16 %v435_v30, %v430_v29  ;;  %v429_v37 = vld [vmem:[%s1332_s9 + $0x190] sm:$0xff]  ;;  %v434_v38 = vld [vmem:[%s1332_s9 + $0x1b8] sm:$0xff]  ;;  %v937_v40 = vpack.c.bf16 %v437_v33, %v432_v32  ;;  %v436_v41 = vld [vmem:[%s1332_s9 + $0x1c8] sm:$0xff] }
  0x5e   : > { %v440_v42 = vld [vmem:[%s1332_s9 + $0x1e8] sm:$0xff]  ;;  %v445_v43 = vld [vmem:[%s1332_s9 + $0x210] sm:$0xff]  ;;  %v442_v44 = vld [vmem:[%s1332_s9 + $0x1f8] sm:$0xff]  ;;  %v903_v46 = vpack.c.bf16 %v434_v38, %v429_v37  ;;  %v939_v47 = vpack.c.bf16 %v436_v41, %v431_v39 }
  0x5f   : > { %896 = vmatpush1.bf16.msra.mxu0 %v895_v21  ;;  %932 = vmatpush1.bf16.msra.mxu1 %v931_v22  ;;  %v447_v45 = vld [vmem:[%s1332_s9 + $0x220] sm:$0xff]  ;;  %v905_v48 = vpack.c.bf16 %v445_v43, %v440_v42  ;;  %v444_v50 = vld [vmem:[%s1332_s9 + $0x208] sm:$0xff]  ;;  %v441_v51 = vld [vmem:[%s1332_s9 + $0x1f0] sm:$0xff] }
  0x60   : > { %898 = vmatprep.subr.bf16.mxu0 %v897_v23  ;;  %934 = vmatprep.subr.bf16.mxu1 %v933_v27  ;;  %v439_v49 = vld [vmem:[%s1332_s9 + $0x1e0] sm:$0xff]  ;;  %v941_v52 = vpack.c.bf16 %v447_v45, %v442_v44  ;;  %v446_v53 = vld [vmem:[%s1332_s9 + $0x218] sm:$0xff]  ;;  %v452_v56 = vld [vmem:[%s1332_s9 + $0x248] sm:$0xff] }
  0x61   : > { %v450_v54 = vld [vmem:[%s1332_s9 + $0x238] sm:$0xff]  ;;  %v455_v55 = vld [vmem:[%s1332_s9 + $0x260] sm:$0xff]  ;;  %v457_v57 = vld [vmem:[%s1332_s9 + $0x270] sm:$0xff]  ;;  %v907_v58 = vpack.c.bf16 %v444_v50, %v439_v49  ;;  %v943_v59 = vpack.c.bf16 %v446_v53, %v441_v51  ;;  %v1057_v51 = vmov 0.0  }
  0x62   : > { %v909_v60 = vpack.c.bf16 %v455_v55, %v450_v54  ;;  %v449_v61 = vld [vmem:[%s1332_s9 + $0x230] sm:$0xff]  ;;  %v454_v62 = vld [vmem:[%s1332_s9 + $0x258] sm:$0xff]  ;;  %v451_v63 = vld [vmem:[%s1332_s9 + $0x240] sm:$0xff]  ;;  %v945_v0 = vpack.c.bf16 %v457_v57, %v452_v56 }
  0x63   : > { %900 = vmatpush1.bf16.msra.mxu0 %v899_v34  ;;  %936 = vmatpush1.bf16.msra.mxu1 %v935_v35  ;;  %v456_v1 = vld [vmem:[%s1332_s9 + $0x268] sm:$0xff]  ;;  %v465_v3 = vld [vmem:[%s1332_s9 + $0x2b0] sm:$0xff]  ;;  %v462_v4 = vld [vmem:[%s1332_s9 + $0x298] sm:$0xff]  ;;  %v911_v6 = vpack.c.bf16 %v454_v62, %v449_v61 }
  0x64   : > { %902 = vmatprep.subr.bf16.mxu0 %v901_v36  ;;  %938 = vmatprep.subr.bf16.mxu1 %v937_v40  ;;  %v460_v2 = vld [vmem:[%s1332_s9 + $0x288] sm:$0xff]  ;;  %v467_v5 = vld [vmem:[%s1332_s9 + $0x2c0] sm:$0xff]  ;;  %v947_v7 = vpack.c.bf16 %v456_v1, %v451_v63  ;;  %v461_v12 = vld [vmem:[%s1332_s9 + $0x290] sm:$0xff] }
  0x65   : > { %v913_v8 = vpack.c.bf16 %v465_v3, %v460_v2  ;;  %v459_v9 = vld [vmem:[%s1332_s9 + $0x280] sm:$0xff]  ;;  %v464_v10 = vld [vmem:[%s1332_s9 + $0x2a8] sm:$0xff]  ;;  %v949_v11 = vpack.c.bf16 %v467_v5, %v462_v4  ;;  %v466_v13 = vld [vmem:[%s1332_s9 + $0x2b8] sm:$0xff] }
  0x66   : > { %v915_v14 = vpack.c.bf16 %v464_v10, %v459_v9  ;;  %v951_v15 = vpack.c.bf16 %v466_v13, %v461_v12  ;;  %v470_v16 = vld [vmem:[%s1332_s9 + $0x2d8] sm:$0x3f]  ;;  %v472_v17 = vld [vmem:[%s1332_s9 + $0x2e8] sm:$0x3f]  ;;  %v383_v18 = vld [vmem:[%s1332_s9 + $0x20] sm:$0xff] }
  0x67   : > { %904 = vmatpush1.bf16.msra.mxu0 %v903_v46  ;;  %940 = vmatpush1.bf16.msra.mxu1 %v939_v47  ;;  %v388_v19 = vld [vmem:[%s1332_s9 + $0x48] sm:$0xff]  ;;  %v469_v20 = vld [vmem:[%s1332_s9 + $0x2d0] sm:$0x3f]  ;;  %v471_v21 = vld [vmem:[%s1332_s9 + $0x2e0] sm:$0x3f] }
  0x68   : > { %906 = vmatprep.subr.bf16.mxu0 %v905_v48  ;;  %942 = vmatprep.subr.bf16.mxu1 %v941_v52  ;;  %v1417_v22 = vld [vmem:[%s1518_s0] sm:$0xff]  ;;  %v954_v23 = vpack.c.bf16 %v388_v19, %v383_v18  ;;  %v393_v24 = vld [vmem:[%s1332_s9 + $0x70] sm:$0xff]  ;;  %v398_v25 = vld [vmem:[%s1332_s9 + $0x98] sm:$0xff] }
  0x69   : > { %v378_v27 = vld [vmem:[%s1518_s0 + $0x18] sm:$0xff]  ;;  %v957_v28 = vpack.c.bf16 %v398_v25, %v393_v24  ;;  %v1433_v29 = vld [vmem:[%s1518_s0 + $0x10] sm:$0xff]  ;;  %v408_v32 = vld [vmem:[%s1332_s9 + $0xe8] sm:$0xff] }
  0x6a   : > { %v403_v30 = vld [vmem:[%s1332_s9 + $0xc0] sm:$0xff]  ;;  %v413_v34 = vld [vmem:[%s1332_s9 + $0x110] sm:$0xff]  ;;  %v418_v35 = vld [vmem:[%s1332_s9 + $0x138] sm:$0xff] }
  0x6b   : > { %908 = vmatpush1.bf16.msra.mxu0 %v907_v58  ;;  %944 = vmatpush1.bf16.msra.mxu1 %v943_v59  ;;  %v960_v33 = vpack.c.bf16 %v408_v32, %v403_v30  ;;  %v963_v36 = vpack.c.bf16 %v418_v35, %v413_v34  ;;  %v423_v37 = vld [vmem:[%s1332_s9 + $0x160] sm:$0xff]  ;;  %v428_v38 = vld [vmem:[%s1332_s9 + $0x188] sm:$0xff]  ;;  %v438_v40 = vld [vmem:[%s1332_s9 + $0x1d8] sm:$0xff] }
  0x6c   : > { %910 = vmatprep.subr.bf16.mxu0 %v909_v60  ;;  %946 = vmatprep.subr.bf16.mxu1 %v945_v0  ;;  %v966_v39 = vpack.c.bf16 %v428_v38, %v423_v37  ;;  %v443_v42 = vld [vmem:[%s1332_s9 + $0x200] sm:$0xff]  ;;  %v448_v43 = vld [vmem:[%s1332_s9 + $0x228] sm:$0xff]  ;;  %v453_v45 = vld [vmem:[%s1332_s9 + $0x250] sm:$0xff] }
  0x6d   : > { %v972_v44 = vpack.c.bf16 %v448_v43, %v443_v42  ;;  %v458_v46 = vld [vmem:[%s1332_s9 + $0x278] sm:$0xff]  ;;  %v463_v48 = vld [vmem:[%s1332_s9 + $0x2a0] sm:$0xff]  ;;  %v468_v49 = vld [vmem:[%s1332_s9 + $0x2c8] sm:$0xff] }
  0x6e   : > { %v975_v47 = vpack.c.bf16 %v458_v46, %v453_v45  ;;  %v978_v50 = vpack.c.bf16 %v468_v49, %v463_v48  ;;  %v473_v52 = vld [vmem:[%s1332_s9 + $0x2f0] sm:$0x3f] }
  0x6f   : > { %912 = vmatpush1.bf16.msra.mxu0 %v911_v6  ;;  %948 = vmatpush1.bf16.msra.mxu1 %v947_v7 }
  0x70   : > { %914 = vmatprep.subr.bf16.mxu0 %v913_v8  ;;  %950 = vmatprep.subr.bf16.mxu1 %v949_v11 }
  0x73   : > { %916 = vmatpush1.bf16.msra.mxu0 %v915_v14  ;;  %952 = vmatpush1.bf16.msra.mxu1 %v951_v15 }
  0x74   : > { %865 = vmatprep.subr.msk.mxu0 %vm493_vm1, %v470_v16  ;;  %869 = vmatprep.subr.msk.mxu1 %vm493_vm1, %v472_v17 }
  0x77   : > { %866 = vmatpush1.msk.msra.mxu0 %vm493_vm1, %v469_v20  ;;  %870 = vmatpush1.msk.msra.mxu1 %vm493_vm1, %v471_v21 }
  0x78   : > { %574 = vmatmul.mubr.f32.vlgmr.msra.gmra.mrb[0].mxu0 %v1417_v22  ;;  %651 = vmatmul.mubr.f32.vlgmr.msra.gmra.mrb[0].mxu1 %v1417_v22 }
  0x79   : > { %953 = vmatprep.subr.bf16.mxu0 %v1056_v26  ;;  %980 = vmatprep.subr.bf16.mxu1 %v1056_v26 }
  0x7a   : > { %955 = vmatpush1.bf16.msra.mxu0 %v954_v23  ;;  %990 = vmatpush1.bf16.msra.mxu1 %v954_v23 }
  0x7b   : > { %956 = vmatprep.subr.bf16.mxu0 %v1056_v26  ;;  %981 = vmatprep.subr.bf16.mxu1 %v1056_v26 }
  0x7c   : > { %868 = vmatprep.mubr.msk.f32.mxu0 %vm486_vm0, %v378_v27  ;;  %872 = vmatprep.mubr.msk.f32.mxu1 %vm486_vm0, %v378_v27 }
  0x7d   : > { %580 = vmatmul.mubr.f32.gmra.mrb[2].mxu0 %v1433_v29  ;;  %657 = vmatmul.mubr.f32.gmra.mrb[2].mxu1 %v1433_v29 }
  0x7e   : > { %958 = vmatpush1.bf16.msra.mxu0 %v957_v28  ;;  %991 = vmatpush1.bf16.msra.mxu1 %v957_v28 }
  0x7f   : > { %959 = vmatprep.subr.bf16.mxu0 %v1056_v26  ;;  %982 = vmatprep.subr.bf16.mxu1 %v1056_v26 }
  0x80   : > { %874 = vmatprep.mubr.msk.f32.mxu0 %vm486_vm0, %v1318_v31  ;;  %875 = vmatprep.mubr.msk.f32.mxu1 %vm486_vm0, %v378_v27  ;;  %v433_v31 = vld [vmem:[%s1332_s9 + $0x1b0] sm:$0xff] }
  0x81   : > { %v969_v41 = vpack.c.bf16 %v438_v40, %v433_v31 }
  0x82   : > { %961 = vmatpush1.bf16.msra.mxu0 %v960_v33  ;;  %992 = vmatpush1.bf16.msra.mxu1 %v960_v33 }
  0x83   : > { %962 = vmatprep.subr.bf16.mxu0 %v1056_v26  ;;  %983 = vmatprep.subr.bf16.mxu1 %v1056_v26 }
  0x86   : > { %964 = vmatpush1.bf16.msra.mxu0 %v963_v36  ;;  %993 = vmatpush1.bf16.msra.mxu1 %v963_v36 }
  0x87   : > { %965 = vmatprep.subr.bf16.mxu0 %v1056_v26  ;;  %984 = vmatprep.subr.bf16.mxu1 %v1056_v26 }
  0x8a   : > { %967 = vmatpush1.bf16.msra.mxu0 %v966_v39  ;;  %994 = vmatpush1.bf16.msra.mxu1 %v966_v39 }
  0x8b   : > { %968 = vmatprep.subr.bf16.mxu0 %v1056_v26  ;;  %985 = vmatprep.subr.bf16.mxu1 %v1056_v26 }
  0x8e   : > { %970 = vmatpush1.bf16.msra.mxu0 %v969_v41  ;;  %995 = vmatpush1.bf16.msra.mxu1 %v969_v41 }
  0x8f   : > { %971 = vmatprep.subr.bf16.mxu0 %v1056_v26  ;;  %986 = vmatprep.subr.bf16.mxu1 %v1056_v26 }
  0x92   : > { %973 = vmatpush1.bf16.msra.mxu0 %v972_v44  ;;  %996 = vmatpush1.bf16.msra.mxu1 %v972_v44 }
  0x93   : > { %974 = vmatprep.subr.bf16.mxu0 %v1056_v26  ;;  %987 = vmatprep.subr.bf16.mxu1 %v1056_v26 }
  0x96   : > { %976 = vmatpush1.bf16.msra.mxu0 %v975_v47  ;;  %997 = vmatpush1.bf16.msra.mxu1 %v975_v47 }
  0x97   : > { %977 = vmatprep.subr.bf16.mxu0 %v1056_v26  ;;  %988 = vmatprep.subr.bf16.mxu1 %v1056_v26 }
  0x9a   : > { %979 = vmatpush1.bf16.msra.mxu0 %v978_v50  ;;  %998 = vmatpush1.bf16.msra.mxu1 %v978_v50 }
  0x9b   : > { %699 = vmatprep.subr.mxu0 %v1057_v51  ;;  %989 = vmatprep.subr.mxu1 %v1057_v51 }
  0x9e   : > { %873 = vmatpush1.msk.msra.mxu0 %vm493_vm1, %v473_v52  ;;  %999 = vmatpush1.msk.msra.mxu1 %vm493_vm1, %v473_v52 }
  0x9f   : > { %728 = vmatmul.mubr.f32.vlgmr.msra.gmra.mrb[4].mxu0 %v1417_v22  ;;  %733 = vmatmul.mubr.f32.vlgmr.msra.gmra.mrb[4].mxu1 %v1433_v29 }
  0xcb   : > { %v479_v53 = vpop.permute.xlu0 %478 }
  0xcf   : > { %v484_v63 = vpop.permute.xlu0 %483 }
 0x14b   : > { %v575_v54 = vpop.f32.mrb[0].mxu0  ;;  %v652_v55 = vpop.f32.mrb[0].mxu1 }
 0x14c   : > { %v576_v56 = vadd.f32 %v575_v54, %v479_v53  ;;  %v577_v57 = vpop.f32.mrb[1].mxu0  ;;  %v653_v58 = vadd.f32 %v652_v55, %v479_v53  ;;  %v654_v60 = vpop.f32.mrb[1].mxu1 }
 0x14d   : > { %v578_v59 = vadd.f32 %v577_v57, %v479_v53  ;;  %v655_v62 = vadd.f32 %v654_v60, %v479_v53 }
 0x14e   : > { %v738_v61 = vmax.f32 %v576_v56, 0.0  ;;  %v740_v0 = vmax.f32 %v653_v58, 0.0 }
 0x14f   : > { %v739_v1 = vmax.f32 %v578_v59, 0.0  ;;  %v741_v2 = vmax.f32 %v655_v62, 0.0 }
 0x150   : > { %748 = vst [vmem:[%s1479_s24] sm:$0xff] %v738_v61  ;;  %v581_v3 = vpop.f32.mrb[2].mxu0  ;;  %750 = vst [vmem:[%s1479_s24 + $0x10] sm:$0xff] %v740_v0  ;;  %v658_v4 = vpop.f32.mrb[2].mxu1 }
 0x151   : > { %749 = vst [vmem:[%s1479_s24 + $0x8] sm:$0xff] %v739_v1  ;;  %v582_v5 = vadd.f32 %v581_v3, %v484_v63  ;;  %v583_v6 = vpop.f32.mrb[3].mxu0  ;;  %751 = vst [vmem:[%s1479_s24 + $0x18] sm:$0xff] %v741_v2  ;;  %v659_v7 = vadd.f32 %v658_v4, %v484_v63  ;;  %v660_v9 = vpop.f32.mrb[3].mxu1 }
 0x152   : > { %v584_v8 = vadd.f32 %v583_v6, %v484_v63  ;;  %v661_v11 = vadd.f32 %v660_v9, %v484_v63 }
 0x153   : > { %v743_v10 = vmax.f32 %v582_v5, 0.0  ;;  %v745_v12 = vmax.f32 %v659_v7, 0.0 }
 0x154   : > { %v744_v13 = vmax.f32 %v584_v8, 0.0  ;;  %v746_v14 = vmax.f32 %v661_v11, 0.0 }
 0x155   : > { %753 = vst [vmem:[%s1479_s24 + $0x28] sm:$0xff] %v743_v10  ;;  %755 = vst [vmem:[%s1479_s24 + $0x38] sm:$0xff] %v745_v12 }
 0x156   : > { %754 = vst [vmem:[%s1479_s24 + $0x30] sm:$0xff] %v744_v13  ;;  %756 = vst [vmem:[%s1479_s24 + $0x40] sm:$0xff] %v746_v14 }
 0x157   : > { %v780_v23 = vld [vmem:[%s1479_s24] sm:$0xff] (%p1108_p5)  ;;  %v784_v25 = vld [vmem:[%s1479_s24 + $0x10] sm:$0xff] (%p1108_p5) }
 0x158   : > { %v782_v24 = vld [vmem:[%s1479_s24 + $0x8] sm:$0xff] (%p1108_p5)  ;;  %v786_v26 = vld [vmem:[%s1479_s24 + $0x18] sm:$0xff] (%p1108_p5)  ;;  %781 = vst [vmem:[%s767_s14] sm:$0xff] (%p1108_p5), %v780_v23  ;;  %785 = vst [vmem:[%s767_s14 + $0x10] sm:$0xff] (%p1108_p5), %v784_v25 }
 0x159   : > { %783 = vst [vmem:[%s767_s14 + $0x8] sm:$0xff] (%p1108_p5), %v782_v24  ;;  %787 = vst [vmem:[%s767_s14 + $0x18] sm:$0xff] (%p1108_p5), %v786_v26 }
 0x15c   : > { %v790_v28 = vld [vmem:[%s1479_s24 + $0x28] sm:$0xff] (%p1108_p5)  ;;  %v794_v30 = vld [vmem:[%s1479_s24 + $0x38] sm:$0xff] (%p1108_p5) }
 0x15d   : > { %v792_v29 = vld [vmem:[%s1479_s24 + $0x30] sm:$0xff] (%p1108_p5)  ;;  %v796_v32 = vld [vmem:[%s1479_s24 + $0x40] sm:$0xff] (%p1108_p5)  ;;  %791 = vst [vmem:[%s767_s14 + $0xc8] sm:$0xff] (%p1108_p5), %v790_v28  ;;  %795 = vst [vmem:[%s767_s14 + $0xd8] sm:$0xff] (%p1108_p5), %v794_v30 }
 0x15e   : > { %793 = vst [vmem:[%s767_s14 + $0xd0] sm:$0xff] (%p1108_p5), %v792_v29  ;;  %797 = vst [vmem:[%s767_s14 + $0xe0] sm:$0xff] (%p1108_p5), %v796_v32 }
 0x171   : > { %764 = sbr.rel (!%p1108_p5) target bundleno = 384 (0x180), region = 59 }
 0x172   : > { %v729_v15 = vpop.f32.mrb[4].mxu0  ;;  %v734_v17 = vpop.f32.mrb[4].mxu1 }
 0x173   : > { %v730_v16 = vadd.f32 %v729_v15, %v479_v53  ;;  %v731_v18 = vpop.f32.mrb[5].mxu0  ;;  %v735_v19 = vadd.f32 %v734_v17, %v484_v63  ;;  %v736_v20 = vpop.f32.mrb[5].mxu1 }
 0x175   : > { %v742_v21 = vmax.f32 %v730_v16, 0.0  ;;  %v747_v22 = vmax.f32 %v735_v19, 0.0 }
 0x177   : > { %752 = vst [vmem:[%s1479_s24 + $0x20] sm:$0xff] %v742_v21  ;;  %757 = vst [vmem:[%s1479_s24 + $0x48] sm:$0xff] %v747_v22 }
 0x17e   : > { %v788_v27 = vld [vmem:[%s1479_s24 + $0x20] sm:$0xff]  ;;  %v798_v33 = vld [vmem:[%s1479_s24 + $0x48] sm:$0xff] }
 0x17f   : > { %789 = vst [vmem:[%s767_s14 + $0x20] sm:$0xff] %v788_v27  ;;  %799 = vst [vmem:[%s767_s14 + $0xe8] sm:$0xff] %v798_v33 }
 0x180 PF: > { %p10_p10 = scmp.ge.s32.totalorder %s1095_s16, 7   ;;  %s1523_s12 = smov %s1049_s13 }
 0x181   : > { %s1524_s13 = smov %s1106_s19  ;;  %s1525_s14 = smov %s1095_s16 }
 0x182   :  { %12 = sbr.rel (!%p10_p10) target bundleno = 2 (0x2), region = 113 }

// kernel: basic_rn_forward.5
= control target key start
LH: loop header
LB: loop body
LE: loop exit
PB: predicated region body
PF: predicated region fallthrough
CT: control target
= control target key end

     0   :  { %vm158_vm0 = vcmask 261120   ;;  %s8773_s1 = inlined_call_operand.vmem [shape: f32[3,288,256], index: 1, kind: input, shape index: {}]   ;;  %s8774_s0 = inlined_call_operand.vmem [shape: f32[3,64,288], index: 0, kind: input, shape index: {}]   ;;  %s8775_s3 = inlined_call_operand.vmem [shape: f32[3,256,256], index: 3, kind: input, shape index: {}]   ;;  %s8776_s5 = inlined_call_operand.vmem [shape: f32[3,256,256], index: 5, kind: input, shape index: {}]   ;;  %s8777_s2 = inlined_call_operand.vmem [shape: f32[3,1,256], index: 2, kind: input, shape index: {}]   ;;  %s8778_s4 = inlined_call_operand.vmem [shape: f32[3,1,256], index: 4, kind: input, shape index: {}]   ;;  %s8779_s7 = inlined_call_operand.vmem [shape: f32[3,256,256], index: 7, kind: input, shape index: {}]   ;;  %s8780_s6 = inlined_call_operand.vmem [shape: f32[3,1,256], index: 6, kind: input, shape index: {}]   ;;  %s8781_s8 = inlined_call_operand.vmem [shape: f32[3,1,256], index: 8, kind: input, shape index: {}]   ;;  %s8782_s9 = inlined_call_operand.vmem [shape: f32[256,256], index: 9, kind: input, shape index: {}]   ;;  %s8783_s11 = inlined_call_operand.vmem [shape: f32[256,256], index: 11, kind: input, shape index: {}]   ;;  %s8784_s13 = inlined_call_operand.vmem [shape: f32[256,128], index: 13, kind: input, shape index: {}]   ;;  %s8785_s10 = inlined_call_operand.vmem [shape: f32[1,256], index: 10, kind: input, shape index: {}]   ;;  %s8786_s12 = inlined_call_operand.vmem [shape: f32[1,256], index: 12, kind: input, shape index: {}]   ;;  %s8787_s14 = inlined_call_operand.vmem [shape: f32[1,128], index: 14, kind: input, shape index: {}]   ;;  %s8788_s15 = inlined_call_operand.vmem [shape: f32[32,128], index: 15, kind: output, shape index: {}]  }
   0x1   :  { %v75_v0 = vld [vmem:[%s8773_s1 + $0x8] sm:$0xff]  ;;  %v77_v1 = vld [vmem:[%s8773_s1 + $0x18] sm:$0xff]  ;;  %v74_v2 = vld [vmem:[%s8773_s1] sm:$0xff] }
   0x2   :  { %v4215_v3 = vpack.c.bf16 %v77_v1, %v75_v0  ;;  %v76_v4 = vld [vmem:[%s8773_s1 + $0x10] sm:$0xff]  ;;  %v79_v5 = vld [vmem:[%s8773_s1 + $0x28] sm:$0xff]  ;;  %v81_v6 = vld [vmem:[%s8773_s1 + $0x38] sm:$0xff] }
   0x3   :  { %v4217_v7 = vpack.c.bf16 %v76_v4, %v74_v2  ;;  %v4219_v8 = vpack.c.bf16 %v81_v6, %v79_v5  ;;  %v78_v9 = vld [vmem:[%s8773_s1 + $0x20] sm:$0xff]  ;;  %v80_v10 = vld [vmem:[%s8773_s1 + $0x30] sm:$0xff]  ;;  %v83_v11 = vld [vmem:[%s8773_s1 + $0x48] sm:$0xff] }
   0x4   :  { %4216 = vmatprep.subr.bf16.mxu0 %v4215_v3  ;;  %v85_v12 = vld [vmem:[%s8773_s1 + $0x58] sm:$0xff]  ;;  %v4221_v13 = vpack.c.bf16 %v80_v10, %v78_v9  ;;  %v82_v15 = vld [vmem:[%s8773_s1 + $0x40] sm:$0xff]  ;;  %v84_v16 = vld [vmem:[%s8773_s1 + $0x50] sm:$0xff] }
   0x5   :  { %4218 = vmatpush1.bf16.msra.mxu0 %v4217_v7  ;;  %v4223_v14 = vpack.c.bf16 %v85_v12, %v83_v11  ;;  %v87_v17 = vld [vmem:[%s8773_s1 + $0x68] sm:$0xff]  ;;  %v89_v18 = vld [vmem:[%s8773_s1 + $0x78] sm:$0xff]  ;;  %v4225_v19 = vpack.c.bf16 %v84_v16, %v82_v15  ;;  %v86_v21 = vld [vmem:[%s8773_s1 + $0x60] sm:$0xff] }
   0x6   :  { %4220 = vmatprep.subr.bf16.mxu0 %v4219_v8  ;;  %v4227_v20 = vpack.c.bf16 %v89_v18, %v87_v17  ;;  %v88_v22 = vld [vmem:[%s8773_s1 + $0x70] sm:$0xff]  ;;  %v91_v23 = vld [vmem:[%s8773_s1 + $0x88] sm:$0xff]  ;;  %v93_v24 = vld [vmem:[%s8773_s1 + $0x98] sm:$0xff] }
   0x7   :  { %v4229_v25 = vpack.c.bf16 %v88_v22, %v86_v21  ;;  %v4231_v26 = vpack.c.bf16 %v93_v24, %v91_v23  ;;  %v90_v27 = vld [vmem:[%s8773_s1 + $0x80] sm:$0xff]  ;;  %v92_v28 = vld [vmem:[%s8773_s1 + $0x90] sm:$0xff]  ;;  %v95_v29 = vld [vmem:[%s8773_s1 + $0xa8] sm:$0xff] }
   0x8   :  { %v97_v30 = vld [vmem:[%s8773_s1 + $0xb8] sm:$0xff]  ;;  %v4233_v31 = vpack.c.bf16 %v92_v28, %v90_v27  ;;  %v94_v33 = vld [vmem:[%s8773_s1 + $0xa0] sm:$0xff]  ;;  %v96_v34 = vld [vmem:[%s8773_s1 + $0xb0] sm:$0xff] }
   0x9   :  { %4222 = vmatpush1.bf16.msra.mxu0 %v4221_v13  ;;  %v4235_v32 = vpack.c.bf16 %v97_v30, %v95_v29  ;;  %v99_v35 = vld [vmem:[%s8773_s1 + $0xc8] sm:$0xff]  ;;  %v101_v36 = vld [vmem:[%s8773_s1 + $0xd8] sm:$0xff]  ;;  %v4237_v37 = vpack.c.bf16 %v96_v34, %v94_v33  ;;  %v98_v39 = vld [vmem:[%s8773_s1 + $0xc0] sm:$0xff] }
   0xa   :  { %4224 = vmatprep.subr.bf16.mxu0 %v4223_v14  ;;  %v4239_v38 = vpack.c.bf16 %v101_v36, %v99_v35  ;;  %v100_v40 = vld [vmem:[%s8773_s1 + $0xd0] sm:$0xff]  ;;  %v51_v41 = vld [vmem:[%s8774_s0 + $0x8] sm:$0xff]  ;;  %v105_v43 = vld [vmem:[%s8773_s1 + $0xf8] sm:$0xff] }
   0xb   :  { %v103_v42 = vld [vmem:[%s8773_s1 + $0xe8] sm:$0xff]  ;;  %247 = vmatprep.mubr.f32.mxu0 %v51_v41  ;;  %v4241_v44 = vpack.c.bf16 %v100_v40, %v98_v39  ;;  %v102_v46 = vld [vmem:[%s8773_s1 + $0xe0] sm:$0xff]  ;;  %v104_v47 = vld [vmem:[%s8773_s1 + $0xf0] sm:$0xff] }
   0xc   :  { %v4243_v45 = vpack.c.bf16 %v105_v43, %v103_v42  ;;  %v107_v48 = vld [vmem:[%s8773_s1 + $0x108] sm:$0xff]  ;;  %v109_v49 = vld [vmem:[%s8773_s1 + $0x118] sm:$0xff]  ;;  %v4245_v50 = vpack.c.bf16 %v104_v47, %v102_v46  ;;  %v106_v52 = vld [vmem:[%s8773_s1 + $0x100] sm:$0xff] }
   0xd   :  { %4226 = vmatpush1.bf16.msra.mxu0 %v4225_v19  ;;  %v4247_v51 = vpack.c.bf16 %v109_v49, %v107_v48  ;;  %v108_v53 = vld [vmem:[%s8773_s1 + $0x110] sm:$0xff]  ;;  %v111_v54 = vld [vmem:[%s8773_s1 + $0x128] sm:$0xff]  ;;  %v113_v55 = vld [vmem:[%s8773_s1 + $0x138] sm:$0xff] }
   0xe   :  { %4228 = vmatprep.subr.bf16.mxu0 %v4227_v20  ;;  %v110_v56 = vld [vmem:[%s8773_s1 + $0x120] sm:$0xff]  ;;  %v112_v57 = vld [vmem:[%s8773_s1 + $0x130] sm:$0xff]  ;;  %v4249_v58 = vpack.c.bf16 %v108_v53, %v106_v52  ;;  %v115_v59 = vld [vmem:[%s8773_s1 + $0x148] sm:$0xff]  ;;  %v4251_v0 = vpack.c.bf16 %v113_v55, %v111_v54 }
   0xf   :  { %v117_v60 = vld [vmem:[%s8773_s1 + $0x158] sm:$0xff]  ;;  %v426_v61 = vld [vmem:[%s8775_s3 + $0x8] sm:$0xff]  ;;  %v425_v63 = vld [vmem:[%s8775_s3] sm:$0xff]  ;;  %v4253_v11 = vpack.c.bf16 %v112_v57, %v110_v56 }
  0x10   :  { %v428_v62 = vld [vmem:[%s8775_s3 + $0x18] sm:$0xff]  ;;  %v427_v2 = vld [vmem:[%s8775_s3 + $0x10] sm:$0xff]  ;;  %v430_v3 = vld [vmem:[%s8775_s3 + $0x28] sm:$0xff]  ;;  %v4255_v15 = vpack.c.bf16 %v117_v60, %v115_v59 }
  0x11   :  { %4230 = vmatpush1.bf16.msra.mxu0 %v4229_v25  ;;  %v4287_v1 = vpack.c.bf16 %v428_v62, %v426_v61  ;;  %v432_v4 = vld [vmem:[%s8775_s3 + $0x38] sm:$0xff]  ;;  %v4289_v5 = vpack.c.bf16 %v427_v2, %v425_v63  ;;  %v429_v7 = vld [vmem:[%s8775_s3 + $0x20] sm:$0xff]  ;;  %v431_v8 = vld [vmem:[%s8775_s3 + $0x30] sm:$0xff] }
  0x12   :  { %4232 = vmatprep.subr.bf16.mxu0 %v4231_v26  ;;  %v4291_v6 = vpack.c.bf16 %v432_v4, %v430_v3  ;;  %v434_v9 = vld [vmem:[%s8775_s3 + $0x48] sm:$0xff]  ;;  %v436_v10 = vld [vmem:[%s8775_s3 + $0x58] sm:$0xff]  ;;  %v114_v12 = vld [vmem:[%s8773_s1 + $0x140] sm:$0xff]  ;;  %v4293_v14 = vpack.c.bf16 %v431_v8, %v429_v7 }
  0x13   :  { %4288 = vmatprep.subr.bf16.mxu1 %v4287_v1  ;;  %v116_v13 = vld [vmem:[%s8773_s1 + $0x150] sm:$0xff]  ;;  %v119_v16 = vld [vmem:[%s8773_s1 + $0x168] sm:$0xff]  ;;  %v4295_v17 = vpack.c.bf16 %v436_v10, %v434_v9  ;;  %v433_v18 = vld [vmem:[%s8775_s3 + $0x40] sm:$0xff] }
  0x14   :  { %4290 = vmatpush1.bf16.msra.mxu1 %v4289_v5  ;;  %v435_v19 = vld [vmem:[%s8775_s3 + $0x50] sm:$0xff]  ;;  %v121_v20 = vld [vmem:[%s8773_s1 + $0x178] sm:$0xff]  ;;  %v438_v21 = vld [vmem:[%s8775_s3 + $0x68] sm:$0xff]  ;;  %v4257_v23 = vpack.c.bf16 %v116_v13, %v114_v12 }
  0x15   :  { %4234 = vmatpush1.bf16.msra.mxu0 %v4233_v31  ;;  %4292 = vmatprep.subr.bf16.mxu1 %v4291_v6  ;;  %v440_v22 = vld [vmem:[%s8775_s3 + $0x78] sm:$0xff]  ;;  %v118_v24 = vld [vmem:[%s8773_s1 + $0x160] sm:$0xff]  ;;  %v120_v25 = vld [vmem:[%s8773_s1 + $0x170] sm:$0xff]  ;;  %v4297_v26 = vpack.c.bf16 %v435_v19, %v433_v18  ;;  %v4259_v27 = vpack.c.bf16 %v121_v20, %v119_v16 }
  0x16   :  { %4236 = vmatprep.subr.bf16.mxu0 %v4235_v32  ;;  %v123_v28 = vld [vmem:[%s8773_s1 + $0x188] sm:$0xff]  ;;  %v4299_v29 = vpack.c.bf16 %v440_v22, %v438_v21  ;;  %v437_v30 = vld [vmem:[%s8775_s3 + $0x60] sm:$0xff]  ;;  %v439_v31 = vld [vmem:[%s8775_s3 + $0x70] sm:$0xff]  ;;  %v4261_v35 = vpack.c.bf16 %v120_v25, %v118_v24 }
  0x17   :  { %v125_v32 = vld [vmem:[%s8773_s1 + $0x198] sm:$0xff]  ;;  %v442_v33 = vld [vmem:[%s8775_s3 + $0x88] sm:$0xff]  ;;  %v122_v36 = vld [vmem:[%s8773_s1 + $0x180] sm:$0xff] }
  0x18   :  { %4294 = vmatpush1.bf16.msra.mxu1 %v4293_v14  ;;  %v444_v34 = vld [vmem:[%s8775_s3 + $0x98] sm:$0xff]  ;;  %v4263_v39 = vpack.c.bf16 %v125_v32, %v123_v28  ;;  %v127_v40 = vld [vmem:[%s8773_s1 + $0x1a8] sm:$0xff]  ;;  %v441_v42 = vld [vmem:[%s8775_s3 + $0x80] sm:$0xff] }
  0x19   :  { %4238 = vmatpush1.bf16.msra.mxu0 %v4237_v37  ;;  %4296 = vmatprep.subr.bf16.mxu1 %v4295_v17  ;;  %v124_v37 = vld [vmem:[%s8773_s1 + $0x190] sm:$0xff]  ;;  %v4303_v41 = vpack.c.bf16 %v444_v34, %v442_v33  ;;  %v448_v46 = vld [vmem:[%s8775_s3 + $0xb8] sm:$0xff]  ;;  %v126_v48 = vld [vmem:[%s8773_s1 + $0x1a0] sm:$0xff] }
  0x1a   :  { %4240 = vmatprep.subr.bf16.mxu0 %v4239_v38  ;;  %v4301_v38 = vpack.c.bf16 %v439_v31, %v437_v30  ;;  %v443_v43 = vld [vmem:[%s8775_s3 + $0x90] sm:$0xff]  ;;  %v4265_v47 = vpack.c.bf16 %v124_v37, %v122_v36  ;;  %v131_v52 = vld [vmem:[%s8773_s1 + $0x1c8] sm:$0xff]  ;;  %v445_v54 = vld [vmem:[%s8775_s3 + $0xa0] sm:$0xff] }
  0x1b   :  { %v128_v49 = vld [vmem:[%s8773_s1 + $0x1b0] sm:$0xff]  ;;  %v133_v56 = vld [vmem:[%s8773_s1 + $0x1d8] sm:$0xff]  ;;  %v450_v57 = vld [vmem:[%s8775_s3 + $0xc8] sm:$0xff] }
  0x1c   :  { %4298 = vmatpush1.bf16.msra.mxu1 %v4297_v26  ;;  %v447_v55 = vld [vmem:[%s8775_s3 + $0xb0] sm:$0xff]  ;;  %v4269_v59 = vpack.c.bf16 %v128_v49, %v126_v48  ;;  %v130_v60 = vld [vmem:[%s8773_s1 + $0x1c0] sm:$0xff]  ;;  %v4271_v63 = vpack.c.bf16 %v133_v56, %v131_v52  ;;  %v137_v4 = vld [vmem:[%s8773_s1 + $0x1f8] sm:$0xff] }
  0x1d   :  { %4242 = vmatpush1.bf16.msra.mxu0 %v4241_v44  ;;  %4300 = vmatprep.subr.bf16.mxu1 %v4299_v29  ;;  %v129_v44 = vld [vmem:[%s8773_s1 + $0x1b8] sm:$0xff]  ;;  %v132_v61 = vld [vmem:[%s8773_s1 + $0x1d0] sm:$0xff]  ;;  %v4309_v62 = vpack.c.bf16 %v447_v55, %v445_v54  ;;  %v449_v2 = vld [vmem:[%s8775_s3 + $0xc0] sm:$0xff] }
  0x1e   :  { %4244 = vmatprep.subr.bf16.mxu0 %v4243_v45  ;;  %v446_v45 = vld [vmem:[%s8775_s3 + $0xa8] sm:$0xff]  ;;  %v451_v3 = vld [vmem:[%s8775_s3 + $0xd0] sm:$0xff]  ;;  %v456_v6 = vld [vmem:[%s8775_s3 + $0xf8] sm:$0xff]  ;;  %v4273_v7 = vpack.c.bf16 %v132_v61, %v130_v60 }
  0x1f   :  { %v4307_v53 = vpack.c.bf16 %v448_v46, %v446_v45  ;;  %v454_v5 = vld [vmem:[%s8775_s3 + $0xe8] sm:$0xff]  ;;  %v134_v8 = vld [vmem:[%s8773_s1 + $0x1e0] sm:$0xff]  ;;  %v136_v9 = vld [vmem:[%s8773_s1 + $0x1f0] sm:$0xff]  ;;  %v4313_v10 = vpack.c.bf16 %v451_v3, %v449_v2 }
  0x20   :  { %4302 = vmatpush1.bf16.msra.mxu1 %v4301_v38  ;;  %v139_v12 = vld [vmem:[%s8773_s1 + $0x208] sm:$0xff]  ;;  %v4315_v13 = vpack.c.bf16 %v456_v6, %v454_v5  ;;  %v453_v14 = vld [vmem:[%s8775_s3 + $0xe0] sm:$0xff]  ;;  %v141_v16 = vld [vmem:[%s8773_s1 + $0x218] sm:$0xff]  ;;  %v4277_v19 = vpack.c.bf16 %v136_v9, %v134_v8 }
  0x21   :  { %4246 = vmatpush1.bf16.msra.mxu0 %v4245_v50  ;;  %v4305_v50 = vpack.c.bf16 %v443_v43, %v441_v42  ;;  %4304 = vmatprep.subr.bf16.mxu1 %v4303_v41  ;;  %v458_v17 = vld [vmem:[%s8775_s3 + $0x108] sm:$0xff]  ;;  %v460_v18 = vld [vmem:[%s8775_s3 + $0x118] sm:$0xff]  ;;  %v4279_v21 = vpack.c.bf16 %v141_v16, %v139_v12  ;;  %v138_v22 = vld [vmem:[%s8773_s1 + $0x200] sm:$0xff] }
  0x22   :  { %4248 = vmatprep.subr.bf16.mxu0 %v4247_v51  ;;  %v4267_v51 = vpack.c.bf16 %v129_v44, %v127_v40  ;;  %v143_v24 = vld [vmem:[%s8773_s1 + $0x228] sm:$0xff]  ;;  %v4319_v25 = vpack.c.bf16 %v460_v18, %v458_v17  ;;  %v145_v26 = vld [vmem:[%s8773_s1 + $0x238] sm:$0xff]  ;;  %v459_v28 = vld [vmem:[%s8775_s3 + $0x110] sm:$0xff] }
  0x23   :  { %v462_v29 = vld [vmem:[%s8775_s3 + $0x128] sm:$0xff]  ;;  %v464_v30 = vld [vmem:[%s8775_s3 + $0x138] sm:$0xff]  ;;  %v50_v31 = vld [vmem:[%s8774_s0] sm:$0xff]  ;;  %v4283_v34 = vpack.c.bf16 %v145_v26, %v143_v24 }
  0x24   :  { %4306 = vmatpush1.bf16.msra.mxu1 %v4305_v50  ;;  %v54_v33 = vld [vmem:[%s8774_s0 + $0x20] sm:$0xff]  ;;  %v144_v36 = vld [vmem:[%s8773_s1 + $0x230] sm:$0xff]  ;;  %v4323_v38 = vpack.c.bf16 %v464_v30, %v462_v29  ;;  %v466_v41 = vld [vmem:[%s8775_s3 + $0x148] sm:$0xff] }
  0x25   :  { %4250 = vmatpush1.bf16.msra.mxu0 %v4249_v58  ;;  %v452_v58 = vld [vmem:[%s8775_s3 + $0xd8] sm:$0xff]  ;;  %4308 = vmatprep.subr.bf16.mxu1 %v4307_v53  ;;  %v463_v40 = vld [vmem:[%s8775_s3 + $0x130] sm:$0xff]  ;;  %v465_v48 = vld [vmem:[%s8775_s3 + $0x140] sm:$0xff] }
  0x26   :  { %4252 = vmatprep.subr.bf16.mxu0 %v4251_v0  ;;  %v135_v0 = vld [vmem:[%s8773_s1 + $0x1e8] sm:$0xff]  ;;  %v4311_v1 = vpack.c.bf16 %v452_v58, %v450_v57  ;;  %v468_v42 = vld [vmem:[%s8775_s3 + $0x158] sm:$0xff]  ;;  %v467_v49 = vld [vmem:[%s8775_s3 + $0x150] sm:$0xff] }
  0x27   :  { %v53_v43 = vld [vmem:[%s8774_s0 + $0x18] sm:$0xff]  ;;  %v470_v50 = vld [vmem:[%s8775_s3 + $0x168] sm:$0xff]  ;;  %v56_v52 = vld [vmem:[%s8774_s0 + $0x30] sm:$0xff]  ;;  %v4329_v54 = vpack.c.bf16 %v467_v49, %v465_v48 }
  0x28   :  { %4310 = vmatpush1.bf16.msra.mxu1 %v4309_v62  ;;  %v57_v45 = vld [vmem:[%s8774_s0 + $0x38] sm:$0xff]  ;;  %v60_v53 = vld [vmem:[%s8774_s0 + $0x50] sm:$0xff]  ;;  %v469_v56 = vld [vmem:[%s8775_s3 + $0x160] sm:$0xff] }
  0x29   :  { %4254 = vmatpush1.bf16.msra.mxu0 %v4253_v11  ;;  %v4275_v11 = vpack.c.bf16 %v137_v4, %v135_v0  ;;  %4312 = vmatprep.subr.bf16.mxu1 %v4311_v1  ;;  %v471_v57 = vld [vmem:[%s8775_s3 + $0x170] sm:$0xff]  ;;  %v474_v58 = vld [vmem:[%s8775_s3 + $0x188] sm:$0xff]  ;;  %v473_v0 = vld [vmem:[%s8775_s3 + $0x180] sm:$0xff] }
  0x2a   :  { %4256 = vmatprep.subr.bf16.mxu0 %v4255_v15  ;;  %v455_v15 = vld [vmem:[%s8775_s3 + $0xf0] sm:$0xff]  ;;  %v59_v60 = vld [vmem:[%s8774_s0 + $0x48] sm:$0xff]  ;;  %v4333_v62 = vpack.c.bf16 %v471_v57, %v469_v56  ;;  %v480_v3 = vld [vmem:[%s8775_s3 + $0x1b8] sm:$0xff] }
  0x2b   :  { %v4317_v20 = vpack.c.bf16 %v455_v15, %v453_v14  ;;  %v63_v61 = vld [vmem:[%s8774_s0 + $0x68] sm:$0xff]  ;;  %v475_v1 = vld [vmem:[%s8775_s3 + $0x190] sm:$0xff]  ;;  %v62_v4 = vld [vmem:[%s8774_s0 + $0x60] sm:$0xff] }
  0x2c   :  { %4314 = vmatpush1.bf16.msra.mxu1 %v4313_v10  ;;  %v478_v2 = vld [vmem:[%s8775_s3 + $0x1a8] sm:$0xff]  ;;  %v66_v5 = vld [vmem:[%s8774_s0 + $0x80] sm:$0xff]  ;;  %v4337_v6 = vpack.c.bf16 %v475_v1, %v473_v0  ;;  %v479_v9 = vld [vmem:[%s8775_s3 + $0x1b0] sm:$0xff] }
  0x2d   :  { %4258 = vmatpush1.bf16.msra.mxu0 %v4257_v23  ;;  %v140_v23 = vld [vmem:[%s8773_s1 + $0x210] sm:$0xff]  ;;  %4316 = vmatprep.subr.bf16.mxu1 %v4315_v13  ;;  %v477_v8 = vld [vmem:[%s8775_s3 + $0x1a0] sm:$0xff]  ;;  %v482_v10 = vld [vmem:[%s8775_s3 + $0x1c8] sm:$0xff] }
  0x2e   :  { %4260 = vmatprep.subr.bf16.mxu0 %v4259_v27  ;;  %v457_v27 = vld [vmem:[%s8775_s3 + $0x100] sm:$0xff]  ;;  %v4281_v32 = vpack.c.bf16 %v140_v23, %v138_v22  ;;  %v65_v12 = vld [vmem:[%s8774_s0 + $0x78] sm:$0xff]  ;;  %v4341_v14 = vpack.c.bf16 %v479_v9, %v477_v8  ;;  %v68_v16 = vld [vmem:[%s8774_s0 + $0x90] sm:$0xff] }
  0x2f   :  { %v4321_v37 = vpack.c.bf16 %v459_v28, %v457_v27  ;;  %v69_v13 = vld [vmem:[%s8774_s0 + $0x98] sm:$0xff]  ;;  %v72_v17 = vld [vmem:[%s8774_s0 + $0xb0] sm:$0xff]  ;;  %v71_v18 = vld [vmem:[%s8774_s0 + $0xa8] sm:$0xff] }
  0x30   :  { %4318 = vmatpush1.bf16.msra.mxu1 %v4317_v20  ;;  %v52_v20 = vld [vmem:[%s8774_s0 + $0x10] sm:$0xff]  ;;  %v58_v22 = vld [vmem:[%s8774_s0 + $0x40] sm:$0xff]  ;;  %v61_v23 = vld [vmem:[%s8774_s0 + $0x58] sm:$0xff] }
  0x31   :  { %4262 = vmatpush1.bf16.msra.mxu0 %v4261_v35  ;;  %v142_v35 = vld [vmem:[%s8773_s1 + $0x220] sm:$0xff]  ;;  %4320 = vmatprep.subr.bf16.mxu1 %v4319_v25  ;;  %v64_v24 = vld [vmem:[%s8774_s0 + $0x70] sm:$0xff]  ;;  %v67_v25 = vld [vmem:[%s8774_s0 + $0x88] sm:$0xff] }
  0x32   :  { %4264 = vmatprep.subr.bf16.mxu0 %v4263_v39  ;;  %v461_v39 = vld [vmem:[%s8775_s3 + $0x120] sm:$0xff]  ;;  %v4285_v44 = vpack.c.bf16 %v144_v36, %v142_v35  ;;  %v73_v27 = vld [vmem:[%s8774_s0 + $0xb8] sm:$0xff]  ;;  %v483_v29 = vld [vmem:[%s8775_s3 + $0x1d0] sm:$0xff] }
  0x33   :  { %v4325_v46 = vpack.c.bf16 %v463_v40, %v461_v39  ;;  %v70_v26 = vld [vmem:[%s8774_s0 + $0xa0] sm:$0xff]  ;;  %v487_v35 = vld [vmem:[%s8775_s3 + $0x1f0] sm:$0xff]  ;;  %v148_v40 = vlaneseq  ;;  %v639_v1 = vld [vmem:[%s8776_s5 + $0x48] sm:$0xff] }
  0x34   :  { %4322 = vmatpush1.bf16.msra.mxu1 %v4321_v37  ;;  %v481_v28 = vld [vmem:[%s8775_s3 + $0x1c0] sm:$0xff]  ;;  %v631_v37 = vld [vmem:[%s8776_s5 + $0x8] sm:$0xff] }
  0x35   :  { %4266 = vmatpush1.bf16.msra.mxu0 %v4265_v47  ;;  %4324 = vmatprep.subr.bf16.mxu1 %v4323_v38  ;;  %v4327_v47 = vpack.c.bf16 %v468_v42, %v466_v41  ;;  %v4345_v30 = vpack.c.bf16 %v483_v29, %v481_v28  ;;  %v633_v38 = vld [vmem:[%s8776_s5 + $0x18] sm:$0xff]  ;;  %v149_v41 = vshrl.u32 %v148_v40, 7 }
  0x36   :  { %4268 = vmatprep.subr.bf16.mxu0 %v4267_v51  ;;  %v472_v51 = vld [vmem:[%s8775_s3 + $0x178] sm:$0xff]  ;;  %v4351_v39 = vpack.c.bf16 %v633_v38, %v631_v37  ;;  %v651_v38 = vld [vmem:[%s8776_s5 + $0xa8] sm:$0xff] }
  0x37   :  { %v4331_v55 = vpack.c.bf16 %v472_v51, %v470_v50  ;;  %v5847_v42 = vsub.s32 0, %v149_v41  ;;  %v630_v50 = vld [vmem:[%s8776_s5] sm:$0xff]  ;;  %v632_v51 = vld [vmem:[%s8776_s5 + $0x10] sm:$0xff] }
  0x38   :  { %4326 = vmatpush1.bf16.msra.mxu1 %v4325_v46  ;;  %v4353_v57 = vpack.c.bf16 %v632_v51, %v630_v50  ;;  %v650_v51 = vld [vmem:[%s8776_s5 + $0xa0] sm:$0xff] }
  0x39   :  { %4270 = vmatpush1.bf16.msra.mxu0 %v4269_v59  ;;  %4328 = vmatprep.subr.bf16.mxu1 %v4327_v47  ;;  %v476_v59 = vld [vmem:[%s8775_s3 + $0x198] sm:$0xff] }
  0x3a   :  { %4272 = vmatprep.subr.bf16.mxu0 %v4271_v63  ;;  %v4335_v63 = vpack.c.bf16 %v476_v59, %v474_v58 }
  0x3c   :  { %4330 = vmatpush1.bf16.msra.mxu1 %v4329_v54  ;;  %v637_v54 = vld [vmem:[%s8776_s5 + $0x38] sm:$0xff] }
  0x3d   :  { %4274 = vmatpush1.bf16.msra.mxu0 %v4273_v7  ;;  %4332 = vmatprep.subr.bf16.mxu1 %v4331_v55  ;;  %v4339_v7 = vpack.c.bf16 %v480_v3, %v478_v2  ;;  %v641_v2 = vld [vmem:[%s8776_s5 + $0x58] sm:$0xff] }
  0x3e   :  { %4276 = vmatprep.subr.bf16.mxu0 %v4275_v11  ;;  %v484_v11 = vld [vmem:[%s8775_s3 + $0x1d8] sm:$0xff]  ;;  %v4359_v9 = vpack.c.bf16 %v641_v2, %v639_v1  ;;  %v659_v2 = vld [vmem:[%s8776_s5 + $0xe8] sm:$0xff] }
  0x3f   :  { %v4343_v15 = vpack.c.bf16 %v484_v11, %v482_v10  ;;  %v638_v10 = vld [vmem:[%s8776_s5 + $0x40] sm:$0xff]  ;;  %v640_v11 = vld [vmem:[%s8776_s5 + $0x50] sm:$0xff] }
  0x40   :  { %4334 = vmatpush1.bf16.msra.mxu1 %v4333_v62  ;;  %v634_v62 = vld [vmem:[%s8776_s5 + $0x20] sm:$0xff] }
  0x41   :  { %4278 = vmatpush1.bf16.msra.mxu0 %v4277_v19  ;;  %4336 = vmatprep.subr.bf16.mxu1 %v4335_v63  ;;  %v5264_v19 = vmov 0.0   ;;  %v636_v63 = vld [vmem:[%s8776_s5 + $0x30] sm:$0xff] }
  0x42   :  { %4280 = vmatprep.subr.bf16.mxu0 %v4279_v21  ;;  %v55_v21 = vld [vmem:[%s8774_s0 + $0x28] sm:$0xff] }
  0x44   :  { %248 = vmatmul.mubr.f32.vlgmr.msra.gmra.mrb[0].mxu0 %v50_v31  ;;  %4338 = vmatpush1.bf16.msra.mxu1 %v4337_v6  ;;  %v486_v31 = vld [vmem:[%s8775_s3 + $0x1e8] sm:$0xff] }
  0x45   :  { %4282 = vmatpush1.bf16.msra.mxu0 %v4281_v32  ;;  %253 = vmatprep.mubr.f32.mxu0 %v54_v33  ;;  %v488_v32 = vld [vmem:[%s8775_s3 + $0x1f8] sm:$0xff] }
  0x46   :  { %4284 = vmatprep.subr.bf16.mxu0 %v4283_v34  ;;  %4340 = vmatprep.subr.bf16.mxu1 %v4339_v7  ;;  %v4347_v33 = vpack.c.bf16 %v488_v32, %v486_v31  ;;  %v485_v34 = vld [vmem:[%s8775_s3 + $0x1e0] sm:$0xff] }
  0x47   :  { %v4349_v36 = vpack.c.bf16 %v487_v35, %v485_v34  ;;  %v646_v35 = vld [vmem:[%s8776_s5 + $0x80] sm:$0xff] }
  0x48   :  { %254 = vmatmul.mubr.f32.gmra.mrb[2].mxu0 %v53_v43  ;;  %4342 = vmatpush1.bf16.msra.mxu1 %v4341_v14  ;;  %v146_v43 = vld [vmem:[%s8777_s2] sm:$0x3]  ;;  %v645_v14 = vld [vmem:[%s8776_s5 + $0x78] sm:$0xff] }
  0x49   :  { %259 = vmatprep.mubr.f32.mxu0 %v57_v45  ;;  %4286 = vmatpush1.bf16.msra.mxu0 %v4285_v44  ;;  %v5852_v44 = vsub.s32 1, %v149_v41  ;;  %v5855_v45 = vrot.slane %v146_v43, %v5847_v42 }
  0x4a   :  { %4344 = vmatprep.subr.bf16.mxu1 %v4343_v15 }
  0x4b   :  { %v5858_v46 = vrot.slane %v146_v43, %v5852_v44 }
  0x4c   :  { %260 = vmatmul.mubr.f32.gmra.mrb[4].mxu0 %v56_v52  ;;  %4346 = vmatpush1.bf16.msra.mxu1 %v4345_v30 }
  0x4d   :  { %265 = vmatprep.mubr.f32.mxu0 %v60_v53  ;;  %4348 = vmatprep.subr.bf16.mxu1 %v4347_v33  ;;  %v635_v53 = vld [vmem:[%s8776_s5 + $0x28] sm:$0xff] }
  0x50   :  { %266 = vmatmul.mubr.f32.gmra.mrb[6].mxu0 %v59_v60  ;;  %4350 = vmatpush1.bf16.msra.mxu1 %v4349_v36  ;;  %v648_v36 = vld [vmem:[%s8776_s5 + $0x90] sm:$0xff] }
  0x51   :  { %271 = vmatprep.mubr.f32.mxu0 %v63_v61  ;;  %4352 = vmatprep.subr.bf16.mxu1 %v4351_v39  ;;  %v4355_v61 = vpack.c.bf16 %v637_v54, %v635_v53  ;;  %v653_v39 = vld [vmem:[%s8776_s5 + $0xb8] sm:$0xff]  ;;  %v4369_v43 = vpack.c.bf16 %v648_v36, %v646_v35  ;;  %v655_v54 = vld [vmem:[%s8776_s5 + $0xc8] sm:$0xff] }
  0x52   :  { %v4371_v50 = vpack.c.bf16 %v653_v39, %v651_v38  ;;  %v676_v38 = vld [vmem:[%s8776_s5 + $0x170] sm:$0xff]  ;;  %v679_v39 = vld [vmem:[%s8776_s5 + $0x188] sm:$0xff] }
  0x54   :  { %272 = vmatmul.mubr.f32.gmra.mrb[8].mxu0 %v62_v4 }
  0x55   :  { %277 = vmatprep.mubr.f32.mxu0 %v66_v5  ;;  %v4357_v5 = vpack.c.bf16 %v636_v63, %v634_v62  ;;  %v654_v63 = vld [vmem:[%s8776_s5 + $0xc0] sm:$0xff] }
  0x58   :  { %278 = vmatmul.mubr.f32.gmra.mrb[10].mxu0 %v65_v12 }
  0x59   :  { %283 = vmatprep.mubr.f32.mxu0 %v69_v13  ;;  %v643_v13 = vld [vmem:[%s8776_s5 + $0x68] sm:$0xff] }
  0x5c   :  { %284 = vmatmul.mubr.f32.gmra.mrb[12].mxu0 %v68_v16 }
  0x5d   :  { %289 = vmatprep.mubr.f32.mxu0 %v72_v17  ;;  %v4361_v17 = vpack.c.bf16 %v640_v11, %v638_v10  ;;  %v658_v11 = vld [vmem:[%s8776_s5 + $0xe0] sm:$0xff] }
  0x60   :  { %290 = vmatmul.mubr.f32.gmra.mrb[14].mxu0 %v71_v18 }
  0x61   :  { %360 = vmatprep.mubr.f32.mxu0 %v5264_v19 }
  0x64   :  { %3562 = vmatmul.mubr.msk.f32.vlgmr.msra.gmra.mrb[0].mxu0 %vm158_vm0, %v52_v20 }
  0x65   :  { %366 = vmatprep.mubr.f32.mxu0 %v5264_v19 }
  0x68   :  { %3563 = vmatmul.mubr.msk.f32.gmra.mrb[2].mxu0 %vm158_vm0, %v55_v21 }
  0x69   :  { %372 = vmatprep.mubr.f32.mxu0 %v5264_v19 }
  0x6c   :  { %3564 = vmatmul.mubr.msk.f32.gmra.mrb[4].mxu0 %vm158_vm0, %v58_v22  ;;  %v4363_v22 = vpack.c.bf16 %v645_v14, %v643_v13  ;;  %v663_v14 = vld [vmem:[%s8776_s5 + $0x108] sm:$0xff] }
  0x6d   :  { %378 = vmatprep.mubr.f32.mxu0 %v5264_v19 }
  0x70   :  { %3565 = vmatmul.mubr.msk.f32.gmra.mrb[6].mxu0 %vm158_vm0, %v61_v23  ;;  %v642_v23 = vld [vmem:[%s8776_s5 + $0x60] sm:$0xff] }
  0x71   :  { %384 = vmatprep.mubr.f32.mxu0 %v5264_v19 }
  0x74   :  { %3566 = vmatmul.mubr.msk.f32.gmra.mrb[8].mxu0 %vm158_vm0, %v64_v24  ;;  %v644_v24 = vld [vmem:[%s8776_s5 + $0x70] sm:$0xff] }
  0x75   :  { %390 = vmatprep.mubr.f32.mxu0 %v5264_v19  ;;  %v4365_v30 = vpack.c.bf16 %v644_v24, %v642_v23 }
  0x78   :  { %3567 = vmatmul.mubr.msk.f32.gmra.mrb[10].mxu0 %vm158_vm0, %v67_v25 }
  0x79   :  { %396 = vmatprep.mubr.f32.mxu0 %v5264_v19 }
  0x7c   :  { %3568 = vmatmul.mubr.msk.f32.gmra.mrb[12].mxu0 %vm158_vm0, %v70_v26  ;;  %v647_v26 = vld [vmem:[%s8776_s5 + $0x88] sm:$0xff] }
  0x7d   :  { %402 = vmatprep.mubr.f32.mxu0 %v5264_v19 }
  0x80   :  { %3569 = vmatmul.mubr.msk.f32.gmra.mrb[14].mxu0 %vm158_vm0, %v73_v27  ;;  %v649_v27 = vld [vmem:[%s8776_s5 + $0x98] sm:$0xff] }
  0x81   :  { %v4367_v34 = vpack.c.bf16 %v649_v27, %v647_v26  ;;  %v668_v26 = vld [vmem:[%s8776_s5 + $0x130] sm:$0xff]  ;;  %v671_v27 = vld [vmem:[%s8776_s5 + $0x148] sm:$0xff] }
 0x137   :  { %v362_v47 = vpop.f32.mrb[0].mxu0 }
 0x138   :  { %v5167_v48 = vadd.f32 %v362_v47, %v5855_v45  ;;  %v364_v49 = vpop.f32.mrb[1].mxu0 }
 0x139   :  { %v5168_v52 = vadd.f32 %v364_v49, %v5858_v46 }
 0x13a   :  { %v409_v58 = vmax.f32 %v5167_v48, 0.0 }
 0x13b   :  { %v368_v55 = vpop.f32.mrb[2].mxu0  ;;  %v410_v56 = vmax.f32 %v5168_v52, 0.0  ;;  %v652_v52 = vld [vmem:[%s8776_s5 + $0xb0] sm:$0xff] }
 0x13c   :  { %v5169_v59 = vadd.f32 %v368_v55, %v5855_v45  ;;  %v370_v60 = vpop.f32.mrb[3].mxu0  ;;  %v657_v55 = vld [vmem:[%s8776_s5 + $0xd8] sm:$0xff] }
 0x13d   :  { %v5170_v0 = vadd.f32 %v370_v60, %v5858_v46  ;;  %565 = vmatprep.mubr.f32.mxu1 %v410_v56  ;;  %v4375_v62 = vpack.c.bf16 %v657_v55, %v655_v54  ;;  %v684_v54 = vld [vmem:[%s8776_s5 + $0x1b0] sm:$0xff]  ;;  %v687_v55 = vld [vmem:[%s8776_s5 + $0x1c8] sm:$0xff] }
 0x13e   :  { %566 = vmatmul.mubr.f32.vlgmr.msra.gmra.mrb[0].mxu1 %v409_v58  ;;  %v411_v6 = vmax.f32 %v5169_v59, 0.0  ;;  %v4373_v58 = vpack.c.bf16 %v652_v52, %v650_v51 }
 0x13f   :  { %v412_v3 = vmax.f32 %v5170_v0, 0.0  ;;  %v374_v4 = vpop.f32.mrb[4].mxu0  ;;  %4354 = vmatpush1.bf16.msra.mxu1 %v4353_v57  ;;  %v656_v0 = vld [vmem:[%s8776_s5 + $0xd0] sm:$0xff] }
 0x140   :  { %v5171_v7 = vadd.f32 %v374_v4, %v5855_v45  ;;  %v376_v8 = vpop.f32.mrb[5].mxu0  ;;  %4356 = vmatprep.subr.bf16.mxu1 %v4355_v61 }
 0x141   :  { %v5172_v12 = vadd.f32 %v376_v8, %v5858_v46  ;;  %571 = vmatprep.mubr.f32.mxu1 %v412_v3  ;;  %v661_v3 = vld [vmem:[%s8776_s5 + $0xf8] sm:$0xff] }
 0x142   :  { %572 = vmatmul.mubr.f32.gmra.mrb[2].mxu1 %v411_v6  ;;  %v413_v18 = vmax.f32 %v5171_v7, 0.0  ;;  %v4377_v6 = vpack.c.bf16 %v656_v0, %v654_v63  ;;  %v4379_v10 = vpack.c.bf16 %v661_v3, %v659_v2  ;;  %v693_v63 = vld [vmem:[%s8776_s5 + $0x1f8] sm:$0xff]  ;;  %v692_v2 = vld [vmem:[%s8776_s5 + $0x1f0] sm:$0xff] }
 0x143   :  { %v414_v15 = vmax.f32 %v5172_v12, 0.0  ;;  %v380_v16 = vpop.f32.mrb[6].mxu0  ;;  %4358 = vmatpush1.bf16.msra.mxu1 %v4357_v5  ;;  %v660_v12 = vld [vmem:[%s8776_s5 + $0xf0] sm:$0xff] }
 0x144   :  { %v5173_v20 = vadd.f32 %v380_v16, %v5855_v45  ;;  %v382_v21 = vpop.f32.mrb[7].mxu0  ;;  %4360 = vmatprep.subr.bf16.mxu1 %v4359_v9  ;;  %v4381_v16 = vpack.c.bf16 %v660_v12, %v658_v11 }
 0x145   :  { %v5174_v25 = vadd.f32 %v382_v21, %v5858_v46  ;;  %577 = vmatprep.mubr.f32.mxu1 %v414_v15  ;;  %v667_v21 = vld [vmem:[%s8776_s5 + $0x128] sm:$0xff] }
 0x146   :  { %578 = vmatmul.mubr.f32.gmra.mrb[4].mxu1 %v413_v18  ;;  %v415_v31 = vmax.f32 %v5173_v20, 0.0  ;;  %v664_v20 = vld [vmem:[%s8776_s5 + $0x110] sm:$0xff] }
 0x147   :  { %v416_v28 = vmax.f32 %v5174_v25, 0.0  ;;  %v386_v29 = vpop.f32.mrb[8].mxu0  ;;  %4362 = vmatpush1.bf16.msra.mxu1 %v4361_v17  ;;  %v666_v25 = vld [vmem:[%s8776_s5 + $0x120] sm:$0xff] }
 0x148   :  { %v5175_v32 = vadd.f32 %v386_v29, %v5855_v45  ;;  %v388_v33 = vpop.f32.mrb[9].mxu0  ;;  %4364 = vmatprep.subr.bf16.mxu1 %v4363_v22  ;;  %v669_v22 = vld [vmem:[%s8776_s5 + $0x138] sm:$0xff]  ;;  %v4389_v29 = vpack.c.bf16 %v668_v26, %v666_v25  ;;  %v835_v26 = vld [vmem:[%s8779_s7] sm:$0xff] }
 0x149   :  { %v5176_v37 = vadd.f32 %v388_v33, %v5858_v46  ;;  %583 = vmatprep.mubr.f32.mxu1 %v416_v28  ;;  %v4387_v24 = vpack.c.bf16 %v669_v22, %v667_v21  ;;  %v673_v28 = vld [vmem:[%s8776_s5 + $0x158] sm:$0xff]  ;;  %v675_v33 = vld [vmem:[%s8776_s5 + $0x168] sm:$0xff] }
 0x14a   :  { %584 = vmatmul.mubr.f32.gmra.mrb[6].mxu1 %v415_v31  ;;  %v417_v47 = vmax.f32 %v5175_v32, 0.0  ;;  %v670_v31 = vld [vmem:[%s8776_s5 + $0x140] sm:$0xff]  ;;  %v672_v32 = vld [vmem:[%s8776_s5 + $0x150] sm:$0xff]  ;;  %v3603_v22 = vld [vmem:[%s8773_s1 + $0x288] sm:$0xff] }
 0x14b   :  { %v418_v40 = vmax.f32 %v5176_v37, 0.0  ;;  %v392_v41 = vpop.f32.mrb[10].mxu0  ;;  %4366 = vmatpush1.bf16.msra.mxu1 %v4365_v30  ;;  %v4391_v30 = vpack.c.bf16 %v673_v28, %v671_v27  ;;  %v4393_v35 = vpack.c.bf16 %v672_v32, %v670_v31  ;;  %v674_v37 = vld [vmem:[%s8776_s5 + $0x160] sm:$0xff]  ;;  %v838_v25 = vld [vmem:[%s8779_s7 + $0x18] sm:$0xff]  ;;  %v837_v32 = vld [vmem:[%s8779_s7 + $0x10] sm:$0xff] }
 0x14c   :  { %v5177_v48 = vadd.f32 %v392_v41, %v5855_v45  ;;  %v394_v49 = vpop.f32.mrb[11].mxu0  ;;  %4368 = vmatprep.subr.bf16.mxu1 %v4367_v34  ;;  %v677_v34 = vld [vmem:[%s8776_s5 + $0x178] sm:$0xff]  ;;  %v4397_v41 = vpack.c.bf16 %v676_v38, %v674_v37  ;;  %v839_v38 = vld [vmem:[%s8779_s7 + $0x20] sm:$0xff] }
 0x14d   :  { %v5178_v53 = vadd.f32 %v394_v49, %v5858_v46  ;;  %589 = vmatprep.mubr.f32.mxu1 %v418_v40  ;;  %v4395_v36 = vpack.c.bf16 %v677_v34, %v675_v33  ;;  %v681_v40 = vld [vmem:[%s8776_s5 + $0x198] sm:$0xff]  ;;  %v683_v49 = vld [vmem:[%s8776_s5 + $0x1a8] sm:$0xff] }
 0x14e   :  { %590 = vmatmul.mubr.f32.gmra.mrb[8].mxu1 %v417_v47  ;;  %v419_v59 = vmax.f32 %v5177_v48, 0.0  ;;  %v678_v47 = vld [vmem:[%s8776_s5 + $0x180] sm:$0xff]  ;;  %v680_v48 = vld [vmem:[%s8776_s5 + $0x190] sm:$0xff]  ;;  %v840_v33 = vld [vmem:[%s8779_s7 + $0x28] sm:$0xff] }
 0x14f   :  { %v420_v56 = vmax.f32 %v5178_v53, 0.0  ;;  %v398_v57 = vpop.f32.mrb[12].mxu0  ;;  %4370 = vmatpush1.bf16.msra.mxu1 %v4369_v43  ;;  %v4399_v43 = vpack.c.bf16 %v681_v40, %v679_v39  ;;  %v4401_v51 = vpack.c.bf16 %v680_v48, %v678_v47  ;;  %v682_v53 = vld [vmem:[%s8776_s5 + $0x1a0] sm:$0xff]  ;;  %v842_v34 = vld [vmem:[%s8779_s7 + $0x38] sm:$0xff]  ;;  %v841_v39 = vld [vmem:[%s8779_s7 + $0x30] sm:$0xff] }
 0x150   :  { %v5179_v60 = vadd.f32 %v398_v57, %v5855_v45  ;;  %v400_v61 = vpop.f32.mrb[13].mxu0  ;;  %4372 = vmatprep.subr.bf16.mxu1 %v4371_v50  ;;  %v685_v50 = vld [vmem:[%s8776_s5 + $0x1b8] sm:$0xff]  ;;  %v4405_v57 = vpack.c.bf16 %v684_v54, %v682_v53  ;;  %v4419_v37 = vpack.c.bf16 %v842_v34, %v840_v33  ;;  %v844_v40 = vld [vmem:[%s8779_s7 + $0x48] sm:$0xff] }
 0x151   :  { %v5180_v1 = vadd.f32 %v400_v61, %v5858_v46  ;;  %595 = vmatprep.mubr.f32.mxu1 %v420_v56  ;;  %v4403_v52 = vpack.c.bf16 %v685_v50, %v683_v49  ;;  %v689_v56 = vld [vmem:[%s8776_s5 + $0x1d8] sm:$0xff]  ;;  %v3602_v49 = vld [vmem:[%s8773_s1 + $0x280] sm:$0xff]  ;;  %v3604_v50 = vld [vmem:[%s8773_s1 + $0x290] sm:$0xff] }
 0x152   :  { %596 = vmatmul.mubr.f32.gmra.mrb[10].mxu1 %v419_v59  ;;  %v421_v7 = vmax.f32 %v5179_v60, 0.0  ;;  %v686_v59 = vld [vmem:[%s8776_s5 + $0x1c0] sm:$0xff]  ;;  %v688_v60 = vld [vmem:[%s8776_s5 + $0x1d0] sm:$0xff]  ;;  %v3617_v34 = vld [vmem:[%s8773_s1 + $0x2f8] sm:$0xff] }
 0x153   :  { %v422_v4 = vmax.f32 %v5180_v1, 0.0  ;;  %v404_v5 = vpop.f32.mrb[14].mxu0  ;;  %4374 = vmatpush1.bf16.msra.mxu1 %v4373_v58  ;;  %v4407_v58 = vpack.c.bf16 %v689_v56, %v687_v55  ;;  %v4409_v61 = vpack.c.bf16 %v688_v60, %v686_v59  ;;  %v690_v1 = vld [vmem:[%s8776_s5 + $0x1e0] sm:$0xff]  ;;  %v3607_v56 = vld [vmem:[%s8773_s1 + $0x2a8] sm:$0xff]  ;;  %v845_v59 = vld [vmem:[%s8779_s7 + $0x50] sm:$0xff] }
 0x154   :  { %v5181_v8 = vadd.f32 %v404_v5, %v5855_v45  ;;  %v406_v9 = vpop.f32.mrb[15].mxu0  ;;  %4376 = vmatprep.subr.bf16.mxu1 %v4375_v62  ;;  %v665_v45 = vld [vmem:[%s8776_s5 + $0x118] sm:$0xff]  ;;  %v691_v62 = vld [vmem:[%s8776_s5 + $0x1e8] sm:$0xff]  ;;  %v4413_v3 = vpack.c.bf16 %v692_v2, %v690_v1  ;;  %v4489_v2 = vpack.c.bf16 %v3604_v50, %v3602_v49 }
 0x155   :  { %v5182_v13 = vadd.f32 %v406_v9, %v5858_v46  ;;  %601 = vmatprep.mubr.f32.mxu1 %v422_v4  ;;  %v4383_v18 = vpack.c.bf16 %v665_v45, %v663_v14  ;;  %v662_v46 = vld [vmem:[%s8776_s5 + $0x100] sm:$0xff]  ;;  %v4411_v0 = vpack.c.bf16 %v693_v63, %v691_v62  ;;  %v3595_v4 = vld [vmem:[%s8773_s1 + $0x248] sm:$0xff]  ;;  %v3597_v5 = vld [vmem:[%s8773_s1 + $0x258] sm:$0xff] }
 0x156   :  { %602 = vmatmul.mubr.f32.gmra.mrb[12].mxu1 %v421_v7  ;;  %v423_v17 = vmax.f32 %v5181_v8, 0.0  ;;  %v4385_v23 = vpack.c.bf16 %v664_v20, %v662_v46  ;;  %v489_v7 = vld [vmem:[%s8778_s4] sm:$0x3]  ;;  %v3596_v14 = vld [vmem:[%s8773_s1 + $0x250] sm:$0xff]  ;;  %v848_v62 = vld [vmem:[%s8779_s7 + $0x68] sm:$0xff] }
 0x157   :  { %v424_v15 = vmax.f32 %v5182_v13, 0.0  ;;  %4378 = vmatpush1.bf16.msra.mxu1 %v4377_v6  ;;  %v4479_v6 = vpack.c.bf16 %v3597_v5, %v3595_v4  ;;  %v6072_v8 = vrot.slane %v489_v7, %v5847_v42  ;;  %v6075_v9 = vrot.slane %v489_v7, %v5852_v44  ;;  %v3594_v13 = vld [vmem:[%s8773_s1 + $0x240] sm:$0xff]  ;;  %v850_v63 = vld [vmem:[%s8779_s7 + $0x78] sm:$0xff]  ;;  %v3608_v4 = vld [vmem:[%s8773_s1 + $0x2b0] sm:$0xff] }
 0x158   :  { %4380 = vmatprep.subr.bf16.mxu1 %v4379_v10  ;;  %v4481_v21 = vpack.c.bf16 %v3596_v14, %v3594_v13  ;;  %v4427_v13 = vpack.c.bf16 %v850_v63, %v848_v62  ;;  %v847_v14 = vld [vmem:[%s8779_s7 + $0x60] sm:$0xff]  ;;  %v3620_v63 = vld [vmem:[%s8773_s1 + $0x310] sm:$0xff] }
 0x159   :  { %607 = vmatprep.mubr.f32.mxu1 %v424_v15  ;;  %v3599_v15 = vld [vmem:[%s8773_s1 + $0x268] sm:$0xff]  ;;  %v3618_v62 = vld [vmem:[%s8773_s1 + $0x300] sm:$0xff] }
 0x15a   :  { %608 = vmatmul.mubr.f32.gmra.mrb[14].mxu1 %v423_v17  ;;  %v3598_v17 = vld [vmem:[%s8773_s1 + $0x260] sm:$0xff] }
 0x15b   :  { %4382 = vmatpush1.bf16.msra.mxu1 %v4381_v16  ;;  %v3601_v16 = vld [vmem:[%s8773_s1 + $0x278] sm:$0xff] }
 0x15c   :  { %4384 = vmatprep.subr.bf16.mxu1 %v4383_v18  ;;  %v3600_v18 = vld [vmem:[%s8773_s1 + $0x270] sm:$0xff] }
 0x15d   :  { %v4485_v48 = vpack.c.bf16 %v3600_v18, %v3598_v17  ;;  %v852_v17 = vld [vmem:[%s8779_s7 + $0x88] sm:$0xff]  ;;  %v854_v18 = vld [vmem:[%s8779_s7 + $0x98] sm:$0xff] }
 0x15f   :  { %4386 = vmatpush1.bf16.msra.mxu1 %v4385_v23  ;;  %v3605_v23 = vld [vmem:[%s8773_s1 + $0x298] sm:$0xff] }
 0x160   :  { %4388 = vmatprep.subr.bf16.mxu1 %v4387_v24  ;;  %v836_v24 = vld [vmem:[%s8779_s7 + $0x8] sm:$0xff]  ;;  %v4487_v55 = vpack.c.bf16 %v3605_v23, %v3603_v22  ;;  %v3610_v22 = vld [vmem:[%s8773_s1 + $0x2c0] sm:$0xff]  ;;  %v3612_v23 = vld [vmem:[%s8773_s1 + $0x2d0] sm:$0xff] }
 0x161   :  { %v4415_v31 = vpack.c.bf16 %v838_v25, %v836_v24 }
 0x163   :  { %4390 = vmatpush1.bf16.msra.mxu1 %v4389_v29  ;;  %4416 = vmatprep.subr.bf16.mxu0 %v4415_v31  ;;  %v851_v31 = vld [vmem:[%s8779_s7 + $0x80] sm:$0xff] }
 0x164   :  { %4392 = vmatprep.subr.bf16.mxu1 %v4391_v30  ;;  %v4483_v30 = vpack.c.bf16 %v3601_v16, %v3599_v15  ;;  %v3613_v16 = vld [vmem:[%s8773_s1 + $0x2d8] sm:$0xff] }
 0x167   :  { %4394 = vmatpush1.bf16.msra.mxu1 %v4393_v35 }
 0x168   :  { %4396 = vmatprep.subr.bf16.mxu1 %v4395_v36  ;;  %v4417_v36 = vpack.c.bf16 %v837_v32, %v835_v26  ;;  %v853_v32 = vld [vmem:[%s8779_s7 + $0x90] sm:$0xff] }
 0x16a   :  { %4418 = vmatpush1.bf16.msra.mxu0 %v4417_v36  ;;  %v858_v36 = vld [vmem:[%s8779_s7 + $0xb8] sm:$0xff] }
 0x16b   :  { %4398 = vmatpush1.bf16.msra.mxu1 %v4397_v41  ;;  %v846_v41 = vld [vmem:[%s8779_s7 + $0x58] sm:$0xff]  ;;  %4420 = vmatprep.subr.bf16.mxu0 %v4419_v37 }
 0x16c   :  { %4400 = vmatprep.subr.bf16.mxu1 %v4399_v43 }
 0x16f   :  { %4402 = vmatpush1.bf16.msra.mxu1 %v4401_v51  ;;  %v4421_v51 = vpack.c.bf16 %v841_v39, %v839_v38  ;;  %v4497_v39 = vpack.c.bf16 %v3612_v23, %v3610_v22  ;;  %v3622_v22 = vld [vmem:[%s8773_s1 + $0x320] sm:$0xff]  ;;  %v3624_v23 = vld [vmem:[%s8773_s1 + $0x330] sm:$0xff] }
 0x170   :  { %4404 = vmatprep.subr.bf16.mxu1 %v4403_v52 }
 0x171   :  { %4422 = vmatpush1.bf16.msra.mxu0 %v4421_v51  ;;  %v3619_v51 = vld [vmem:[%s8773_s1 + $0x308] sm:$0xff] }
 0x173   :  { %4406 = vmatpush1.bf16.msra.mxu1 %v4405_v57  ;;  %v4423_v57 = vpack.c.bf16 %v846_v41, %v844_v40  ;;  %v3614_v40 = vld [vmem:[%s8773_s1 + $0x2e0] sm:$0xff]  ;;  %v3616_v41 = vld [vmem:[%s8773_s1 + $0x2f0] sm:$0xff] }
 0x174   :  { %4408 = vmatprep.subr.bf16.mxu1 %v4407_v58  ;;  %v843_v58 = vld [vmem:[%s8779_s7 + $0x40] sm:$0xff] }
 0x175   :  { %v4425_v5 = vpack.c.bf16 %v845_v59, %v843_v58  ;;  %4424 = vmatprep.subr.bf16.mxu0 %v4423_v57  ;;  %v860_v57 = vld [vmem:[%s8779_s7 + $0xc8] sm:$0xff]  ;;  %v862_v58 = vld [vmem:[%s8779_s7 + $0xd8] sm:$0xff] }
 0x177   :  { %4410 = vmatpush1.bf16.msra.mxu1 %v4409_v61  ;;  %v3609_v61 = vld [vmem:[%s8773_s1 + $0x2b8] sm:$0xff]  ;;  %4426 = vmatpush1.bf16.msra.mxu0 %v4425_v5  ;;  %v3623_v5 = vld [vmem:[%s8773_s1 + $0x328] sm:$0xff] }
 0x178   :  { %4412 = vmatprep.subr.bf16.mxu1 %v4411_v0  ;;  %4428 = vmatprep.subr.bf16.mxu0 %v4427_v13  ;;  %v864_v13 = vld [vmem:[%s8779_s7 + $0xe8] sm:$0xff] }
 0x17b   :  { %4414 = vmatpush1.bf16.msra.mxu1 %v4413_v3  ;;  %v3606_v3 = vld [vmem:[%s8773_s1 + $0x2a0] sm:$0xff] }
 0x17c   :  { %4480 = vmatprep.subr.bf16.mxu1 %v4479_v6 }
 0x211   :  { %v567_v10 = vpop.f32.mrb[0].mxu1 }
 0x212   :  { %v568_v11 = vadd.f32 %v567_v10, %v6072_v8  ;;  %v569_v12 = vpop.f32.mrb[1].mxu1 }
 0x213   :  { %v570_v45 = vadd.f32 %v569_v12, %v6075_v9  ;;  %v3611_v12 = vld [vmem:[%s8773_s1 + $0x2c8] sm:$0xff] }
 0x214   :  { %v614_v27 = vmax.f32 %v568_v11, 0.0  ;;  %v4491_v11 = vpack.c.bf16 %v3609_v61, %v3607_v56  ;;  %v3621_v56 = vld [vmem:[%s8773_s1 + $0x318] sm:$0xff]  ;;  %v4501_v61 = vpack.c.bf16 %v3616_v41, %v3614_v40  ;;  %v867_v41 = vld [vmem:[%s8779_s7 + $0x100] sm:$0xff] }
 0x215   :  { %v615_v46 = vmax.f32 %v570_v45, 0.0  ;;  %v573_v20 = vpop.f32.mrb[2].mxu1  ;;  %v849_v45 = vld [vmem:[%s8779_s7 + $0x70] sm:$0xff] }
 0x216   :  { %v574_v28 = vadd.f32 %v573_v20, %v6072_v8  ;;  %v575_v29 = vpop.f32.mrb[3].mxu1  ;;  %v4429_v24 = vpack.c.bf16 %v849_v45, %v847_v14  ;;  %v866_v14 = vld [vmem:[%s8779_s7 + $0xf8] sm:$0xff] }
 0x217   :  { %v576_v35 = vadd.f32 %v575_v29, %v6075_v9  ;;  %770 = vmatprep.mubr.f32.mxu1 %v615_v46  ;;  %v3615_v29 = vld [vmem:[%s8773_s1 + $0x2e8] sm:$0xff] }
 0x218   :  { %771 = vmatmul.mubr.f32.vlgmr.msra.gmra.mrb[16].mxu1 %v614_v27  ;;  %v616_v52 = vmax.f32 %v574_v28, 0.0  ;;  %v4495_v28 = vpack.c.bf16 %v3613_v16, %v3611_v12  ;;  %4430 = vmatpush1.bf16.msra.mxu0 %v4429_v24  ;;  %v4499_v50 = vpack.c.bf16 %v3617_v34, %v3615_v29  ;;  %v3625_v12 = vld [vmem:[%s8773_s1 + $0x338] sm:$0xff]  ;;  %v4505_v16 = vpack.c.bf16 %v3620_v63, %v3618_v62  ;;  %v3627_v24 = vld [vmem:[%s8773_s1 + $0x348] sm:$0xff]  ;;  %v3634_v63 = vld [vmem:[%s8773_s1 + $0x380] sm:$0xff] }
 0x219   :  { %v617_v43 = vmax.f32 %v576_v35, 0.0  ;;  %4482 = vmatpush1.bf16.msra.mxu1 %v4481_v21  ;;  %v579_v47 = vpop.f32.mrb[4].mxu1  ;;  %v4493_v21 = vpack.c.bf16 %v3608_v4, %v3606_v3  ;;  %v856_v35 = vld [vmem:[%s8779_s7 + $0xa8] sm:$0xff]  ;;  %v4503_v4 = vpack.c.bf16 %v3621_v56, %v3619_v51  ;;  %v3630_v51 = vld [vmem:[%s8773_s1 + $0x360] sm:$0xff] }
 0x21a   :  { %v580_v53 = vadd.f32 %v579_v47, %v6072_v8  ;;  %v581_v54 = vpop.f32.mrb[5].mxu1  ;;  %4484 = vmatprep.subr.bf16.mxu1 %v4483_v30  ;;  %v4431_v30 = vpack.c.bf16 %v854_v18, %v852_v17  ;;  %v868_v29 = vld [vmem:[%s8779_s7 + $0x108] sm:$0xff] }
 0x21b   :  { %v582_v60 = vadd.f32 %v581_v54, %v6075_v9  ;;  %776 = vmatprep.mubr.f32.mxu1 %v617_v43  ;;  %v4433_v43 = vpack.c.bf16 %v853_v32, %v851_v31  ;;  %v857_v54 = vld [vmem:[%s8779_s7 + $0xb0] sm:$0xff]  ;;  %v4509_v31 = vpack.c.bf16 %v3624_v23, %v3622_v22  ;;  %v3626_v32 = vld [vmem:[%s8773_s1 + $0x340] sm:$0xff] }
 0x21c   :  { %777 = vmatmul.mubr.f32.gmra.mrb[18].mxu1 %v616_v52  ;;  %v618_v6 = vmax.f32 %v580_v53, 0.0  ;;  %4432 = vmatprep.subr.bf16.mxu0 %v4431_v30  ;;  %v4435_v52 = vpack.c.bf16 %v858_v36, %v856_v35  ;;  %v855_v53 = vld [vmem:[%s8779_s7 + $0xa0] sm:$0xff]  ;;  %v3628_v35 = vld [vmem:[%s8773_s1 + $0x350] sm:$0xff]  ;;  %v3631_v36 = vld [vmem:[%s8773_s1 + $0x368] sm:$0xff] }
 0x21d   :  { %v619_v0 = vmax.f32 %v582_v60, 0.0  ;;  %4486 = vmatpush1.bf16.msra.mxu1 %v4485_v48  ;;  %v585_v1 = vpop.f32.mrb[6].mxu1  ;;  %4434 = vmatpush1.bf16.msra.mxu0 %v4433_v43  ;;  %v869_v43 = vld [vmem:[%s8779_s7 + $0x110] sm:$0xff] }
 0x21e   :  { %v586_v7 = vadd.f32 %v585_v1, %v6072_v8  ;;  %v587_v10 = vpop.f32.mrb[7].mxu1  ;;  %4488 = vmatprep.subr.bf16.mxu1 %v4487_v55  ;;  %4436 = vmatprep.subr.bf16.mxu0 %v4435_v52  ;;  %v3632_v52 = vld [vmem:[%s8773_s1 + $0x370] sm:$0xff] }
 0x21f   :  { %v588_v15 = vadd.f32 %v587_v10, %v6075_v9  ;;  %782 = vmatprep.mubr.f32.mxu1 %v619_v0  ;;  %v4437_v0 = vpack.c.bf16 %v857_v54, %v855_v53  ;;  %v861_v10 = vld [vmem:[%s8779_s7 + $0xd0] sm:$0xff]  ;;  %v3635_v53 = vld [vmem:[%s8773_s1 + $0x388] sm:$0xff]  ;;  %v4449_v54 = vpack.c.bf16 %v869_v43, %v867_v41 }
 0x220   :  { %783 = vmatmul.mubr.f32.gmra.mrb[20].mxu1 %v618_v6  ;;  %v620_v25 = vmax.f32 %v586_v7, 0.0  ;;  %v4439_v6 = vpack.c.bf16 %v862_v58, %v860_v57  ;;  %v859_v7 = vld [vmem:[%s8779_s7 + $0xc0] sm:$0xff]  ;;  %v873_v58 = vld [vmem:[%s8779_s7 + $0x130] sm:$0xff]  ;;  %v892_v43 = vld [vmem:[%s8779_s7 + $0x1c8] sm:$0xff] }
 0x221   :  { %v621_v46 = vmax.f32 %v588_v15, 0.0  ;;  %4490 = vmatpush1.bf16.msra.mxu1 %v4489_v2  ;;  %v591_v20 = vpop.f32.mrb[8].mxu1  ;;  %4438 = vmatpush1.bf16.msra.mxu0 %v4437_v0  ;;  %v4441_v17 = vpack.c.bf16 %v861_v10, %v859_v7  ;;  %v871_v57 = vld [vmem:[%s8779_s7 + $0x120] sm:$0xff]  ;;  %v3636_v0 = vld [vmem:[%s8773_s1 + $0x390] sm:$0xff]  ;;  %v880_v7 = vld [vmem:[%s8779_s7 + $0x168] sm:$0xff] }
 0x222   :  { %v592_v26 = vadd.f32 %v591_v20, %v6072_v8  ;;  %v593_v27 = vpop.f32.mrb[9].mxu1  ;;  %4492 = vmatprep.subr.bf16.mxu1 %v4491_v11  ;;  %4440 = vmatprep.subr.bf16.mxu0 %v4439_v6  ;;  %v877_v6 = vld [vmem:[%s8779_s7 + $0x150] sm:$0xff]  ;;  %v882_v10 = vld [vmem:[%s8779_s7 + $0x178] sm:$0xff] }
 0x223   :  { %v594_v33 = vadd.f32 %v593_v27, %v6075_v9  ;;  %788 = vmatprep.mubr.f32.mxu1 %v621_v46  ;;  %v863_v27 = vld [vmem:[%s8779_s7 + $0xe0] sm:$0xff]  ;;  %v889_v41 = vld [vmem:[%s8779_s7 + $0x1b0] sm:$0xff] }
 0x224   :  { %789 = vmatmul.mubr.f32.gmra.mrb[22].mxu1 %v620_v25  ;;  %v622_v47 = vmax.f32 %v592_v26, 0.0  ;;  %v4443_v25 = vpack.c.bf16 %v866_v14, %v864_v13  ;;  %v3638_v13 = vld [vmem:[%s8773_s1 + $0x3a0] sm:$0xff]  ;;  %v3640_v14 = vld [vmem:[%s8773_s1 + $0x3b0] sm:$0xff] }
 0x225   :  { %v623_v37 = vmax.f32 %v594_v33, 0.0  ;;  %4494 = vmatpush1.bf16.msra.mxu1 %v4493_v21  ;;  %v597_v38 = vpop.f32.mrb[10].mxu1  ;;  %v4507_v21 = vpack.c.bf16 %v3625_v12, %v3623_v5  ;;  %4442 = vmatpush1.bf16.msra.mxu0 %v4441_v17  ;;  %v875_v5 = vld [vmem:[%s8779_s7 + $0x140] sm:$0xff]  ;;  %v4459_v17 = vpack.c.bf16 %v882_v10, %v880_v7  ;;  %v4525_v22 = vpack.c.bf16 %v3640_v14, %v3638_v13  ;;  %v3577_v14 = vld [vmem:[%s8774_s0 + $0xf8] sm:$0xff] }
 0x226   :  { %v598_v48 = vadd.f32 %v597_v38, %v6072_v8  ;;  %v599_v49 = vpop.f32.mrb[11].mxu1  ;;  %4496 = vmatprep.subr.bf16.mxu1 %v4495_v28  ;;  %v865_v28 = vld [vmem:[%s8779_s7 + $0xf0] sm:$0xff]  ;;  %4444 = vmatprep.subr.bf16.mxu0 %v4443_v25  ;;  %v3662_v10 = vld [vmem:[%s8773_s1 + $0x460] sm:$0xff] }
 0x227   :  { %v600_v55 = vadd.f32 %v599_v49, %v6075_v9  ;;  %794 = vmatprep.mubr.f32.mxu1 %v623_v37  ;;  %v3571_v37 = vld [vmem:[%s8774_s0 + $0xc8] sm:$0xff]  ;;  %v4445_v38 = vpack.c.bf16 %v865_v28, %v863_v27  ;;  %v4513_v49 = vpack.c.bf16 %v3628_v35, %v3626_v32  ;;  %v3644_v25 = vld [vmem:[%s8773_s1 + $0x3d0] sm:$0xff]  ;;  %v3649_v27 = vld [vmem:[%s8773_s1 + $0x3f8] sm:$0xff] }
 0x228   :  { %795 = vmatmul.mubr.f32.gmra.mrb[24].mxu1 %v622_v47  ;;  %v624_v1 = vmax.f32 %v598_v48, 0.0  ;;  %v872_v47 = vld [vmem:[%s8779_s7 + $0x128] sm:$0xff]  ;;  %v874_v48 = vld [vmem:[%s8779_s7 + $0x138] sm:$0xff]  ;;  %v3648_v35 = vld [vmem:[%s8773_s1 + $0x3f0] sm:$0xff] }
 0x229   :  { %v625_v59 = vmax.f32 %v600_v55, 0.0  ;;  %4498 = vmatpush1.bf16.msra.mxu1 %v4497_v39  ;;  %v603_v60 = vpop.f32.mrb[12].mxu1  ;;  %v3633_v39 = vld [vmem:[%s8773_s1 + $0x378] sm:$0xff]  ;;  %4446 = vmatpush1.bf16.msra.mxu0 %v4445_v38  ;;  %v4451_v56 = vpack.c.bf16 %v874_v48, %v872_v47 }
 0x22a   :  { %v604_v2 = vadd.f32 %v603_v60, %v6072_v8  ;;  %v605_v3 = vpop.f32.mrb[13].mxu1  ;;  %4500 = vmatprep.subr.bf16.mxu1 %v4499_v50  ;;  %v4515_v50 = vpack.c.bf16 %v3633_v39, %v3631_v36  ;;  %v3637_v55 = vld [vmem:[%s8773_s1 + $0x398] sm:$0xff]  ;;  %v3651_v36 = vld [vmem:[%s8773_s1 + $0x408] sm:$0xff] }
 0x22b   :  { %v606_v11 = vadd.f32 %v605_v3, %v6075_v9  ;;  %800 = vmatprep.mubr.f32.mxu1 %v625_v59  ;;  %v876_v59 = vld [vmem:[%s8779_s7 + $0x148] sm:$0xff]  ;;  %v878_v60 = vld [vmem:[%s8779_s7 + $0x158] sm:$0xff]  ;;  %v4519_v62 = vpack.c.bf16 %v3637_v55, %v3635_v53 }
 0x22c   :  { %801 = vmatmul.mubr.f32.gmra.mrb[26].mxu1 %v624_v1  ;;  %v626_v18 = vmax.f32 %v604_v2, 0.0  ;;  %v3639_v1 = vld [vmem:[%s8773_s1 + $0x3a8] sm:$0xff]  ;;  %v4453_v2 = vpack.c.bf16 %v873_v58, %v871_v57  ;;  %v3641_v3 = vld [vmem:[%s8773_s1 + $0x3b8] sm:$0xff]  ;;  %v3654_v58 = vld [vmem:[%s8773_s1 + $0x420] sm:$0xff] }
 0x22d   :  { %v627_v45 = vmax.f32 %v606_v11, 0.0  ;;  %4502 = vmatpush1.bf16.msra.mxu1 %v4501_v61  ;;  %v609_v15 = vpop.f32.mrb[14].mxu1  ;;  %v4517_v61 = vpack.c.bf16 %v3632_v52, %v3630_v51  ;;  %v4521_v11 = vpack.c.bf16 %v3636_v0, %v3634_v63  ;;  %v4523_v12 = vpack.c.bf16 %v3641_v3, %v3639_v1  ;;  %v3653_v38 = vld [vmem:[%s8773_s1 + $0x418] sm:$0xff]  ;;  %v3652_v51 = vld [vmem:[%s8773_s1 + $0x410] sm:$0xff]  ;;  %v3655_v53 = vld [vmem:[%s8773_s1 + $0x428] sm:$0xff] }
 0x22e   :  { %v610_v46 = vadd.f32 %v609_v15, %v6072_v8  ;;  %v611_v20 = vpop.f32.mrb[15].mxu1  ;;  %4504 = vmatprep.subr.bf16.mxu1 %v4503_v4  ;;  %v3629_v8 = vld [vmem:[%s8773_s1 + $0x358] sm:$0xff]  ;;  %v4455_v4 = vpack.c.bf16 %v878_v60, %v876_v59  ;;  %v4457_v15 = vpack.c.bf16 %v877_v6, %v875_v5  ;;  %v3656_v59 = vld [vmem:[%s8773_s1 + $0x430] sm:$0xff]  ;;  %v3659_v60 = vld [vmem:[%s8773_s1 + $0x448] sm:$0xff] }
 0x22f   :  { %v612_v26 = vadd.f32 %v611_v20, %v6075_v9  ;;  %806 = vmatprep.mubr.f32.mxu1 %v627_v45  ;;  %v870_v9 = vld [vmem:[%s8779_s7 + $0x118] sm:$0xff]  ;;  %v4511_v34 = vpack.c.bf16 %v3629_v8, %v3627_v24  ;;  %v3643_v45 = vld [vmem:[%s8773_s1 + $0x3c8] sm:$0xff]  ;;  %v3642_v24 = vld [vmem:[%s8773_s1 + $0x3c0] sm:$0xff] }
 0x230   :  { %807 = vmatmul.mubr.f32.gmra.mrb[28].mxu1 %v626_v18  ;;  %v628_v33 = vmax.f32 %v610_v46, 0.0  ;;  %v4447_v40 = vpack.c.bf16 %v870_v9, %v868_v29  ;;  %v879_v18 = vld [vmem:[%s8779_s7 + $0x160] sm:$0xff]  ;;  %v881_v46 = vld [vmem:[%s8779_s7 + $0x170] sm:$0xff]  ;;  %v884_v20 = vld [vmem:[%s8779_s7 + $0x188] sm:$0xff]  ;;  %v4529_v32 = vpack.c.bf16 %v3644_v25, %v3642_v24 }
 0x231   :  { %v629_v30 = vmax.f32 %v612_v26, 0.0  ;;  %4506 = vmatpush1.bf16.msra.mxu1 %v4505_v16  ;;  %v3645_v16 = vld [vmem:[%s8773_s1 + $0x3d8] sm:$0xff]  ;;  %v3647_v26 = vld [vmem:[%s8773_s1 + $0x3e8] sm:$0xff]  ;;  %v4461_v8 = vpack.c.bf16 %v881_v46, %v879_v18  ;;  %v883_v29 = vld [vmem:[%s8779_s7 + $0x180] sm:$0xff] }
 0x232   :  { %4508 = vmatprep.subr.bf16.mxu1 %v4507_v21  ;;  %4448 = vmatprep.subr.bf16.mxu0 %v4447_v40  ;;  %v886_v21 = vld [vmem:[%s8779_s7 + $0x198] sm:$0xff]  ;;  %v4527_v23 = vpack.c.bf16 %v3645_v16, %v3643_v45  ;;  %v885_v9 = vld [vmem:[%s8779_s7 + $0x190] sm:$0xff]  ;;  %v887_v40 = vld [vmem:[%s8779_s7 + $0x1a0] sm:$0xff] }
 0x233   :  { %812 = vmatprep.mubr.f32.mxu1 %v629_v30  ;;  %4450 = vmatpush1.bf16.msra.mxu0 %v4449_v54  ;;  %v4463_v28 = vpack.c.bf16 %v886_v21, %v884_v20  ;;  %v888_v30 = vld [vmem:[%s8779_s7 + $0x1a8] sm:$0xff]  ;;  %v894_v47 = vld [vmem:[%s8779_s7 + $0x1d8] sm:$0xff]  ;;  %v4469_v52 = vpack.c.bf16 %v889_v41, %v887_v40  ;;  %v3658_v0 = vld [vmem:[%s8773_s1 + $0x440] sm:$0xff] }
 0x234   :  { %813 = vmatmul.mubr.f32.gmra.mrb[30].mxu1 %v628_v33  ;;  %4452 = vmatprep.subr.bf16.mxu0 %v4451_v56  ;;  %v4531_v33 = vpack.c.bf16 %v3649_v27, %v3647_v26  ;;  %v3657_v54 = vld [vmem:[%s8773_s1 + $0x438] sm:$0xff]  ;;  %v4471_v55 = vpack.c.bf16 %v894_v47, %v892_v43  ;;  %v3660_v1 = vld [vmem:[%s8773_s1 + $0x450] sm:$0xff]  ;;  %v3574_v6 = vld [vmem:[%s8774_s0 + $0xe0] sm:$0xff] }
 0x235   :  { %4510 = vmatpush1.bf16.msra.mxu1 %v4509_v31  ;;  %1255 = vmatprep.mubr.f32.mxu1 %v3571_v37  ;;  %v890_v31 = vld [vmem:[%s8779_s7 + $0x1b8] sm:$0xff]  ;;  %v4465_v37 = vpack.c.bf16 %v885_v9, %v883_v29  ;;  %v4539_v57 = vpack.c.bf16 %v3657_v54, %v3655_v53  ;;  %v4545_v5 = vpack.c.bf16 %v3660_v1, %v3658_v0  ;;  %v3576_v45 = vld [vmem:[%s8774_s0 + $0xf0] sm:$0xff]  ;;  %v3579_v16 = vld [vmem:[%s8774_s0 + $0x108] sm:$0xff] }
 0x236   :  { %4512 = vmatprep.subr.bf16.mxu1 %v4511_v34  ;;  %v3646_v34 = vld [vmem:[%s8773_s1 + $0x3e0] sm:$0xff]  ;;  %v4467_v39 = vpack.c.bf16 %v890_v31, %v888_v30  ;;  %v3665_v3 = vld [vmem:[%s8773_s1 + $0x478] sm:$0xff]  ;;  %v896_v25 = vld [vmem:[%s8779_s7 + $0x1e8] sm:$0xff] }
 0x237   :  { %4454 = vmatpush1.bf16.msra.mxu0 %v4453_v2  ;;  %v4533_v48 = vpack.c.bf16 %v3648_v35, %v3646_v34  ;;  %v3663_v2 = vld [vmem:[%s8773_s1 + $0x468] sm:$0xff]  ;;  %v3582_v18 = vld [vmem:[%s8774_s0 + $0x120] sm:$0xff]  ;;  %v3585_v20 = vld [vmem:[%s8774_s0 + $0x138] sm:$0xff] }
 0x238   :  { %4456 = vmatprep.subr.bf16.mxu0 %v4455_v4  ;;  %v3570_v4 = vld [vmem:[%s8774_s0 + $0xc0] sm:$0xff]  ;;  %v4547_v7 = vpack.c.bf16 %v3665_v3, %v3663_v2  ;;  %v898_v26 = vld [vmem:[%s8779_s7 + $0x1f8] sm:$0xff]  ;;  %v897_v29 = vld [vmem:[%s8779_s7 + $0x1f0] sm:$0xff] }
 0x239   :  { %4514 = vmatpush1.bf16.msra.mxu1 %v4513_v49  ;;  %v4535_v49 = vpack.c.bf16 %v3653_v38, %v3651_v36  ;;  %v3586_v46 = vld [vmem:[%s8774_s0 + $0x140] sm:$0xff]  ;;  %v4475_v27 = vpack.c.bf16 %v898_v26, %v896_v25  ;;  %v3592_v9 = vld [vmem:[%s8774_s0 + $0x170] sm:$0xff]  ;;  %v3591_v31 = vld [vmem:[%s8774_s0 + $0x168] sm:$0xff] }
 0x23a   :  { %4516 = vmatprep.subr.bf16.mxu1 %v4515_v50  ;;  %v3650_v50 = vld [vmem:[%s8773_s1 + $0x400] sm:$0xff]  ;;  %v3581_v35 = vld [vmem:[%s8774_s0 + $0x118] sm:$0xff]  ;;  %v3584_v36 = vld [vmem:[%s8774_s0 + $0x130] sm:$0xff] }
 0x23b   :  { %4458 = vmatpush1.bf16.msra.mxu0 %v4457_v15  ;;  %v4537_v56 = vpack.c.bf16 %v3652_v51, %v3650_v50  ;;  %v3580_v15 = vld [vmem:[%s8774_s0 + $0x110] sm:$0xff]  ;;  %v891_v21 = vld [vmem:[%s8779_s7 + $0x1c0] sm:$0xff]  ;;  %v3678_v40 = vld [vmem:[%s8775_s3 + $0x218] sm:$0xff] }
 0x23c   :  { %4460 = vmatprep.subr.bf16.mxu0 %v4459_v17  ;;  %v3583_v17 = vld [vmem:[%s8774_s0 + $0x128] sm:$0xff]  ;;  %v3578_v34 = vld [vmem:[%s8774_s0 + $0x100] sm:$0xff]  ;;  %v3593_v43 = vld [vmem:[%s8774_s0 + $0x178] sm:$0xff] }
 0x23d   :  { %4518 = vmatpush1.bf16.msra.mxu1 %v4517_v61  ;;  %v3661_v61 = vld [vmem:[%s8773_s1 + $0x458] sm:$0xff]  ;;  %v3590_v38 = vld [vmem:[%s8774_s0 + $0x160] sm:$0xff]  ;;  %v3677_v54 = vld [vmem:[%s8775_s3 + $0x210] sm:$0xff] }
 0x23e   :  { %4520 = vmatprep.subr.bf16.mxu1 %v4519_v62  ;;  %v4541_v62 = vpack.c.bf16 %v3656_v59, %v3654_v58  ;;  %v4543_v63 = vpack.c.bf16 %v3661_v61, %v3659_v60  ;;  %v694_v47 = vld [vmem:[%s8780_s6] sm:$0x3]  ;;  %v3681_v2 = vld [vmem:[%s8775_s3 + $0x230] sm:$0xff] }
 0x23f   :  { %4462 = vmatpush1.bf16.msra.mxu0 %v4461_v8  ;;  %v3588_v8 = vld [vmem:[%s8774_s0 + $0x150] sm:$0xff]  ;;  %v3675_v53 = vld [vmem:[%s8775_s3 + $0x200] sm:$0xff] }
 0x240   :  { %4464 = vmatprep.subr.bf16.mxu0 %v4463_v28  ;;  %v895_v28 = vld [vmem:[%s8779_s7 + $0x1e0] sm:$0xff]  ;;  %v4553_v60 = vpack.c.bf16 %v3677_v54, %v3675_v53 }
 0x241   :  { %4522 = vmatpush1.bf16.msra.mxu1 %v4521_v11  ;;  %v3664_v11 = vld [vmem:[%s8773_s1 + $0x470] sm:$0xff]  ;;  %v4477_v30 = vpack.c.bf16 %v897_v29, %v895_v28  ;;  %v3679_v1 = vld [vmem:[%s8775_s3 + $0x220] sm:$0xff]  ;;  %v3692_v28 = vld [vmem:[%s8775_s3 + $0x288] sm:$0xff] }
 0x242   :  { %4524 = vmatprep.subr.bf16.mxu1 %v4523_v12  ;;  %v3573_v12 = vld [vmem:[%s8774_s0 + $0xd8] sm:$0xff]  ;;  %v4549_v13 = vpack.c.bf16 %v3664_v11, %v3662_v10  ;;  %v4557_v10 = vpack.c.bf16 %v3681_v2, %v3679_v1  ;;  %v3687_v26 = vld [vmem:[%s8775_s3 + $0x260] sm:$0xff] }
 0x243   :  { %4466 = vmatpush1.bf16.msra.mxu0 %v4465_v37  ;;  %v3587_v37 = vld [vmem:[%s8774_s0 + $0x148] sm:$0xff]  ;;  %v3694_v29 = vld [vmem:[%s8775_s3 + $0x298] sm:$0xff]  ;;  %v3695_v54 = vld [vmem:[%s8775_s3 + $0x2a0] sm:$0xff] }
 0x244   :  { %4468 = vmatprep.subr.bf16.mxu0 %v4467_v39  ;;  %v3676_v39 = vld [vmem:[%s8775_s3 + $0x208] sm:$0xff]  ;;  %v3699_v2 = vld [vmem:[%s8775_s3 + $0x2c0] sm:$0xff] }
 0x245   :  { %4526 = vmatpush1.bf16.msra.mxu1 %v4525_v22  ;;  %v893_v22 = vld [vmem:[%s8779_s7 + $0x1d0] sm:$0xff]  ;;  %v4551_v41 = vpack.c.bf16 %v3678_v40, %v3676_v39  ;;  %v3696_v39 = vld [vmem:[%s8775_s3 + $0x2a8] sm:$0xff]  ;;  %v3698_v40 = vld [vmem:[%s8775_s3 + $0x2b8] sm:$0xff] }
 0x246   :  { %4528 = vmatprep.subr.bf16.mxu1 %v4527_v23  ;;  %v3589_v23 = vld [vmem:[%s8774_s0 + $0x158] sm:$0xff]  ;;  %v4473_v24 = vpack.c.bf16 %v893_v22, %v891_v21  ;;  %v4571_v53 = vpack.c.bf16 %v3698_v40, %v3696_v39  ;;  %v3721_v39 = vld [vmem:[%s8775_s3 + $0x370] sm:$0xff]  ;;  %v3724_v40 = vld [vmem:[%s8775_s3 + $0x388] sm:$0xff] }
 0x247   :  { %4470 = vmatpush1.bf16.msra.mxu0 %v4469_v52 }
 0x248   :  { %4472 = vmatprep.subr.bf16.mxu0 %v4471_v55 }
 0x249   :  { %4530 = vmatpush1.bf16.msra.mxu1 %v4529_v32  ;;  %v3572_v32 = vld [vmem:[%s8774_s0 + $0xd0] sm:$0xff] }
 0x24a   :  { %4532 = vmatprep.subr.bf16.mxu1 %v4531_v33  ;;  %v3575_v33 = vld [vmem:[%s8774_s0 + $0xe8] sm:$0xff] }
 0x24b   :  { %4474 = vmatpush1.bf16.msra.mxu0 %v4473_v24 }
 0x24c   :  { %4476 = vmatprep.subr.bf16.mxu0 %v4475_v27 }
 0x24d   :  { %4534 = vmatpush1.bf16.msra.mxu1 %v4533_v48  ;;  %v6593_v48 = vrot.slane %v694_v47, %v5847_v42 }
 0x24e   :  { %4536 = vmatprep.subr.bf16.mxu1 %v4535_v49  ;;  %v6596_v49 = vrot.slane %v694_v47, %v5852_v44 }
 0x24f   :  { %4478 = vmatpush1.bf16.msra.mxu0 %v4477_v30 }
 0x250   :  { %4552 = vmatprep.subr.bf16.mxu0 %v4551_v41 }
 0x251   :  { %4538 = vmatpush1.bf16.msra.mxu1 %v4537_v56  ;;  %v3680_v56 = vld [vmem:[%s8775_s3 + $0x228] sm:$0xff] }
 0x252   :  { %4540 = vmatprep.subr.bf16.mxu1 %v4539_v57  ;;  %v3682_v57 = vld [vmem:[%s8775_s3 + $0x238] sm:$0xff] }
 0x253   :  { %v4555_v0 = vpack.c.bf16 %v3682_v57, %v3680_v56  ;;  %v3700_v57 = vld [vmem:[%s8775_s3 + $0x2c8] sm:$0xff] }
 0x255   :  { %4542 = vmatpush1.bf16.msra.mxu1 %v4541_v62 }
 0x256   :  { %4544 = vmatprep.subr.bf16.mxu1 %v4543_v63 }
 0x258   :  { %1256 = vmatmul.mubr.f32.vlgmr.msra.gmra.mrb[32].mxu1 %v3570_v4  ;;  %v3684_v4 = vld [vmem:[%s8775_s3 + $0x248] sm:$0xff] }
 0x259   :  { %4546 = vmatpush1.bf16.msra.mxu1 %v4545_v5  ;;  %1261 = vmatprep.mubr.f32.mxu1 %v3574_v6  ;;  %v3686_v5 = vld [vmem:[%s8775_s3 + $0x258] sm:$0xff] }
 0x25a   :  { %4548 = vmatprep.subr.bf16.mxu1 %v4547_v7 }
 0x25c   :  { %1262 = vmatmul.mubr.f32.gmra.mrb[34].mxu1 %v3573_v12 }
 0x25d   :  { %1267 = vmatprep.mubr.f32.mxu1 %v3577_v14  ;;  %4550 = vmatpush1.bf16.msra.mxu1 %v4549_v13  ;;  %v4559_v14 = vpack.c.bf16 %v3686_v5, %v3684_v4  ;;  %v3704_v5 = vld [vmem:[%s8775_s3 + $0x2e8] sm:$0xff] }
 0x260   :  { %1268 = vmatmul.mubr.f32.gmra.mrb[36].mxu1 %v3576_v45  ;;  %v3683_v45 = vld [vmem:[%s8775_s3 + $0x240] sm:$0xff] }
 0x261   :  { %1273 = vmatprep.mubr.f32.mxu1 %v3580_v15  ;;  %v3685_v15 = vld [vmem:[%s8775_s3 + $0x250] sm:$0xff] }
 0x262   :  { %v4561_v21 = vpack.c.bf16 %v3685_v15, %v3683_v45  ;;  %v3703_v15 = vld [vmem:[%s8775_s3 + $0x2e0] sm:$0xff] }
 0x264   :  { %1274 = vmatmul.mubr.f32.gmra.mrb[38].mxu1 %v3579_v16 }
 0x265   :  { %1279 = vmatprep.mubr.f32.mxu1 %v3583_v17  ;;  %v3688_v17 = vld [vmem:[%s8775_s3 + $0x268] sm:$0xff] }
 0x268   :  { %1280 = vmatmul.mubr.f32.gmra.mrb[40].mxu1 %v3582_v18  ;;  %v3690_v18 = vld [vmem:[%s8775_s3 + $0x278] sm:$0xff] }
 0x269   :  { %1285 = vmatprep.mubr.f32.mxu1 %v3586_v46  ;;  %v4563_v25 = vpack.c.bf16 %v3690_v18, %v3688_v17  ;;  %v3708_v18 = vld [vmem:[%s8775_s3 + $0x308] sm:$0xff] }
 0x26c   :  { %1286 = vmatmul.mubr.f32.gmra.mrb[42].mxu1 %v3585_v20 }
 0x26d   :  { %1291 = vmatprep.mubr.f32.mxu1 %v3589_v23 }
 0x270   :  { %1292 = vmatmul.mubr.f32.gmra.mrb[44].mxu1 %v3588_v8  ;;  %v3689_v8 = vld [vmem:[%s8775_s3 + $0x270] sm:$0xff] }
 0x271   :  { %1297 = vmatprep.mubr.f32.mxu1 %v3592_v9 }
 0x274   :  { %1298 = vmatmul.mubr.f32.gmra.mrb[46].mxu1 %v3591_v31  ;;  %v4565_v31 = vpack.c.bf16 %v3689_v8, %v3687_v26 }
 0x275   :  { %1368 = vmatprep.mubr.f32.mxu1 %v5264_v19 }
 0x278   :  { %3667 = vmatmul.mubr.msk.f32.vlgmr.msra.gmra.mrb[32].mxu1 %vm158_vm0, %v3572_v32 }
 0x279   :  { %1374 = vmatprep.mubr.f32.mxu1 %v5264_v19 }
 0x27c   :  { %3668 = vmatmul.mubr.msk.f32.gmra.mrb[34].mxu1 %vm158_vm0, %v3575_v33 }
 0x27d   :  { %1380 = vmatprep.mubr.f32.mxu1 %v5264_v19 }
 0x280   :  { %3669 = vmatmul.mubr.msk.f32.gmra.mrb[36].mxu1 %vm158_vm0, %v3578_v34 }
 0x281   :  { %1386 = vmatprep.mubr.f32.mxu1 %v5264_v19 }
 0x284   :  { %3670 = vmatmul.mubr.msk.f32.gmra.mrb[38].mxu1 %vm158_vm0, %v3581_v35  ;;  %v4567_v35 = vpack.c.bf16 %v3694_v29, %v3692_v28  ;;  %v3713_v28 = vld [vmem:[%s8775_s3 + $0x330] sm:$0xff]  ;;  %v3716_v29 = vld [vmem:[%s8775_s3 + $0x348] sm:$0xff] }
 0x285   :  { %1392 = vmatprep.mubr.f32.mxu1 %v5264_v19 }
 0x288   :  { %3671 = vmatmul.mubr.msk.f32.gmra.mrb[40].mxu1 %vm158_vm0, %v3584_v36  ;;  %v3691_v36 = vld [vmem:[%s8775_s3 + $0x280] sm:$0xff] }
 0x289   :  { %1398 = vmatprep.mubr.f32.mxu1 %v5264_v19 }
 0x28c   :  { %3672 = vmatmul.mubr.msk.f32.gmra.mrb[42].mxu1 %vm158_vm0, %v3587_v37  ;;  %v3693_v37 = vld [vmem:[%s8775_s3 + $0x290] sm:$0xff] }
 0x28d   :  { %1404 = vmatprep.mubr.f32.mxu1 %v5264_v19  ;;  %v4569_v47 = vpack.c.bf16 %v3693_v37, %v3691_v36 }
 0x290   :  { %3673 = vmatmul.mubr.msk.f32.gmra.mrb[44].mxu1 %vm158_vm0, %v3590_v38 }
 0x291   :  { %1410 = vmatprep.mubr.f32.mxu1 %v5264_v19 }
 0x294   :  { %3674 = vmatmul.mubr.msk.f32.gmra.mrb[46].mxu1 %vm158_vm0, %v3593_v43 }
 0x2eb   :  { %v772_v50 = vpop.f32.mrb[16].mxu1 }
 0x2ec   :  { %v773_v51 = vadd.f32 %v772_v50, %v6593_v48  ;;  %v774_v52 = vpop.f32.mrb[17].mxu1 }
 0x2ed   :  { %v775_v55 = vadd.f32 %v774_v52, %v6596_v49 }
 0x2ee   :  { %v819_v61 = vmax.f32 %v773_v51, 0.0 }
 0x2ef   :  { %v820_v58 = vmax.f32 %v775_v55, 0.0  ;;  %v778_v59 = vpop.f32.mrb[18].mxu1  ;;  %v3697_v55 = vld [vmem:[%s8775_s3 + $0x2b0] sm:$0xff] }
 0x2f0   :  { %v779_v62 = vadd.f32 %v778_v59, %v6593_v48  ;;  %v780_v63 = vpop.f32.mrb[19].mxu1 }
 0x2f1   :  { %v781_v3 = vadd.f32 %v780_v63, %v6596_v49  ;;  %975 = vmatprep.mubr.f32.mxu0 %v820_v58  ;;  %v3702_v58 = vld [vmem:[%s8775_s3 + $0x2d8] sm:$0xff] }
 0x2f2   :  { %976 = vmatmul.mubr.f32.vlgmr.msra.gmra.mrb[16].mxu0 %v819_v61  ;;  %v821_v11 = vmax.f32 %v779_v62, 0.0  ;;  %v4573_v61 = vpack.c.bf16 %v3697_v55, %v3695_v54  ;;  %v4575_v1 = vpack.c.bf16 %v3702_v58, %v3700_v57  ;;  %v3729_v57 = vld [vmem:[%s8775_s3 + $0x3b0] sm:$0xff]  ;;  %v3732_v58 = vld [vmem:[%s8775_s3 + $0x3c8] sm:$0xff] }
 0x2f3   :  { %v822_v6 = vmax.f32 %v781_v3, 0.0  ;;  %v784_v7 = vpop.f32.mrb[20].mxu1  ;;  %4554 = vmatpush1.bf16.msra.mxu0 %v4553_v60  ;;  %v3701_v3 = vld [vmem:[%s8775_s3 + $0x2d0] sm:$0xff] }
 0x2f4   :  { %v785_v12 = vadd.f32 %v784_v7, %v6593_v48  ;;  %v786_v13 = vpop.f32.mrb[21].mxu1  ;;  %4556 = vmatprep.subr.bf16.mxu0 %v4555_v0 }
 0x2f5   :  { %v787_v16 = vadd.f32 %v786_v13, %v6596_v49  ;;  %981 = vmatprep.mubr.f32.mxu0 %v822_v6  ;;  %v3706_v6 = vld [vmem:[%s8775_s3 + $0x2f8] sm:$0xff] }
 0x2f6   :  { %982 = vmatmul.mubr.f32.gmra.mrb[18].mxu0 %v821_v11  ;;  %v823_v22 = vmax.f32 %v785_v12, 0.0  ;;  %v4577_v11 = vpack.c.bf16 %v3701_v3, %v3699_v2  ;;  %v4579_v45 = vpack.c.bf16 %v3706_v6, %v3704_v5  ;;  %v3737_v5 = vld [vmem:[%s8775_s3 + $0x3f0] sm:$0xff] }
 0x2f7   :  { %v824_v46 = vmax.f32 %v787_v16, 0.0  ;;  %v790_v20 = vpop.f32.mrb[22].mxu1  ;;  %4558 = vmatpush1.bf16.msra.mxu0 %v4557_v10  ;;  %v3705_v16 = vld [vmem:[%s8775_s3 + $0x2f0] sm:$0xff] }
 0x2f8   :  { %v791_v23 = vadd.f32 %v790_v20, %v6593_v48  ;;  %v792_v24 = vpop.f32.mrb[23].mxu1  ;;  %4560 = vmatprep.subr.bf16.mxu0 %v4559_v14  ;;  %v4581_v20 = vpack.c.bf16 %v3705_v16, %v3703_v15 }
 0x2f9   :  { %v793_v27 = vadd.f32 %v792_v24, %v6596_v49  ;;  %987 = vmatprep.mubr.f32.mxu0 %v824_v46  ;;  %v3712_v24 = vld [vmem:[%s8775_s3 + $0x328] sm:$0xff] }
 0x2fa   :  { %988 = vmatmul.mubr.f32.gmra.mrb[20].mxu0 %v823_v22  ;;  %v825_v32 = vmax.f32 %v791_v23, 0.0  ;;  %v3709_v23 = vld [vmem:[%s8775_s3 + $0x310] sm:$0xff] }
 0x2fb   :  { %v826_v9 = vmax.f32 %v793_v27, 0.0  ;;  %v796_v30 = vpop.f32.mrb[24].mxu1  ;;  %4562 = vmatpush1.bf16.msra.mxu0 %v4561_v21  ;;  %v3711_v27 = vld [vmem:[%s8775_s3 + $0x320] sm:$0xff] }
 0x2fc   :  { %v797_v33 = vadd.f32 %v796_v30, %v6593_v48  ;;  %v798_v34 = vpop.f32.mrb[25].mxu1  ;;  %4564 = vmatprep.subr.bf16.mxu0 %v4563_v25  ;;  %v3714_v25 = vld [vmem:[%s8775_s3 + $0x338] sm:$0xff]  ;;  %v4589_v30 = vpack.c.bf16 %v3713_v28, %v3711_v27 }
 0x2fd   :  { %v799_v38 = vadd.f32 %v798_v34, %v6596_v49  ;;  %993 = vmatprep.mubr.f32.mxu0 %v826_v9  ;;  %v4587_v8 = vpack.c.bf16 %v3714_v25, %v3712_v24  ;;  %v3718_v9 = vld [vmem:[%s8775_s3 + $0x358] sm:$0xff]  ;;  %v3720_v34 = vld [vmem:[%s8775_s3 + $0x368] sm:$0xff] }
 0x2fe   :  { %994 = vmatmul.mubr.f32.gmra.mrb[22].mxu0 %v825_v32  ;;  %v827_v50 = vmax.f32 %v797_v33, 0.0  ;;  %v3715_v32 = vld [vmem:[%s8775_s3 + $0x340] sm:$0xff]  ;;  %v3717_v33 = vld [vmem:[%s8775_s3 + $0x350] sm:$0xff] }
 0x2ff   :  { %v828_v41 = vmax.f32 %v799_v38, 0.0  ;;  %v802_v43 = vpop.f32.mrb[26].mxu1  ;;  %4566 = vmatpush1.bf16.msra.mxu0 %v4565_v31  ;;  %v4591_v31 = vpack.c.bf16 %v3718_v9, %v3716_v29  ;;  %v4593_v36 = vpack.c.bf16 %v3717_v33, %v3715_v32  ;;  %v3719_v38 = vld [vmem:[%s8775_s3 + $0x360] sm:$0xff] }
 0x300   :  { %v803_v51 = vadd.f32 %v802_v43, %v6593_v48  ;;  %v804_v52 = vpop.f32.mrb[27].mxu1  ;;  %4568 = vmatprep.subr.bf16.mxu0 %v4567_v35  ;;  %v3722_v35 = vld [vmem:[%s8775_s3 + $0x378] sm:$0xff]  ;;  %v4597_v43 = vpack.c.bf16 %v3721_v39, %v3719_v38 }
 0x301   :  { %v805_v56 = vadd.f32 %v804_v52, %v6596_v49  ;;  %999 = vmatprep.mubr.f32.mxu0 %v828_v41  ;;  %v4595_v37 = vpack.c.bf16 %v3722_v35, %v3720_v34  ;;  %v3726_v41 = vld [vmem:[%s8775_s3 + $0x398] sm:$0xff]  ;;  %v3728_v52 = vld [vmem:[%s8775_s3 + $0x3a8] sm:$0xff] }
 0x302   :  { %1000 = vmatmul.mubr.f32.gmra.mrb[24].mxu0 %v827_v50  ;;  %v829_v62 = vmax.f32 %v803_v51, 0.0  ;;  %v3723_v50 = vld [vmem:[%s8775_s3 + $0x380] sm:$0xff]  ;;  %v3725_v51 = vld [vmem:[%s8775_s3 + $0x390] sm:$0xff] }
 0x303   :  { %v830_v59 = vmax.f32 %v805_v56, 0.0  ;;  %v808_v60 = vpop.f32.mrb[28].mxu1  ;;  %4570 = vmatpush1.bf16.msra.mxu0 %v4569_v47  ;;  %v4599_v47 = vpack.c.bf16 %v3726_v41, %v3724_v40  ;;  %v4601_v54 = vpack.c.bf16 %v3725_v51, %v3723_v50  ;;  %v3727_v56 = vld [vmem:[%s8775_s3 + $0x3a0] sm:$0xff] }
 0x304   :  { %v809_v63 = vadd.f32 %v808_v60, %v6593_v48  ;;  %v810_v0 = vpop.f32.mrb[29].mxu1  ;;  %4572 = vmatprep.subr.bf16.mxu0 %v4571_v53  ;;  %v3730_v53 = vld [vmem:[%s8775_s3 + $0x3b8] sm:$0xff]  ;;  %v4605_v60 = vpack.c.bf16 %v3729_v57, %v3727_v56  ;;  %v3740_v57 = vld [vmem:[%s8776_s5 + $0x200] sm:$0xff] }
 0x305   :  { %v811_v4 = vadd.f32 %v810_v0, %v6596_v49  ;;  %1005 = vmatprep.mubr.f32.mxu0 %v830_v59  ;;  %v4603_v55 = vpack.c.bf16 %v3730_v53, %v3728_v52  ;;  %v3734_v59 = vld [vmem:[%s8775_s3 + $0x3d8] sm:$0xff]  ;;  %v3736_v0 = vld [vmem:[%s8775_s3 + $0x3e8] sm:$0xff] }
 0x306   :  { %1006 = vmatmul.mubr.f32.gmra.mrb[26].mxu0 %v829_v62  ;;  %v831_v12 = vmax.f32 %v809_v63, 0.0  ;;  %v3731_v62 = vld [vmem:[%s8775_s3 + $0x3c0] sm:$0xff]  ;;  %v3733_v63 = vld [vmem:[%s8775_s3 + $0x3d0] sm:$0xff]  ;;  %v3743_v56 = vld [vmem:[%s8776_s5 + $0x218] sm:$0xff] }
 0x307   :  { %v832_v7 = vmax.f32 %v811_v4, 0.0  ;;  %v814_v10 = vpop.f32.mrb[30].mxu1  ;;  %4574 = vmatpush1.bf16.msra.mxu0 %v4573_v61  ;;  %v4607_v61 = vpack.c.bf16 %v3734_v59, %v3732_v58  ;;  %v4609_v2 = vpack.c.bf16 %v3733_v63, %v3731_v62  ;;  %v3735_v4 = vld [vmem:[%s8775_s3 + $0x3e0] sm:$0xff]  ;;  %v3742_v62 = vld [vmem:[%s8776_s5 + $0x210] sm:$0xff]  ;;  %v3745_v63 = vld [vmem:[%s8776_s5 + $0x228] sm:$0xff] }
 0x308   :  { %v815_v13 = vadd.f32 %v814_v10, %v6593_v48  ;;  %v816_v14 = vpop.f32.mrb[31].mxu1  ;;  %4576 = vmatprep.subr.bf16.mxu0 %v4575_v1  ;;  %v3710_v48 = vld [vmem:[%s8775_s3 + $0x318] sm:$0xff]  ;;  %v4613_v6 = vpack.c.bf16 %v3737_v5, %v3735_v4  ;;  %v3744_v4 = vld [vmem:[%s8776_s5 + $0x220] sm:$0xff]  ;;  %v3746_v5 = vld [vmem:[%s8776_s5 + $0x230] sm:$0xff] }
 0x309   :  { %v817_v17 = vadd.f32 %v816_v14, %v6596_v49  ;;  %1011 = vmatprep.mubr.f32.mxu0 %v832_v7  ;;  %v4583_v22 = vpack.c.bf16 %v3710_v48, %v3708_v18  ;;  %v3707_v49 = vld [vmem:[%s8775_s3 + $0x300] sm:$0xff]  ;;  %v3738_v1 = vld [vmem:[%s8775_s3 + $0x3f8] sm:$0xff] }
 0x30a   :  { %1012 = vmatmul.mubr.f32.gmra.mrb[28].mxu0 %v831_v12  ;;  %v833_v21 = vmax.f32 %v815_v13, 0.0  ;;  %v4585_v26 = vpack.c.bf16 %v3709_v23, %v3707_v49  ;;  %v4611_v3 = vpack.c.bf16 %v3738_v1, %v3736_v0  ;;  %v3666_v7 = vld [vmem:[%s8777_s2 + $0x2] sm:$0x3]  ;;  %v3747_v0 = vld [vmem:[%s8776_s5 + $0x238] sm:$0xff] }
 0x30b   :  { %v834_v46 = vmax.f32 %v817_v17, 0.0  ;;  %4578 = vmatpush1.bf16.msra.mxu0 %v4577_v11  ;;  %v1160_v10 = vrot.slane %v3666_v7, %v5847_v42  ;;  %v6805_v11 = vrot.slane %v3666_v7, %v5852_v44  ;;  %v3751_v7 = vld [vmem:[%s8776_s5 + $0x258] sm:$0xff] }
 0x30c   :  { %4580 = vmatprep.subr.bf16.mxu0 %v4579_v45 }
 0x30d   :  { %1017 = vmatprep.mubr.f32.mxu0 %v834_v46 }
 0x30e   :  { %1018 = vmatmul.mubr.f32.gmra.mrb[30].mxu0 %v833_v21 }
 0x30f   :  { %4582 = vmatpush1.bf16.msra.mxu0 %v4581_v20 }
 0x310   :  { %4584 = vmatprep.subr.bf16.mxu0 %v4583_v22 }
 0x313   :  { %4586 = vmatpush1.bf16.msra.mxu0 %v4585_v26 }
 0x314   :  { %4588 = vmatprep.subr.bf16.mxu0 %v4587_v8 }
 0x317   :  { %4590 = vmatpush1.bf16.msra.mxu0 %v4589_v30 }
 0x318   :  { %4592 = vmatprep.subr.bf16.mxu0 %v4591_v31 }
 0x31b   :  { %4594 = vmatpush1.bf16.msra.mxu0 %v4593_v36 }
 0x31c   :  { %4596 = vmatprep.subr.bf16.mxu0 %v4595_v37 }
 0x31f   :  { %4598 = vmatpush1.bf16.msra.mxu0 %v4597_v43 }
 0x320   :  { %4600 = vmatprep.subr.bf16.mxu0 %v4599_v47 }
 0x323   :  { %4602 = vmatpush1.bf16.msra.mxu0 %v4601_v54 }
 0x324   :  { %4604 = vmatprep.subr.bf16.mxu0 %v4603_v55  ;;  %v3741_v55 = vld [vmem:[%s8776_s5 + $0x208] sm:$0xff] }
 0x327   :  { %4606 = vmatpush1.bf16.msra.mxu0 %v4605_v60 }
 0x328   :  { %4608 = vmatprep.subr.bf16.mxu0 %v4607_v61  ;;  %v4615_v61 = vpack.c.bf16 %v3743_v56, %v3741_v55 }
 0x32b   :  { %4610 = vmatpush1.bf16.msra.mxu0 %v4609_v2  ;;  %v4617_v2 = vpack.c.bf16 %v3742_v62, %v3740_v57  ;;  %v3776_v57 = vld [vmem:[%s8776_s5 + $0x320] sm:$0xff] }
 0x32c   :  { %4612 = vmatprep.subr.bf16.mxu0 %v4611_v3  ;;  %v4619_v3 = vpack.c.bf16 %v3747_v0, %v3745_v63  ;;  %v3780_v63 = vld [vmem:[%s8776_s5 + $0x340] sm:$0xff]  ;;  %v3782_v0 = vld [vmem:[%s8776_s5 + $0x350] sm:$0xff] }
 0x32f   :  { %4614 = vmatpush1.bf16.msra.mxu0 %v4613_v6  ;;  %v3749_v6 = vld [vmem:[%s8776_s5 + $0x248] sm:$0xff] }
 0x330   :  { %4616 = vmatprep.subr.bf16.mxu0 %v4615_v61 }
 0x34b   :  { %v1370_v12 = vpop.f32.mrb[32].mxu1 }
 0x34c   :  { %v5183_v13 = vadd.f32 %v1370_v12, %v1160_v10  ;;  %v1372_v14 = vpop.f32.mrb[33].mxu1 }
 0x34d   :  { %v5184_v45 = vadd.f32 %v1372_v14, %v6805_v11  ;;  %v3748_v14 = vld [vmem:[%s8776_s5 + $0x240] sm:$0xff] }
 0x34e   :  { %v1417_v17 = vmax.f32 %v5183_v13, 0.0  ;;  %v4623_v13 = vpack.c.bf16 %v3751_v7, %v3749_v6  ;;  %v3786_v6 = vld [vmem:[%s8776_s5 + $0x370] sm:$0xff]  ;;  %v3789_v7 = vld [vmem:[%s8776_s5 + $0x388] sm:$0xff] }
 0x34f   :  { %v1418_v15 = vmax.f32 %v5184_v45, 0.0  ;;  %v1376_v16 = vpop.f32.mrb[34].mxu1  ;;  %v3750_v45 = vld [vmem:[%s8776_s5 + $0x250] sm:$0xff] }
 0x350   :  { %v5185_v18 = vadd.f32 %v1376_v16, %v1160_v10  ;;  %v1378_v48 = vpop.f32.mrb[35].mxu1  ;;  %v3755_v16 = vld [vmem:[%s8776_s5 + $0x278] sm:$0xff] }
 0x351   :  { %v5186_v46 = vadd.f32 %v1378_v48, %v6805_v11  ;;  %1575 = vmatprep.mubr.f32.mxu0 %v1418_v15  ;;  %v3753_v15 = vld [vmem:[%s8776_s5 + $0x268] sm:$0xff]  ;;  %v3752_v48 = vld [vmem:[%s8776_s5 + $0x260] sm:$0xff] }
 0x352   :  { %1576 = vmatmul.mubr.f32.vlgmr.msra.gmra.mrb[32].mxu0 %v1417_v17  ;;  %v1419_v22 = vmax.f32 %v5185_v18, 0.0  ;;  %v4625_v17 = vpack.c.bf16 %v3750_v45, %v3748_v14  ;;  %v4627_v18 = vpack.c.bf16 %v3755_v16, %v3753_v15  ;;  %v3790_v14 = vld [vmem:[%s8776_s5 + $0x390] sm:$0xff]  ;;  %v3793_v45 = vld [vmem:[%s8776_s5 + $0x3a8] sm:$0xff]  ;;  %v3795_v15 = vld [vmem:[%s8776_s5 + $0x3b8] sm:$0xff] }
 0x353   :  { %v1420_v20 = vmax.f32 %v5186_v46, 0.0  ;;  %v1382_v21 = vpop.f32.mrb[36].mxu1  ;;  %4618 = vmatpush1.bf16.msra.mxu0 %v4617_v2  ;;  %v3754_v46 = vld [vmem:[%s8776_s5 + $0x270] sm:$0xff]  ;;  %v3787_v2 = vld [vmem:[%s8776_s5 + $0x378] sm:$0xff] }
 0x354   :  { %v5187_v49 = vadd.f32 %v1382_v21, %v1160_v10  ;;  %v1384_v23 = vpop.f32.mrb[37].mxu1  ;;  %4620 = vmatprep.subr.bf16.mxu0 %v4619_v3  ;;  %v3759_v21 = vld [vmem:[%s8776_s5 + $0x298] sm:$0xff]  ;;  %v4657_v3 = vpack.c.bf16 %v3782_v0, %v3780_v63 }
 0x355   :  { %v5188_v24 = vadd.f32 %v1384_v23, %v6805_v11  ;;  %1581 = vmatprep.mubr.f32.mxu0 %v1420_v20  ;;  %v3757_v20 = vld [vmem:[%s8776_s5 + $0x288] sm:$0xff]  ;;  %v3756_v23 = vld [vmem:[%s8776_s5 + $0x280] sm:$0xff] }
 0x356   :  { %1582 = vmatmul.mubr.f32.gmra.mrb[34].mxu0 %v1419_v22  ;;  %v1421_v8 = vmax.f32 %v5187_v49, 0.0  ;;  %v4629_v22 = vpack.c.bf16 %v3754_v46, %v3752_v48  ;;  %v4631_v49 = vpack.c.bf16 %v3759_v21, %v3757_v20  ;;  %v3794_v48 = vld [vmem:[%s8776_s5 + $0x3b0] sm:$0xff]  ;;  %v3797_v46 = vld [vmem:[%s8776_s5 + $0x3c8] sm:$0xff]  ;;  %v3799_v20 = vld [vmem:[%s8776_s5 + $0x3d8] sm:$0xff] }
 0x357   :  { %v1422_v25 = vmax.f32 %v5188_v24, 0.0  ;;  %v1388_v26 = vpop.f32.mrb[38].mxu1  ;;  %v3758_v24 = vld [vmem:[%s8776_s5 + $0x290] sm:$0xff] }
 0x358   :  { %v5189_v27 = vadd.f32 %v1388_v26, %v1160_v10  ;;  %v1390_v28 = vpop.f32.mrb[39].mxu1  ;;  %v3763_v26 = vld [vmem:[%s8776_s5 + $0x2b8] sm:$0xff] }
 0x359   :  { %v5190_v29 = vadd.f32 %v1390_v28, %v6805_v11  ;;  %1587 = vmatprep.mubr.f32.mxu0 %v1422_v25  ;;  %v3761_v25 = vld [vmem:[%s8776_s5 + $0x2a8] sm:$0xff]  ;;  %v3760_v28 = vld [vmem:[%s8776_s5 + $0x2a0] sm:$0xff] }
 0x35a   :  { %1588 = vmatmul.mubr.f32.gmra.mrb[36].mxu0 %v1421_v8  ;;  %v1423_v31 = vmax.f32 %v5189_v27, 0.0  ;;  %v4633_v8 = vpack.c.bf16 %v3758_v24, %v3756_v23  ;;  %v4635_v27 = vpack.c.bf16 %v3763_v26, %v3761_v25  ;;  %v3798_v23 = vld [vmem:[%s8776_s5 + $0x3d0] sm:$0xff]  ;;  %v3801_v25 = vld [vmem:[%s8776_s5 + $0x3e8] sm:$0xff]  ;;  %v3803_v26 = vld [vmem:[%s8776_s5 + $0x3f8] sm:$0xff] }
 0x35b   :  { %v1424_v9 = vmax.f32 %v5190_v29, 0.0  ;;  %v1394_v30 = vpop.f32.mrb[40].mxu1  ;;  %v3762_v29 = vld [vmem:[%s8776_s5 + $0x2b0] sm:$0xff] }
 0x35c   :  { %v5191_v32 = vadd.f32 %v1394_v30, %v1160_v10  ;;  %v1396_v33 = vpop.f32.mrb[41].mxu1  ;;  %v3767_v30 = vld [vmem:[%s8776_s5 + $0x2d8] sm:$0xff] }
 0x35d   :  { %v5192_v34 = vadd.f32 %v1396_v33, %v6805_v11  ;;  %1593 = vmatprep.mubr.f32.mxu0 %v1424_v9  ;;  %v3765_v9 = vld [vmem:[%s8776_s5 + $0x2c8] sm:$0xff]  ;;  %v3764_v33 = vld [vmem:[%s8776_s5 + $0x2c0] sm:$0xff] }
 0x35e   :  { %1594 = vmatmul.mubr.f32.gmra.mrb[38].mxu0 %v1423_v31  ;;  %v1425_v37 = vmax.f32 %v5191_v32, 0.0  ;;  %v4637_v31 = vpack.c.bf16 %v3762_v29, %v3760_v28  ;;  %v4639_v32 = vpack.c.bf16 %v3767_v30, %v3765_v9  ;;  %v3802_v28 = vld [vmem:[%s8776_s5 + $0x3f0] sm:$0xff]  ;;  %v3895_v9 = vld [vmem:[%s8773_s1 + $0x488] sm:$0xff]  ;;  %v3897_v30 = vld [vmem:[%s8773_s1 + $0x498] sm:$0xff] }
 0x35f   :  { %v1426_v35 = vmax.f32 %v5192_v34, 0.0  ;;  %v1400_v36 = vpop.f32.mrb[42].mxu1  ;;  %v3766_v34 = vld [vmem:[%s8776_s5 + $0x2d0] sm:$0xff] }
 0x360   :  { %v5193_v38 = vadd.f32 %v1400_v36, %v1160_v10  ;;  %v1402_v39 = vpop.f32.mrb[43].mxu1  ;;  %v3771_v36 = vld [vmem:[%s8776_s5 + $0x2f8] sm:$0xff] }
 0x361   :  { %v5194_v40 = vadd.f32 %v1402_v39, %v6805_v11  ;;  %1599 = vmatprep.mubr.f32.mxu0 %v1426_v35  ;;  %v3769_v35 = vld [vmem:[%s8776_s5 + $0x2e8] sm:$0xff]  ;;  %v3768_v39 = vld [vmem:[%s8776_s5 + $0x2e0] sm:$0xff] }
 0x362   :  { %1600 = vmatmul.mubr.f32.gmra.mrb[40].mxu0 %v1425_v37  ;;  %v1427_v47 = vmax.f32 %v5193_v38, 0.0  ;;  %v4641_v37 = vpack.c.bf16 %v3766_v34, %v3764_v33  ;;  %v4643_v38 = vpack.c.bf16 %v3771_v36, %v3769_v35  ;;  %v899_v36 = vld [vmem:[%s8781_s8] sm:$0x3] }
 0x363   :  { %v1428_v41 = vmax.f32 %v5194_v40, 0.0  ;;  %v1406_v43 = vpop.f32.mrb[44].mxu1  ;;  %v3770_v40 = vld [vmem:[%s8776_s5 + $0x2f0] sm:$0xff] }
 0x364   :  { %v5195_v50 = vadd.f32 %v1406_v43, %v1160_v10  ;;  %v1408_v51 = vpop.f32.mrb[45].mxu1  ;;  %v3775_v43 = vld [vmem:[%s8776_s5 + $0x318] sm:$0xff] }
 0x365   :  { %v5196_v52 = vadd.f32 %v1408_v51, %v6805_v11  ;;  %1605 = vmatprep.mubr.f32.mxu0 %v1428_v41  ;;  %v3773_v41 = vld [vmem:[%s8776_s5 + $0x308] sm:$0xff]  ;;  %v3772_v51 = vld [vmem:[%s8776_s5 + $0x300] sm:$0xff] }
 0x366   :  { %1606 = vmatmul.mubr.f32.gmra.mrb[42].mxu0 %v1427_v47  ;;  %v1429_v58 = vmax.f32 %v5195_v50, 0.0  ;;  %v4645_v47 = vpack.c.bf16 %v3770_v40, %v3768_v39  ;;  %v4647_v50 = vpack.c.bf16 %v3775_v43, %v3773_v41  ;;  %v904_v39 = vrot.slane %v899_v36, %v5847_v42 }
 0x367   :  { %v1430_v53 = vmax.f32 %v5196_v52, 0.0  ;;  %v1412_v54 = vpop.f32.mrb[46].mxu1  ;;  %v3774_v52 = vld [vmem:[%s8776_s5 + $0x310] sm:$0xff]  ;;  %v908_v40 = vrot.slane %v899_v36, %v5852_v44 }
 0x368   :  { %v5197_v59 = vadd.f32 %v1412_v54, %v1160_v10  ;;  %v1414_v60 = vpop.f32.mrb[47].mxu1  ;;  %v3779_v54 = vld [vmem:[%s8776_s5 + $0x338] sm:$0xff]  ;;  %v4649_v55 = vpack.c.bf16 %v3774_v52, %v3772_v51 }
 0x369   :  { %v5198_v1 = vadd.f32 %v1414_v60, %v6805_v11  ;;  %1611 = vmatprep.mubr.f32.mxu0 %v1430_v53  ;;  %v4621_v11 = vpack.c.bf16 %v3746_v5, %v3744_v4  ;;  %v3777_v53 = vld [vmem:[%s8776_s5 + $0x328] sm:$0xff]  ;;  %v3783_v60 = vld [vmem:[%s8776_s5 + $0x358] sm:$0xff]  ;;  %v3784_v5 = vld [vmem:[%s8776_s5 + $0x360] sm:$0xff] }
 0x36a   :  { %1612 = vmatmul.mubr.f32.gmra.mrb[44].mxu0 %v1429_v58  ;;  %v1431_v12 = vmax.f32 %v5197_v59, 0.0  ;;  %v4651_v56 = vpack.c.bf16 %v3779_v54, %v3777_v53  ;;  %v3778_v58 = vld [vmem:[%s8776_s5 + $0x330] sm:$0xff]  ;;  %v3781_v59 = vld [vmem:[%s8776_s5 + $0x348] sm:$0xff] }
 0x36b   :  { %v1432_v10 = vmax.f32 %v5198_v1, 0.0  ;;  %4622 = vmatpush1.bf16.msra.mxu0 %v4621_v11  ;;  %v4653_v61 = vpack.c.bf16 %v3778_v58, %v3776_v57  ;;  %v4655_v62 = vpack.c.bf16 %v3783_v60, %v3781_v59  ;;  %v3785_v1 = vld [vmem:[%s8776_s5 + $0x368] sm:$0xff]  ;;  %v4661_v11 = vpack.c.bf16 %v3786_v6, %v3784_v5 }
 0x36c   :  { %4624 = vmatprep.subr.bf16.mxu0 %v4623_v13  ;;  %v4659_v4 = vpack.c.bf16 %v3787_v2, %v3785_v1  ;;  %v3788_v13 = vld [vmem:[%s8776_s5 + $0x380] sm:$0xff] }
 0x36d   :  { %1617 = vmatprep.mubr.f32.mxu0 %v1432_v10  ;;  %v3791_v10 = vld [vmem:[%s8776_s5 + $0x398] sm:$0xff]  ;;  %v4665_v16 = vpack.c.bf16 %v3790_v14, %v3788_v13 }
 0x36e   :  { %1618 = vmatmul.mubr.f32.gmra.mrb[46].mxu0 %v1431_v12  ;;  %v4663_v12 = vpack.c.bf16 %v3791_v10, %v3789_v7 }
 0x36f   :  { %4626 = vmatpush1.bf16.msra.mxu0 %v4625_v17  ;;  %v4667_v17 = vpack.c.bf16 %v3795_v15, %v3793_v45 }
 0x370   :  { %4628 = vmatprep.subr.bf16.mxu0 %v4627_v18  ;;  %v3792_v18 = vld [vmem:[%s8776_s5 + $0x3a0] sm:$0xff] }
 0x371   :  { %v4669_v21 = vpack.c.bf16 %v3794_v48, %v3792_v18 }
 0x373   :  { %4630 = vmatpush1.bf16.msra.mxu0 %v4629_v22  ;;  %v4671_v22 = vpack.c.bf16 %v3799_v20, %v3797_v46 }
 0x374   :  { %4632 = vmatprep.subr.bf16.mxu0 %v4631_v49  ;;  %v3796_v49 = vld [vmem:[%s8776_s5 + $0x3c0] sm:$0xff] }
 0x375   :  { %v4673_v24 = vpack.c.bf16 %v3798_v23, %v3796_v49 }
 0x377   :  { %4634 = vmatpush1.bf16.msra.mxu0 %v4633_v8  ;;  %v4675_v8 = vpack.c.bf16 %v3803_v26, %v3801_v25 }
 0x378   :  { %4636 = vmatprep.subr.bf16.mxu0 %v4635_v27  ;;  %v3800_v27 = vld [vmem:[%s8776_s5 + $0x3e0] sm:$0xff] }
 0x379   :  { %v4677_v29 = vpack.c.bf16 %v3802_v28, %v3800_v27 }
 0x37b   :  { %4638 = vmatpush1.bf16.msra.mxu0 %v4637_v31  ;;  %v4743_v31 = vpack.c.bf16 %v3897_v30, %v3895_v9  ;;  %v3739_v30 = vld [vmem:[%s8778_s4 + $0x2] sm:$0x3] }
 0x37c   :  { %4640 = vmatprep.subr.bf16.mxu0 %v4639_v32 }
 0x37f   :  { %4642 = vmatpush1.bf16.msra.mxu0 %v4641_v37 }
 0x380   :  { %4644 = vmatprep.subr.bf16.mxu0 %v4643_v38 }
 0x383   :  { %4646 = vmatpush1.bf16.msra.mxu0 %v4645_v47 }
 0x384   :  { %4648 = vmatprep.subr.bf16.mxu0 %v4647_v50 }
 0x387   :  { %4650 = vmatpush1.bf16.msra.mxu0 %v4649_v55 }
 0x388   :  { %4652 = vmatprep.subr.bf16.mxu0 %v4651_v56 }
 0x38b   :  { %4654 = vmatpush1.bf16.msra.mxu0 %v4653_v61 }
 0x38c   :  { %4656 = vmatprep.subr.bf16.mxu0 %v4655_v62 }
 0x38f   :  { %4658 = vmatpush1.bf16.msra.mxu0 %v4657_v3 }
 0x390   :  { %4660 = vmatprep.subr.bf16.mxu0 %v4659_v4 }
 0x393   :  { %4662 = vmatpush1.bf16.msra.mxu0 %v4661_v11 }
 0x394   :  { %4664 = vmatprep.subr.bf16.mxu0 %v4663_v12 }
 0x397   :  { %4666 = vmatpush1.bf16.msra.mxu0 %v4665_v16 }
 0x398   :  { %4668 = vmatprep.subr.bf16.mxu0 %v4667_v17 }
 0x39b   :  { %4670 = vmatpush1.bf16.msra.mxu0 %v4669_v21 }
 0x39c   :  { %4672 = vmatprep.subr.bf16.mxu0 %v4671_v22 }
 0x39f   :  { %4674 = vmatpush1.bf16.msra.mxu0 %v4673_v24 }
 0x3a0   :  { %4676 = vmatprep.subr.bf16.mxu0 %v4675_v8 }
 0x3a3   :  { %4678 = vmatpush1.bf16.msra.mxu0 %v4677_v29 }
 0x3a4   :  { %4744 = vmatprep.subr.bf16.mxu0 %v4743_v31  ;;  %v7038_v31 = vrot.slane %v3739_v30, %v5847_v42 }
 0x3c5   :  { %v977_v32 = vpop.f32.mrb[16].mxu0 }
 0x3c6   :  { %v979_v33 = vpop.f32.mrb[17].mxu0  ;;  %v978_v47 = vadd.f32 %v977_v32, %v904_v39  ;;  %v7041_v32 = vrot.slane %v3739_v30, %v5852_v44  ;;  %v3909_v30 = vld [vmem:[%s8773_s1 + $0x4f8] sm:$0xff] }
 0x3c7   :  { %v980_v50 = vadd.f32 %v979_v33, %v908_v40 }
 0x3c8   :  { %v1024_v55 = vmax.f32 %v978_v47, 0.0  ;;  %v3806_v47 = vld [vmem:[%s8779_s7 + $0x208] sm:$0xff] }
 0x3c9   :  { %v983_v34 = vpop.f32.mrb[18].mxu0  ;;  %v1025_v58 = vmax.f32 %v980_v50, 0.0  ;;  %v3808_v50 = vld [vmem:[%s8779_s7 + $0x218] sm:$0xff] }
 0x3ca   :  { %v985_v35 = vpop.f32.mrb[19].mxu0  ;;  %v984_v56 = vadd.f32 %v983_v34, %v904_v39  ;;  %v3894_v34 = vld [vmem:[%s8773_s1 + $0x480] sm:$0xff] }
 0x3cb   :  { %v986_v59 = vadd.f32 %v985_v35, %v908_v40 }
 0x3cc   :  { %v1026_v3 = vmax.f32 %v984_v56, 0.0  ;;  %v4679_v56 = vpack.c.bf16 %v3808_v50, %v3806_v47 }
 0x3cd   :  { %v989_v37 = vpop.f32.mrb[20].mxu0  ;;  %v1027_v6 = vmax.f32 %v986_v59, 0.0  ;;  %v3812_v59 = vld [vmem:[%s8779_s7 + $0x238] sm:$0xff] }
 0x3ce   :  { %v991_v38 = vpop.f32.mrb[21].mxu0  ;;  %v990_v4 = vadd.f32 %v989_v37, %v904_v39  ;;  %v3896_v37 = vld [vmem:[%s8773_s1 + $0x490] sm:$0xff]  ;;  %4680 = vmatprep.subr.bf16.mxu1 %v4679_v56  ;;  %v3913_v56 = vld [vmem:[%s8773_s1 + $0x518] sm:$0xff] }
 0x3cf   :  { %v992_v7 = vadd.f32 %v991_v38, %v908_v40  ;;  %v3899_v38 = vld [vmem:[%s8773_s1 + $0x4a8] sm:$0xff] }
 0x3d0   :  { %v1028_v16 = vmax.f32 %v990_v4, 0.0  ;;  %v3811_v4 = vld [vmem:[%s8779_s7 + $0x230] sm:$0xff] }
 0x3d1   :  { %v995_v41 = vpop.f32.mrb[22].mxu0  ;;  %v1029_v48 = vmax.f32 %v992_v7, 0.0  ;;  %v3903_v7 = vld [vmem:[%s8773_s1 + $0x4c8] sm:$0xff] }
 0x3d2   :  { %v997_v43 = vpop.f32.mrb[23].mxu0  ;;  %v996_v17 = vadd.f32 %v995_v41, %v904_v39  ;;  %v3898_v41 = vld [vmem:[%s8773_s1 + $0x4a0] sm:$0xff] }
 0x3d3   :  { %v998_v46 = vadd.f32 %v997_v43, %v908_v40  ;;  %v3900_v43 = vld [vmem:[%s8773_s1 + $0x4b0] sm:$0xff] }
 0x3d4   :  { %v1030_v26 = vmax.f32 %v996_v17, 0.0  ;;  %v3902_v17 = vld [vmem:[%s8773_s1 + $0x4c0] sm:$0xff] }
 0x3d5   :  { %v1001_v51 = vpop.f32.mrb[24].mxu0  ;;  %v1031_v27 = vmax.f32 %v998_v46, 0.0  ;;  %v3815_v46 = vld [vmem:[%s8779_s7 + $0x250] sm:$0xff] }
 0x3d6   :  { %v1002_v52 = vadd.f32 %v1001_v51, %v904_v39  ;;  %v1003_v53 = vpop.f32.mrb[25].mxu0  ;;  %v3805_v51 = vld [vmem:[%s8779_s7 + $0x200] sm:$0xff] }
 0x3d7   :  { %v1004_v54 = vadd.f32 %v1003_v53, %v908_v40 }
 0x3d8   :  { %v1032_v57 = vmax.f32 %v1002_v52, 0.0 }
 0x3d9   :  { %v1033_v60 = vmax.f32 %v1004_v54, 0.0  ;;  %v1007_v61 = vpop.f32.mrb[26].mxu0  ;;  %v4745_v54 = vpack.c.bf16 %v3896_v37, %v3894_v34  ;;  %v3906_v37 = vld [vmem:[%s8773_s1 + $0x4e0] sm:$0xff] }
 0x3da   :  { %v7018_v62 = vadd.f32 %v1032_v57, %v1024_v55  ;;  %v1008_v63 = vadd.f32 %v1007_v61, %v904_v39  ;;  %v1009_v0 = vpop.f32.mrb[27].mxu0  ;;  %v3807_v57 = vld [vmem:[%s8779_s7 + $0x210] sm:$0xff] }
 0x3db   :  { %v7020_v1 = vadd.f32 %v1033_v60, %v1025_v58  ;;  %v1010_v2 = vadd.f32 %v1009_v0, %v908_v40  ;;  %v3810_v58 = vld [vmem:[%s8779_s7 + $0x228] sm:$0xff]  ;;  %v4681_v0 = vpack.c.bf16 %v3807_v57, %v3805_v51  ;;  %v3908_v51 = vld [vmem:[%s8773_s1 + $0x4f0] sm:$0xff] }
 0x3dc   :  { %v1034_v5 = vmax.f32 %v1008_v63, 0.0 }
 0x3dd   :  { %v1035_v10 = vmax.f32 %v1010_v2, 0.0  ;;  %v1013_v11 = vpop.f32.mrb[28].mxu0  ;;  %v4683_v2 = vpack.c.bf16 %v3812_v59, %v3810_v58  ;;  %4682 = vmatpush1.bf16.msra.mxu1 %v4681_v0  ;;  %v3821_v0 = vld [vmem:[%s8779_s7 + $0x280] sm:$0xff] }
 0x3de   :  { %v7022_v12 = vadd.f32 %v1034_v5, %v1026_v3  ;;  %v1014_v13 = vadd.f32 %v1013_v11, %v904_v39  ;;  %v1015_v14 = vpop.f32.mrb[29].mxu0  ;;  %v3809_v3 = vld [vmem:[%s8779_s7 + $0x220] sm:$0xff]  ;;  %v3814_v5 = vld [vmem:[%s8779_s7 + $0x248] sm:$0xff]  ;;  %v3816_v11 = vld [vmem:[%s8779_s7 + $0x258] sm:$0xff] }
 0x3df   :  { %v7024_v45 = vadd.f32 %v1035_v10, %v1027_v6  ;;  %v1016_v15 = vadd.f32 %v1015_v14, %v908_v40  ;;  %v3905_v10 = vld [vmem:[%s8773_s1 + $0x4d8] sm:$0xff]  ;;  %4684 = vmatprep.subr.bf16.mxu1 %v4683_v2  ;;  %v3823_v2 = vld [vmem:[%s8779_s7 + $0x290] sm:$0xff] }
 0x3e0   :  { %v1036_v18 = vmax.f32 %v1014_v13, 0.0  ;;  %v4685_v13 = vpack.c.bf16 %v3811_v4, %v3809_v3 }
 0x3e1   :  { %v1037_v20 = vmax.f32 %v1016_v15, 0.0  ;;  %v1019_v21 = vpop.f32.mrb[30].mxu0 }
 0x3e2   :  { %v7026_v22 = vadd.f32 %v1036_v18, %v1028_v16  ;;  %v1020_v49 = vadd.f32 %v1019_v21, %v904_v39  ;;  %v1021_v23 = vpop.f32.mrb[31].mxu0  ;;  %v3901_v39 = vld [vmem:[%s8773_s1 + $0x4b8] sm:$0xff]  ;;  %v4749_v16 = vpack.c.bf16 %v3900_v43, %v3898_v41  ;;  %v4687_v18 = vpack.c.bf16 %v3816_v11, %v3814_v5  ;;  %4686 = vmatpush1.bf16.msra.mxu1 %v4685_v13 }
 0x3e3   :  { %v7028_v24 = vadd.f32 %v1037_v20, %v1029_v48  ;;  %v1022_v25 = vadd.f32 %v1021_v23, %v908_v40  ;;  %v4747_v55 = vpack.c.bf16 %v3901_v39, %v3899_v38  ;;  %v3813_v48 = vld [vmem:[%s8779_s7 + $0x240] sm:$0xff]  ;;  %v4751_v23 = vpack.c.bf16 %v3905_v10, %v3903_v7  ;;  %v3912_v7 = vld [vmem:[%s8773_s1 + $0x510] sm:$0xff]  ;;  %v3826_v10 = vld [vmem:[%s8779_s7 + $0x2a8] sm:$0xff] }
 0x3e4   :  { %v1038_v8 = vmax.f32 %v1020_v49, 0.0  ;;  %4688 = vmatprep.subr.bf16.mxu1 %v4687_v18  ;;  %v3817_v39 = vld [vmem:[%s8779_s7 + $0x260] sm:$0xff]  ;;  %v3828_v11 = vld [vmem:[%s8779_s7 + $0x2b8] sm:$0xff] }
 0x3e5   :  { %v1039_v28 = vmax.f32 %v1022_v25, 0.0  ;;  %v3904_v25 = vld [vmem:[%s8773_s1 + $0x4d0] sm:$0xff] }
 0x3e6   :  { %v7030_v29 = vadd.f32 %v1038_v8, %v1030_v26  ;;  %v3818_v26 = vld [vmem:[%s8779_s7 + $0x268] sm:$0xff]  ;;  %v3820_v8 = vld [vmem:[%s8779_s7 + $0x278] sm:$0xff] }
 0x3e7   :  { %v7032_v9 = vadd.f32 %v1039_v28, %v1031_v27  ;;  %v3907_v28 = vld [vmem:[%s8773_s1 + $0x4e8] sm:$0xff]  ;;  %v4691_v38 = vpack.c.bf16 %v3820_v8, %v3818_v26 }
 0x3e8   :  { %v4755_v50 = vpack.c.bf16 %v3909_v30, %v3907_v28  ;;  %v3830_v28 = vld [vmem:[%s8779_s7 + $0x2c8] sm:$0xff]  ;;  %v3832_v30 = vld [vmem:[%s8779_s7 + $0x2d8] sm:$0xff] }
 0x425   :  { %v1577_v33 = vpop.f32.mrb[32].mxu0 }
 0x426   :  { %v1578_v35 = vadd.f32 %v1577_v33, %v7038_v31  ;;  %v1579_v36 = vpop.f32.mrb[33].mxu0  ;;  %v4689_v33 = vpack.c.bf16 %v3815_v46, %v3813_v48  ;;  %v3914_v46 = vld [vmem:[%s8773_s1 + $0x520] sm:$0xff] }
 0x427   :  { %v1580_v40 = vadd.f32 %v1579_v36, %v7041_v32  ;;  %v4753_v36 = vpack.c.bf16 %v3904_v25, %v3902_v17 }
 0x428   :  { %v1624_v60 = vmax.f32 %v1578_v35, 0.0  ;;  %4690 = vmatpush1.bf16.msra.mxu1 %v4689_v33 }
 0x429   :  { %v1625_v52 = vmax.f32 %v1580_v40, 0.0  ;;  %v1583_v53 = vpop.f32.mrb[34].mxu0  ;;  %v3819_v40 = vld [vmem:[%s8779_s7 + $0x270] sm:$0xff]  ;;  %4692 = vmatprep.subr.bf16.mxu1 %v4691_v38 }
 0x42a   :  { %v1584_v61 = vadd.f32 %v1583_v53, %v7038_v31  ;;  %v1585_v63 = vpop.f32.mrb[35].mxu0  ;;  %v3824_v53 = vld [vmem:[%s8779_s7 + $0x298] sm:$0xff]  ;;  %v4693_v57 = vpack.c.bf16 %v3819_v40, %v3817_v39  ;;  %v3918_v40 = vld [vmem:[%s8773_s1 + $0x540] sm:$0xff] }
 0x42b   :  { %v1586_v6 = vadd.f32 %v1585_v63, %v7041_v32  ;;  %1782 = vmatprep.mubr.f32.mxu0 %v1625_v52  ;;  %v3822_v52 = vld [vmem:[%s8779_s7 + $0x288] sm:$0xff] }
 0x42c   :  { %1783 = vmatmul.mubr.f32.vlgmr.msra.gmra.mrb[48].mxu0 %v1624_v60  ;;  %v1626_v20 = vmax.f32 %v1584_v61, 0.0  ;;  %v4757_v60 = vpack.c.bf16 %v3908_v51, %v3906_v37  ;;  %v3910_v61 = vld [vmem:[%s8773_s1 + $0x500] sm:$0xff]  ;;  %v4695_v63 = vpack.c.bf16 %v3824_v53, %v3822_v52  ;;  %4694 = vmatpush1.bf16.msra.mxu1 %v4693_v57 }
 0x42d   :  { %v1627_v14 = vmax.f32 %v1586_v6, 0.0  ;;  %4746 = vmatpush1.bf16.msra.mxu0 %v4745_v54  ;;  %v1589_v15 = vpop.f32.mrb[36].mxu0  ;;  %v4761_v48 = vpack.c.bf16 %v3912_v7, %v3910_v61 }
 0x42e   :  { %v1590_v21 = vadd.f32 %v1589_v15, %v7038_v31  ;;  %v1591_v49 = vpop.f32.mrb[37].mxu0  ;;  %4748 = vmatprep.subr.bf16.mxu0 %v4747_v55  ;;  %v3911_v55 = vld [vmem:[%s8773_s1 + $0x508] sm:$0xff]  ;;  %v3917_v15 = vld [vmem:[%s8773_s1 + $0x538] sm:$0xff]  ;;  %4696 = vmatprep.subr.bf16.mxu1 %v4695_v63 }
 0x42f   :  { %v1592_v27 = vadd.f32 %v1591_v49, %v7041_v32  ;;  %1788 = vmatprep.mubr.f32.mxu0 %v1627_v14  ;;  %v4759_v6 = vpack.c.bf16 %v3913_v56, %v3911_v55  ;;  %v3915_v14 = vld [vmem:[%s8773_s1 + $0x528] sm:$0xff]  ;;  %v3827_v49 = vld [vmem:[%s8779_s7 + $0x2b0] sm:$0xff]  ;;  %v3836_v56 = vld [vmem:[%s8779_s7 + $0x2f8] sm:$0xff] }
 0x430   :  { %1789 = vmatmul.mubr.f32.gmra.mrb[50].mxu0 %v1626_v20  ;;  %v1628_v41 = vmax.f32 %v1590_v21, 0.0  ;;  %v4699_v20 = vpack.c.bf16 %v3828_v11, %v3826_v10  ;;  %v3825_v21 = vld [vmem:[%s8779_s7 + $0x2a0] sm:$0xff]  ;;  %v4763_v8 = vpack.c.bf16 %v3917_v15, %v3915_v14  ;;  %v3834_v55 = vld [vmem:[%s8779_s7 + $0x2e8] sm:$0xff] }
 0x431   :  { %v1629_v34 = vmax.f32 %v1592_v27, 0.0  ;;  %4750 = vmatpush1.bf16.msra.mxu0 %v4749_v16  ;;  %v1595_v35 = vpop.f32.mrb[38].mxu0  ;;  %v4697_v16 = vpack.c.bf16 %v3823_v2, %v3821_v0  ;;  %v3916_v27 = vld [vmem:[%s8773_s1 + $0x530] sm:$0xff]  ;;  %v4707_v2 = vpack.c.bf16 %v3836_v56, %v3834_v55  ;;  %v3922_v11 = vld [vmem:[%s8773_s1 + $0x560] sm:$0xff]  ;;  %v3927_v14 = vld [vmem:[%s8773_s1 + $0x588] sm:$0xff] }
 0x432   :  { %v1596_v43 = vadd.f32 %v1595_v35, %v7038_v31  ;;  %v1597_v47 = vpop.f32.mrb[39].mxu0  ;;  %4752 = vmatprep.subr.bf16.mxu0 %v4751_v23  ;;  %v3921_v35 = vld [vmem:[%s8773_s1 + $0x558] sm:$0xff]  ;;  %v4765_v39 = vpack.c.bf16 %v3916_v27, %v3914_v46  ;;  %v3842_v27 = vld [vmem:[%s8779_s7 + $0x328] sm:$0xff]  ;;  %v3845_v56 = vld [vmem:[%s8779_s7 + $0x340] sm:$0xff] }
 0x433   :  { %v1598_v54 = vadd.f32 %v1597_v47, %v7041_v32  ;;  %1794 = vmatprep.mubr.f32.mxu0 %v1629_v34  ;;  %v3919_v34 = vld [vmem:[%s8773_s1 + $0x548] sm:$0xff]  ;;  %4698 = vmatpush1.bf16.msra.mxu1 %v4697_v16  ;;  %v3831_v47 = vld [vmem:[%s8779_s7 + $0x2d0] sm:$0xff] }
 0x434   :  { %1795 = vmatmul.mubr.f32.gmra.mrb[52].mxu0 %v1628_v41  ;;  %v1630_v3 = vmax.f32 %v1596_v43, 0.0  ;;  %4700 = vmatprep.subr.bf16.mxu1 %v4699_v20  ;;  %v4703_v41 = vpack.c.bf16 %v3832_v30, %v3830_v28  ;;  %v3829_v43 = vld [vmem:[%s8779_s7 + $0x2c0] sm:$0xff]  ;;  %v4767_v53 = vpack.c.bf16 %v3921_v35, %v3919_v34  ;;  %v3838_v16 = vld [vmem:[%s8779_s7 + $0x308] sm:$0xff]  ;;  %v3928_v20 = vld [vmem:[%s8773_s1 + $0x590] sm:$0xff] }
 0x435   :  { %v1631_v58 = vmax.f32 %v1598_v54, 0.0  ;;  %4754 = vmatpush1.bf16.msra.mxu0 %v4753_v36  ;;  %v1601_v59 = vpop.f32.mrb[40].mxu0  ;;  %v4701_v36 = vpack.c.bf16 %v3827_v49, %v3825_v21  ;;  %v3920_v54 = vld [vmem:[%s8773_s1 + $0x550] sm:$0xff]  ;;  %v3837_v21 = vld [vmem:[%s8779_s7 + $0x300] sm:$0xff]  ;;  %v3844_v28 = vld [vmem:[%s8779_s7 + $0x338] sm:$0xff] }
 0x436   :  { %v1602_v4 = vadd.f32 %v1601_v59, %v7038_v31  ;;  %v1603_v5 = vpop.f32.mrb[41].mxu0  ;;  %4756 = vmatprep.subr.bf16.mxu0 %v4755_v50  ;;  %v3925_v59 = vld [vmem:[%s8773_s1 + $0x578] sm:$0xff]  ;;  %v4769_v0 = vpack.c.bf16 %v3920_v54, %v3918_v40  ;;  %v3839_v49 = vld [vmem:[%s8779_s7 + $0x310] sm:$0xff]  ;;  %v3931_v30 = vld [vmem:[%s8773_s1 + $0x5a8] sm:$0xff] }
 0x437   :  { %v1604_v13 = vadd.f32 %v1603_v5, %v7041_v32  ;;  %1800 = vmatprep.mubr.f32.mxu0 %v1631_v58  ;;  %v3923_v58 = vld [vmem:[%s8773_s1 + $0x568] sm:$0xff]  ;;  %4702 = vmatpush1.bf16.msra.mxu1 %v4701_v36  ;;  %v4713_v34 = vpack.c.bf16 %v3839_v49, %v3837_v21  ;;  %v3930_v36 = vld [vmem:[%s8773_s1 + $0x5a0] sm:$0xff]  ;;  %v3944_v21 = vld [vmem:[%s8773_s1 + $0x610] sm:$0xff] }
 0x438   :  { %1801 = vmatmul.mubr.f32.gmra.mrb[54].mxu0 %v1630_v3  ;;  %v1632_v23 = vmax.f32 %v1602_v4, 0.0  ;;  %4704 = vmatprep.subr.bf16.mxu1 %v4703_v41  ;;  %v3833_v3 = vld [vmem:[%s8779_s7 + $0x2e0] sm:$0xff]  ;;  %v3835_v4 = vld [vmem:[%s8779_s7 + $0x2f0] sm:$0xff]  ;;  %v4771_v10 = vpack.c.bf16 %v3925_v59, %v3923_v58  ;;  %v3858_v49 = vld [vmem:[%s8779_s7 + $0x3a8] sm:$0xff] }
 0x439   :  { %v1633_v17 = vmax.f32 %v1604_v13, 0.0  ;;  %4758 = vmatpush1.bf16.msra.mxu0 %v4757_v60  ;;  %v1607_v18 = vpop.f32.mrb[42].mxu0  ;;  %v4705_v60 = vpack.c.bf16 %v3831_v47, %v3829_v43  ;;  %v3924_v13 = vld [vmem:[%s8773_s1 + $0x570] sm:$0xff]  ;;  %v3846_v43 = vld [vmem:[%s8779_s7 + $0x348] sm:$0xff]  ;;  %v3848_v47 = vld [vmem:[%s8779_s7 + $0x358] sm:$0xff] }
 0x43a   :  { %v1608_v25 = vadd.f32 %v1607_v18, %v7038_v31  ;;  %v1609_v26 = vpop.f32.mrb[43].mxu0  ;;  %4760 = vmatprep.subr.bf16.mxu0 %v4759_v6  ;;  %v3926_v18 = vld [vmem:[%s8773_s1 + $0x580] sm:$0xff]  ;;  %v4773_v46 = vpack.c.bf16 %v3924_v13, %v3922_v11  ;;  %v3932_v41 = vld [vmem:[%s8773_s1 + $0x5b0] sm:$0xff]  ;;  %v4719_v55 = vpack.c.bf16 %v3848_v47, %v3846_v43  ;;  %v3854_v13 = vld [vmem:[%s8779_s7 + $0x388] sm:$0xff] }
 0x43b   :  { %v1610_v33 = vadd.f32 %v1609_v26, %v7041_v32  ;;  %1806 = vmatprep.mubr.f32.mxu0 %v1633_v17  ;;  %v3840_v17 = vld [vmem:[%s8779_s7 + $0x318] sm:$0xff]  ;;  %4706 = vmatpush1.bf16.msra.mxu1 %v4705_v60  ;;  %v3871_v26 = vld [vmem:[%s8774_s0 + $0x188] sm:$0xff]  ;;  %v4777_v35 = vpack.c.bf16 %v3928_v20, %v3926_v18  ;;  %v3934_v54 = vld [vmem:[%s8773_s1 + $0x5c0] sm:$0xff] }
 0x43c   :  { %1807 = vmatmul.mubr.f32.gmra.mrb[56].mxu0 %v1632_v23  ;;  %v1634_v50 = vmax.f32 %v1608_v25, 0.0  ;;  %4708 = vmatprep.subr.bf16.mxu1 %v4707_v2  ;;  %v3936_v59 = vld [vmem:[%s8773_s1 + $0x5d0] sm:$0xff]  ;;  %v3850_v60 = vld [vmem:[%s8779_s7 + $0x368] sm:$0xff]  ;;  %v3942_v18 = vld [vmem:[%s8773_s1 + $0x600] sm:$0xff] }
 0x43d   :  { %v1635_v37 = vmax.f32 %v1610_v33, 0.0  ;;  %4762 = vmatpush1.bf16.msra.mxu0 %v4761_v48  ;;  %v1613_v38 = vpop.f32.mrb[44].mxu0  ;;  %v3933_v33 = vld [vmem:[%s8773_s1 + $0x5b8] sm:$0xff]  ;;  %v3940_v11 = vld [vmem:[%s8773_s1 + $0x5f0] sm:$0xff] }
 0x43e   :  { %v1614_v51 = vadd.f32 %v1613_v38, %v7038_v31  ;;  %v1615_v52 = vpop.f32.mrb[45].mxu0  ;;  %4764 = vmatprep.subr.bf16.mxu0 %v4763_v8  ;;  %v4711_v8 = vpack.c.bf16 %v3840_v17, %v3838_v16  ;;  %v3841_v38 = vld [vmem:[%s8779_s7 + $0x320] sm:$0xff]  ;;  %v4779_v40 = vpack.c.bf16 %v3933_v33, %v3931_v30 }
 0x43f   :  { %v1616_v57 = vadd.f32 %v1615_v52, %v7041_v32  ;;  %1812 = vmatprep.mubr.f32.mxu0 %v1635_v37  ;;  %v4715_v37 = vpack.c.bf16 %v3844_v28, %v3842_v27  ;;  %v4793_v27 = vpack.c.bf16 %v3944_v21, %v3942_v18  ;;  %v3946_v28 = vld [vmem:[%s8773_s1 + $0x620] sm:$0xff]  ;;  %v3879_v18 = vld [vmem:[%s8774_s0 + $0x1c8] sm:$0xff] }
 0x440   :  { %1813 = vmatmul.mubr.f32.gmra.mrb[58].mxu0 %v1634_v50  ;;  %v1636_v5 = vmax.f32 %v1614_v51, 0.0  ;;  %v3935_v50 = vld [vmem:[%s8773_s1 + $0x5c8] sm:$0xff]  ;;  %v3937_v51 = vld [vmem:[%s8773_s1 + $0x5d8] sm:$0xff]  ;;  %v3857_v33 = vld [vmem:[%s8779_s7 + $0x3a0] sm:$0xff] }
 0x441   :  { %v1637_v61 = vmax.f32 %v1616_v57, 0.0  ;;  %4766 = vmatpush1.bf16.msra.mxu0 %v4765_v39  ;;  %v1619_v63 = vpop.f32.mrb[46].mxu0  ;;  %v3843_v39 = vld [vmem:[%s8779_s7 + $0x330] sm:$0xff]  ;;  %v4783_v58 = vpack.c.bf16 %v3937_v51, %v3935_v50  ;;  %v3950_v51 = vld [vmem:[%s8773_s1 + $0x640] sm:$0xff] }
 0x442   :  { %v1620_v6 = vadd.f32 %v1619_v63, %v7038_v31  ;;  %v1621_v7 = vpop.f32.mrb[47].mxu0  ;;  %4768 = vmatprep.subr.bf16.mxu0 %v4767_v53  ;;  %v3929_v31 = vld [vmem:[%s8773_s1 + $0x598] sm:$0xff]  ;;  %v4717_v52 = vpack.c.bf16 %v3843_v39, %v3841_v38  ;;  %v4781_v53 = vpack.c.bf16 %v3932_v41, %v3930_v36  ;;  %v3847_v57 = vld [vmem:[%s8779_s7 + $0x350] sm:$0xff]  ;;  %v3939_v63 = vld [vmem:[%s8773_s1 + $0x5e8] sm:$0xff] }
 0x443   :  { %v1622_v15 = vadd.f32 %v1621_v7, %v7041_v32  ;;  %1818 = vmatprep.mubr.f32.mxu0 %v1637_v61  ;;  %v4709_v32 = vpack.c.bf16 %v3835_v4, %v3833_v3  ;;  %v4775_v25 = vpack.c.bf16 %v3929_v31, %v3927_v14  ;;  %v3852_v61 = vld [vmem:[%s8779_s7 + $0x378] sm:$0xff]  ;;  %v4721_v2 = vpack.c.bf16 %v3847_v57, %v3845_v56  ;;  %v3938_v4 = vld [vmem:[%s8773_s1 + $0x5e0] sm:$0xff]  ;;  %v3851_v7 = vld [vmem:[%s8779_s7 + $0x370] sm:$0xff] }
 0x444   :  { %1819 = vmatmul.mubr.f32.gmra.mrb[60].mxu0 %v1636_v5  ;;  %v1638_v23 = vmax.f32 %v1620_v6, 0.0  ;;  %v4785_v3 = vpack.c.bf16 %v3936_v59, %v3934_v54  ;;  %v4723_v5 = vpack.c.bf16 %v3852_v61, %v3850_v60  ;;  %v3849_v6 = vld [vmem:[%s8779_s7 + $0x360] sm:$0xff]  ;;  %v3856_v14 = vld [vmem:[%s8779_s7 + $0x398] sm:$0xff]  ;;  %v4789_v17 = vpack.c.bf16 %v3940_v11, %v3938_v4  ;;  %v3948_v36 = vld [vmem:[%s8773_s1 + $0x630] sm:$0xff] }
 0x445   :  { %v1639_v48 = vmax.f32 %v1622_v15, 0.0  ;;  %4770 = vmatpush1.bf16.msra.mxu0 %v4769_v0  ;;  %4710 = vmatpush1.bf16.msra.mxu1 %v4709_v32  ;;  %v3941_v0 = vld [vmem:[%s8773_s1 + $0x5f8] sm:$0xff]  ;;  %v3943_v15 = vld [vmem:[%s8773_s1 + $0x608] sm:$0xff]  ;;  %v4725_v16 = vpack.c.bf16 %v3851_v7, %v3849_v6  ;;  %v4727_v32 = vpack.c.bf16 %v3856_v14, %v3854_v13  ;;  %v4797_v43 = vpack.c.bf16 %v3948_v36, %v3946_v28  ;;  %v3954_v57 = vld [vmem:[%s8773_s1 + $0x660] sm:$0xff] }
 0x446   :  { %4772 = vmatprep.subr.bf16.mxu0 %v4771_v10  ;;  %4712 = vmatprep.subr.bf16.mxu1 %v4711_v8  ;;  %v4787_v10 = vpack.c.bf16 %v3941_v0, %v3939_v63  ;;  %v3945_v31 = vld [vmem:[%s8773_s1 + $0x618] sm:$0xff]  ;;  %v3951_v39 = vld [vmem:[%s8773_s1 + $0x648] sm:$0xff]  ;;  %v3958_v0 = vld [vmem:[%s8773_s1 + $0x680] sm:$0xff] }
 0x447   :  { %1824 = vmatprep.mubr.f32.mxu0 %v1639_v48  ;;  %v3853_v48 = vld [vmem:[%s8779_s7 + $0x380] sm:$0xff]  ;;  %v4791_v20 = vpack.c.bf16 %v3945_v31, %v3943_v15  ;;  %v3864_v38 = vld [vmem:[%s8779_s7 + $0x3d8] sm:$0xff]  ;;  %v3959_v59 = vld [vmem:[%s8773_s1 + $0x688] sm:$0xff] }
 0x448   :  { %1825 = vmatmul.mubr.f32.gmra.mrb[62].mxu0 %v1638_v23  ;;  %v3860_v23 = vld [vmem:[%s8779_s7 + $0x3b8] sm:$0xff]  ;;  %v3874_v7 = vld [vmem:[%s8774_s0 + $0x1a0] sm:$0xff]  ;;  %v3964_v13 = vld [vmem:[%s8773_s1 + $0x6b0] sm:$0xff] }
 0x449   :  { %4774 = vmatpush1.bf16.msra.mxu0 %v4773_v46  ;;  %2269 = vmatprep.mubr.f32.mxu0 %v3871_v26  ;;  %v3855_v46 = vld [vmem:[%s8779_s7 + $0x390] sm:$0xff]  ;;  %v3949_v26 = vld [vmem:[%s8773_s1 + $0x638] sm:$0xff]  ;;  %v4731_v30 = vpack.c.bf16 %v3860_v23, %v3858_v49  ;;  %v3962_v11 = vld [vmem:[%s8773_s1 + $0x6a0] sm:$0xff] }
 0x44a   :  { %4776 = vmatprep.subr.bf16.mxu0 %v4775_v25  ;;  %4714 = vmatpush1.bf16.msra.mxu1 %v4713_v34  ;;  %v3947_v25 = vld [vmem:[%s8773_s1 + $0x628] sm:$0xff]  ;;  %v4729_v8 = vpack.c.bf16 %v3855_v46, %v3853_v48  ;;  %v3859_v34 = vld [vmem:[%s8779_s7 + $0x3b0] sm:$0xff]  ;;  %v3957_v54 = vld [vmem:[%s8773_s1 + $0x678] sm:$0xff]  ;;  %v4813_v15 = vpack.c.bf16 %v3964_v13, %v3962_v11 }
 0x44b   :  { %4716 = vmatprep.subr.bf16.mxu1 %v4715_v37  ;;  %v3862_v37 = vld [vmem:[%s8779_s7 + $0x3c8] sm:$0xff]  ;;  %v4733_v41 = vpack.c.bf16 %v3859_v34, %v3857_v33  ;;  %v3961_v60 = vld [vmem:[%s8773_s1 + $0x698] sm:$0xff]  ;;  %v3882_v48 = vld [vmem:[%s8774_s0 + $0x1e0] sm:$0xff] }
 0x44c   :  { %v4735_v47 = vpack.c.bf16 %v3864_v38, %v3862_v37  ;;  %v4807_v63 = vpack.c.bf16 %v3961_v60, %v3959_v59  ;;  %v3965_v4 = vld [vmem:[%s8773_s1 + $0x6b8] sm:$0xff]  ;;  %v3886_v46 = vld [vmem:[%s8774_s0 + $0x200] sm:$0xff]  ;;  %v3863_v49 = vld [vmem:[%s8779_s7 + $0x3d0] sm:$0xff] }
 0x44d   :  { %4778 = vmatpush1.bf16.msra.mxu0 %v4777_v35  ;;  %v4795_v35 = vpack.c.bf16 %v3949_v26, %v3947_v25  ;;  %v3873_v14 = vld [vmem:[%s8774_s0 + $0x198] sm:$0xff]  ;;  %v3861_v21 = vld [vmem:[%s8779_s7 + $0x3c0] sm:$0xff]  ;;  %v3866_v26 = vld [vmem:[%s8779_s7 + $0x3e8] sm:$0xff] }
 0x44e   :  { %4780 = vmatprep.subr.bf16.mxu0 %v4779_v40  ;;  %4718 = vmatpush1.bf16.msra.mxu1 %v4717_v52  ;;  %v3953_v40 = vld [vmem:[%s8773_s1 + $0x658] sm:$0xff]  ;;  %v3952_v52 = vld [vmem:[%s8773_s1 + $0x650] sm:$0xff]  ;;  %v4737_v25 = vpack.c.bf16 %v3863_v49, %v3861_v21  ;;  %v3891_v36 = vld [vmem:[%s8774_s0 + $0x228] sm:$0xff] }
 0x44f   :  { %4720 = vmatprep.subr.bf16.mxu1 %v4719_v55  ;;  %v4799_v50 = vpack.c.bf16 %v3953_v40, %v3951_v39  ;;  %v4801_v55 = vpack.c.bf16 %v3952_v52, %v3950_v51  ;;  %v3877_v31 = vld [vmem:[%s8774_s0 + $0x1b8] sm:$0xff]  ;;  %v3867_v33 = vld [vmem:[%s8779_s7 + $0x3f0] sm:$0xff]  ;;  %v3875_v38 = vld [vmem:[%s8774_s0 + $0x1a8] sm:$0xff] }
 0x450   :  { %v3889_v23 = vld [vmem:[%s8774_s0 + $0x218] sm:$0xff]  ;;  %v3892_v34 = vld [vmem:[%s8774_s0 + $0x230] sm:$0xff]  ;;  %v3878_v39 = vld [vmem:[%s8774_s0 + $0x1c0] sm:$0xff] }
 0x451   :  { %4782 = vmatpush1.bf16.msra.mxu0 %v4781_v53  ;;  %v3955_v53 = vld [vmem:[%s8773_s1 + $0x668] sm:$0xff]  ;;  %v3872_v37 = vld [vmem:[%s8774_s0 + $0x190] sm:$0xff]  ;;  %v3881_v40 = vld [vmem:[%s8774_s0 + $0x1d8] sm:$0xff] }
 0x452   :  { %4784 = vmatprep.subr.bf16.mxu0 %v4783_v58  ;;  %4722 = vmatpush1.bf16.msra.mxu1 %v4721_v2  ;;  %v4803_v56 = vpack.c.bf16 %v3957_v54, %v3955_v53  ;;  %v3956_v58 = vld [vmem:[%s8773_s1 + $0x670] sm:$0xff]  ;;  %v3978_v51 = vld [vmem:[%s8775_s3 + $0x418] sm:$0xff]  ;;  %v3804_v54 = vld [vmem:[%s8780_s6 + $0x2] sm:$0x3] }
 0x453   :  { %4724 = vmatprep.subr.bf16.mxu1 %v4723_v5  ;;  %v4805_v61 = vpack.c.bf16 %v3956_v58, %v3954_v57  ;;  %v3960_v2 = vld [vmem:[%s8773_s1 + $0x690] sm:$0xff]  ;;  %v3870_v5 = vld [vmem:[%s8774_s0 + $0x180] sm:$0xff]  ;;  %v3893_v53 = vld [vmem:[%s8774_s0 + $0x238] sm:$0xff] }
 0x454   :  { %v4809_v6 = vpack.c.bf16 %v3960_v2, %v3958_v0  ;;  %v3975_v59 = vld [vmem:[%s8775_s3 + $0x400] sm:$0xff]  ;;  %v3977_v60 = vld [vmem:[%s8775_s3 + $0x410] sm:$0xff]  ;;  %v3982_v0 = vld [vmem:[%s8775_s3 + $0x438] sm:$0xff] }
 0x455   :  { %4786 = vmatpush1.bf16.msra.mxu0 %v4785_v3  ;;  %v3963_v3 = vld [vmem:[%s8773_s1 + $0x6a8] sm:$0xff]  ;;  %v3979_v11 = vld [vmem:[%s8775_s3 + $0x420] sm:$0xff]  ;;  %v3981_v13 = vld [vmem:[%s8775_s3 + $0x430] sm:$0xff] }
 0x456   :  { %4788 = vmatprep.subr.bf16.mxu0 %v4787_v10  ;;  %4726 = vmatpush1.bf16.msra.mxu1 %v4725_v16  ;;  %v4811_v10 = vpack.c.bf16 %v3965_v4, %v3963_v3  ;;  %v3876_v16 = vld [vmem:[%s8774_s0 + $0x1b0] sm:$0xff]  ;;  %v4817_v4 = vpack.c.bf16 %v3977_v60, %v3975_v59  ;;  %v3983_v21 = vld [vmem:[%s8775_s3 + $0x440] sm:$0xff]  ;;  %v3998_v59 = vld [vmem:[%s8775_s3 + $0x4b8] sm:$0xff] }
 0x457   :  { %4728 = vmatprep.subr.bf16.mxu1 %v4727_v32  ;;  %v3883_v32 = vld [vmem:[%s8774_s0 + $0x1e8] sm:$0xff]  ;;  %v3985_v49 = vld [vmem:[%s8775_s3 + $0x450] sm:$0xff] }
 0x459   :  { %4790 = vmatpush1.bf16.msra.mxu0 %v4789_v17  ;;  %v3880_v17 = vld [vmem:[%s8774_s0 + $0x1d0] sm:$0xff] }
 0x45a   :  { %4792 = vmatprep.subr.bf16.mxu0 %v4791_v20  ;;  %4730 = vmatpush1.bf16.msra.mxu1 %v4729_v8  ;;  %v3885_v20 = vld [vmem:[%s8774_s0 + $0x1f8] sm:$0xff] }
 0x45b   :  { %4732 = vmatprep.subr.bf16.mxu1 %v4731_v30  ;;  %v3868_v8 = vld [vmem:[%s8779_s7 + $0x3f8] sm:$0xff]  ;;  %v3865_v30 = vld [vmem:[%s8779_s7 + $0x3e0] sm:$0xff] }
 0x45c   :  { %v4739_v28 = vpack.c.bf16 %v3868_v8, %v3866_v26  ;;  %v3990_v26 = vld [vmem:[%s8775_s3 + $0x478] sm:$0xff] }
 0x45d   :  { %4794 = vmatpush1.bf16.msra.mxu0 %v4793_v27  ;;  %v3888_v27 = vld [vmem:[%s8774_s0 + $0x210] sm:$0xff] }
 0x45e   :  { %4796 = vmatprep.subr.bf16.mxu0 %v4795_v35  ;;  %4734 = vmatpush1.bf16.msra.mxu1 %v4733_v41  ;;  %v4741_v35 = vpack.c.bf16 %v3867_v33, %v3865_v30  ;;  %v3884_v41 = vld [vmem:[%s8774_s0 + $0x1f0] sm:$0xff] }
 0x45f   :  { %4736 = vmatprep.subr.bf16.mxu1 %v4735_v47  ;;  %v3890_v47 = vld [vmem:[%s8774_s0 + $0x220] sm:$0xff] }
 0x461   :  { %4798 = vmatpush1.bf16.msra.mxu0 %v4797_v43  ;;  %v3887_v43 = vld [vmem:[%s8774_s0 + $0x208] sm:$0xff] }
 0x462   :  { %4800 = vmatprep.subr.bf16.mxu0 %v4799_v50  ;;  %4738 = vmatpush1.bf16.msra.mxu1 %v4737_v25  ;;  %v3976_v50 = vld [vmem:[%s8775_s3 + $0x408] sm:$0xff] }
 0x463   :  { %4740 = vmatprep.subr.bf16.mxu1 %v4739_v28  ;;  %v4815_v52 = vpack.c.bf16 %v3978_v51, %v3976_v50  ;;  %v3988_v25 = vld [vmem:[%s8775_s3 + $0x468] sm:$0xff]  ;;  %v4825_v28 = vpack.c.bf16 %v3985_v49, %v3983_v21  ;;  %v4006_v21 = vld [vmem:[%s8775_s3 + $0x4f8] sm:$0xff] }
 0x465   :  { %4802 = vmatpush1.bf16.msra.mxu0 %v4801_v55  ;;  %v7559_v55 = vrot.slane %v3804_v54, %v5847_v42 }
 0x466   :  { %4804 = vmatprep.subr.bf16.mxu0 %v4803_v56  ;;  %4742 = vmatpush1.bf16.msra.mxu1 %v4741_v35  ;;  %v7562_v56 = vrot.slane %v3804_v54, %v5852_v44  ;;  %v4827_v35 = vpack.c.bf16 %v3990_v26, %v3988_v25  ;;  %v3991_v54 = vld [vmem:[%s8775_s3 + $0x480] sm:$0xff] }
 0x467   :  { %4816 = vmatprep.subr.bf16.mxu1 %v4815_v52 }
 0x469   :  { %4806 = vmatpush1.bf16.msra.mxu0 %v4805_v61 }
 0x46a   :  { %4808 = vmatprep.subr.bf16.mxu0 %v4807_v63  ;;  %v3980_v63 = vld [vmem:[%s8775_s3 + $0x428] sm:$0xff] }
 0x46c   :  { %2270 = vmatmul.mubr.f32.vlgmr.msra.gmra.mrb[64].mxu0 %v3870_v5 }
 0x46d   :  { %4810 = vmatpush1.bf16.msra.mxu0 %v4809_v6  ;;  %2275 = vmatprep.mubr.f32.mxu0 %v3874_v7 }
 0x46e   :  { %4812 = vmatprep.subr.bf16.mxu0 %v4811_v10  ;;  %v4819_v10 = vpack.c.bf16 %v3982_v0, %v3980_v63 }
 0x470   :  { %2276 = vmatmul.mubr.f32.gmra.mrb[66].mxu0 %v3873_v14 }
 0x471   :  { %2281 = vmatprep.mubr.f32.mxu0 %v3877_v31  ;;  %4814 = vmatpush1.bf16.msra.mxu0 %v4813_v15  ;;  %v3984_v15 = vld [vmem:[%s8775_s3 + $0x448] sm:$0xff]  ;;  %v3986_v31 = vld [vmem:[%s8775_s3 + $0x458] sm:$0xff] }
 0x474   :  { %2282 = vmatmul.mubr.f32.gmra.mrb[68].mxu0 %v3876_v16 }
 0x475   :  { %2287 = vmatprep.mubr.f32.mxu0 %v3880_v17 }
 0x478   :  { %2288 = vmatmul.mubr.f32.gmra.mrb[70].mxu0 %v3879_v18  ;;  %v4821_v18 = vpack.c.bf16 %v3981_v13, %v3979_v11  ;;  %v4002_v11 = vld [vmem:[%s8775_s3 + $0x4d8] sm:$0xff] }
 0x479   :  { %2293 = vmatprep.mubr.f32.mxu0 %v3883_v32 }
 0x47c   :  { %2294 = vmatmul.mubr.f32.gmra.mrb[72].mxu0 %v3882_v48 }
 0x47d   :  { %2299 = vmatprep.mubr.f32.mxu0 %v3886_v46 }
 0x480   :  { %2300 = vmatmul.mubr.f32.gmra.mrb[74].mxu0 %v3885_v20  ;;  %v4823_v20 = vpack.c.bf16 %v3986_v31, %v3984_v15 }
 0x481   :  { %2305 = vmatprep.mubr.f32.mxu0 %v3889_v23 }
 0x484   :  { %2306 = vmatmul.mubr.f32.gmra.mrb[76].mxu0 %v3888_v27 }
 0x485   :  { %2311 = vmatprep.mubr.f32.mxu0 %v3892_v34 }
 0x488   :  { %2312 = vmatmul.mubr.f32.gmra.mrb[78].mxu0 %v3891_v36  ;;  %v3987_v36 = vld [vmem:[%s8775_s3 + $0x460] sm:$0xff] }
 0x489   :  { %2382 = vmatprep.mubr.f32.mxu0 %v5264_v19 }
 0x48c   :  { %3967 = vmatmul.mubr.msk.f32.vlgmr.msra.gmra.mrb[64].mxu0 %vm158_vm0, %v3872_v37  ;;  %v3989_v37 = vld [vmem:[%s8775_s3 + $0x470] sm:$0xff] }
 0x48d   :  { %2388 = vmatprep.mubr.f32.mxu0 %v5264_v19 }
 0x490   :  { %3968 = vmatmul.mubr.msk.f32.gmra.mrb[66].mxu0 %vm158_vm0, %v3875_v38 }
 0x491   :  { %2394 = vmatprep.mubr.f32.mxu0 %v5264_v19 }
 0x494   :  { %3969 = vmatmul.mubr.msk.f32.gmra.mrb[68].mxu0 %vm158_vm0, %v3878_v39  ;;  %v3992_v39 = vld [vmem:[%s8775_s3 + $0x488] sm:$0xff] }
 0x495   :  { %2400 = vmatprep.mubr.f32.mxu0 %v5264_v19 }
 0x498   :  { %3970 = vmatmul.mubr.msk.f32.gmra.mrb[70].mxu0 %vm158_vm0, %v3881_v40  ;;  %v3994_v40 = vld [vmem:[%s8775_s3 + $0x498] sm:$0xff] }
 0x499   :  { %2406 = vmatprep.mubr.f32.mxu0 %v5264_v19 }
 0x49c   :  { %3971 = vmatmul.mubr.msk.f32.gmra.mrb[72].mxu0 %vm158_vm0, %v3884_v41 }
 0x49d   :  { %2412 = vmatprep.mubr.f32.mxu0 %v5264_v19 }
 0x4a0   :  { %3972 = vmatmul.mubr.msk.f32.gmra.mrb[74].mxu0 %vm158_vm0, %v3887_v43 }
 0x4a1   :  { %2418 = vmatprep.mubr.f32.mxu0 %v5264_v19 }
 0x4a4   :  { %3973 = vmatmul.mubr.msk.f32.gmra.mrb[76].mxu0 %vm158_vm0, %v3890_v47  ;;  %v4829_v47 = vpack.c.bf16 %v3989_v37, %v3987_v36 }
 0x4a5   :  { %2424 = vmatprep.mubr.f32.mxu0 %v5264_v19 }
 0x4a8   :  { %3974 = vmatmul.mubr.msk.f32.gmra.mrb[78].mxu0 %vm158_vm0, %v3893_v53  ;;  %v4831_v53 = vpack.c.bf16 %v3994_v40, %v3992_v39  ;;  %v4009_v40 = vld [vmem:[%s8775_s3 + $0x510] sm:$0xff] }
 0x4ff   :  { %v1784_v57 = vpop.f32.mrb[48].mxu0 }
 0x500   :  { %v1785_v19 = vadd.f32 %v1784_v57, %v7559_v55  ;;  %v1786_v58 = vpop.f32.mrb[49].mxu0  ;;  %v3993_v57 = vld [vmem:[%s8775_s3 + $0x490] sm:$0xff] }
 0x501   :  { %v1787_v61 = vadd.f32 %v1786_v58, %v7562_v56  ;;  %v3996_v58 = vld [vmem:[%s8775_s3 + $0x4a8] sm:$0xff]  ;;  %v4833_v63 = vpack.c.bf16 %v3993_v57, %v3991_v54  ;;  %v4018_v54 = vld [vmem:[%s8775_s3 + $0x558] sm:$0xff] }
 0x502   :  { %v1831_v5 = vmax.f32 %v1785_v19, 0.0 }
 0x503   :  { %v1832_v2 = vmax.f32 %v1787_v61, 0.0  ;;  %v1790_v3 = vpop.f32.mrb[50].mxu0 }
 0x504   :  { %v1791_v6 = vadd.f32 %v1790_v3, %v7559_v55  ;;  %v1792_v7 = vpop.f32.mrb[51].mxu0 }
 0x505   :  { %v1793_v14 = vadd.f32 %v1792_v7, %v7562_v56  ;;  %1989 = vmatprep.mubr.f32.mxu1 %v1832_v2 }
 0x506   :  { %1990 = vmatmul.mubr.f32.vlgmr.msra.gmra.mrb[48].mxu1 %v1831_v5  ;;  %v1833_v32 = vmax.f32 %v1791_v6, 0.0  ;;  %v3995_v5 = vld [vmem:[%s8775_s3 + $0x4a0] sm:$0xff]  ;;  %v3997_v6 = vld [vmem:[%s8775_s3 + $0x4b0] sm:$0xff] }
 0x507   :  { %v1834_v16 = vmax.f32 %v1793_v14, 0.0  ;;  %v1796_v17 = vpop.f32.mrb[52].mxu0  ;;  %4818 = vmatpush1.bf16.msra.mxu1 %v4817_v4  ;;  %v4835_v4 = vpack.c.bf16 %v3998_v59, %v3996_v58  ;;  %v4837_v15 = vpack.c.bf16 %v3997_v6, %v3995_v5  ;;  %v4015_v58 = vld [vmem:[%s8775_s3 + $0x540] sm:$0xff]  ;;  %v4017_v59 = vld [vmem:[%s8775_s3 + $0x550] sm:$0xff]  ;;  %v4026_v5 = vld [vmem:[%s8775_s3 + $0x598] sm:$0xff] }
 0x508   :  { %v1797_v48 = vadd.f32 %v1796_v17, %v7559_v55  ;;  %v1798_v46 = vpop.f32.mrb[53].mxu0  ;;  %4820 = vmatprep.subr.bf16.mxu1 %v4819_v10  ;;  %v4000_v10 = vld [vmem:[%s8775_s3 + $0x4c8] sm:$0xff] }
 0x509   :  { %v1799_v23 = vadd.f32 %v1798_v46, %v7562_v56  ;;  %1995 = vmatprep.mubr.f32.mxu1 %v1834_v16 }
 0x50a   :  { %1996 = vmatmul.mubr.f32.gmra.mrb[50].mxu1 %v1833_v32  ;;  %v1835_v30 = vmax.f32 %v1797_v48, 0.0  ;;  %v3999_v32 = vld [vmem:[%s8775_s3 + $0x4c0] sm:$0xff]  ;;  %v4001_v48 = vld [vmem:[%s8775_s3 + $0x4d0] sm:$0xff] }
 0x50b   :  { %v1836_v8 = vmax.f32 %v1799_v23, 0.0  ;;  %v1802_v27 = vpop.f32.mrb[54].mxu0  ;;  %4822 = vmatpush1.bf16.msra.mxu1 %v4821_v18  ;;  %v4839_v18 = vpack.c.bf16 %v4002_v11, %v4000_v10  ;;  %v4841_v25 = vpack.c.bf16 %v4001_v48, %v3999_v32  ;;  %v4023_v10 = vld [vmem:[%s8775_s3 + $0x580] sm:$0xff]  ;;  %v4025_v11 = vld [vmem:[%s8775_s3 + $0x590] sm:$0xff]  ;;  %v4034_v32 = vld [vmem:[%s8775_s3 + $0x5d8] sm:$0xff] }
 0x50c   :  { %v1803_v33 = vadd.f32 %v1802_v27, %v7559_v55  ;;  %v1804_v34 = vpop.f32.mrb[55].mxu0  ;;  %4824 = vmatprep.subr.bf16.mxu1 %v4823_v20  ;;  %v4004_v20 = vld [vmem:[%s8775_s3 + $0x4e8] sm:$0xff] }
 0x50d   :  { %v1805_v38 = vadd.f32 %v1804_v34, %v7562_v56  ;;  %2001 = vmatprep.mubr.f32.mxu1 %v1836_v8 }
 0x50e   :  { %2002 = vmatmul.mubr.f32.gmra.mrb[52].mxu1 %v1835_v30  ;;  %v1837_v50 = vmax.f32 %v1803_v33, 0.0  ;;  %v4003_v30 = vld [vmem:[%s8775_s3 + $0x4e0] sm:$0xff]  ;;  %v4005_v33 = vld [vmem:[%s8775_s3 + $0x4f0] sm:$0xff] }
 0x50f   :  { %v1838_v41 = vmax.f32 %v1805_v38, 0.0  ;;  %v1808_v43 = vpop.f32.mrb[56].mxu0  ;;  %4826 = vmatpush1.bf16.msra.mxu1 %v4825_v28  ;;  %v4843_v28 = vpack.c.bf16 %v4006_v21, %v4004_v20  ;;  %v4845_v37 = vpack.c.bf16 %v4005_v33, %v4003_v30  ;;  %v4031_v20 = vld [vmem:[%s8775_s3 + $0x5c0] sm:$0xff]  ;;  %v4033_v21 = vld [vmem:[%s8775_s3 + $0x5d0] sm:$0xff] }
 0x510   :  { %v1809_v51 = vadd.f32 %v1808_v43, %v7559_v55  ;;  %v1810_v52 = vpop.f32.mrb[57].mxu0  ;;  %4828 = vmatprep.subr.bf16.mxu1 %v4827_v35  ;;  %v4008_v35 = vld [vmem:[%s8775_s3 + $0x508] sm:$0xff]  ;;  %v4014_v43 = vld [vmem:[%s8775_s3 + $0x538] sm:$0xff]  ;;  %v3966_v30 = vld [vmem:[%s8777_s2 + $0x4] sm:$0x3] }
 0x511   :  { %v1811_v19 = vadd.f32 %v1810_v52, %v7562_v56  ;;  %2007 = vmatprep.mubr.f32.mxu1 %v1838_v41  ;;  %v4012_v41 = vld [vmem:[%s8775_s3 + $0x528] sm:$0xff]  ;;  %v4013_v52 = vld [vmem:[%s8775_s3 + $0x530] sm:$0xff]  ;;  %v2174_v33 = vrot.slane %v3966_v30, %v5847_v42 }
 0x512   :  { %2008 = vmatmul.mubr.f32.gmra.mrb[54].mxu1 %v1837_v50  ;;  %v1839_v0 = vmax.f32 %v1809_v51, 0.0  ;;  %v4851_v50 = vpack.c.bf16 %v4014_v43, %v4012_v41  ;;  %v4011_v51 = vld [vmem:[%s8775_s3 + $0x520] sm:$0xff] }
 0x513   :  { %v1840_v60 = vmax.f32 %v1811_v19, 0.0  ;;  %v1814_v61 = vpop.f32.mrb[58].mxu0  ;;  %4830 = vmatpush1.bf16.msra.mxu1 %v4829_v47  ;;  %v4853_v57 = vpack.c.bf16 %v4013_v52, %v4011_v51 }
 0x514   :  { %v1815_v2 = vadd.f32 %v1814_v61, %v7559_v55  ;;  %v1816_v3 = vpop.f32.mrb[59].mxu0  ;;  %4832 = vmatprep.subr.bf16.mxu1 %v4831_v53  ;;  %v4016_v53 = vld [vmem:[%s8775_s3 + $0x548] sm:$0xff]  ;;  %v4022_v61 = vld [vmem:[%s8775_s3 + $0x578] sm:$0xff] }
 0x515   :  { %v1817_v7 = vadd.f32 %v1816_v3, %v7562_v56  ;;  %2013 = vmatprep.mubr.f32.mxu1 %v1840_v60  ;;  %v4855_v19 = vpack.c.bf16 %v4018_v54, %v4016_v53  ;;  %v4020_v60 = vld [vmem:[%s8775_s3 + $0x568] sm:$0xff]  ;;  %v4021_v3 = vld [vmem:[%s8775_s3 + $0x570] sm:$0xff] }
 0x516   :  { %2014 = vmatmul.mubr.f32.gmra.mrb[56].mxu1 %v1839_v0  ;;  %v1841_v31 = vmax.f32 %v1815_v2, 0.0  ;;  %v4859_v0 = vpack.c.bf16 %v4022_v61, %v4020_v60  ;;  %v4019_v2 = vld [vmem:[%s8775_s3 + $0x560] sm:$0xff] }
 0x517   :  { %v1842_v13 = vmax.f32 %v1817_v7, 0.0  ;;  %v1820_v14 = vpop.f32.mrb[60].mxu0  ;;  %4834 = vmatpush1.bf16.msra.mxu1 %v4833_v63  ;;  %v4857_v63 = vpack.c.bf16 %v4017_v59, %v4015_v58  ;;  %v4861_v6 = vpack.c.bf16 %v4021_v3, %v4019_v2 }
 0x518   :  { %v1821_v16 = vadd.f32 %v1820_v14, %v7559_v55  ;;  %v1822_v17 = vpop.f32.mrb[61].mxu0  ;;  %4836 = vmatprep.subr.bf16.mxu1 %v4835_v4  ;;  %v4024_v4 = vld [vmem:[%s8775_s3 + $0x588] sm:$0xff]  ;;  %v4030_v14 = vld [vmem:[%s8775_s3 + $0x5b8] sm:$0xff] }
 0x519   :  { %v1823_v46 = vadd.f32 %v1822_v17, %v7562_v56  ;;  %2019 = vmatprep.mubr.f32.mxu1 %v1842_v13  ;;  %v4863_v7 = vpack.c.bf16 %v4026_v5, %v4024_v4  ;;  %v4028_v13 = vld [vmem:[%s8775_s3 + $0x5a8] sm:$0xff]  ;;  %v4029_v17 = vld [vmem:[%s8775_s3 + $0x5b0] sm:$0xff] }
 0x51a   :  { %2020 = vmatmul.mubr.f32.gmra.mrb[58].mxu1 %v1841_v31  ;;  %v1843_v26 = vmax.f32 %v1821_v16, 0.0  ;;  %v4867_v31 = vpack.c.bf16 %v4030_v14, %v4028_v13  ;;  %v4027_v16 = vld [vmem:[%s8775_s3 + $0x5a0] sm:$0xff] }
 0x51b   :  { %v1844_v49 = vmax.f32 %v1823_v46, 0.0  ;;  %v1826_v23 = vpop.f32.mrb[62].mxu0  ;;  %4838 = vmatpush1.bf16.msra.mxu1 %v4837_v15  ;;  %v4865_v15 = vpack.c.bf16 %v4025_v11, %v4023_v10  ;;  %v4869_v48 = vpack.c.bf16 %v4029_v17, %v4027_v16 }
 0x51c   :  { %v1827_v8 = vadd.f32 %v1826_v23, %v7559_v55  ;;  %v1828_v27 = vpop.f32.mrb[63].mxu0  ;;  %4840 = vmatprep.subr.bf16.mxu1 %v4839_v18  ;;  %v4010_v55 = vld [vmem:[%s8775_s3 + $0x518] sm:$0xff]  ;;  %v4032_v18 = vld [vmem:[%s8775_s3 + $0x5c8] sm:$0xff] }
 0x51d   :  { %v1829_v34 = vadd.f32 %v1828_v27, %v7562_v56  ;;  %2025 = vmatprep.mubr.f32.mxu1 %v1844_v49  ;;  %v4847_v39 = vpack.c.bf16 %v4010_v55, %v4008_v35  ;;  %v4007_v56 = vld [vmem:[%s8775_s3 + $0x500] sm:$0xff]  ;;  %v4871_v46 = vpack.c.bf16 %v4034_v32, %v4032_v18  ;;  %v4036_v49 = vld [vmem:[%s8775_s3 + $0x5e8] sm:$0xff]  ;;  %v4038_v23 = vld [vmem:[%s8775_s3 + $0x5f8] sm:$0xff] }
 0x51e   :  { %2026 = vmatmul.mubr.f32.gmra.mrb[60].mxu1 %v1843_v26  ;;  %v1845_v38 = vmax.f32 %v1827_v8, 0.0  ;;  %v4849_v47 = vpack.c.bf16 %v4009_v40, %v4007_v56  ;;  %v4875_v26 = vpack.c.bf16 %v4038_v23, %v4036_v49  ;;  %v4035_v8 = vld [vmem:[%s8775_s3 + $0x5e0] sm:$0xff]  ;;  %v4037_v27 = vld [vmem:[%s8775_s3 + $0x5f0] sm:$0xff] }
 0x51f   :  { %v1846_v36 = vmax.f32 %v1829_v34, 0.0  ;;  %4842 = vmatpush1.bf16.msra.mxu1 %v4841_v25  ;;  %v4873_v25 = vpack.c.bf16 %v4033_v21, %v4031_v20  ;;  %v7771_v34 = vrot.slane %v3966_v30, %v5852_v44  ;;  %v4041_v20 = vld [vmem:[%s8776_s5 + $0x408] sm:$0xff]  ;;  %v4043_v21 = vld [vmem:[%s8776_s5 + $0x418] sm:$0xff]  ;;  %v4040_v49 = vld [vmem:[%s8776_s5 + $0x400] sm:$0xff] }
 0x520   :  { %4844 = vmatprep.subr.bf16.mxu1 %v4843_v28  ;;  %v4877_v28 = vpack.c.bf16 %v4037_v27, %v4035_v8  ;;  %v4879_v8 = vpack.c.bf16 %v4043_v21, %v4041_v20  ;;  %v4042_v27 = vld [vmem:[%s8776_s5 + $0x410] sm:$0xff]  ;;  %v4047_v30 = vld [vmem:[%s8776_s5 + $0x438] sm:$0xff] }
 0x521   :  { %2031 = vmatprep.mubr.f32.mxu1 %v1846_v36  ;;  %v4075_v20 = vld [vmem:[%s8776_s5 + $0x518] sm:$0xff] }
 0x522   :  { %2032 = vmatmul.mubr.f32.gmra.mrb[62].mxu1 %v1845_v38 }
 0x523   :  { %4846 = vmatpush1.bf16.msra.mxu1 %v4845_v37 }
 0x524   :  { %4848 = vmatprep.subr.bf16.mxu1 %v4847_v39 }
 0x527   :  { %4850 = vmatpush1.bf16.msra.mxu1 %v4849_v47 }
 0x528   :  { %4852 = vmatprep.subr.bf16.mxu1 %v4851_v50 }
 0x52b   :  { %4854 = vmatpush1.bf16.msra.mxu1 %v4853_v57 }
 0x52c   :  { %4856 = vmatprep.subr.bf16.mxu1 %v4855_v19 }
 0x52f   :  { %4858 = vmatpush1.bf16.msra.mxu1 %v4857_v63 }
 0x530   :  { %4860 = vmatprep.subr.bf16.mxu1 %v4859_v0 }
 0x533   :  { %4862 = vmatpush1.bf16.msra.mxu1 %v4861_v6 }
 0x534   :  { %4864 = vmatprep.subr.bf16.mxu1 %v4863_v7 }
 0x537   :  { %4866 = vmatpush1.bf16.msra.mxu1 %v4865_v15 }
 0x538   :  { %4868 = vmatprep.subr.bf16.mxu1 %v4867_v31 }
 0x53b   :  { %4870 = vmatpush1.bf16.msra.mxu1 %v4869_v48 }
 0x53c   :  { %4872 = vmatprep.subr.bf16.mxu1 %v4871_v46 }
 0x53f   :  { %4874 = vmatpush1.bf16.msra.mxu1 %v4873_v25 }
 0x540   :  { %4876 = vmatprep.subr.bf16.mxu1 %v4875_v26 }
 0x543   :  { %4878 = vmatpush1.bf16.msra.mxu1 %v4877_v28  ;;  %v4045_v28 = vld [vmem:[%s8776_s5 + $0x428] sm:$0xff] }
 0x544   :  { %4880 = vmatprep.subr.bf16.mxu1 %v4879_v8  ;;  %v4079_v8 = vld [vmem:[%s8776_s5 + $0x538] sm:$0xff] }
 0x55f   :  { %v2384_v35 = vpop.f32.mrb[64].mxu0 }
 0x560   :  { %v5199_v55 = vadd.f32 %v2384_v35, %v2174_v33  ;;  %v2386_v36 = vpop.f32.mrb[65].mxu0 }
 0x561   :  { %v5200_v37 = vadd.f32 %v2386_v36, %v7771_v34  ;;  %v4883_v36 = vpack.c.bf16 %v4047_v30, %v4045_v28  ;;  %v4076_v30 = vld [vmem:[%s8776_s5 + $0x520] sm:$0xff] }
 0x562   :  { %v2431_v56 = vmax.f32 %v5199_v55, 0.0  ;;  %v4881_v55 = vpack.c.bf16 %v4042_v27, %v4040_v49 }
 0x563   :  { %v2432_v38 = vmax.f32 %v5200_v37, 0.0  ;;  %v2390_v39 = vpop.f32.mrb[66].mxu0  ;;  %v4046_v37 = vld [vmem:[%s8776_s5 + $0x430] sm:$0xff] }
 0x564   :  { %v5201_v40 = vadd.f32 %v2390_v39, %v2174_v33  ;;  %v2392_v41 = vpop.f32.mrb[67].mxu0 }
 0x565   :  { %v5202_v43 = vadd.f32 %v2392_v41, %v7771_v34  ;;  %2589 = vmatprep.mubr.f32.mxu1 %v2432_v38  ;;  %v4049_v38 = vld [vmem:[%s8776_s5 + $0x448] sm:$0xff] }
 0x566   :  { %2590 = vmatmul.mubr.f32.vlgmr.msra.gmra.mrb[64].mxu1 %v2431_v56  ;;  %v2433_v51 = vmax.f32 %v5201_v40, 0.0 }
 0x567   :  { %v2434_v47 = vmax.f32 %v5202_v43, 0.0  ;;  %v2396_v50 = vpop.f32.mrb[68].mxu0  ;;  %4882 = vmatpush1.bf16.msra.mxu1 %v4881_v55  ;;  %v4048_v43 = vld [vmem:[%s8776_s5 + $0x440] sm:$0xff]  ;;  %v4081_v55 = vld [vmem:[%s8776_s5 + $0x548] sm:$0xff] }
 0x568   :  { %v5203_v52 = vadd.f32 %v2396_v50, %v2174_v33  ;;  %v2398_v53 = vpop.f32.mrb[69].mxu0  ;;  %4884 = vmatprep.subr.bf16.mxu1 %v4883_v36  ;;  %v4053_v50 = vld [vmem:[%s8776_s5 + $0x468] sm:$0xff]  ;;  %v4083_v36 = vld [vmem:[%s8776_s5 + $0x558] sm:$0xff] }
 0x569   :  { %v5204_v54 = vadd.f32 %v2398_v53, %v7771_v34  ;;  %2595 = vmatprep.mubr.f32.mxu1 %v2434_v47  ;;  %v4050_v47 = vld [vmem:[%s8776_s5 + $0x450] sm:$0xff] }
 0x56a   :  { %2596 = vmatmul.mubr.f32.gmra.mrb[66].mxu1 %v2433_v51  ;;  %v2435_v58 = vmax.f32 %v5203_v52, 0.0  ;;  %v4055_v51 = vld [vmem:[%s8776_s5 + $0x478] sm:$0xff]  ;;  %v4889_v52 = vpack.c.bf16 %v4050_v47, %v4048_v43  ;;  %v4084_v43 = vld [vmem:[%s8776_s5 + $0x560] sm:$0xff]  ;;  %v4086_v47 = vld [vmem:[%s8776_s5 + $0x570] sm:$0xff] }
 0x56b   :  { %v2436_v57 = vmax.f32 %v5204_v54, 0.0  ;;  %v2402_v19 = vpop.f32.mrb[70].mxu0  ;;  %v4891_v53 = vpack.c.bf16 %v4055_v51, %v4053_v50  ;;  %v4052_v54 = vld [vmem:[%s8776_s5 + $0x460] sm:$0xff]  ;;  %v4089_v50 = vld [vmem:[%s8776_s5 + $0x588] sm:$0xff]  ;;  %v4091_v51 = vld [vmem:[%s8776_s5 + $0x598] sm:$0xff] }
 0x56c   :  { %v5205_v59 = vadd.f32 %v2402_v19, %v2174_v33  ;;  %v2404_v60 = vpop.f32.mrb[71].mxu0  ;;  %v4057_v19 = vld [vmem:[%s8776_s5 + $0x488] sm:$0xff] }
 0x56d   :  { %v5206_v61 = vadd.f32 %v2404_v60, %v7771_v34  ;;  %2601 = vmatprep.mubr.f32.mxu1 %v2436_v57  ;;  %v4054_v57 = vld [vmem:[%s8776_s5 + $0x470] sm:$0xff] }
 0x56e   :  { %2602 = vmatmul.mubr.f32.gmra.mrb[68].mxu1 %v2435_v58  ;;  %v2437_v2 = vmax.f32 %v5205_v59, 0.0  ;;  %v4059_v58 = vld [vmem:[%s8776_s5 + $0x498] sm:$0xff]  ;;  %v4893_v59 = vpack.c.bf16 %v4054_v57, %v4052_v54  ;;  %v4088_v54 = vld [vmem:[%s8776_s5 + $0x580] sm:$0xff]  ;;  %v4090_v57 = vld [vmem:[%s8776_s5 + $0x590] sm:$0xff] }
 0x56f   :  { %v2438_v63 = vmax.f32 %v5206_v61, 0.0  ;;  %v2408_v0 = vpop.f32.mrb[72].mxu0  ;;  %v4895_v60 = vpack.c.bf16 %v4059_v58, %v4057_v19  ;;  %v4056_v61 = vld [vmem:[%s8776_s5 + $0x480] sm:$0xff]  ;;  %v4093_v19 = vld [vmem:[%s8776_s5 + $0x5a8] sm:$0xff]  ;;  %v4095_v58 = vld [vmem:[%s8776_s5 + $0x5b8] sm:$0xff] }
 0x570   :  { %v5207_v3 = vadd.f32 %v2408_v0, %v2174_v33  ;;  %v2410_v4 = vpop.f32.mrb[73].mxu0  ;;  %v4061_v0 = vld [vmem:[%s8776_s5 + $0x4a8] sm:$0xff] }
 0x571   :  { %v5208_v5 = vadd.f32 %v2410_v4, %v7771_v34  ;;  %2607 = vmatprep.mubr.f32.mxu1 %v2438_v63  ;;  %v4058_v63 = vld [vmem:[%s8776_s5 + $0x490] sm:$0xff] }
 0x572   :  { %2608 = vmatmul.mubr.f32.gmra.mrb[70].mxu1 %v2437_v2  ;;  %v2439_v10 = vmax.f32 %v5207_v3, 0.0  ;;  %v4063_v2 = vld [vmem:[%s8776_s5 + $0x4b8] sm:$0xff]  ;;  %v4897_v3 = vpack.c.bf16 %v4058_v63, %v4056_v61  ;;  %v4092_v61 = vld [vmem:[%s8776_s5 + $0x5a0] sm:$0xff]  ;;  %v4094_v63 = vld [vmem:[%s8776_s5 + $0x5b0] sm:$0xff] }
 0x573   :  { %v2440_v6 = vmax.f32 %v5208_v5, 0.0  ;;  %v2414_v7 = vpop.f32.mrb[74].mxu0  ;;  %v4899_v4 = vpack.c.bf16 %v4063_v2, %v4061_v0  ;;  %v4060_v5 = vld [vmem:[%s8776_s5 + $0x4a0] sm:$0xff]  ;;  %v4097_v0 = vld [vmem:[%s8776_s5 + $0x5c8] sm:$0xff]  ;;  %v4099_v2 = vld [vmem:[%s8776_s5 + $0x5d8] sm:$0xff] }
 0x574   :  { %v5209_v11 = vadd.f32 %v2414_v7, %v2174_v33  ;;  %v2416_v13 = vpop.f32.mrb[75].mxu0  ;;  %v4065_v7 = vld [vmem:[%s8776_s5 + $0x4c8] sm:$0xff] }
 0x575   :  { %v5210_v14 = vadd.f32 %v2416_v13, %v7771_v34  ;;  %2613 = vmatprep.mubr.f32.mxu1 %v2440_v6  ;;  %v4062_v6 = vld [vmem:[%s8776_s5 + $0x4b0] sm:$0xff] }
 0x576   :  { %2614 = vmatmul.mubr.f32.gmra.mrb[72].mxu1 %v2439_v10  ;;  %v2441_v16 = vmax.f32 %v5209_v11, 0.0  ;;  %v4067_v10 = vld [vmem:[%s8776_s5 + $0x4d8] sm:$0xff]  ;;  %v4901_v11 = vpack.c.bf16 %v4062_v6, %v4060_v5  ;;  %v4096_v5 = vld [vmem:[%s8776_s5 + $0x5c0] sm:$0xff]  ;;  %v4098_v6 = vld [vmem:[%s8776_s5 + $0x5d0] sm:$0xff] }
 0x577   :  { %v2442_v15 = vmax.f32 %v5210_v14, 0.0  ;;  %v2420_v31 = vpop.f32.mrb[76].mxu0  ;;  %v4903_v13 = vpack.c.bf16 %v4067_v10, %v4065_v7  ;;  %v4064_v14 = vld [vmem:[%s8776_s5 + $0x4c0] sm:$0xff]  ;;  %v4937_v7 = vpack.c.bf16 %v4098_v6, %v4096_v5  ;;  %v4101_v10 = vld [vmem:[%s8776_s5 + $0x5e8] sm:$0xff]  ;;  %v4119_v5 = vld [vmem:[%s8779_s7 + $0x470] sm:$0xff] }
 0x578   :  { %v5211_v17 = vadd.f32 %v2420_v31, %v2174_v33  ;;  %v2422_v18 = vpop.f32.mrb[77].mxu0  ;;  %v4069_v31 = vld [vmem:[%s8776_s5 + $0x4e8] sm:$0xff] }
 0x579   :  { %v5212_v32 = vadd.f32 %v2422_v18, %v7771_v34  ;;  %2619 = vmatprep.mubr.f32.mxu1 %v2442_v15  ;;  %v4066_v15 = vld [vmem:[%s8776_s5 + $0x4d0] sm:$0xff] }
 0x57a   :  { %2620 = vmatmul.mubr.f32.gmra.mrb[74].mxu1 %v2441_v16  ;;  %v2443_v23 = vmax.f32 %v5211_v17, 0.0  ;;  %v4071_v16 = vld [vmem:[%s8776_s5 + $0x4f8] sm:$0xff]  ;;  %v4905_v17 = vpack.c.bf16 %v4066_v15, %v4064_v14  ;;  %v4100_v14 = vld [vmem:[%s8776_s5 + $0x5e0] sm:$0xff]  ;;  %v4102_v15 = vld [vmem:[%s8776_s5 + $0x5f0] sm:$0xff] }
 0x57b   :  { %v2444_v48 = vmax.f32 %v5212_v32, 0.0  ;;  %v2426_v46 = vpop.f32.mrb[78].mxu0  ;;  %v4907_v18 = vpack.c.bf16 %v4071_v16, %v4069_v31  ;;  %v4068_v32 = vld [vmem:[%s8776_s5 + $0x4e0] sm:$0xff]  ;;  %v4941_v31 = vpack.c.bf16 %v4102_v15, %v4100_v14 }
 0x57c   :  { %v5213_v25 = vadd.f32 %v2426_v46, %v2174_v33  ;;  %v2428_v26 = vpop.f32.mrb[79].mxu0  ;;  %v4044_v33 = vld [vmem:[%s8776_s5 + $0x420] sm:$0xff]  ;;  %v4073_v46 = vld [vmem:[%s8776_s5 + $0x508] sm:$0xff] }
 0x57d   :  { %v5214_v35 = vadd.f32 %v2428_v26, %v7771_v34  ;;  %2625 = vmatprep.mubr.f32.mxu1 %v2444_v48  ;;  %v4051_v34 = vld [vmem:[%s8776_s5 + $0x458] sm:$0xff]  ;;  %v4885_v56 = vpack.c.bf16 %v4046_v37, %v4044_v33  ;;  %v4070_v48 = vld [vmem:[%s8776_s5 + $0x4f0] sm:$0xff]  ;;  %v4911_v49 = vpack.c.bf16 %v4075_v20, %v4073_v46  ;;  %v4077_v26 = vld [vmem:[%s8776_s5 + $0x528] sm:$0xff]  ;;  %v4919_v37 = vpack.c.bf16 %v4083_v36, %v4081_v55 }
 0x57e   :  { %2626 = vmatmul.mubr.f32.gmra.mrb[76].mxu1 %v2443_v23  ;;  %v2445_v40 = vmax.f32 %v5213_v25, 0.0  ;;  %v4887_v41 = vpack.c.bf16 %v4051_v34, %v4049_v38  ;;  %v4909_v21 = vpack.c.bf16 %v4070_v48, %v4068_v32  ;;  %v4072_v23 = vld [vmem:[%s8776_s5 + $0x500] sm:$0xff]  ;;  %v4074_v25 = vld [vmem:[%s8776_s5 + $0x510] sm:$0xff]  ;;  %v4915_v28 = vpack.c.bf16 %v4079_v8, %v4077_v26 }
 0x57f   :  { %v2446_v39 = vmax.f32 %v5214_v35, 0.0  ;;  %4886 = vmatpush1.bf16.msra.mxu1 %v4885_v56  ;;  %v4913_v27 = vpack.c.bf16 %v4074_v25, %v4072_v23  ;;  %v4078_v35 = vld [vmem:[%s8776_s5 + $0x530] sm:$0xff]  ;;  %v4080_v38 = vld [vmem:[%s8776_s5 + $0x540] sm:$0xff]  ;;  %v4087_v56 = vld [vmem:[%s8776_s5 + $0x578] sm:$0xff] }
 0x580   :  { %4888 = vmatprep.subr.bf16.mxu1 %v4887_v41  ;;  %v4917_v33 = vpack.c.bf16 %v4078_v35, %v4076_v30  ;;  %v4082_v34 = vld [vmem:[%s8776_s5 + $0x550] sm:$0xff]  ;;  %v3869_v16 = vld [vmem:[%s8781_s8 + $0x2] sm:$0x3]  ;;  %v4108_v23 = vld [vmem:[%s8779_s7 + $0x418] sm:$0xff] }
 0x581   :  { %2631 = vmatprep.mubr.f32.mxu1 %v2446_v39  ;;  %v4085_v39 = vld [vmem:[%s8776_s5 + $0x568] sm:$0xff]  ;;  %v4105_v25 = vld [vmem:[%s8779_s7 + $0x400] sm:$0xff]  ;;  %v4112_v35 = vld [vmem:[%s8779_s7 + $0x438] sm:$0xff] }
 0x582   :  { %2632 = vmatmul.mubr.f32.gmra.mrb[78].mxu1 %v2445_v40  ;;  %v4921_v40 = vpack.c.bf16 %v4082_v34, %v4080_v38  ;;  %v4923_v41 = vpack.c.bf16 %v4087_v56, %v4085_v39  ;;  %v4110_v30 = vld [vmem:[%s8779_s7 + $0x428] sm:$0xff]  ;;  %v4109_v34 = vld [vmem:[%s8779_s7 + $0x420] sm:$0xff]  ;;  %v4111_v39 = vld [vmem:[%s8779_s7 + $0x430] sm:$0xff] }
 0x583   :  { %4890 = vmatpush1.bf16.msra.mxu1 %v4889_v52  ;;  %v4925_v52 = vpack.c.bf16 %v4086_v47, %v4084_v43  ;;  %v4947_v38 = vpack.c.bf16 %v4112_v35, %v4110_v30  ;;  %v4114_v56 = vld [vmem:[%s8779_s7 + $0x448] sm:$0xff]  ;;  %v4949_v47 = vpack.c.bf16 %v4111_v39, %v4109_v34  ;;  %v4125_v35 = vld [vmem:[%s8779_s7 + $0x4a0] sm:$0xff]  ;;  %v4132_v34 = vld [vmem:[%s8779_s7 + $0x4d8] sm:$0xff] }
 0x584   :  { %4892 = vmatprep.subr.bf16.mxu1 %v4891_v53  ;;  %v4927_v53 = vpack.c.bf16 %v4091_v51, %v4089_v50 }
 0x587   :  { %4894 = vmatpush1.bf16.msra.mxu1 %v4893_v59  ;;  %v4929_v59 = vpack.c.bf16 %v4090_v57, %v4088_v54 }
 0x588   :  { %4896 = vmatprep.subr.bf16.mxu1 %v4895_v60  ;;  %v4931_v60 = vpack.c.bf16 %v4095_v58, %v4093_v19  ;;  %v4118_v58 = vld [vmem:[%s8779_s7 + $0x468] sm:$0xff] }
 0x58b   :  { %4898 = vmatpush1.bf16.msra.mxu1 %v4897_v3  ;;  %v4933_v3 = vpack.c.bf16 %v4094_v63, %v4092_v61 }
 0x58c   :  { %4900 = vmatprep.subr.bf16.mxu1 %v4899_v4  ;;  %v4935_v4 = vpack.c.bf16 %v4099_v2, %v4097_v0 }
 0x58f   :  { %4902 = vmatpush1.bf16.msra.mxu1 %v4901_v11  ;;  %v4103_v11 = vld [vmem:[%s8776_s5 + $0x5f8] sm:$0xff] }
 0x590   :  { %4904 = vmatprep.subr.bf16.mxu1 %v4903_v13  ;;  %v4939_v13 = vpack.c.bf16 %v4103_v11, %v4101_v10  ;;  %v4122_v10 = vld [vmem:[%s8779_s7 + $0x488] sm:$0xff]  ;;  %v4124_v11 = vld [vmem:[%s8779_s7 + $0x498] sm:$0xff] }
 0x593   :  { %4906 = vmatpush1.bf16.msra.mxu1 %v4905_v17  ;;  %v7977_v17 = vrot.slane %v3869_v16, %v5847_v42 }
 0x594   :  { %4908 = vmatprep.subr.bf16.mxu1 %v4907_v18  ;;  %v7980_v18 = vrot.slane %v3869_v16, %v5852_v44 }
 0x597   :  { %4910 = vmatpush1.bf16.msra.mxu1 %v4909_v21 }
 0x598   :  { %4912 = vmatprep.subr.bf16.mxu1 %v4911_v49  ;;  %v4106_v49 = vld [vmem:[%s8779_s7 + $0x408] sm:$0xff] }
 0x59b   :  { %4914 = vmatpush1.bf16.msra.mxu1 %v4913_v27  ;;  %v4943_v27 = vpack.c.bf16 %v4108_v23, %v4106_v49  ;;  %v4126_v49 = vld [vmem:[%s8779_s7 + $0x4a8] sm:$0xff]  ;;  %v4128_v23 = vld [vmem:[%s8779_s7 + $0x4b8] sm:$0xff] }
 0x59c   :  { %4916 = vmatprep.subr.bf16.mxu1 %v4915_v28  ;;  %v4107_v28 = vld [vmem:[%s8779_s7 + $0x410] sm:$0xff]  ;;  %v4963_v30 = vpack.c.bf16 %v4128_v23, %v4126_v49 }
 0x59d   :  { %4944 = vmatprep.subr.bf16.mxu0 %v4943_v27 }
 0x59f   :  { %4918 = vmatpush1.bf16.msra.mxu1 %v4917_v33 }
 0x5a0   :  { %4920 = vmatprep.subr.bf16.mxu1 %v4919_v37  ;;  %v4945_v37 = vpack.c.bf16 %v4107_v28, %v4105_v25 }
 0x5a2   :  { %4946 = vmatpush1.bf16.msra.mxu0 %v4945_v37 }
 0x5a3   :  { %4922 = vmatpush1.bf16.msra.mxu1 %v4921_v40  ;;  %4948 = vmatprep.subr.bf16.mxu0 %v4947_v38  ;;  %v4130_v38 = vld [vmem:[%s8779_s7 + $0x4c8] sm:$0xff] }
 0x5a4   :  { %4924 = vmatprep.subr.bf16.mxu1 %v4923_v41  ;;  %v4116_v41 = vld [vmem:[%s8779_s7 + $0x458] sm:$0xff] }
 0x5a6   :  { %4950 = vmatpush1.bf16.msra.mxu0 %v4949_v47  ;;  %v4967_v47 = vpack.c.bf16 %v4132_v34, %v4130_v38  ;;  %v4153_v34 = vld [vmem:[%s8779_s7 + $0x580] sm:$0xff] }
 0x5a7   :  { %4926 = vmatpush1.bf16.msra.mxu1 %v4925_v52  ;;  %v4951_v52 = vpack.c.bf16 %v4116_v41, %v4114_v56 }
 0x5a8   :  { %4928 = vmatprep.subr.bf16.mxu1 %v4927_v53  ;;  %v4113_v53 = vld [vmem:[%s8779_s7 + $0x440] sm:$0xff] }
 0x5a9   :  { %4952 = vmatprep.subr.bf16.mxu0 %v4951_v52 }
 0x5ab   :  { %4930 = vmatpush1.bf16.msra.mxu1 %v4929_v59  ;;  %v4120_v59 = vld [vmem:[%s8779_s7 + $0x478] sm:$0xff] }
 0x5ac   :  { %4932 = vmatprep.subr.bf16.mxu1 %v4931_v60 }
 0x5af   :  { %4934 = vmatpush1.bf16.msra.mxu1 %v4933_v3  ;;  %v4955_v3 = vpack.c.bf16 %v4120_v59, %v4118_v58 }
 0x5b0   :  { %4936 = vmatprep.subr.bf16.mxu1 %v4935_v4  ;;  %v4117_v4 = vld [vmem:[%s8779_s7 + $0x460] sm:$0xff] }
 0x5b3   :  { %4938 = vmatpush1.bf16.msra.mxu1 %v4937_v7 }
 0x5b4   :  { %4940 = vmatprep.subr.bf16.mxu1 %v4939_v13 }
 0x5b7   :  { %4942 = vmatpush1.bf16.msra.mxu1 %v4941_v31 }
 0x5d9   :  { %v1991_v32 = vpop.f32.mrb[48].mxu1 }
 0x5da   :  { %v1992_v48 = vadd.f32 %v1991_v32, %v7977_v17  ;;  %v1993_v46 = vpop.f32.mrb[49].mxu1  ;;  %v4959_v32 = vpack.c.bf16 %v4124_v11, %v4122_v10 }
 0x5db   :  { %v1994_v20 = vadd.f32 %v1993_v46, %v7980_v18  ;;  %v4123_v46 = vld [vmem:[%s8779_s7 + $0x490] sm:$0xff] }
 0x5dc   :  { %v2038_v21 = vmax.f32 %v1992_v48, 0.0  ;;  %v4121_v48 = vld [vmem:[%s8779_s7 + $0x480] sm:$0xff] }
 0x5dd   :  { %v2039_v26 = vmax.f32 %v1994_v20, 0.0  ;;  %v1997_v8 = vpop.f32.mrb[50].mxu1  ;;  %v4961_v27 = vpack.c.bf16 %v4123_v46, %v4121_v48  ;;  %v4141_v46 = vld [vmem:[%s8779_s7 + $0x520] sm:$0xff] }
 0x5de   :  { %v8003_v55 = vadd.f32 %v2038_v21, %v7018_v62  ;;  %v1998_v36 = vadd.f32 %v1997_v8, %v7977_v17  ;;  %v1999_v33 = vpop.f32.mrb[51].mxu1 }
 0x5df   :  { %v8016_v62 = vadd.f32 %v2039_v26, %v7020_v1  ;;  %v2000_v40 = vadd.f32 %v1999_v33, %v7980_v18  ;;  %v4115_v1 = vld [vmem:[%s8779_s7 + $0x450] sm:$0xff] }
 0x5e0   :  { %v2040_v43 = vmax.f32 %v1998_v36, 0.0  ;;  %v4127_v36 = vld [vmem:[%s8779_s7 + $0x4b0] sm:$0xff] }
 0x5e1   :  { %v2041_v50 = vmax.f32 %v2000_v40, 0.0  ;;  %v2003_v51 = vpop.f32.mrb[52].mxu1 }
 0x5e2   :  { %v8029_v54 = vadd.f32 %v2040_v43, %v7022_v12  ;;  %v2004_v57 = vadd.f32 %v2003_v51, %v7977_v17  ;;  %v2005_v19 = vpop.f32.mrb[53].mxu1  ;;  %v4953_v12 = vpack.c.bf16 %v4115_v1, %v4113_v53  ;;  %v4131_v51 = vld [vmem:[%s8779_s7 + $0x4d0] sm:$0xff]  ;;  %v4134_v1 = vld [vmem:[%s8779_s7 + $0x4e8] sm:$0xff] }
 0x5e3   :  { %v8039_v60 = vadd.f32 %v2041_v50, %v7024_v45  ;;  %v2006_v61 = vadd.f32 %v2005_v19, %v7980_v18  ;;  %v4129_v50 = vld [vmem:[%s8779_s7 + $0x4c0] sm:$0xff] }
 0x5e4   :  { %v2042_v63 = vmax.f32 %v2004_v57, 0.0  ;;  %4954 = vmatpush1.bf16.msra.mxu0 %v4953_v12  ;;  %v4136_v57 = vld [vmem:[%s8779_s7 + $0x4f8] sm:$0xff] }
 0x5e5   :  { %v2043_v0 = vmax.f32 %v2006_v61, 0.0  ;;  %v2009_v2 = vpop.f32.mrb[54].mxu1  ;;  %4956 = vmatprep.subr.bf16.mxu0 %v4955_v3  ;;  %v4971_v12 = vpack.c.bf16 %v4136_v57, %v4134_v1  ;;  %v4039_v57 = vld [vmem:[%s8778_s4 + $0x4] sm:$0x3] }
 0x5e6   :  { %v8049_v45 = vadd.f32 %v2042_v63, %v7026_v22  ;;  %v2010_v6 = vadd.f32 %v2009_v2, %v7977_v17  ;;  %v2011_v7 = vpop.f32.mrb[55].mxu1  ;;  %v4957_v22 = vpack.c.bf16 %v4119_v5, %v4117_v4  ;;  %v4135_v2 = vld [vmem:[%s8779_s7 + $0x4f0] sm:$0xff]  ;;  %v4138_v5 = vld [vmem:[%s8779_s7 + $0x508] sm:$0xff] }
 0x5e7   :  { %v8059_v13 = vadd.f32 %v2043_v0, %v7028_v24  ;;  %v2012_v14 = vadd.f32 %v2011_v7, %v7980_v18  ;;  %v4133_v0 = vld [vmem:[%s8779_s7 + $0x4e0] sm:$0xff] }
 0x5e8   :  { %v2044_v15 = vmax.f32 %v2010_v6, 0.0  ;;  %4958 = vmatpush1.bf16.msra.mxu0 %v4957_v22  ;;  %v4140_v6 = vld [vmem:[%s8779_s7 + $0x518] sm:$0xff]  ;;  %v4139_v22 = vld [vmem:[%s8779_s7 + $0x510] sm:$0xff] }
 0x5e9   :  { %v2045_v31 = vmax.f32 %v2012_v14, 0.0  ;;  %v2015_v16 = vpop.f32.mrb[56].mxu1  ;;  %4960 = vmatprep.subr.bf16.mxu0 %v4959_v32 }
 0x5ea   :  { %v8069_v24 = vadd.f32 %v2044_v15, %v7030_v29  ;;  %v2016_v20 = vadd.f32 %v2015_v16, %v7977_v17  ;;  %v2017_v21 = vpop.f32.mrb[57].mxu1  ;;  %v4137_v15 = vld [vmem:[%s8779_s7 + $0x500] sm:$0xff] }
 0x5eb   :  { %v2061_v25 = vadd.f32 %v2045_v31, %v7032_v9  ;;  %v2018_v26 = vadd.f32 %v2017_v21, %v7980_v18  ;;  %v4977_v32 = vpack.c.bf16 %v4139_v22, %v4137_v15  ;;  %v4148_v21 = vld [vmem:[%s8779_s7 + $0x558] sm:$0xff] }
 0x5ec   :  { %v2046_v8 = vmax.f32 %v2016_v20, 0.0  ;;  %4962 = vmatpush1.bf16.msra.mxu0 %v4961_v27  ;;  %v4146_v20 = vld [vmem:[%s8779_s7 + $0x548] sm:$0xff]  ;;  %v4152_v27 = vld [vmem:[%s8779_s7 + $0x578] sm:$0xff] }
 0x5ed   :  { %v2047_v29 = vmax.f32 %v2018_v26, 0.0  ;;  %v2021_v28 = vpop.f32.mrb[58].mxu1  ;;  %4964 = vmatprep.subr.bf16.mxu0 %v4963_v30  ;;  %v4983_v23 = vpack.c.bf16 %v4148_v21, %v4146_v20  ;;  %v4147_v26 = vld [vmem:[%s8779_s7 + $0x550] sm:$0xff]  ;;  %v4149_v30 = vld [vmem:[%s8779_s7 + $0x560] sm:$0xff] }
 0x5ee   :  { %v8087_v33 = vadd.f32 %v8003_v55, %v2046_v8  ;;  %v2022_v9 = vadd.f32 %v2021_v28, %v7977_v17  ;;  %v2023_v37 = vpop.f32.mrb[59].mxu1  ;;  %v4965_v55 = vpack.c.bf16 %v4127_v36, %v4125_v35  ;;  %v4150_v8 = vld [vmem:[%s8779_s7 + $0x568] sm:$0xff]  ;;  %v4151_v35 = vld [vmem:[%s8779_s7 + $0x570] sm:$0xff] }
 0x5ef   :  { %v8097_v39 = vadd.f32 %v8016_v62, %v2047_v29  ;;  %v2024_v56 = vadd.f32 %v2023_v37, %v7980_v18  ;;  %v4987_v28 = vpack.c.bf16 %v4152_v27, %v4150_v8  ;;  %v4154_v36 = vld [vmem:[%s8779_s7 + $0x588] sm:$0xff]  ;;  %v4989_v37 = vpack.c.bf16 %v4151_v35, %v4149_v30 }
 0x5f0   :  { %v2048_v40 = vmax.f32 %v2022_v9, 0.0  ;;  %4966 = vmatpush1.bf16.msra.mxu0 %v4965_v55  ;;  %v4156_v9 = vld [vmem:[%s8779_s7 + $0x598] sm:$0xff] }
 0x5f1   :  { %v2049_v41 = vmax.f32 %v2024_v56, 0.0  ;;  %v2027_v43 = vpop.f32.mrb[60].mxu1  ;;  %4968 = vmatprep.subr.bf16.mxu0 %v4967_v47  ;;  %v4991_v38 = vpack.c.bf16 %v4156_v9, %v4154_v36  ;;  %v4155_v56 = vld [vmem:[%s8779_s7 + $0x590] sm:$0xff]  ;;  %v4160_v55 = vld [vmem:[%s8779_s7 + $0x5b8] sm:$0xff]  ;;  %v4157_v47 = vld [vmem:[%s8779_s7 + $0x5a0] sm:$0xff] }
 0x5f2   :  { %v8107_v62 = vadd.f32 %v8029_v54, %v2048_v40  ;;  %v2028_v52 = vadd.f32 %v2027_v43, %v7977_v17  ;;  %v2029_v53 = vpop.f32.mrb[61].mxu1  ;;  %v4969_v54 = vpack.c.bf16 %v4131_v51, %v4129_v50  ;;  %v4158_v40 = vld [vmem:[%s8779_s7 + $0x5a8] sm:$0xff]  ;;  %v4159_v50 = vld [vmem:[%s8779_s7 + $0x5b0] sm:$0xff] }
 0x5f3   :  { %v8117_v19 = vadd.f32 %v8039_v60, %v2049_v41  ;;  %v2030_v58 = vadd.f32 %v2029_v53, %v7980_v18  ;;  %v4993_v41 = vpack.c.bf16 %v4155_v56, %v4153_v34  ;;  %v4995_v43 = vpack.c.bf16 %v4160_v55, %v4158_v40  ;;  %v4162_v51 = vld [vmem:[%s8779_s7 + $0x5c8] sm:$0xff] }
 0x5f4   :  { %v2050_v59 = vmax.f32 %v2028_v52, 0.0  ;;  %4970 = vmatpush1.bf16.msra.mxu0 %v4969_v54  ;;  %v4164_v52 = vld [vmem:[%s8779_s7 + $0x5d8] sm:$0xff]  ;;  %v4997_v53 = vpack.c.bf16 %v4159_v50, %v4157_v47 }
 0x5f5   :  { %v2051_v61 = vmax.f32 %v2030_v58, 0.0  ;;  %v2033_v63 = vpop.f32.mrb[62].mxu1  ;;  %4972 = vmatprep.subr.bf16.mxu0 %v4971_v12  ;;  %v4999_v1 = vpack.c.bf16 %v4164_v52, %v4162_v51  ;;  %v2518_v58 = vrot.slane %v4039_v57, %v5847_v42  ;;  %v4161_v52 = vld [vmem:[%s8779_s7 + $0x5c0] sm:$0xff] }
 0x5f6   :  { %v8127_v60 = vadd.f32 %v8049_v45, %v2050_v59  ;;  %v2034_v3 = vadd.f32 %v2033_v63, %v7977_v17  ;;  %v2035_v4 = vpop.f32.mrb[63].mxu1  ;;  %v4973_v45 = vpack.c.bf16 %v4135_v2, %v4133_v0  ;;  %v4975_v17 = vpack.c.bf16 %v4140_v6, %v4138_v5 }
 0x5f7   :  { %v8137_v7 = vadd.f32 %v8059_v13, %v2051_v61  ;;  %v2036_v10 = vadd.f32 %v2035_v4, %v7980_v18  ;;  %v4142_v18 = vld [vmem:[%s8779_s7 + $0x528] sm:$0xff]  ;;  %v4144_v13 = vld [vmem:[%s8779_s7 + $0x538] sm:$0xff]  ;;  %v2522_v59 = vrot.slane %v4039_v57, %v5852_v44 }
 0x5f8   :  { %v2052_v11 = vmax.f32 %v2034_v3, 0.0  ;;  %4974 = vmatpush1.bf16.msra.mxu0 %v4973_v45  ;;  %v4979_v48 = vpack.c.bf16 %v4144_v13, %v4142_v18  ;;  %v4166_v57 = vld [vmem:[%s8779_s7 + $0x5e8] sm:$0xff] }
 0x5f9   :  { %v2053_v14 = vmax.f32 %v2036_v10, 0.0  ;;  %4976 = vmatprep.subr.bf16.mxu0 %v4975_v17 }
 0x5fa   :  { %v8147_v31 = vadd.f32 %v8069_v24, %v2052_v11  ;;  %v4143_v24 = vld [vmem:[%s8779_s7 + $0x530] sm:$0xff] }
 0x5fb   :  { %v8155_v16 = vadd.f32 %v2061_v25, %v2053_v14  ;;  %v4981_v49 = vpack.c.bf16 %v4143_v24, %v4141_v46  ;;  %v4145_v25 = vld [vmem:[%s8779_s7 + $0x540] sm:$0xff] }
 0x5fc   :  { %4978 = vmatpush1.bf16.msra.mxu0 %v4977_v32  ;;  %v4985_v29 = vpack.c.bf16 %v4147_v26, %v4145_v25 }
 0x5fd   :  { %4980 = vmatprep.subr.bf16.mxu0 %v4979_v48 }
 0x600   :  { %4982 = vmatpush1.bf16.msra.mxu0 %v4981_v49 }
 0x601   :  { %4984 = vmatprep.subr.bf16.mxu0 %v4983_v23 }
 0x604   :  { %4986 = vmatpush1.bf16.msra.mxu0 %v4985_v29 }
 0x605   :  { %4988 = vmatprep.subr.bf16.mxu0 %v4987_v28 }
 0x608   :  { %4990 = vmatpush1.bf16.msra.mxu0 %v4989_v37 }
 0x609   :  { %4992 = vmatprep.subr.bf16.mxu0 %v4991_v38 }
 0x60c   :  { %4994 = vmatpush1.bf16.msra.mxu0 %v4993_v41 }
 0x60d   :  { %4996 = vmatprep.subr.bf16.mxu0 %v4995_v43 }
 0x610   :  { %4998 = vmatpush1.bf16.msra.mxu0 %v4997_v53  ;;  %v4163_v53 = vld [vmem:[%s8779_s7 + $0x5d0] sm:$0xff] }
 0x611   :  { %5000 = vmatprep.subr.bf16.mxu0 %v4999_v1  ;;  %v5001_v1 = vpack.c.bf16 %v4163_v53, %v4161_v52  ;;  %v3112_v52 = vld [vmem:[%s8782_s9 + $0xe0] sm:$0xff]  ;;  %v3114_v53 = vld [vmem:[%s8782_s9 + $0xf0] sm:$0xff] }
 0x614   :  { %5002 = vmatpush1.bf16.msra.mxu0 %v5001_v1  ;;  %v3117_v1 = vld [vmem:[%s8782_s9 + $0x108] sm:$0xff] }
 0x639   :  { %v2591_v54 = vpop.f32.mrb[64].mxu1 }
 0x63a   :  { %v2592_v61 = vadd.f32 %v2591_v54, %v2518_v58  ;;  %v2593_v63 = vpop.f32.mrb[65].mxu1  ;;  %v4165_v54 = vld [vmem:[%s8779_s7 + $0x5e0] sm:$0xff] }
 0x63b   :  { %v2594_v12 = vadd.f32 %v2593_v63, %v2522_v59 }
 0x63c   :  { %v2638_v3 = vmax.f32 %v2592_v61, 0.0  ;;  %v4167_v61 = vld [vmem:[%s8779_s7 + $0x5f0] sm:$0xff] }
 0x63d   :  { %v2639_v0 = vmax.f32 %v2594_v12, 0.0  ;;  %v2597_v2 = vpop.f32.mrb[66].mxu1  ;;  %v5005_v63 = vpack.c.bf16 %v4167_v61, %v4165_v54  ;;  %v3085_v12 = vld [vmem:[%s8782_s9 + $0x8] sm:$0xff]  ;;  %v3116_v54 = vld [vmem:[%s8782_s9 + $0x100] sm:$0xff]  ;;  %v3118_v61 = vld [vmem:[%s8782_s9 + $0x110] sm:$0xff] }
 0x63e   :  { %v2598_v4 = vadd.f32 %v2597_v2, %v2518_v58  ;;  %v2599_v5 = vpop.f32.mrb[67].mxu1  ;;  %v3084_v2 = vld [vmem:[%s8782_s9] sm:$0xff] }
 0x63f   :  { %v2600_v6 = vadd.f32 %v2599_v5, %v2522_v59  ;;  %2796 = vmatprep.mubr.f32.mxu1 %v2639_v0  ;;  %v3087_v0 = vld [vmem:[%s8782_s9 + $0x18] sm:$0xff]  ;;  %v3089_v5 = vld [vmem:[%s8782_s9 + $0x28] sm:$0xff] }
 0x640   :  { %2797 = vmatmul.mubr.f32.vlgmr.msra.gmra.mrb[80].mxu1 %v2638_v3  ;;  %v2640_v45 = vmax.f32 %v2598_v4, 0.0  ;;  %v5007_v3 = vpack.c.bf16 %v3087_v0, %v3085_v12  ;;  %v3086_v4 = vld [vmem:[%s8782_s9 + $0x10] sm:$0xff]  ;;  %v3123_v12 = vld [vmem:[%s8782_s9 + $0x138] sm:$0xff]  ;;  %v5041_v0 = vpack.c.bf16 %v3118_v61, %v3116_v54 }
 0x641   :  { %v2641_v10 = vmax.f32 %v2600_v6, 0.0  ;;  %v2603_v11 = vpop.f32.mrb[68].mxu1  ;;  %v3091_v6 = vld [vmem:[%s8782_s9 + $0x38] sm:$0xff] }
 0x642   :  { %v2604_v14 = vadd.f32 %v2603_v11, %v2518_v58  ;;  %v2605_v17 = vpop.f32.mrb[69].mxu1  ;;  %v5011_v11 = vpack.c.bf16 %v3091_v6, %v3089_v5  ;;  %5008 = vmatprep.subr.bf16.mxu1 %v5007_v3  ;;  %v3120_v3 = vld [vmem:[%s8782_s9 + $0x120] sm:$0xff] }
 0x643   :  { %v2606_v15 = vadd.f32 %v2605_v17, %v2522_v59  ;;  %2802 = vmatprep.mubr.f32.mxu1 %v2641_v10  ;;  %v5009_v10 = vpack.c.bf16 %v3086_v4, %v3084_v2  ;;  %v3093_v17 = vld [vmem:[%s8782_s9 + $0x48] sm:$0xff]  ;;  %v3122_v4 = vld [vmem:[%s8782_s9 + $0x130] sm:$0xff]  ;;  %v4104_v6 = vld [vmem:[%s8780_s6 + $0x4] sm:$0x3] }
 0x644   :  { %2803 = vmatmul.mubr.f32.gmra.mrb[82].mxu1 %v2640_v45  ;;  %v2642_v13 = vmax.f32 %v2604_v14, 0.0  ;;  %v3088_v45 = vld [vmem:[%s8782_s9 + $0x20] sm:$0xff]  ;;  %v3090_v14 = vld [vmem:[%s8782_s9 + $0x30] sm:$0xff]  ;;  %v5045_v5 = vpack.c.bf16 %v3122_v4, %v3120_v3  ;;  %v3125_v3 = vld [vmem:[%s8782_s9 + $0x148] sm:$0xff] }
 0x645   :  { %v2643_v22 = vmax.f32 %v2606_v15, 0.0  ;;  %v2609_v18 = vpop.f32.mrb[70].mxu1  ;;  %v3095_v15 = vld [vmem:[%s8782_s9 + $0x58] sm:$0xff]  ;;  %5010 = vmatpush1.bf16.msra.mxu1 %v5009_v10  ;;  %v2725_v10 = vrot.slane %v4104_v6, %v5847_v42 }
 0x646   :  { %v2610_v32 = vadd.f32 %v2609_v18, %v2518_v58  ;;  %v2611_v48 = vpop.f32.mrb[71].mxu1  ;;  %5012 = vmatprep.subr.bf16.mxu1 %v5011_v11  ;;  %v5015_v18 = vpack.c.bf16 %v3095_v15, %v3093_v17  ;;  %v2729_v11 = vrot.slane %v4104_v6, %v5852_v44  ;;  %v3127_v4 = vld [vmem:[%s8782_s9 + $0x158] sm:$0xff]  ;;  %v3124_v6 = vld [vmem:[%s8782_s9 + $0x140] sm:$0xff] }
 0x647   :  { %v2612_v46 = vadd.f32 %v2611_v48, %v2522_v59  ;;  %2808 = vmatprep.mubr.f32.mxu1 %v2643_v22  ;;  %v5013_v22 = vpack.c.bf16 %v3090_v14, %v3088_v45  ;;  %v3097_v48 = vld [vmem:[%s8782_s9 + $0x68] sm:$0xff] }
 0x648   :  { %2809 = vmatmul.mubr.f32.gmra.mrb[84].mxu1 %v2642_v13  ;;  %v2644_v21 = vmax.f32 %v2610_v32, 0.0  ;;  %v3092_v13 = vld [vmem:[%s8782_s9 + $0x40] sm:$0xff]  ;;  %v3094_v32 = vld [vmem:[%s8782_s9 + $0x50] sm:$0xff] }
 0x649   :  { %v2645_v24 = vmax.f32 %v2612_v46, 0.0  ;;  %v2615_v20 = vpop.f32.mrb[72].mxu1  ;;  %v3099_v46 = vld [vmem:[%s8782_s9 + $0x78] sm:$0xff]  ;;  %5014 = vmatpush1.bf16.msra.mxu1 %v5013_v22 }
 0x64a   :  { %v2616_v49 = vadd.f32 %v2615_v20, %v2518_v58  ;;  %v2617_v23 = vpop.f32.mrb[73].mxu1  ;;  %5016 = vmatprep.subr.bf16.mxu1 %v5015_v18  ;;  %v5019_v20 = vpack.c.bf16 %v3099_v46, %v3097_v48 }
 0x64b   :  { %v2618_v25 = vadd.f32 %v2617_v23, %v2522_v59  ;;  %2814 = vmatprep.mubr.f32.mxu1 %v2645_v24  ;;  %v5017_v24 = vpack.c.bf16 %v3094_v32, %v3092_v13  ;;  %v3101_v23 = vld [vmem:[%s8782_s9 + $0x88] sm:$0xff] }
 0x64c   :  { %2815 = vmatmul.mubr.f32.gmra.mrb[86].mxu1 %v2644_v21  ;;  %v2646_v27 = vmax.f32 %v2616_v49, 0.0  ;;  %v3096_v21 = vld [vmem:[%s8782_s9 + $0x60] sm:$0xff]  ;;  %v3098_v49 = vld [vmem:[%s8782_s9 + $0x70] sm:$0xff] }
 0x64d   :  { %v2647_v26 = vmax.f32 %v2618_v25, 0.0  ;;  %v2621_v8 = vpop.f32.mrb[74].mxu1  ;;  %v3103_v25 = vld [vmem:[%s8782_s9 + $0x98] sm:$0xff]  ;;  %5018 = vmatpush1.bf16.msra.mxu1 %v5017_v24 }
 0x64e   :  { %v2622_v29 = vadd.f32 %v2621_v8, %v2518_v58  ;;  %v2623_v28 = vpop.f32.mrb[75].mxu1  ;;  %5020 = vmatprep.subr.bf16.mxu1 %v5019_v20  ;;  %v5023_v8 = vpack.c.bf16 %v3103_v25, %v3101_v23 }
 0x64f   :  { %v2624_v30 = vadd.f32 %v2623_v28, %v2522_v59  ;;  %2820 = vmatprep.mubr.f32.mxu1 %v2647_v26  ;;  %v5021_v26 = vpack.c.bf16 %v3098_v49, %v3096_v21  ;;  %v3105_v28 = vld [vmem:[%s8782_s9 + $0xa8] sm:$0xff] }
 0x650   :  { %2821 = vmatmul.mubr.f32.gmra.mrb[88].mxu1 %v2646_v27  ;;  %v2648_v9 = vmax.f32 %v2622_v29, 0.0  ;;  %v3100_v27 = vld [vmem:[%s8782_s9 + $0x80] sm:$0xff]  ;;  %v3102_v29 = vld [vmem:[%s8782_s9 + $0x90] sm:$0xff] }
 0x651   :  { %v2649_v35 = vmax.f32 %v2624_v30, 0.0  ;;  %v2627_v36 = vpop.f32.mrb[76].mxu1  ;;  %v3107_v30 = vld [vmem:[%s8782_s9 + $0xb8] sm:$0xff]  ;;  %5022 = vmatpush1.bf16.msra.mxu1 %v5021_v26 }
 0x652   :  { %v2628_v37 = vadd.f32 %v2627_v36, %v2518_v58  ;;  %v2629_v38 = vpop.f32.mrb[77].mxu1  ;;  %5024 = vmatprep.subr.bf16.mxu1 %v5023_v8  ;;  %v5027_v36 = vpack.c.bf16 %v3107_v30, %v3105_v28 }
 0x653   :  { %v2630_v34 = vadd.f32 %v2629_v38, %v2522_v59  ;;  %2826 = vmatprep.mubr.f32.mxu1 %v2649_v35  ;;  %v5025_v35 = vpack.c.bf16 %v3102_v29, %v3100_v27  ;;  %v3109_v38 = vld [vmem:[%s8782_s9 + $0xc8] sm:$0xff] }
 0x654   :  { %2827 = vmatmul.mubr.f32.gmra.mrb[90].mxu1 %v2648_v9  ;;  %v2650_v55 = vmax.f32 %v2628_v37, 0.0  ;;  %v3104_v9 = vld [vmem:[%s8782_s9 + $0xa0] sm:$0xff]  ;;  %v3106_v37 = vld [vmem:[%s8782_s9 + $0xb0] sm:$0xff] }
 0x655   :  { %v2651_v56 = vmax.f32 %v2630_v34, 0.0  ;;  %v2633_v40 = vpop.f32.mrb[78].mxu1  ;;  %v3111_v34 = vld [vmem:[%s8782_s9 + $0xd8] sm:$0xff]  ;;  %5026 = vmatpush1.bf16.msra.mxu1 %v5025_v35 }
 0x656   :  { %v2634_v41 = vadd.f32 %v2633_v40, %v2518_v58  ;;  %v2635_v43 = vpop.f32.mrb[79].mxu1  ;;  %v4168_v58 = vld [vmem:[%s8779_s7 + $0x5f8] sm:$0xff]  ;;  %5028 = vmatprep.subr.bf16.mxu1 %v5027_v36  ;;  %v5031_v40 = vpack.c.bf16 %v3111_v34, %v3109_v38 }
 0x657   :  { %v2636_v47 = vadd.f32 %v2635_v43, %v2522_v59  ;;  %2832 = vmatprep.mubr.f32.mxu1 %v2651_v56  ;;  %v5003_v59 = vpack.c.bf16 %v4168_v58, %v4166_v57  ;;  %v5029_v56 = vpack.c.bf16 %v3106_v37, %v3104_v9  ;;  %v3113_v43 = vld [vmem:[%s8782_s9 + $0xe8] sm:$0xff]  ;;  %v3119_v57 = vld [vmem:[%s8782_s9 + $0x118] sm:$0xff]  ;;  %v5037_v58 = vpack.c.bf16 %v3114_v53, %v3112_v52 }
 0x658   :  { %2833 = vmatmul.mubr.f32.gmra.mrb[92].mxu1 %v2650_v55  ;;  %v2652_v51 = vmax.f32 %v2634_v41, 0.0  ;;  %v3108_v55 = vld [vmem:[%s8782_s9 + $0xc0] sm:$0xff]  ;;  %v3110_v41 = vld [vmem:[%s8782_s9 + $0xd0] sm:$0xff] }
 0x659   :  { %v2653_v50 = vmax.f32 %v2636_v47, 0.0  ;;  %5004 = vmatprep.subr.bf16.mxu0 %v5003_v59  ;;  %v3115_v47 = vld [vmem:[%s8782_s9 + $0xf8] sm:$0xff]  ;;  %5030 = vmatpush1.bf16.msra.mxu1 %v5029_v56  ;;  %v5039_v59 = vpack.c.bf16 %v3119_v57, %v3117_v1 }
 0x65a   :  { %5006 = vmatpush1.bf16.msra.mxu0 %v5005_v63  ;;  %5032 = vmatprep.subr.bf16.mxu1 %v5031_v40  ;;  %v3121_v63 = vld [vmem:[%s8782_s9 + $0x128] sm:$0xff] }
 0x65b   :  { %2838 = vmatprep.mubr.f32.mxu1 %v2653_v50  ;;  %v5033_v50 = vpack.c.bf16 %v3110_v41, %v3108_v55  ;;  %v5043_v2 = vpack.c.bf16 %v3123_v12, %v3121_v63 }
 0x65c   :  { %2839 = vmatmul.mubr.f32.gmra.mrb[94].mxu1 %v2652_v51  ;;  %v5035_v51 = vpack.c.bf16 %v3115_v47, %v3113_v43 }
 0x65d   :  { %5034 = vmatpush1.bf16.msra.mxu1 %v5033_v50 }
 0x65e   :  { %5036 = vmatprep.subr.bf16.mxu1 %v5035_v51 }
 0x661   :  { %5038 = vmatpush1.bf16.msra.mxu1 %v5037_v58 }
 0x662   :  { %5040 = vmatprep.subr.bf16.mxu1 %v5039_v59 }
 0x665   :  { %5042 = vmatpush1.bf16.msra.mxu1 %v5041_v0 }
 0x666   :  { %5044 = vmatprep.subr.bf16.mxu1 %v5043_v2 }
 0x669   :  { %5046 = vmatpush1.bf16.msra.mxu1 %v5045_v5  ;;  %v5047_v5 = vpack.c.bf16 %v3127_v4, %v3125_v3  ;;  %v3272_v3 = vld [vmem:[%s8783_s11 + $0x78] sm:$0xff] }
 0x66b   :  { %5048 = vmatprep.subr.bf16.mxu1 %v5047_v5 }
 0x713   :  { %v2798_v45 = vpop.f32.mrb[80].mxu1 }
 0x714   :  { %v2799_v14 = vadd.f32 %v2798_v45, %v2725_v10  ;;  %v2800_v17 = vpop.f32.mrb[81].mxu1  ;;  %v3129_v45 = vld [vmem:[%s8782_s9 + $0x168] sm:$0xff] }
 0x715   :  { %v2801_v15 = vadd.f32 %v2800_v17, %v2729_v11 }
 0x716   :  { %v2845_v13 = vmax.f32 %v2799_v14, 0.0  ;;  %v3131_v14 = vld [vmem:[%s8782_s9 + $0x178] sm:$0xff] }
 0x717   :  { %v2846_v22 = vmax.f32 %v2801_v15, 0.0  ;;  %v2804_v18 = vpop.f32.mrb[82].mxu1  ;;  %v5051_v17 = vpack.c.bf16 %v3131_v14, %v3129_v45  ;;  %v3128_v15 = vld [vmem:[%s8782_s9 + $0x160] sm:$0xff]  ;;  %v3276_v45 = vld [vmem:[%s8783_s11 + $0x98] sm:$0xff] }
 0x718   :  { %v2805_v32 = vadd.f32 %v2804_v18, %v2725_v10  ;;  %v2806_v48 = vpop.f32.mrb[83].mxu1 }
 0x719   :  { %v2807_v46 = vadd.f32 %v2806_v48, %v2729_v11  ;;  %3003 = vmatprep.mubr.f32.mxu0 %v2846_v22  ;;  %v3130_v22 = vld [vmem:[%s8782_s9 + $0x170] sm:$0xff] }
 0x71a   :  { %3004 = vmatmul.mubr.f32.vlgmr.msra.gmra.mrb[80].mxu0 %v2845_v13  ;;  %v2847_v21 = vmax.f32 %v2805_v32, 0.0  ;;  %v5053_v18 = vpack.c.bf16 %v3130_v22, %v3128_v15  ;;  %v3133_v13 = vld [vmem:[%s8782_s9 + $0x188] sm:$0xff]  ;;  %v3135_v32 = vld [vmem:[%s8782_s9 + $0x198] sm:$0xff]  ;;  %v3273_v15 = vld [vmem:[%s8783_s11 + $0x80] sm:$0xff] }
 0x71b   :  { %v2848_v24 = vmax.f32 %v2807_v46, 0.0  ;;  %v2810_v20 = vpop.f32.mrb[84].mxu1  ;;  %v5055_v48 = vpack.c.bf16 %v3135_v32, %v3133_v13  ;;  %v3132_v46 = vld [vmem:[%s8782_s9 + $0x180] sm:$0xff]  ;;  %v3275_v22 = vld [vmem:[%s8783_s11 + $0x90] sm:$0xff]  ;;  %v3280_v13 = vld [vmem:[%s8783_s11 + $0xb8] sm:$0xff] }
 0x71c   :  { %v2811_v49 = vadd.f32 %v2810_v20, %v2725_v10  ;;  %v2812_v23 = vpop.f32.mrb[85].mxu1  ;;  %v5089_v32 = vpack.c.bf16 %v3275_v22, %v3273_v15  ;;  %v3309_v15 = vld [vmem:[%s8783_s11 + $0x1a0] sm:$0xff]  ;;  %v3311_v22 = vld [vmem:[%s8783_s11 + $0x1b0] sm:$0xff] }
 0x71d   :  { %v2813_v25 = vadd.f32 %v2812_v23, %v2729_v11  ;;  %3009 = vmatprep.mubr.f32.mxu0 %v2848_v24  ;;  %v3134_v24 = vld [vmem:[%s8782_s9 + $0x190] sm:$0xff] }
 0x71e   :  { %3010 = vmatmul.mubr.f32.gmra.mrb[82].mxu0 %v2847_v21  ;;  %v2849_v27 = vmax.f32 %v2811_v49, 0.0  ;;  %v5057_v20 = vpack.c.bf16 %v3134_v24, %v3132_v46  ;;  %v3137_v21 = vld [vmem:[%s8782_s9 + $0x1a8] sm:$0xff]  ;;  %v3139_v49 = vld [vmem:[%s8782_s9 + $0x1b8] sm:$0xff]  ;;  %v3277_v46 = vld [vmem:[%s8783_s11 + $0xa0] sm:$0xff] }
 0x71f   :  { %v2850_v26 = vmax.f32 %v2813_v25, 0.0  ;;  %v2816_v8 = vpop.f32.mrb[86].mxu1  ;;  %v5059_v23 = vpack.c.bf16 %v3139_v49, %v3137_v21  ;;  %v3136_v25 = vld [vmem:[%s8782_s9 + $0x1a0] sm:$0xff]  ;;  %v3279_v24 = vld [vmem:[%s8783_s11 + $0xb0] sm:$0xff]  ;;  %v3284_v21 = vld [vmem:[%s8783_s11 + $0xd8] sm:$0xff] }
 0x720   :  { %v2817_v29 = vadd.f32 %v2816_v8, %v2725_v10  ;;  %v2818_v28 = vpop.f32.mrb[87].mxu1  ;;  %v5093_v49 = vpack.c.bf16 %v3279_v24, %v3277_v46  ;;  %v4169_v46 = vld [vmem:[%s8781_s8 + $0x4] sm:$0x3] }
 0x721   :  { %v2819_v30 = vadd.f32 %v2818_v28, %v2729_v11  ;;  %3015 = vmatprep.mubr.f32.mxu0 %v2850_v26  ;;  %v3138_v26 = vld [vmem:[%s8782_s9 + $0x1b0] sm:$0xff]  ;;  %v2932_v24 = vrot.slane %v4169_v46, %v5847_v42 }
 0x722   :  { %3016 = vmatmul.mubr.f32.gmra.mrb[84].mxu0 %v2849_v27  ;;  %v2851_v9 = vmax.f32 %v2817_v29, 0.0  ;;  %v5061_v8 = vpack.c.bf16 %v3138_v26, %v3136_v25  ;;  %v3141_v27 = vld [vmem:[%s8782_s9 + $0x1c8] sm:$0xff]  ;;  %v3143_v29 = vld [vmem:[%s8782_s9 + $0x1d8] sm:$0xff]  ;;  %v3281_v25 = vld [vmem:[%s8783_s11 + $0xc0] sm:$0xff] }
 0x723   :  { %v2852_v35 = vmax.f32 %v2819_v30, 0.0  ;;  %v2822_v36 = vpop.f32.mrb[88].mxu1  ;;  %v5063_v28 = vpack.c.bf16 %v3143_v29, %v3141_v27  ;;  %v3140_v30 = vld [vmem:[%s8782_s9 + $0x1c0] sm:$0xff]  ;;  %v3283_v26 = vld [vmem:[%s8783_s11 + $0xd0] sm:$0xff]  ;;  %v3288_v27 = vld [vmem:[%s8783_s11 + $0xf8] sm:$0xff] }
 0x724   :  { %v2823_v37 = vadd.f32 %v2822_v36, %v2725_v10  ;;  %v2824_v38 = vpop.f32.mrb[89].mxu1  ;;  %v5097_v29 = vpack.c.bf16 %v3283_v26, %v3281_v25 }
 0x725   :  { %v2825_v34 = vadd.f32 %v2824_v38, %v2729_v11  ;;  %3021 = vmatprep.mubr.f32.mxu0 %v2852_v35  ;;  %v3142_v35 = vld [vmem:[%s8782_s9 + $0x1d0] sm:$0xff] }
 0x726   :  { %3022 = vmatmul.mubr.f32.gmra.mrb[86].mxu0 %v2851_v9  ;;  %v2853_v55 = vmax.f32 %v2823_v37, 0.0  ;;  %v5065_v36 = vpack.c.bf16 %v3142_v35, %v3140_v30  ;;  %v3145_v9 = vld [vmem:[%s8782_s9 + $0x1e8] sm:$0xff]  ;;  %v3147_v37 = vld [vmem:[%s8782_s9 + $0x1f8] sm:$0xff]  ;;  %v3285_v30 = vld [vmem:[%s8783_s11 + $0xe0] sm:$0xff] }
 0x727   :  { %v2854_v56 = vmax.f32 %v2825_v34, 0.0  ;;  %v2828_v40 = vpop.f32.mrb[90].mxu1  ;;  %v5067_v38 = vpack.c.bf16 %v3147_v37, %v3145_v9  ;;  %v3144_v34 = vld [vmem:[%s8782_s9 + $0x1e0] sm:$0xff]  ;;  %v3287_v35 = vld [vmem:[%s8783_s11 + $0xf0] sm:$0xff]  ;;  %v3292_v9 = vld [vmem:[%s8783_s11 + $0x118] sm:$0xff] }
 0x728   :  { %v2829_v41 = vadd.f32 %v2828_v40, %v2725_v10  ;;  %v2830_v43 = vpop.f32.mrb[91].mxu1  ;;  %v5101_v37 = vpack.c.bf16 %v3287_v35, %v3285_v30 }
 0x729   :  { %v2831_v47 = vadd.f32 %v2830_v43, %v2729_v11  ;;  %3027 = vmatprep.mubr.f32.mxu0 %v2854_v56  ;;  %v3146_v56 = vld [vmem:[%s8782_s9 + $0x1f0] sm:$0xff]  ;;  %v3257_v43 = vld [vmem:[%s8783_s11] sm:$0xff] }
 0x72a   :  { %3028 = vmatmul.mubr.f32.gmra.mrb[88].mxu0 %v2853_v55  ;;  %v2855_v52 = vmax.f32 %v2829_v41, 0.0  ;;  %v5069_v40 = vpack.c.bf16 %v3146_v56, %v3144_v34  ;;  %v3258_v55 = vld [vmem:[%s8783_s11 + $0x8] sm:$0xff]  ;;  %v3260_v41 = vld [vmem:[%s8783_s11 + $0x18] sm:$0xff]  ;;  %v3289_v34 = vld [vmem:[%s8783_s11 + $0x100] sm:$0xff] }
 0x72b   :  { %v2856_v50 = vmax.f32 %v2831_v47, 0.0  ;;  %v2834_v51 = vpop.f32.mrb[92].mxu1  ;;  %v5071_v47 = vpack.c.bf16 %v3260_v41, %v3258_v55  ;;  %v3291_v56 = vld [vmem:[%s8783_s11 + $0x110] sm:$0xff]  ;;  %v3296_v55 = vld [vmem:[%s8783_s11 + $0x138] sm:$0xff] }
 0x72c   :  { %v2835_v53 = vadd.f32 %v2834_v51, %v2725_v10  ;;  %v2836_v1 = vpop.f32.mrb[93].mxu1  ;;  %v3262_v51 = vld [vmem:[%s8783_s11 + $0x28] sm:$0xff]  ;;  %v5105_v41 = vpack.c.bf16 %v3291_v56, %v3289_v34 }
 0x72d   :  { %v2837_v57 = vadd.f32 %v2836_v1, %v2729_v11  ;;  %3033 = vmatprep.mubr.f32.mxu0 %v2856_v50  ;;  %v3259_v50 = vld [vmem:[%s8783_s11 + $0x10] sm:$0xff]  ;;  %5072 = vmatprep.subr.bf16.mxu0 %v5071_v47  ;;  %v3293_v47 = vld [vmem:[%s8783_s11 + $0x120] sm:$0xff] }
 0x72e   :  { %3034 = vmatmul.mubr.f32.gmra.mrb[90].mxu0 %v2855_v52  ;;  %v2857_v54 = vmax.f32 %v2835_v53, 0.0  ;;  %v3264_v52 = vld [vmem:[%s8783_s11 + $0x38] sm:$0xff]  ;;  %v5073_v53 = vpack.c.bf16 %v3259_v50, %v3257_v43  ;;  %v3295_v50 = vld [vmem:[%s8783_s11 + $0x130] sm:$0xff] }
 0x72f   :  { %v2858_v58 = vmax.f32 %v2837_v57, 0.0  ;;  %v2840_v59 = vpop.f32.mrb[94].mxu1  ;;  %v5075_v1 = vpack.c.bf16 %v3264_v52, %v3262_v51  ;;  %v3261_v57 = vld [vmem:[%s8783_s11 + $0x20] sm:$0xff]  ;;  %v3298_v51 = vld [vmem:[%s8783_s11 + $0x148] sm:$0xff]  ;;  %v3300_v52 = vld [vmem:[%s8783_s11 + $0x158] sm:$0xff] }
 0x730   :  { %v2841_v61 = vadd.f32 %v2840_v59, %v2725_v10  ;;  %v2842_v63 = vpop.f32.mrb[95].mxu1  ;;  %v3126_v10 = vld [vmem:[%s8782_s9 + $0x150] sm:$0xff]  ;;  %v3266_v59 = vld [vmem:[%s8783_s11 + $0x48] sm:$0xff]  ;;  %5074 = vmatpush1.bf16.msra.mxu0 %v5073_v53  ;;  %v5109_v53 = vpack.c.bf16 %v3295_v50, %v3293_v47 }
 0x731   :  { %v2843_v12 = vadd.f32 %v2842_v63, %v2729_v11  ;;  %3039 = vmatprep.mubr.f32.mxu0 %v2858_v58  ;;  %v5049_v11 = vpack.c.bf16 %v3126_v10, %v3124_v6  ;;  %v3263_v58 = vld [vmem:[%s8783_s11 + $0x30] sm:$0xff]  ;;  %5076 = vmatprep.subr.bf16.mxu0 %v5075_v1  ;;  %v3269_v6 = vld [vmem:[%s8783_s11 + $0x60] sm:$0xff]  ;;  %v5111_v1 = vpack.c.bf16 %v3300_v52, %v3298_v51 }
 0x732   :  { %3040 = vmatmul.mubr.f32.gmra.mrb[92].mxu0 %v2857_v54  ;;  %v2859_v2 = vmax.f32 %v2841_v61, 0.0  ;;  %v3268_v54 = vld [vmem:[%s8783_s11 + $0x58] sm:$0xff]  ;;  %v5077_v61 = vpack.c.bf16 %v3263_v58, %v3261_v57  ;;  %v3271_v10 = vld [vmem:[%s8783_s11 + $0x70] sm:$0xff]  ;;  %v3297_v57 = vld [vmem:[%s8783_s11 + $0x140] sm:$0xff] }
 0x733   :  { %v2860_v0 = vmax.f32 %v2843_v12, 0.0  ;;  %5050 = vmatpush1.bf16.msra.mxu1 %v5049_v11  ;;  %v5079_v63 = vpack.c.bf16 %v3268_v54, %v3266_v59  ;;  %v3265_v12 = vld [vmem:[%s8783_s11 + $0x40] sm:$0xff]  ;;  %v3274_v11 = vld [vmem:[%s8783_s11 + $0x88] sm:$0xff]  ;;  %v5085_v14 = vpack.c.bf16 %v3271_v10, %v3269_v6  ;;  %v3299_v58 = vld [vmem:[%s8783_s11 + $0x150] sm:$0xff] }
 0x734   :  { %5052 = vmatprep.subr.bf16.mxu1 %v5051_v17  ;;  %5078 = vmatpush1.bf16.msra.mxu0 %v5077_v61  ;;  %v5087_v17 = vpack.c.bf16 %v3276_v45, %v3274_v11  ;;  %v3302_v59 = vld [vmem:[%s8783_s11 + $0x168] sm:$0xff]  ;;  %v3304_v54 = vld [vmem:[%s8783_s11 + $0x178] sm:$0xff]  ;;  %v5113_v61 = vpack.c.bf16 %v3299_v58, %v3297_v57  ;;  %v3305_v6 = vld [vmem:[%s8783_s11 + $0x180] sm:$0xff] }
 0x735   :  { %3045 = vmatprep.mubr.f32.mxu0 %v2860_v0  ;;  %v3267_v0 = vld [vmem:[%s8783_s11 + $0x50] sm:$0xff]  ;;  %5080 = vmatprep.subr.bf16.mxu0 %v5079_v63  ;;  %v5115_v63 = vpack.c.bf16 %v3304_v54, %v3302_v59  ;;  %v3310_v11 = vld [vmem:[%s8783_s11 + $0x1a8] sm:$0xff]  ;;  %v3312_v45 = vld [vmem:[%s8783_s11 + $0x1b8] sm:$0xff] }
 0x736   :  { %3046 = vmatmul.mubr.f32.gmra.mrb[94].mxu0 %v2859_v2  ;;  %v3270_v2 = vld [vmem:[%s8783_s11 + $0x68] sm:$0xff]  ;;  %v5081_v4 = vpack.c.bf16 %v3267_v0, %v3265_v12  ;;  %v3301_v12 = vld [vmem:[%s8783_s11 + $0x160] sm:$0xff]  ;;  %v3303_v0 = vld [vmem:[%s8783_s11 + $0x170] sm:$0xff] }
 0x737   :  { %5054 = vmatpush1.bf16.msra.mxu1 %v5053_v18  ;;  %v5083_v5 = vpack.c.bf16 %v3272_v3, %v3270_v2  ;;  %v3278_v18 = vld [vmem:[%s8783_s11 + $0xa8] sm:$0xff]  ;;  %v3308_v3 = vld [vmem:[%s8783_s11 + $0x198] sm:$0xff]  ;;  %v3307_v10 = vld [vmem:[%s8783_s11 + $0x190] sm:$0xff] }
 0x738   :  { %5056 = vmatprep.subr.bf16.mxu1 %v5055_v48  ;;  %5082 = vmatpush1.bf16.msra.mxu0 %v5081_v4  ;;  %v5091_v48 = vpack.c.bf16 %v3280_v13, %v3278_v18  ;;  %v3306_v2 = vld [vmem:[%s8783_s11 + $0x188] sm:$0xff]  ;;  %v5117_v4 = vpack.c.bf16 %v3303_v0, %v3301_v12  ;;  %v3316_v13 = vld [vmem:[%s8783_s11 + $0x1d8] sm:$0xff] }
 0x739   :  { %5084 = vmatprep.subr.bf16.mxu0 %v5083_v5  ;;  %v5119_v5 = vpack.c.bf16 %v3308_v3, %v3306_v2  ;;  %v3314_v18 = vld [vmem:[%s8783_s11 + $0x1c8] sm:$0xff] }
 0x73b   :  { %5058 = vmatpush1.bf16.msra.mxu1 %v5057_v20  ;;  %v3282_v20 = vld [vmem:[%s8783_s11 + $0xc8] sm:$0xff] }
 0x73c   :  { %5060 = vmatprep.subr.bf16.mxu1 %v5059_v23  ;;  %5086 = vmatpush1.bf16.msra.mxu0 %v5085_v14  ;;  %v5095_v23 = vpack.c.bf16 %v3284_v21, %v3282_v20  ;;  %v5121_v14 = vpack.c.bf16 %v3307_v10, %v3305_v6  ;;  %v8616_v20 = vrot.slane %v4169_v46, %v5852_v44 }
 0x73d   :  { %5088 = vmatprep.subr.bf16.mxu0 %v5087_v17  ;;  %v5123_v17 = vpack.c.bf16 %v3312_v45, %v3310_v11 }
 0x73f   :  { %5062 = vmatpush1.bf16.msra.mxu1 %v5061_v8  ;;  %v3286_v8 = vld [vmem:[%s8783_s11 + $0xe8] sm:$0xff] }
 0x740   :  { %5064 = vmatprep.subr.bf16.mxu1 %v5063_v28  ;;  %5090 = vmatpush1.bf16.msra.mxu0 %v5089_v32  ;;  %v5099_v28 = vpack.c.bf16 %v3288_v27, %v3286_v8  ;;  %v5125_v32 = vpack.c.bf16 %v3311_v22, %v3309_v15 }
 0x741   :  { %5092 = vmatprep.subr.bf16.mxu0 %v5091_v48  ;;  %v5127_v48 = vpack.c.bf16 %v3316_v13, %v3314_v18 }
 0x743   :  { %5066 = vmatpush1.bf16.msra.mxu1 %v5065_v36  ;;  %v3290_v36 = vld [vmem:[%s8783_s11 + $0x108] sm:$0xff] }
 0x744   :  { %5068 = vmatprep.subr.bf16.mxu1 %v5067_v38  ;;  %5094 = vmatpush1.bf16.msra.mxu0 %v5093_v49  ;;  %v5103_v38 = vpack.c.bf16 %v3292_v9, %v3290_v36 }
 0x745   :  { %5096 = vmatprep.subr.bf16.mxu0 %v5095_v23 }
 0x747   :  { %5070 = vmatpush1.bf16.msra.mxu1 %v5069_v40  ;;  %v3294_v40 = vld [vmem:[%s8783_s11 + $0x128] sm:$0xff] }
 0x748   :  { %5098 = vmatpush1.bf16.msra.mxu0 %v5097_v29  ;;  %v5107_v43 = vpack.c.bf16 %v3296_v55, %v3294_v40 }
 0x749   :  { %5100 = vmatprep.subr.bf16.mxu0 %v5099_v28 }
 0x74c   :  { %5102 = vmatpush1.bf16.msra.mxu0 %v5101_v37 }
 0x74d   :  { %5104 = vmatprep.subr.bf16.mxu0 %v5103_v38 }
 0x750   :  { %5106 = vmatpush1.bf16.msra.mxu0 %v5105_v41 }
 0x751   :  { %5108 = vmatprep.subr.bf16.mxu0 %v5107_v43 }
 0x754   :  { %5110 = vmatpush1.bf16.msra.mxu0 %v5109_v53 }
 0x755   :  { %5112 = vmatprep.subr.bf16.mxu0 %v5111_v1 }
 0x758   :  { %5114 = vmatpush1.bf16.msra.mxu0 %v5113_v61 }
 0x759   :  { %5116 = vmatprep.subr.bf16.mxu0 %v5115_v63 }
 0x75c   :  { %5118 = vmatpush1.bf16.msra.mxu0 %v5117_v4 }
 0x75d   :  { %5120 = vmatprep.subr.bf16.mxu0 %v5119_v5 }
 0x760   :  { %5122 = vmatpush1.bf16.msra.mxu0 %v5121_v14 }
 0x761   :  { %5124 = vmatprep.subr.bf16.mxu0 %v5123_v17 }
 0x764   :  { %5126 = vmatpush1.bf16.msra.mxu0 %v5125_v32 }
 0x765   :  { %5128 = vmatprep.subr.bf16.mxu0 %v5127_v48 }
 0x7ed   :  { %v3005_v21 = vpop.f32.mrb[80].mxu0 }
 0x7ee   :  { %v3006_v49 = vadd.f32 %v3005_v21, %v2932_v24  ;;  %v3007_v23 = vpop.f32.mrb[81].mxu0 }
 0x7ef   :  { %v3008_v25 = vadd.f32 %v3007_v23, %v8616_v20 }
 0x7f0   :  { %v3052_v26 = vmax.f32 %v3006_v49, 0.0 }
 0x7f1   :  { %v3053_v8 = vmax.f32 %v3008_v25, 0.0  ;;  %v3011_v27 = vpop.f32.mrb[82].mxu0 }
 0x7f2   :  { %v3068_v29 = vadd.f32 %v3052_v26, %v8087_v33  ;;  %v3012_v28 = vadd.f32 %v3011_v27, %v2932_v24  ;;  %v3013_v30 = vpop.f32.mrb[83].mxu0  ;;  %v3313_v26 = vld [vmem:[%s8783_s11 + $0x1c0] sm:$0xff]  ;;  %v3320_v27 = vld [vmem:[%s8783_s11 + $0x1f8] sm:$0xff] }
 0x7f3   :  { %v3069_v35 = vadd.f32 %v3053_v8, %v8097_v39  ;;  %v3014_v36 = vadd.f32 %v3013_v30, %v8616_v20  ;;  %v3319_v30 = vld [vmem:[%s8783_s11 + $0x1f0] sm:$0xff] }
 0x7f4   :  { %v3054_v9 = vmax.f32 %v3012_v28, 0.0  ;;  %v3317_v28 = vld [vmem:[%s8783_s11 + $0x1e0] sm:$0xff] }
 0x7f5   :  { %v3055_v37 = vmax.f32 %v3014_v36, 0.0  ;;  %v3017_v38 = vpop.f32.mrb[84].mxu0  ;;  %v3446_v36 = vld [vmem:[%s8784_s13 + $0x80] sm:$0xff] }
 0x7f6   :  { %v3070_v34 = vadd.f32 %v3054_v9, %v8107_v62  ;;  %v3018_v56 = vadd.f32 %v3017_v38, %v2932_v24  ;;  %v3019_v40 = vpop.f32.mrb[85].mxu0  ;;  %v3447_v9 = vld [vmem:[%s8784_s13 + $0x88] sm:$0xff] }
 0x7f7   :  { %v3071_v55 = vadd.f32 %v3055_v37, %v8117_v19  ;;  %v3020_v41 = vadd.f32 %v3019_v40, %v8616_v20  ;;  %v3430_v37 = vld [vmem:[%s8784_s13] sm:$0xff]  ;;  %v5135_v38 = vpack.c.bf16 %v3447_v9, %v3446_v36  ;;  %v3449_v40 = vld [vmem:[%s8784_s13 + $0x98] sm:$0xff] }
 0x7f8   :  { %v3056_v43 = vmax.f32 %v3018_v56, 0.0  ;;  %v3448_v56 = vld [vmem:[%s8784_s13 + $0x90] sm:$0xff] }
 0x7f9   :  { %v3057_v47 = vmax.f32 %v3020_v41, 0.0  ;;  %v3023_v33 = vpop.f32.mrb[86].mxu0  ;;  %v5139_v41 = vpack.c.bf16 %v3449_v40, %v3448_v56  ;;  %5136 = vmatprep.subr.bf16.mxu1 %v5135_v38  ;;  %v3443_v56 = vld [vmem:[%s8784_s13 + $0x68] sm:$0xff] }
 0x7fa   :  { %v3072_v50 = vadd.f32 %v3056_v43, %v8127_v60  ;;  %v3024_v51 = vadd.f32 %v3023_v33, %v2932_v24  ;;  %v3025_v39 = vpop.f32.mrb[87].mxu0  ;;  %v3432_v43 = vld [vmem:[%s8784_s13 + $0x10] sm:$0xff]  ;;  %v3450_v33 = vld [vmem:[%s8784_s13 + $0xa0] sm:$0xff] }
 0x7fb   :  { %v3073_v52 = vadd.f32 %v3057_v47, %v8137_v7  ;;  %v3026_v53 = vadd.f32 %v3025_v39, %v8616_v20  ;;  %v3433_v47 = vld [vmem:[%s8784_s13 + $0x18] sm:$0xff] }
 0x7fc   :  { %v3058_v1 = vmax.f32 %v3024_v51, 0.0  ;;  %v5141_v51 = vpack.c.bf16 %v3433_v47, %v3432_v43  ;;  %v3444_v47 = vld [vmem:[%s8784_s13 + $0x70] sm:$0xff] }
 0x7fd   :  { %v3059_v57 = vmax.f32 %v3026_v53, 0.0  ;;  %v3029_v62 = vpop.f32.mrb[88].mxu0  ;;  %v3435_v53 = vld [vmem:[%s8784_s13 + $0x28] sm:$0xff] }
 0x7fe   :  { %v3074_v58 = vadd.f32 %v3058_v1, %v8147_v31  ;;  %v3030_v59 = vadd.f32 %v3029_v62, %v2932_v24  ;;  %v3031_v19 = vpop.f32.mrb[89].mxu0  ;;  %v3452_v1 = vld [vmem:[%s8784_s13 + $0xb0] sm:$0xff] }
 0x7ff   :  { %v3075_v54 = vadd.f32 %v3059_v57, %v8155_v16  ;;  %v3032_v61 = vadd.f32 %v3031_v19, %v8616_v20  ;;  %v3453_v57 = vld [vmem:[%s8784_s13 + $0xb8] sm:$0xff] }
 0x800   :  { %v3060_v63 = vmax.f32 %v3030_v59, 0.0  ;;  %v3436_v59 = vld [vmem:[%s8784_s13 + $0x30] sm:$0xff]  ;;  %v3437_v19 = vld [vmem:[%s8784_s13 + $0x38] sm:$0xff] }
 0x801   :  { %v3061_v12 = vmax.f32 %v3032_v61, 0.0  ;;  %v3035_v60 = vpop.f32.mrb[90].mxu0  ;;  %v3455_v61 = vld [vmem:[%s8784_s13 + $0xc8] sm:$0xff] }
 0x802   :  { %v3076_v0 = vadd.f32 %v3068_v29, %v3060_v63  ;;  %v3036_v2 = vadd.f32 %v3035_v60, %v2932_v24  ;;  %v3037_v3 = vpop.f32.mrb[91].mxu0  ;;  %v5149_v63 = vpack.c.bf16 %v3437_v19, %v3436_v59  ;;  %v3438_v60 = vld [vmem:[%s8784_s13 + $0x40] sm:$0xff] }
 0x803   :  { %v3077_v7 = vadd.f32 %v3069_v35, %v3061_v12  ;;  %v3038_v4 = vadd.f32 %v3037_v3, %v8616_v20  ;;  %v5133_v35 = vpack.c.bf16 %v3319_v30, %v3317_v28  ;;  %v3457_v3 = vld [vmem:[%s8784_s13 + $0xd8] sm:$0xff] }
 0x804   :  { %v3062_v5 = vmax.f32 %v3036_v2, 0.0  ;;  %v3456_v2 = vld [vmem:[%s8784_s13 + $0xd0] sm:$0xff] }
 0x805   :  { %v3063_v6 = vmax.f32 %v3038_v4, 0.0  ;;  %v3041_v10 = vpop.f32.mrb[92].mxu0  ;;  %3224 = vmatprep.mubr.f32.mxu1 %v3077_v7  ;;  %v5155_v4 = vpack.c.bf16 %v3457_v3, %v3456_v2 }
 0x806   :  { %v3078_v31 = vadd.f32 %v3070_v34, %v3062_v5  ;;  %v3042_v11 = vadd.f32 %v3041_v10, %v2932_v24  ;;  %v3043_v45 = vpop.f32.mrb[93].mxu0  ;;  %3225 = vmatmul.mubr.f32.vlgmr.msra.gmra.mrb[96].mxu1 %v3076_v0  ;;  %v3431_v34 = vld [vmem:[%s8784_s13 + $0x8] sm:$0xff]  ;;  %v3440_v5 = vld [vmem:[%s8784_s13 + $0x50] sm:$0xff]  ;;  %v3458_v10 = vld [vmem:[%s8784_s13 + $0xe0] sm:$0xff] }
 0x807   :  { %v3079_v16 = vadd.f32 %v3071_v55, %v3063_v6  ;;  %v3044_v14 = vadd.f32 %v3043_v45, %v8616_v20  ;;  %v5137_v55 = vpack.c.bf16 %v3431_v34, %v3430_v37  ;;  %v3439_v0 = vld [vmem:[%s8784_s13 + $0x48] sm:$0xff]  ;;  %v3441_v6 = vld [vmem:[%s8784_s13 + $0x58] sm:$0xff]  ;;  %v3442_v34 = vld [vmem:[%s8784_s13 + $0x60] sm:$0xff] }
 0x808   :  { %v3064_v17 = vmax.f32 %v3042_v11, 0.0  ;;  %v5153_v7 = vpack.c.bf16 %v3439_v0, %v3438_v60  ;;  %v5157_v11 = vpack.c.bf16 %v3441_v6, %v3440_v5  ;;  %v5161_v40 = vpack.c.bf16 %v3443_v56, %v3442_v34 }
 0x809   :  { %v3065_v15 = vmax.f32 %v3044_v14, 0.0  ;;  %v3047_v22 = vpop.f32.mrb[94].mxu0  ;;  %3230 = vmatprep.mubr.f32.mxu1 %v3079_v16  ;;  %5138 = vmatpush3.bf16.msra.mxu1 %v5137_v55  ;;  %v3148_v16 = vld [vmem:[%s8785_s10] sm:$0x3]  ;;  %v3460_v55 = vld [vmem:[%s8784_s13 + $0xf0] sm:$0xff] }
 0x80a   :  { %v3080_v18 = vadd.f32 %v3072_v50, %v3064_v17  ;;  %v3048_v13 = vadd.f32 %v3047_v22, %v2932_v24  ;;  %v3049_v32 = vpop.f32.mrb[95].mxu0  ;;  %3231 = vmatmul.mubr.f32.gmra.mrb[98].mxu1 %v3078_v31  ;;  %v3315_v24 = vld [vmem:[%s8783_s11 + $0x1d0] sm:$0xff]  ;;  %v3451_v50 = vld [vmem:[%s8784_s13 + $0xa8] sm:$0xff]  ;;  %5140 = vmatprep.subr.bf16.mxu1 %v5139_v41  ;;  %v3153_v14 = vrot.slane %v3148_v16, %v5847_v42  ;;  %v3461_v41 = vld [vmem:[%s8784_s13 + $0xf8] sm:$0xff] }
 0x80b   :  { %v3081_v48 = vadd.f32 %v3073_v52, %v3065_v15  ;;  %v3050_v46 = vadd.f32 %v3049_v32, %v8616_v20  ;;  %v5129_v8 = vpack.c.bf16 %v3315_v24, %v3313_v26  ;;  %v3318_v20 = vld [vmem:[%s8783_s11 + $0x1e8] sm:$0xff]  ;;  %v5143_v39 = vpack.c.bf16 %v3451_v50, %v3450_v33  ;;  %v3434_v52 = vld [vmem:[%s8784_s13 + $0x20] sm:$0xff]  ;;  %v3445_v33 = vld [vmem:[%s8784_s13 + $0x78] sm:$0xff] }
 0x80c   :  { %v3066_v21 = vmax.f32 %v3048_v13, 0.0  ;;  %v5131_v29 = vpack.c.bf16 %v3320_v27, %v3318_v20  ;;  %v5145_v62 = vpack.c.bf16 %v3435_v53, %v3434_v52  ;;  %v3459_v31 = vld [vmem:[%s8784_s13 + $0xe8] sm:$0xff]  ;;  %v3157_v17 = vrot.slane %v3148_v16, %v5852_v44  ;;  %v4170_v16 = vld [vmem:[%s8787_s14] ss:$0 sm:$0xff] }
 0x80d   :  { %v3067_v49 = vmax.f32 %v3050_v46, 0.0  ;;  %3236 = vmatprep.mubr.f32.mxu1 %v3081_v48  ;;  %5130 = vmatpush1.bf16.msra.mxu0 %v5129_v8  ;;  %v5159_v45 = vpack.c.bf16 %v3459_v31, %v3458_v10  ;;  %v5163_v43 = vpack.c.bf16 %v3461_v41, %v3460_v55  ;;  %v5165_v50 = vpack.c.bf16 %v3445_v33, %v3444_v47 }
 0x80e   :  { %v3082_v23 = vadd.f32 %v3074_v58, %v3066_v21  ;;  %3237 = vmatmul.mubr.f32.gmra.mrb[100].mxu1 %v3080_v18  ;;  %5132 = vmatprep.subr.bf16.mxu0 %v5131_v29  ;;  %v5147_v58 = vpack.c.bf16 %v3453_v57, %v3452_v1 }
 0x80f   :  { %v3083_v25 = vadd.f32 %v3075_v54, %v3067_v49  ;;  %5142 = vmatpush3.bf16.msra.mxu1 %v5141_v51  ;;  %v3454_v54 = vld [vmem:[%s8784_s13 + $0xc0] sm:$0xff] }
 0x810   :  { %5144 = vmatprep.subr.bf16.mxu1 %v5143_v39  ;;  %v5151_v12 = vpack.c.bf16 %v3455_v61, %v3454_v54  ;;  %v3321_v51 = vld [vmem:[%s8786_s12] sm:$0x3] }
 0x811   :  { %3242 = vmatprep.mubr.f32.mxu1 %v3083_v25  ;;  %5134 = vmatpush1.bf16.msra.mxu0 %v5133_v35  ;;  %v3326_v39 = vrot.slane %v3321_v51, %v5847_v42  ;;  %v3330_v52 = vrot.slane %v3321_v51, %v5852_v44 }
 0x812   :  { %3243 = vmatmul.mubr.f32.gmra.mrb[102].mxu1 %v3082_v23 }
 0x813   :  { %5146 = vmatpush3.bf16.msra.mxu1 %v5145_v62 }
 0x814   :  { %5148 = vmatprep.subr.bf16.mxu1 %v5147_v58 }
 0x817   :  { %5150 = vmatpush3.bf16.msra.mxu1 %v5149_v63 }
 0x818   :  { %5152 = vmatprep.subr.bf16.mxu1 %v5151_v12 }
 0x81b   :  { %5154 = vmatpush3.bf16.msra.mxu1 %v5153_v7 }
 0x81c   :  { %5156 = vmatprep.subr.bf16.mxu1 %v5155_v4 }
 0x81f   :  { %5158 = vmatpush3.bf16.msra.mxu1 %v5157_v11 }
 0x820   :  { %5160 = vmatprep.subr.bf16.mxu1 %v5159_v45 }
 0x823   :  { %5162 = vmatpush3.bf16.msra.mxu1 %v5161_v40 }
 0x824   :  { %5164 = vmatprep.subr.bf16.mxu1 %v5163_v43 }
 0x827   :  { %5166 = vmatpush3.bf16.msra.mxu1 %v5165_v50 }
 0x8d9   :  { %v3226_v15 = vpop.f32.mrb[96].mxu1 }
 0x8da   :  { %v3227_v22 = vadd.f32 %v3226_v15, %v3153_v14  ;;  %v3228_v18 = vpop.f32.mrb[97].mxu1 }
 0x8db   :  { %v3229_v13 = vadd.f32 %v3228_v18, %v3157_v17 }
 0x8dc   :  { %v3249_v46 = vmax.f32 %v3227_v22, 0.0 }
 0x8dd   :  { %v3250_v32 = vmax.f32 %v3229_v13, 0.0  ;;  %v3232_v48 = vpop.f32.mrb[98].mxu1 }
 0x8de   :  { %v3233_v21 = vadd.f32 %v3232_v48, %v3153_v14  ;;  %v3234_v49 = vpop.f32.mrb[99].mxu1 }
 0x8df   :  { %v3235_v23 = vadd.f32 %v3234_v49, %v3157_v17  ;;  %3397 = vmatprep.mubr.f32.mxu0 %v3250_v32 }
 0x8e0   :  { %3398 = vmatmul.mubr.f32.vlgmr.msra.gmra.mrb[96].mxu0 %v3249_v46  ;;  %v3251_v24 = vmax.f32 %v3233_v21, 0.0 }
 0x8e1   :  { %v3252_v25 = vmax.f32 %v3235_v23, 0.0  ;;  %v3238_v26 = vpop.f32.mrb[100].mxu1 }
 0x8e2   :  { %v3239_v8 = vadd.f32 %v3238_v26, %v3153_v14  ;;  %v3240_v20 = vpop.f32.mrb[101].mxu1 }
 0x8e3   :  { %v3241_v27 = vadd.f32 %v3240_v20, %v3157_v17  ;;  %3403 = vmatprep.mubr.f32.mxu0 %v3252_v25 }
 0x8e4   :  { %3404 = vmatmul.mubr.f32.gmra.mrb[98].mxu0 %v3251_v24  ;;  %v3253_v30 = vmax.f32 %v3239_v8, 0.0 }
 0x8e5   :  { %v3254_v29 = vmax.f32 %v3241_v27, 0.0  ;;  %v3244_v28 = vpop.f32.mrb[102].mxu1 }
 0x8e6   :  { %v3245_v35 = vadd.f32 %v3244_v28, %v3153_v14  ;;  %v3246_v36 = vpop.f32.mrb[103].mxu1 }
 0x8e7   :  { %v3247_v9 = vadd.f32 %v3246_v36, %v3157_v17  ;;  %3409 = vmatprep.mubr.f32.mxu0 %v3254_v29 }
 0x8e8   :  { %3410 = vmatmul.mubr.f32.gmra.mrb[100].mxu0 %v3253_v30  ;;  %v3255_v38 = vmax.f32 %v3245_v35, 0.0 }
 0x8e9   :  { %v3256_v37 = vmax.f32 %v3247_v9, 0.0 }
 0x8eb   :  { %3415 = vmatprep.mubr.f32.mxu0 %v3256_v37 }
 0x8ec   :  { %3416 = vmatmul.mubr.f32.gmra.mrb[102].mxu0 %v3255_v38 }
 0x9b3   :  { %v3399_v53 = vpop.f32.mrb[96].mxu0 }
 0x9b4   :  { %v3400_v1 = vadd.f32 %v3399_v53, %v3326_v39  ;;  %v3401_v57 = vpop.f32.mrb[97].mxu0 }
 0x9b5   :  { %v3402_v62 = vadd.f32 %v3401_v57, %v3330_v52 }
 0x9b6   :  { %v3422_v19 = vmax.f32 %v3400_v1, 0.0 }
 0x9b7   :  { %v3423_v58 = vmax.f32 %v3402_v62, 0.0  ;;  %v3405_v59 = vpop.f32.mrb[98].mxu0 }
 0x9b8   :  { %v3406_v54 = vadd.f32 %v3405_v59, %v3326_v39  ;;  %v3407_v61 = vpop.f32.mrb[99].mxu0 }
 0x9b9   :  { %v3408_v63 = vadd.f32 %v3407_v61, %v3330_v52  ;;  %3533 = vmatprep.mubr.f32.mxu1 %v3423_v58 }
 0x9ba   :  { %3534 = vmatmul.mubr.f32.vlgmr.msra.gmra.mrb[104].mxu1 %v3422_v19  ;;  %v3424_v0 = vmax.f32 %v3406_v54, 0.0 }
 0x9bb   :  { %v3425_v12 = vmax.f32 %v3408_v63, 0.0  ;;  %v3411_v60 = vpop.f32.mrb[100].mxu0 }
 0x9bc   :  { %v3412_v2 = vadd.f32 %v3411_v60, %v3326_v39  ;;  %v3413_v3 = vpop.f32.mrb[101].mxu0 }
 0x9bd   :  { %v3414_v42 = vadd.f32 %v3413_v3, %v3330_v52  ;;  %3538 = vmatprep.mubr.f32.mxu1 %v3425_v12 }
 0x9be   :  { %3539 = vmatmul.mubr.f32.gmra.mrb[106].mxu1 %v3424_v0  ;;  %v3426_v4 = vmax.f32 %v3412_v2, 0.0 }
 0x9bf   :  { %v3427_v44 = vmax.f32 %v3414_v42, 0.0  ;;  %v3417_v7 = vpop.f32.mrb[102].mxu0 }
 0x9c0   :  { %v3418_v5 = vadd.f32 %v3417_v7, %v3326_v39  ;;  %v3419_v6 = vpop.f32.mrb[103].mxu0 }
 0x9c1   :  { %v3420_v10 = vadd.f32 %v3419_v6, %v3330_v52  ;;  %3543 = vmatprep.mubr.f32.mxu1 %v3427_v44 }
 0x9c2   :  { %3544 = vmatmul.mubr.f32.gmra.mrb[108].mxu1 %v3426_v4  ;;  %v3428_v11 = vmax.f32 %v3418_v5, 0.0 }
 0x9c3   :  { %v3429_v31 = vmax.f32 %v3420_v10, 0.0 }
 0x9c5   :  { %3548 = vmatprep.mubr.f32.mxu1 %v3429_v31 }
 0x9c6   :  { %3549 = vmatmul.mubr.f32.gmra.mrb[110].mxu1 %v3428_v11 }
 0xa8d   :  { %v4203_v45 = vpop.f32.mrb[104].mxu1 }
 0xa8e   :  { %v4204_v14 = vpop.f32.mrb[105].mxu1 }
 0xa8f   :  { %v4205_v17 = vadd.f32 %v4204_v14, %v4203_v45 }
 0xa91   :  { %v3536_v15 = vadd.f32 %v4205_v17, %v4170_v16  ;;  %v4206_v22 = vpop.f32.mrb[106].mxu1 }
 0xa92   :  { %v4207_v18 = vpop.f32.mrb[107].mxu1 }
 0xa93   :  { %3554 = vst [vmem:[%s8788_s15] sm:$0xff] %v3536_v15  ;;  %v4208_v13 = vadd.f32 %v4207_v18, %v4206_v22 }
 0xa95   :  { %v3541_v32 = vadd.f32 %v4208_v13, %v4170_v16  ;;  %v4209_v48 = vpop.f32.mrb[108].mxu1 }
 0xa96   :  { %v4210_v46 = vpop.f32.mrb[109].mxu1 }
 0xa97   :  { %3555 = vst [vmem:[%s8788_s15 + $0x8] sm:$0xff] %v3541_v32  ;;  %v4211_v21 = vadd.f32 %v4210_v46, %v4209_v48 }
 0xa99   :  { %v3546_v49 = vadd.f32 %v4211_v21, %v4170_v16  ;;  %v4212_v23 = vpop.f32.mrb[110].mxu1 }
 0xa9a   :  { %v4213_v25 = vpop.f32.mrb[111].mxu1 }
 0xa9b   :  { %3556 = vst [vmem:[%s8788_s15 + $0x10] sm:$0xff] %v3546_v49  ;;  %v4214_v26 = vadd.f32 %v4213_v25, %v4212_v23 }
 0xa9d   :  { %v3551_v24 = vadd.f32 %v4214_v26, %v4170_v16 }
 0xa9f   :  { %3557 = vst [vmem:[%s8788_s15 + $0x18] sm:$0xff] %v3551_v24 }

</bundles_post_ra>
